<compile_context>
chip_gen: v7x
topology: tpu7x:2x2x1
jax: 0.10.0
libtpu: 0.0.40
codegen_flags: <defaults>
</compile_context>

<pallas_src>
import math
import functools

import jax
import jax.numpy as jnp
from jax import lax
from jax.experimental import pallas as pl
from jax.experimental.pallas import tpu as pltpu


# ----------------------------------------------------------------------------
# Fused GatedAttn kernel (one grid step per batch element)
# ----------------------------------------------------------------------------
def _gated_attn_kernel(x_ref, pos_ref, w_ref, o_ref, *, num_heads):
    # x_ref  : (1, S, C)  f32  flattened (h*w, c) activations for one batch element
    # pos_ref: (1, S, C)  f32  sinusoidal positional encoding
    # w_ref  : (C, 3C)    bf16 weight-normed in_proj^T, query-scale already folded in
    # o_ref  : (1, S, C)  f32  attention output, head h lives in channels [h*D, (h+1)*D)
    S, C = x_ref.shape[1], x_ref.shape[2]
    D = C // num_heads

    seq = x_ref[0] + pos_ref[0]                                  # (S, C)  f32
    seq_bf = seq.astype(jnp.bfloat16)

    # Fused k|v|q projection: one lane-dense MXU matmul with f32 accumulation.
    proj = jnp.dot(seq_bf, w_ref[...],
                   preferred_element_type=jnp.float32)           # (S, 3C) f32

    k = proj[:, 0 * C:1 * C]
    v = proj[:, 1 * C:2 * C]
    q = proj[:, 2 * C:3 * C]                                     # D**-0.5 folded into weights

    head_outs = []
    for h in range(num_heads):                                   # static unroll over heads
        qh = q[:, h * D:(h + 1) * D].astype(jnp.bfloat16)        # (S, D)
        kh = k[:, h * D:(h + 1) * D].astype(jnp.bfloat16)
        vh = v[:, h * D:(h + 1) * D].astype(jnp.bfloat16)

        # contract the last axes directly -> no explicit (S, D) transpose before the MXU push
        s = lax.dot_general(qh, kh, (((1,), (1,)), ((), ())),
                            preferred_element_type=jnp.float32)  # (S, S) f32

        m = jnp.max(s, axis=-1, keepdims=True)
        p = jnp.exp(s - m)
        inv = pl.reciprocal(jnp.sum(p, axis=-1, keepdims=True), approx=True)
        attn = (p * inv).astype(jnp.bfloat16)                    # softmax weights, bf16 for MXU

        head_outs.append(jnp.dot(attn, vh,
                                 preferred_element_type=jnp.float32))  # (S, D) f32

    o_ref[0] = jnp.concatenate(head_outs, axis=-1).astype(o_ref.dtype)


# ----------------------------------------------------------------------------
# Positional encoding (matches GatedAttn.get_pos_enc)
# ----------------------------------------------------------------------------
def get_pos_enc(seq_len, num_channels):
    position = jnp.arange(seq_len, dtype=jnp.float32)
    num_timescales = num_channels // 2
    log_inc = math.log(10000.0) / (num_timescales - 1)
    inv = jnp.exp(jnp.arange(num_timescales, dtype=jnp.float32) * (-log_inc))
    scaled = position[:, None] * inv[None, :]
    enc = jnp.concatenate([jnp.sin(scaled), jnp.cos(scaled)], axis=1)
    if num_channels % 2:
        enc = jnp.pad(enc, ((0, 0), (0, 1)))
    return enc.reshape(1, seq_len, num_channels)


# ----------------------------------------------------------------------------
# Wrapper: NCHW in -> NCHW out, one fused pallas_call
# ----------------------------------------------------------------------------
def gated_attn_forward(x_nchw, w_eff, num_heads):
    """x_nchw: (B, C, H, W).  w_eff: effective (weight-normed) in_proj weight (3C, C)."""
    B, C, H, W = x_nchw.shape
    S = H * W
    D = C // num_heads

    # x.permute(0, 2, 3, 1).view(b, h*w, c)
    x_seq = jnp.transpose(x_nchw, (0, 2, 3, 1)).reshape(B, S, C).astype(jnp.float32)
    pos = get_pos_enc(S, C)                                          # (1, S, C)

    # Fold the query scale (D ** -0.5) into the query rows of in_proj, transpose, cast to bf16.
    w_scaled = w_eff.at[2 * C:, :].multiply(D ** (-0.5))
    w_t = jnp.transpose(w_scaled).astype(jnp.bfloat16)               # (C, 3C)

    out_seq = pl.pallas_call(
        functools.partial(_gated_attn_kernel, num_heads=num_heads),
        out_shape=jax.ShapeDtypeStruct((B, S, C), jnp.float32),
        grid=(B,),
        in_specs=[
            pl.BlockSpec((1, S, C), lambda b: (b, 0, 0)),
            pl.BlockSpec((1, S, C), lambda b: (0, 0, 0)),
            pl.BlockSpec((C, 3 * C), lambda b: (0, 0)),
        ],
        out_specs=pl.BlockSpec((1, S, C), lambda b: (b, 0, 0)),
        compiler_params=pltpu.CompilerParams(
            dimension_semantics=("parallel",)),
    )(x_seq, pos, w_t)

    # x.transpose(1, 2).view(b, c, h, w)
    return jnp.transpose(out_seq, (0, 2, 1)).reshape(B, C, H, W)


# ----------------------------------------------------------------------------
# Pure-JAX f32 reference (independent path) for correctness check
# ----------------------------------------------------------------------------
def reference_forward(x_nchw, w_eff, num_heads):
    B, C, H, W = x_nchw.shape
    S = H * W
    D = C // num_heads

    x = jnp.transpose(x_nchw, (0, 2, 3, 1)).reshape(B, S, C)
    x = x + get_pos_enc(S, C)
    proj = x @ w_eff.T                                               # (B, S, 3C)
    memory, query = proj[..., :2 * C], proj[..., 2 * C:]
    k_, v_ = memory[..., :C], memory[..., C:]

    def split_heads(t):                                              # (B, S, C) -> (B, h, S, D)
        return t.reshape(B, S, num_heads, D).transpose(0, 2, 1, 3)

    q = split_heads(query) * (D ** (-0.5))
    k = split_heads(k_)
    v = split_heads(v_)
    w = jax.nn.softmax(jnp.einsum("bhqd,bhkd->bhqk", q, k), axis=-1)
    a = jnp.einsum("bhqk,bhkd->bhqd", w, v)
    a = a.transpose(0, 2, 1, 3).reshape(B, S, C)                     # combine heads
    return jnp.transpose(a, (0, 2, 1)).reshape(B, C, H, W)


# ----------------------------------------------------------------------------
if __name__ == "__main__":
    key = jax.random.PRNGKey(0)
    k_x, k_v, k_g = jax.random.split(key, 3)

    B, C, H, W = 2, 32, 16, 16          # NCHW, d_model = C = 32
    num_heads = 4

    x = jax.random.normal(k_x, (B, C, H, W), jnp.float32)

    # weight-normed in_proj (bias=False): W_eff[i, :] = g[i] * v[i, :] / ||v[i, :]||  -> (3C, C)
    v_proj = jax.random.normal(k_v, (3 * C, C), jnp.float32)
    g_proj = jax.random.uniform(k_g, (3 * C,), jnp.float32, 0.5, 1.5)
    w_eff = g_proj[:, None] * v_proj / jnp.linalg.norm(v_proj, axis=1, keepdims=True)

    out = jax.block_until_ready(gated_attn_forward(x, w_eff, num_heads))
    ref = jax.block_until_ready(reference_forward(x, w_eff, num_heads))

    assert out.shape == (B, C, H, W), out.shape
    max_err = float(jnp.max(jnp.abs(out - ref)))
    scale = float(jnp.max(jnp.abs(ref))) + 1e-6
    # bf16 MXU operands (f32 accumulation) + approx reciprocal -> looser than the old 1e-3 f32 bound
    assert max_err / scale < 5e-2, f"mismatch vs reference: abs {max_err}, scale {scale}"

    print("KERNEL_OK")
</pallas_src>

<mosaic_0001>
module attributes {stable_mosaic.version = 11 : i64} {
  func.func @_gated_attn_kernel(%arg0: i32, %arg1: memref<1x256x32xf32, #tpu.memory_space<vmem>>, %arg2: memref<1x256x32xf32, #tpu.memory_space<vmem>>, %arg3: memref<32x96xbf16, #tpu.memory_space<vmem>>, %arg4: memref<1x256x32xf32, #tpu.memory_space<vmem>>) attributes {dimension_semantics = [#tpu.dimension_semantics<parallel>], iteration_bounds = array<i64: 2>, scalar_prefetch = 0 : i64, scratch_operands = 0 : i64, tpu.core_type = #tpu.core_type<tc>, window_params = [{transform_indices = @transform_0, window_bounds = array<i64: 1, 256, 32>}, {pipeline_mode = #tpu.pipeline_mode<synchronous>, transform_indices = @transform_1, window_bounds = array<i64: 1, 256, 32>}, {pipeline_mode = #tpu.pipeline_mode<synchronous>, transform_indices = @transform_2, window_bounds = array<i64: 32, 96>}, {transform_indices = @transform_3, window_bounds = array<i64: 1, 256, 32>}]} {
    %c0 = arith.constant 0 : index
    %c0_0 = arith.constant 0 : index
    %c0_1 = arith.constant 0 : index
    %0 = vector.load %arg1[%c0, %c0_0, %c0_1] : memref<1x256x32xf32, #tpu.memory_space<vmem>>, vector<1x256x32xf32>
    %1 = vector.shape_cast %0 : vector<1x256x32xf32> to vector<256x32xf32>
    %c0_2 = arith.constant 0 : index
    %c0_3 = arith.constant 0 : index
    %c0_4 = arith.constant 0 : index
    %2 = vector.load %arg2[%c0_2, %c0_3, %c0_4] : memref<1x256x32xf32, #tpu.memory_space<vmem>>, vector<1x256x32xf32>
    %3 = vector.shape_cast %2 : vector<1x256x32xf32> to vector<256x32xf32>
    %4 = arith.addf %1, %3 : vector<256x32xf32>
    %5 = arith.truncf %4 : vector<256x32xf32> to vector<256x32xbf16>
    %c0_5 = arith.constant 0 : index
    %c0_6 = arith.constant 0 : index
    %6 = vector.load %arg3[%c0_5, %c0_6] : memref<32x96xbf16, #tpu.memory_space<vmem>>, vector<32x96xbf16>
    %cst = arith.constant dense<0.000000e+00> : vector<256x96xf32>
    %7 = tpu.matmul %5, %6, %cst {dimension_numbers = #tpu.dot_dimension_numbers<[1], [0], [0], [1], [0, 0, 1, 1], [], []>} : vector<256x32xbf16>, vector<32x96xbf16>, vector<256x96xf32> -> vector<256x96xf32>
    %8 = vector.extract_strided_slice %7 {offsets = [0, 0], sizes = [256, 32], strides = [1, 1]} : vector<256x96xf32> to vector<256x32xf32>
    %9 = vector.extract_strided_slice %7 {offsets = [0, 32], sizes = [256, 32], strides = [1, 1]} : vector<256x96xf32> to vector<256x32xf32>
    %10 = vector.extract_strided_slice %7 {offsets = [0, 64], sizes = [256, 32], strides = [1, 1]} : vector<256x96xf32> to vector<256x32xf32>
    %11 = vector.extract_strided_slice %10 {offsets = [0, 0], sizes = [256, 8], strides = [1, 1]} : vector<256x32xf32> to vector<256x8xf32>
    %12 = arith.truncf %11 : vector<256x8xf32> to vector<256x8xbf16>
    %13 = vector.extract_strided_slice %8 {offsets = [0, 0], sizes = [256, 8], strides = [1, 1]} : vector<256x32xf32> to vector<256x8xf32>
    %14 = arith.truncf %13 : vector<256x8xf32> to vector<256x8xbf16>
    %15 = vector.extract_strided_slice %9 {offsets = [0, 0], sizes = [256, 8], strides = [1, 1]} : vector<256x32xf32> to vector<256x8xf32>
    %16 = arith.truncf %15 : vector<256x8xf32> to vector<256x8xbf16>
    %cst_7 = arith.constant dense<0.000000e+00> : vector<256x256xf32>
    %17 = tpu.matmul %12, %14, %cst_7 {dimension_numbers = #tpu.dot_dimension_numbers<[1], [1], [0], [0], [0, 0, 1, 0], [], []>} : vector<256x8xbf16>, vector<256x8xbf16>, vector<256x256xf32> -> vector<256x256xf32>
    %cst_8 = arith.constant dense<0xFF800000> : vector<256xf32>
    %18 = vector.multi_reduction <maximumf>, %17, %cst_8 [1] : vector<256x256xf32> to vector<256xf32>
    %19 = vector.shape_cast %18 : vector<256xf32> to vector<256x1xf32>
    %20 = vector.broadcast %19 : vector<256x1xf32> to vector<256x256xf32>
    %21 = arith.subf %17, %20 : vector<256x256xf32>
    %22 = math.exp %21 : vector<256x256xf32>
    %cst_9 = arith.constant dense<0.000000e+00> : vector<256xf32>
    %23 = vector.multi_reduction <add>, %22, %cst_9 [1] : vector<256x256xf32> to vector<256xf32>
    %24 = vector.shape_cast %23 : vector<256xf32> to vector<256x1xf32>
    %25 = tpu.reciprocal %24 {approx = true} : vector<256x1xf32> -> vector<256x1xf32>
    %26 = vector.broadcast %25 : vector<256x1xf32> to vector<256x256xf32>
    %27 = arith.mulf %22, %26 : vector<256x256xf32>
    %28 = arith.truncf %27 : vector<256x256xf32> to vector<256x256xbf16>
    %cst_10 = arith.constant dense<0.000000e+00> : vector<256x8xf32>
    %29 = tpu.matmul %28, %16, %cst_10 {dimension_numbers = #tpu.dot_dimension_numbers<[1], [0], [0], [1], [0, 0, 1, 1], [], []>} : vector<256x256xbf16>, vector<256x8xbf16>, vector<256x8xf32> -> vector<256x8xf32>
    %30 = vector.extract_strided_slice %10 {offsets = [0, 8], sizes = [256, 8], strides = [1, 1]} : vector<256x32xf32> to vector<256x8xf32>
    %31 = arith.truncf %30 : vector<256x8xf32> to vector<256x8xbf16>
    %32 = vector.extract_strided_slice %8 {offsets = [0, 8], sizes = [256, 8], strides = [1, 1]} : vector<256x32xf32> to vector<256x8xf32>
    %33 = arith.truncf %32 : vector<256x8xf32> to vector<256x8xbf16>
    %34 = vector.extract_strided_slice %9 {offsets = [0, 8], sizes = [256, 8], strides = [1, 1]} : vector<256x32xf32> to vector<256x8xf32>
    %35 = arith.truncf %34 : vector<256x8xf32> to vector<256x8xbf16>
    %cst_11 = arith.constant dense<0.000000e+00> : vector<256x256xf32>
    %36 = tpu.matmul %31, %33, %cst_11 {dimension_numbers = #tpu.dot_dimension_numbers<[1], [1], [0], [0], [0, 0, 1, 0], [], []>} : vector<256x8xbf16>, vector<256x8xbf16>, vector<256x256xf32> -> vector<256x256xf32>
    %cst_12 = arith.constant dense<0xFF800000> : vector<256xf32>
    %37 = vector.multi_reduction <maximumf>, %36, %cst_12 [1] : vector<256x256xf32> to vector<256xf32>
    %38 = vector.shape_cast %37 : vector<256xf32> to vector<256x1xf32>
    %39 = vector.broadcast %38 : vector<256x1xf32> to vector<256x256xf32>
    %40 = arith.subf %36, %39 : vector<256x256xf32>
    %41 = math.exp %40 : vector<256x256xf32>
    %cst_13 = arith.constant dense<0.000000e+00> : vector<256xf32>
    %42 = vector.multi_reduction <add>, %41, %cst_13 [1] : vector<256x256xf32> to vector<256xf32>
    %43 = vector.shape_cast %42 : vector<256xf32> to vector<256x1xf32>
    %44 = tpu.reciprocal %43 {approx = true} : vector<256x1xf32> -> vector<256x1xf32>
    %45 = vector.broadcast %44 : vector<256x1xf32> to vector<256x256xf32>
    %46 = arith.mulf %41, %45 : vector<256x256xf32>
    %47 = arith.truncf %46 : vector<256x256xf32> to vector<256x256xbf16>
    %cst_14 = arith.constant dense<0.000000e+00> : vector<256x8xf32>
    %48 = tpu.matmul %47, %35, %cst_14 {dimension_numbers = #tpu.dot_dimension_numbers<[1], [0], [0], [1], [0, 0, 1, 1], [], []>} : vector<256x256xbf16>, vector<256x8xbf16>, vector<256x8xf32> -> vector<256x8xf32>
    %49 = vector.extract_strided_slice %10 {offsets = [0, 16], sizes = [256, 8], strides = [1, 1]} : vector<256x32xf32> to vector<256x8xf32>
    %50 = arith.truncf %49 : vector<256x8xf32> to vector<256x8xbf16>
    %51 = vector.extract_strided_slice %8 {offsets = [0, 16], sizes = [256, 8], strides = [1, 1]} : vector<256x32xf32> to vector<256x8xf32>
    %52 = arith.truncf %51 : vector<256x8xf32> to vector<256x8xbf16>
    %53 = vector.extract_strided_slice %9 {offsets = [0, 16], sizes = [256, 8], strides = [1, 1]} : vector<256x32xf32> to vector<256x8xf32>
    %54 = arith.truncf %53 : vector<256x8xf32> to vector<256x8xbf16>
    %cst_15 = arith.constant dense<0.000000e+00> : vector<256x256xf32>
    %55 = tpu.matmul %50, %52, %cst_15 {dimension_numbers = #tpu.dot_dimension_numbers<[1], [1], [0], [0], [0, 0, 1, 0], [], []>} : vector<256x8xbf16>, vector<256x8xbf16>, vector<256x256xf32> -> vector<256x256xf32>
    %cst_16 = arith.constant dense<0xFF800000> : vector<256xf32>
    %56 = vector.multi_reduction <maximumf>, %55, %cst_16 [1] : vector<256x256xf32> to vector<256xf32>
    %57 = vector.shape_cast %56 : vector<256xf32> to vector<256x1xf32>
    %58 = vector.broadcast %57 : vector<256x1xf32> to vector<256x256xf32>
    %59 = arith.subf %55, %58 : vector<256x256xf32>
    %60 = math.exp %59 : vector<256x256xf32>
    %cst_17 = arith.constant dense<0.000000e+00> : vector<256xf32>
    %61 = vector.multi_reduction <add>, %60, %cst_17 [1] : vector<256x256xf32> to vector<256xf32>
    %62 = vector.shape_cast %61 : vector<256xf32> to vector<256x1xf32>
    %63 = tpu.reciprocal %62 {approx = true} : vector<256x1xf32> -> vector<256x1xf32>
    %64 = vector.broadcast %63 : vector<256x1xf32> to vector<256x256xf32>
    %65 = arith.mulf %60, %64 : vector<256x256xf32>
    %66 = arith.truncf %65 : vector<256x256xf32> to vector<256x256xbf16>
    %cst_18 = arith.constant dense<0.000000e+00> : vector<256x8xf32>
    %67 = tpu.matmul %66, %54, %cst_18 {dimension_numbers = #tpu.dot_dimension_numbers<[1], [0], [0], [1], [0, 0, 1, 1], [], []>} : vector<256x256xbf16>, vector<256x8xbf16>, vector<256x8xf32> -> vector<256x8xf32>
    %68 = vector.extract_strided_slice %10 {offsets = [0, 24], sizes = [256, 8], strides = [1, 1]} : vector<256x32xf32> to vector<256x8xf32>
    %69 = arith.truncf %68 : vector<256x8xf32> to vector<256x8xbf16>
    %70 = vector.extract_strided_slice %8 {offsets = [0, 24], sizes = [256, 8], strides = [1, 1]} : vector<256x32xf32> to vector<256x8xf32>
    %71 = arith.truncf %70 : vector<256x8xf32> to vector<256x8xbf16>
    %72 = vector.extract_strided_slice %9 {offsets = [0, 24], sizes = [256, 8], strides = [1, 1]} : vector<256x32xf32> to vector<256x8xf32>
    %73 = arith.truncf %72 : vector<256x8xf32> to vector<256x8xbf16>
    %cst_19 = arith.constant dense<0.000000e+00> : vector<256x256xf32>
    %74 = tpu.matmul %69, %71, %cst_19 {dimension_numbers = #tpu.dot_dimension_numbers<[1], [1], [0], [0], [0, 0, 1, 0], [], []>} : vector<256x8xbf16>, vector<256x8xbf16>, vector<256x256xf32> -> vector<256x256xf32>
    %cst_20 = arith.constant dense<0xFF800000> : vector<256xf32>
    %75 = vector.multi_reduction <maximumf>, %74, %cst_20 [1] : vector<256x256xf32> to vector<256xf32>
    %76 = vector.shape_cast %75 : vector<256xf32> to vector<256x1xf32>
    %77 = vector.broadcast %76 : vector<256x1xf32> to vector<256x256xf32>
    %78 = arith.subf %74, %77 : vector<256x256xf32>
    %79 = math.exp %78 : vector<256x256xf32>
    %cst_21 = arith.constant dense<0.000000e+00> : vector<256xf32>
    %80 = vector.multi_reduction <add>, %79, %cst_21 [1] : vector<256x256xf32> to vector<256xf32>
    %81 = vector.shape_cast %80 : vector<256xf32> to vector<256x1xf32>
    %82 = tpu.reciprocal %81 {approx = true} : vector<256x1xf32> -> vector<256x1xf32>
    %83 = vector.broadcast %82 : vector<256x1xf32> to vector<256x256xf32>
    %84 = arith.mulf %79, %83 : vector<256x256xf32>
    %85 = arith.truncf %84 : vector<256x256xf32> to vector<256x256xbf16>
    %cst_22 = arith.constant dense<0.000000e+00> : vector<256x8xf32>
    %86 = tpu.matmul %85, %73, %cst_22 {dimension_numbers = #tpu.dot_dimension_numbers<[1], [0], [0], [1], [0, 0, 1, 1], [], []>} : vector<256x256xbf16>, vector<256x8xbf16>, vector<256x8xf32> -> vector<256x8xf32>
    %87 = tpu.concatenate %29, %48, %67, %86 in 1 : vector<256x8xf32>, vector<256x8xf32>, vector<256x8xf32>, vector<256x8xf32> -> vector<256x32xf32>
    %c0_23 = arith.constant 0 : index
    %c0_24 = arith.constant 0 : index
    %c0_25 = arith.constant 0 : index
    %88 = vector.load %arg4[%c0_23, %c0_24, %c0_25] : memref<1x256x32xf32, #tpu.memory_space<vmem>>, vector<1x256x32xf32>
    %89 = vector.shape_cast %88 : vector<1x256x32xf32> to vector<256x32xf32>
    %90 = vector.shape_cast %87 : vector<256x32xf32> to vector<1x256x32xf32>
    tpu.vector_store %arg4[%c0_23, %c0_24, %c0_25], %90 {strides = array<i32>} : memref<1x256x32xf32, #tpu.memory_space<vmem>>, vector<1x256x32xf32>,
    return
  }
  func.func @transform_0(%arg0: i32) -> (i32, i32, i32) {
    %c0_i32 = arith.constant 0 : i32
    %c0_i32_0 = arith.constant 0 : i32
    %c0_i32_1 = arith.constant 0 : i32
    return %arg0, %c0_i32, %c0_i32_0 : i32, i32, i32
  }
  func.func @transform_1(%arg0: i32) -> (i32, i32, i32) {
    %c0_i32 = arith.constant 0 : i32
    %c0_i32_0 = arith.constant 0 : i32
    %c0_i32_1 = arith.constant 0 : i32
    %c0_i32_2 = arith.constant 0 : i32
    return %c0_i32, %c0_i32_0, %c0_i32_1 : i32, i32, i32
  }
  func.func @transform_2(%arg0: i32) -> (i32, i32) {
    %c0_i32 = arith.constant 0 : i32
    %c0_i32_0 = arith.constant 0 : i32
    %c0_i32_1 = arith.constant 0 : i32
    return %c0_i32, %c0_i32_0 : i32, i32
  }
  func.func @transform_3(%arg0: i32) -> (i32, i32, i32) {
    %c0_i32 = arith.constant 0 : i32
    %c0_i32_0 = arith.constant 0 : i32
    %c0_i32_1 = arith.constant 0 : i32
    return %arg0, %c0_i32, %c0_i32_0 : i32, i32, i32
  }
}

</mosaic_0001>

<bundles_post_ra>
// kernel: tpu_custom_call.1
= control target key start
LH: loop header
LB: loop body
LE: loop exit
PB: predicated region body
PF: predicated region fallthrough
CT: control target
= control target key end

     0   :  { %s7031_s12 = smov 0   ;;  %s11599_s0 = inlined_call_operand.vmem [shape: f32[2,256,32], index: 0, kind: input, shape index: {}]   ;;  %s11600_s1 = inlined_call_operand.vmem [shape: f32[1,256,32], index: 1, kind: input, shape index: {}]   ;;  %s11601_s2 = inlined_call_operand.vmem [shape: bf16[32,96], index: 2, kind: input, shape index: {}]   ;;  %s11602_s3 = inlined_call_operand.vmem [shape: f32[2,256,32], index: 3, kind: output, shape index: {}]  }
   0x1 LB: > { %s5376_s13 = sadd.s32 4294967295, %s6995_s12   ;;  %p5380_p0 = scmp.ge.s32.totalorder %s6995_s12, 1  ;;  %s6995_s12 = sphi %s7031_s12, %s13_s12  }
   0x2   : > { %p137_p1 = scmp.lt.s32.totalorder %s6995_s12, 3 }
   0x4   : > { %p138_p2 = pnand %p5380_p0, %p137_p1 }
   0x6   : > { %141 = sbr.rel (%p138_p2) target bundleno = 3184 (0xc70), region = 32 }
   0xd   : > { %v6219_v0 = vld [vmem:[%s11601_s2] sm:$0xff]   ;;  %p161_p3 = scmp.lt.s32.totalorder %s5376_s13, 1  ;;  %v6220_v1 = vld [vmem:[%s11601_s2 + $0x8] sm:$0xff]   ;;  %v206_v4 = vld [vmem:[%s11600_s1 + $0x10] sm:$0xff]  ;;  %vm300_vm0 = vcmask 261120   ;;  %s6998_s15 = smov 64  }
   0xe   : > { %6129 = vmatprep.subr.bf16.mxu0 %v6219_v0  ;;  %v204_v2 = vld [vmem:[%s11600_s1] sm:$0xff]  ;;  %v205_v3 = vld [vmem:[%s11600_s1 + $0x8] sm:$0xff]  ;;  %v207_v5 = vld [vmem:[%s11600_s1 + $0x18] sm:$0xff]  ;;  %s6999_s16 = smov 48   ;;  %s7000_s17 = smov 120   ;;  %vm574_vm1 = vcmask 64512  }
   0xf   : > { %s13166_s13 = smov (!%p161_p3, %s5376_s13), 1  ;;  %6130 = vmatpush3.bf16.msra.mxu0 %v6219_v0  ;;  %v208_v6 = vld [vmem:[%s11600_s1 + $0x20] sm:$0xff]  ;;  %v209_v7 = vld [vmem:[%s11600_s1 + $0x28] sm:$0xff]  ;;  %v210_v20 = vld [vmem:[%s11600_s1 + $0x30] sm:$0xff]  ;;  %s7001_s19 = smov 104   ;;  %vm5223_vm2 = vcmask 130048  }
  0x10   : > { %6131 = vmatprep.subr.bf16.mxu0 %v6220_v1  ;;  %s5469_s18 = sshll.u32 %s13166_s13, 8  ;;  %v211_v21 = vld [vmem:[%s11600_s1 + $0x38] sm:$0xff]  ;;  %v212_v25 = vld [vmem:[%s11600_s1 + $0x40] sm:$0xff]  ;;  %v213_v30 = vld [vmem:[%s11600_s1 + $0x48] sm:$0xff]  ;;  %s7002_s20 = smov 112   ;;  %vm5256_vm3 = vcmask 195584  }
  0x11   : > { %s7062_s27 = scalar_lea.vmem %s11599_s0, %s5469_s18  ;;  %v214_v36 = vld [vmem:[%s11600_s1 + $0x50] sm:$0xff]  ;;  %v215_v37 = vld [vmem:[%s11600_s1 + $0x58] sm:$0xff]  ;;  %v216_v43 = vld [vmem:[%s11600_s1 + $0x60] sm:$0xff]  ;;  %s7003_s21 = smov 96  }
  0x12   : > { %v172_v8 = vld [vmem:[%s7062_s27] sm:$0xff]  ;;  %v173_v9 = vld [vmem:[%s7062_s27 + $0x8] sm:$0xff]  ;;  %v174_v10 = vld [vmem:[%s7062_s27 + $0x10] sm:$0xff]  ;;  %s7004_s22 = smov 40   ;;  %s7005_s23 = smov 88  }
  0x13   : > { %6132 = vmatpush3.bf16.msra.mxu0 %v6220_v1  ;;  %v236_v11 = vadd.f32 %v204_v2, %v172_v8  ;;  %v237_v12 = vadd.f32 %v205_v3, %v173_v9  ;;  %v175_v13 = vld [vmem:[%s7062_s27 + $0x18] sm:$0xff]  ;;  %v238_v14 = vadd.f32 %v206_v4, %v174_v10  ;;  %v176_v15 = vld [vmem:[%s7062_s27 + $0x20] sm:$0xff]  ;;  %v177_v16 = vld [vmem:[%s7062_s27 + $0x28] sm:$0xff]  ;;  %s7006_s24 = smov 80   ;;  %s7007_s25 = smov 72  }
  0x14   : > { %v239_v17 = vadd.f32 %v207_v5, %v175_v13  ;;  %v240_v18 = vadd.f32 %v208_v6, %v176_v15  ;;  %v241_v19 = vadd.f32 %v209_v7, %v177_v16  ;;  %v178_v23 = vld [vmem:[%s7062_s27 + $0x30] sm:$0xff]  ;;  %v179_v24 = vld [vmem:[%s7062_s27 + $0x38] sm:$0xff]  ;;  %v180_v28 = vld [vmem:[%s7062_s27 + $0x40] sm:$0xff]  ;;  %s7008_s26 = smov 8   ;;  %s7009_s28 = smov 16  }
  0x15   : > { %v268_v22 = vpack.c.bf16 %v237_v12, %v236_v11  ;;  %v181_v29 = vld [vmem:[%s7062_s27 + $0x48] sm:$0xff]  ;;  %v242_v31 = vadd.f32 %v210_v20, %v178_v23  ;;  %v243_v32 = vadd.f32 %v211_v21, %v179_v24  ;;  %v244_v33 = vadd.f32 %v212_v25, %v180_v28  ;;  %v182_v39 = vld [vmem:[%s7062_s27 + $0x50] sm:$0xff]  ;;  %v183_v40 = vld [vmem:[%s7062_s27 + $0x58] sm:$0xff]  ;;  %s7010_s29 = smov 24   ;;  %s11447_s5 = scalar_lea.vmem %s11602_s3, %s5469_s18 }
  0x16   : > { %v269_v26 = vpack.c.bf16 %v239_v17, %v238_v14  ;;  %v270_v27 = vpack.c.bf16 %v241_v19, %v240_v18  ;;  %v245_v34 = vadd.f32 %v213_v30, %v181_v29  ;;  %v184_v41 = vld [vmem:[%s7062_s27 + $0x60] sm:$0xff]  ;;  %v185_v42 = vld [vmem:[%s7062_s27 + $0x68] sm:$0xff]  ;;  %v246_v45 = vadd.f32 %v214_v36, %v182_v39  ;;  %v186_v50 = vld [vmem:[%s7062_s27 + $0x70] sm:$0xff] }
  0x17   : > { %6133 = vmatprep.mubr.msk.bf16.mxu0 %vm300_vm0, %v268_v22  ;;  %v271_v35 = vpack.c.bf16 %v243_v32, %v242_v31  ;;  %v217_v44 = vld [vmem:[%s11600_s1 + $0x68] sm:$0xff]  ;;  %v247_v46 = vadd.f32 %v215_v37, %v183_v40  ;;  %v248_v47 = vadd.f32 %v216_v43, %v184_v41  ;;  %v187_v51 = vld [vmem:[%s7062_s27 + $0x78] sm:$0xff]  ;;  %v218_v53 = vld [vmem:[%s11600_s1 + $0x70] sm:$0xff] }
  0x18   : > { %6134 = vmatmul.mubr.msk.bf16.vlgmr.msra.gmra.mrb[0].mxu0 %vm300_vm0, %v269_v26  ;;  %v272_v38 = vpack.c.bf16 %v245_v34, %v244_v33  ;;  %v249_v48 = vadd.f32 %v217_v44, %v185_v42  ;;  %v219_v54 = vld [vmem:[%s11600_s1 + $0x78] sm:$0xff]  ;;  %v188_v55 = vld [vmem:[%s7062_s27 + $0x80] sm:$0xff]  ;;  %v189_v56 = vld [vmem:[%s7062_s27 + $0x88] sm:$0xff]  ;;  %v250_v59 = vadd.f32 %v218_v53, %v186_v50 }
  0x19   : > { %6137 = vmatprep.mubr.msk.bf16.mxu0 %vm300_vm0, %v270_v27  ;;  %v273_v49 = vpack.c.bf16 %v247_v46, %v246_v45  ;;  %v220_v57 = vld [vmem:[%s11600_s1 + $0x80] sm:$0xff]  ;;  %v221_v58 = vld [vmem:[%s11600_s1 + $0x88] sm:$0xff]  ;;  %v251_v60 = vadd.f32 %v219_v54, %v187_v51  ;;  %v190_v0 = vld [vmem:[%s7062_s27 + $0x90] sm:$0xff] }
  0x1a   : > { %v274_v52 = vpack.c.bf16 %v249_v48, %v248_v47  ;;  %v252_v61 = vadd.f32 %v220_v57, %v188_v55  ;;  %v253_v62 = vadd.f32 %v221_v58, %v189_v56  ;;  %v191_v1 = vld [vmem:[%s7062_s27 + $0x98] sm:$0xff]  ;;  %v222_v3 = vld [vmem:[%s11600_s1 + $0x90] sm:$0xff]  ;;  %v192_v5 = vld [vmem:[%s7062_s27 + $0xa0] sm:$0xff] }
  0x1b   : > { %v275_v63 = vpack.c.bf16 %v251_v60, %v250_v59  ;;  %v223_v4 = vld [vmem:[%s11600_s1 + $0x98] sm:$0xff]  ;;  %v193_v6 = vld [vmem:[%s7062_s27 + $0xa8] sm:$0xff]  ;;  %v224_v7 = vld [vmem:[%s11600_s1 + $0xa0] sm:$0xff]  ;;  %v254_v9 = vadd.f32 %v222_v3, %v190_v0 }
  0x1c   : > { %v276_v2 = vpack.c.bf16 %v253_v62, %v252_v61  ;;  %v225_v8 = vld [vmem:[%s11600_s1 + $0xa8] sm:$0xff]  ;;  %v255_v10 = vadd.f32 %v223_v4, %v191_v1  ;;  %v256_v11 = vadd.f32 %v224_v7, %v192_v5  ;;  %v194_v14 = vld [vmem:[%s7062_s27 + $0xb0] sm:$0xff]  ;;  %v195_v15 = vld [vmem:[%s7062_s27 + $0xb8] sm:$0xff] }
  0x1d   : > { %v257_v12 = vadd.f32 %v225_v8, %v193_v6  ;;  %v226_v17 = vld [vmem:[%s11600_s1 + $0xb0] sm:$0xff]  ;;  %v227_v18 = vld [vmem:[%s11600_s1 + $0xb8] sm:$0xff]  ;;  %v196_v19 = vld [vmem:[%s7062_s27 + $0xc0] sm:$0xff] }
  0x1e   : > { %v277_v13 = vpack.c.bf16 %v255_v10, %v254_v9  ;;  %v197_v20 = vld [vmem:[%s7062_s27 + $0xc8] sm:$0xff]  ;;  %v228_v21 = vld [vmem:[%s11600_s1 + $0xc0] sm:$0xff]  ;;  %v258_v23 = vadd.f32 %v226_v17, %v194_v14  ;;  %v259_v24 = vadd.f32 %v227_v18, %v195_v15  ;;  %v198_v28 = vld [vmem:[%s7062_s27 + $0xd0] sm:$0xff] }
  0x1f   : > { %v278_v16 = vpack.c.bf16 %v257_v12, %v256_v11  ;;  %v229_v22 = vld [vmem:[%s11600_s1 + $0xc8] sm:$0xff]  ;;  %v260_v25 = vadd.f32 %v228_v21, %v196_v19  ;;  %v199_v29 = vld [vmem:[%s7062_s27 + $0xd8] sm:$0xff]  ;;  %v230_v31 = vld [vmem:[%s11600_s1 + $0xd0] sm:$0xff] }
  0x20   : > { %6138 = vmatmul.mubr.msk.bf16.gmra.mrb[4].mxu0 %vm300_vm0, %v271_v35  ;;  %v261_v26 = vadd.f32 %v229_v22, %v197_v20  ;;  %v279_v27 = vpack.c.bf16 %v259_v24, %v258_v23  ;;  %v231_v32 = vld [vmem:[%s11600_s1 + $0xd8] sm:$0xff]  ;;  %v200_v33 = vld [vmem:[%s7062_s27 + $0xe0] sm:$0xff]  ;;  %v201_v34 = vld [vmem:[%s7062_s27 + $0xe8] sm:$0xff]  ;;  %v262_v37 = vadd.f32 %v230_v31, %v198_v28 }
  0x21   : > { %6141 = vmatprep.mubr.msk.bf16.mxu0 %vm300_vm0, %v272_v38  ;;  %v232_v35 = vld [vmem:[%s11600_s1 + $0xe0] sm:$0xff]  ;;  %v233_v36 = vld [vmem:[%s11600_s1 + $0xe8] sm:$0xff]  ;;  %v263_v38 = vadd.f32 %v231_v32, %v199_v29  ;;  %v202_v42 = vld [vmem:[%s7062_s27 + $0xf0] sm:$0xff] }
  0x22   : > { %v280_v30 = vpack.c.bf16 %v261_v26, %v260_v25  ;;  %v264_v39 = vadd.f32 %v232_v35, %v200_v33  ;;  %v265_v40 = vadd.f32 %v233_v36, %v201_v34  ;;  %v203_v44 = vld [vmem:[%s7062_s27 + $0xf8] sm:$0xff]  ;;  %v234_v45 = vld [vmem:[%s11600_s1 + $0xf0] sm:$0xff]  ;;  %s6997_s27 = smov 56  }
  0x23   : > { %v281_v41 = vpack.c.bf16 %v263_v38, %v262_v37  ;;  %v235_v46 = vld [vmem:[%s11600_s1 + $0xf8] sm:$0xff]  ;;  %v266_v47 = vadd.f32 %v234_v45, %v202_v42 }
  0x24   : > { %v282_v43 = vpack.c.bf16 %v265_v40, %v264_v39  ;;  %v267_v48 = vadd.f32 %v235_v46, %v203_v44 }
  0x28   : > { %6142 = vmatmul.mubr.msk.bf16.gmra.mrb[8].mxu0 %vm300_vm0, %v273_v49  ;;  %v283_v49 = vpack.c.bf16 %v267_v48, %v266_v47 }
  0x29   : > { %6145 = vmatprep.mubr.msk.bf16.mxu0 %vm300_vm0, %v274_v52 }
  0x30   : > { %6146 = vmatmul.mubr.msk.bf16.gmra.mrb[12].mxu0 %vm300_vm0, %v275_v63 }
  0x31   : > { %6149 = vmatprep.mubr.msk.bf16.mxu0 %vm300_vm0, %v276_v2 }
  0x38   : > { %6150 = vmatmul.mubr.msk.bf16.gmra.mrb[16].mxu0 %vm300_vm0, %v277_v13 }
  0x39   : > { %6153 = vmatprep.mubr.msk.bf16.mxu0 %vm300_vm0, %v278_v16 }
  0x40   : > { %6154 = vmatmul.mubr.msk.bf16.gmra.mrb[20].mxu0 %vm300_vm0, %v279_v27 }
  0x41   : > { %6157 = vmatprep.mubr.msk.bf16.mxu0 %vm300_vm0, %v280_v30 }
  0x48   : > { %6158 = vmatmul.mubr.msk.bf16.gmra.mrb[24].mxu0 %vm300_vm0, %v281_v41 }
  0x49   : > { %6161 = vmatprep.mubr.msk.bf16.mxu0 %vm300_vm0, %v282_v43 }
  0x50   : > { %6162 = vmatmul.mubr.msk.bf16.gmra.mrb[28].mxu0 %vm300_vm0, %v283_v49 }
  0xeb   : > { %v6135_v50 = vpop.f32.mrb[0].mxu0 }
  0xec   : > { %v383_v51 = vpop.f32.mrb[1].mxu0 }
  0xed   : > { %v6136_v52 = vpop.f32.mrb[2].mxu0 }
  0xee   : > { %v7199_v53 = vpack.c.bf16 %v6136_v52, %v6135_v50  ;;  %v386_v54 = vpop.f32.mrb[3].mxu0 }
  0xef   : > { %v7201_v55 = vpack.c.bf16 %v386_v54, %v383_v51 }
  0xf0   : > { %12114 = vst [vmem:[#allocation2_spill] sm:$0xff] %v7199_v53  ;;  %1587 = vrot.lane.b32.xlu1 %v7199_v53, %s6997_s27  ;;  %544 = vrot.lane.b32.xlu0 %v7199_v53, %s6998_s15  ;;  %v627_v23 = vsel %vm574_vm1, %v7199_v53, 0 }
  0xf1   : > { %12115 = vst [vmem:[#allocation3_spill] sm:$0xff] %v7201_v55  ;;  %v624_v16 = vsel %vm574_vm1, %v7201_v55, 0 }
  0xf3   : > { %v6139_v56 = vpop.f32.mrb[4].mxu0 }
  0xf4   : > { %2661 = vrot.lane.b32.xlu1 %v7199_v53, %s6999_s16  ;;  %1619 = vrot.lane.b32.xlu0 %v7199_v53, %s7000_s17  ;;  %v399_v57 = vpop.f32.mrb[5].mxu0 }
  0xf5   : > { %v6140_v58 = vpop.f32.mrb[6].mxu0 }
  0xf6   : > { %v7211_v59 = vpack.c.bf16 %v6140_v58, %v6139_v56  ;;  %v402_v60 = vpop.f32.mrb[7].mxu0 }
  0xf7   : > { %v7213_v61 = vpack.c.bf16 %v402_v60, %v399_v57 }
  0xf8   : > { %12116 = vst [vmem:[#allocation4_spill] sm:$0xff] %v7211_v59  ;;  %3767 = vrot.lane.b32.xlu1 %v7199_v53, %s7001_s19  ;;  %2693 = vrot.lane.b32.xlu0 %v7199_v53, %s7002_s20  ;;  %v633_v37 = vsel %vm574_vm1, %v7211_v59, 0 }
  0xf9   : > { %12117 = vst [vmem:[#allocation5_spill] sm:$0xff] %v7213_v61  ;;  %v630_v30 = vsel %vm574_vm1, %v7213_v61, 0 }
  0xfb   : > { %v6143_v62 = vpop.f32.mrb[8].mxu0 }
  0xfc   : > { %1617 = vrot.lane.b32.xlu1 %v7201_v55, %s7000_s17  ;;  %542 = vrot.lane.b32.xlu0 %v7201_v55, %s6998_s15  ;;  %v415_v63 = vpop.f32.mrb[9].mxu0 }
  0xfd   : > { %v6144_v0 = vpop.f32.mrb[10].mxu0 }
  0xfe   : > { %v7223_v1 = vpack.c.bf16 %v6144_v0, %v6143_v62  ;;  %v418_v2 = vpop.f32.mrb[11].mxu0 }
  0xff   : > { %v7225_v3 = vpack.c.bf16 %v418_v2, %v415_v63 }
 0x100   : > { %12118 = vst [vmem:[#allocation6_spill] sm:$0xff] %v7223_v1  ;;  %2691 = vrot.lane.b32.xlu1 %v7201_v55, %s7002_s20  ;;  %1585 = vrot.lane.b32.xlu0 %v7201_v55, %s6997_s27  ;;  %v639_v39 = vsel %vm574_vm1, %v7223_v1, 0 }
 0x101   : > { %12119 = vst [vmem:[#allocation7_spill] sm:$0xff] %v7225_v3  ;;  %v636_v38 = vsel %vm574_vm1, %v7225_v3, 0 }
 0x103   : > { %v6147_v4 = vpop.f32.mrb[12].mxu0 }
 0x104   : > { %3765 = vrot.lane.b32.xlu1 %v7201_v55, %s7001_s19  ;;  %2659 = vrot.lane.b32.xlu0 %v7201_v55, %s6999_s16  ;;  %v431_v5 = vpop.f32.mrb[13].mxu0 }
 0x105   : > { %v6148_v6 = vpop.f32.mrb[14].mxu0 }
 0x106   : > { %v7235_v7 = vpack.c.bf16 %v6148_v6, %v6147_v4  ;;  %v434_v8 = vpop.f32.mrb[15].mxu0 }
 0x107   : > { %v7237_v9 = vpack.c.bf16 %v434_v8, %v431_v5 }
 0x108   : > { %12120 = vst [vmem:[#allocation8_spill] sm:$0xff] %v7235_v7  ;;  %1623 = vrot.lane.b32.xlu0 %v7211_v59, %s7000_s17  ;;  %548 = vrot.lane.b32.xlu1 %v7211_v59, %s6998_s15  ;;  %v645_v41 = vsel %vm574_vm1, %v7235_v7, 0 }
 0x109   : > { %12121 = vst [vmem:[#allocation9_spill] sm:$0xff] %v7237_v9  ;;  %v642_v40 = vsel %vm574_vm1, %v7237_v9, 0 }
 0x10b   : > { %v6151_v10 = vpop.f32.mrb[16].mxu0 }
 0x10c   : > { %2697 = vrot.lane.b32.xlu0 %v7211_v59, %s7002_s20  ;;  %1591 = vrot.lane.b32.xlu1 %v7211_v59, %s6997_s27  ;;  %v447_v11 = vpop.f32.mrb[17].mxu0 }
 0x10d   : > { %v6152_v12 = vpop.f32.mrb[18].mxu0 }
 0x10e   : > { %v7247_v13 = vpack.c.bf16 %v6152_v12, %v6151_v10  ;;  %v450_v14 = vpop.f32.mrb[19].mxu0 }
 0x10f   : > { %v7249_v15 = vpack.c.bf16 %v450_v14, %v447_v11 }
 0x110   : > { %12122 = vst [vmem:[#allocation10_spill] sm:$0xff] %v7247_v13  ;;  %2665 = vrot.lane.b32.xlu1 %v7211_v59, %s6999_s16  ;;  %1589 = vrot.lane.b32.xlu0 %v7213_v61, %s6997_s27 }
 0x111   : > { %12123 = vst [vmem:[#allocation11_spill] sm:$0xff] %v7249_v15  ;;  %6165 = vmatprep.subr.msk.bf16.mxu1 %vm574_vm1, %v7249_v15 }
 0x112   : > { %5490 = vmatpush3.bf16.xpose.msra.mxu1 %v624_v16 }
 0x113   : > { %6166 = vmatprep.subr.msk.bf16.mxu1 %vm574_vm1, %v7247_v13  ;;  %v6155_v17 = vpop.f32.mrb[20].mxu0 }
 0x114   : > { %546 = vrot.lane.b32.xlu1 %v7213_v61, %s6998_s15  ;;  %1627 = vrot.lane.b32.xlu0 %v7223_v1, %s7000_s17  ;;  %v463_v18 = vpop.f32.mrb[21].mxu0 }
 0x115   : > { %v6156_v19 = vpop.f32.mrb[22].mxu0 }
 0x116   : > { %v7265_v20 = vpack.c.bf16 %v6156_v19, %v6155_v17  ;;  %v466_v21 = vpop.f32.mrb[23].mxu0 }
 0x117   : > { %v7267_v22 = vpack.c.bf16 %v466_v21, %v463_v18 }
 0x118   : > { %12124 = vst [vmem:[#allocation12_spill] sm:$0xff] %v7265_v20  ;;  %1621 = vrot.lane.b32.xlu1 %v7213_v61, %s7000_s17  ;;  %2701 = vrot.lane.b32.xlu0 %v7223_v1, %s7002_s20 }
 0x119   : > { %12125 = vst [vmem:[#allocation13_spill] sm:$0xff] %v7267_v22 }
 0x11a   : > { %5492 = vmatpush3.bf16.xpose.msra.mxu1 %v627_v23 }
 0x11b   : > { %6167 = vmatprep.subr.msk.bf16.mxu1 %vm574_vm1, %v7267_v22  ;;  %v6159_v24 = vpop.f32.mrb[24].mxu0 }
 0x11c   : > { %2695 = vrot.lane.b32.xlu1 %v7213_v61, %s7002_s20  ;;  %550 = vrot.lane.b32.xlu0 %v7225_v3, %s6998_s15  ;;  %v479_v25 = vpop.f32.mrb[25].mxu0 }
 0x11d   : > { %v6160_v26 = vpop.f32.mrb[26].mxu0 }
 0x11e   : > { %v7281_v27 = vpack.c.bf16 %v6160_v26, %v6159_v24  ;;  %v482_v28 = vpop.f32.mrb[27].mxu0 }
 0x11f   : > { %v7283_v29 = vpack.c.bf16 %v482_v28, %v479_v25 }
 0x120   : > { %12126 = vst [vmem:[#allocation14_spill] sm:$0xff] %v7281_v27  ;;  %2663 = vrot.lane.b32.xlu1 %v7213_v61, %s6999_s16  ;;  %2667 = vrot.lane.b32.xlu0 %v7225_v3, %s6999_s16 }
 0x121   : > { %12127 = vst [vmem:[#allocation15_spill] sm:$0xff] %v7283_v29 }
 0x122   : > { %5494 = vmatpush3.bf16.xpose.msra.mxu1 %v630_v30 }
 0x123   : > { %6168 = vmatprep.subr.msk.bf16.mxu1 %vm574_vm1, %v7265_v20  ;;  %v6163_v31 = vpop.f32.mrb[28].mxu0 }
 0x124   : > { %3769 = vrot.lane.b32.xlu1 %v7213_v61, %s7001_s19  ;;  %1631 = vrot.lane.b32.xlu0 %v7235_v7, %s7000_s17  ;;  %v495_v32 = vpop.f32.mrb[29].mxu0 }
 0x125   : > { %v6164_v33 = vpop.f32.mrb[30].mxu0 }
 0x126   : > { %v7297_v34 = vpack.c.bf16 %v6164_v33, %v6163_v31  ;;  %v498_v35 = vpop.f32.mrb[31].mxu0 }
 0x127   : > { %v7299_v36 = vpack.c.bf16 %v498_v35, %v495_v32 }
 0x128   : > { %12128 = vst [vmem:[#allocation16_spill] sm:$0xff] %v7297_v34  ;;  %552 = vrot.lane.b32.xlu1 %v7223_v1, %s6998_s15  ;;  %2705 = vrot.lane.b32.xlu0 %v7235_v7, %s7002_s20 }
 0x129   : > { %12129 = vst [vmem:[#allocation17_spill] sm:$0xff] %v7299_v36 }
 0x12a   : > { %5496 = vmatpush3.bf16.xpose.msra.mxu1 %v633_v37 }
 0x12b   : > { %6169 = vmatprep.subr.msk.bf16.mxu1 %vm574_vm1, %v7283_v29 }
 0x12c   : > { %1595 = vrot.lane.b32.xlu1 %v7223_v1, %s6997_s27  ;;  %554 = vrot.lane.b32.xlu0 %v7237_v9, %s6998_s15 }
 0x130   : > { %2669 = vrot.lane.b32.xlu1 %v7223_v1, %s6999_s16  ;;  %2671 = vrot.lane.b32.xlu0 %v7237_v9, %s6999_s16 }
 0x132   : > { %5498 = vmatpush3.bf16.xpose.msra.mxu1 %v636_v38 }
 0x133   : > { %6170 = vmatprep.subr.msk.bf16.mxu1 %vm574_vm1, %v7281_v27 }
 0x134   : > { %1625 = vrot.lane.b32.xlu1 %v7225_v3, %s7000_s17  ;;  %1603 = vrot.lane.b32.xlu0 %v7247_v13, %s6997_s27 }
 0x138   : > { %1593 = vrot.lane.b32.xlu1 %v7225_v3, %s6997_s27  ;;  %2709 = vrot.lane.b32.xlu0 %v7247_v13, %s7002_s20 }
 0x13a   : > { %5500 = vmatpush3.bf16.xpose.msra.mxu1 %v639_v39 }
 0x13b   : > { %6171 = vmatprep.subr.msk.bf16.mxu1 %vm574_vm1, %v7299_v36 }
 0x13c   : > { %2699 = vrot.lane.b32.xlu1 %v7225_v3, %s7002_s20  ;;  %2677 = vrot.lane.b32.xlu0 %v7247_v13, %s6999_s16 }
 0x140   : > { %556 = vrot.lane.b32.xlu1 %v7235_v7, %s6998_s15  ;;  %3783 = vrot.lane.b32.xlu0 %v7247_v13, %s7001_s19 }
 0x142   : > { %5502 = vmatpush3.bf16.xpose.msra.mxu1 %v642_v40 }
 0x143   : > { %6172 = vmatprep.subr.msk.bf16.mxu1 %vm574_vm1, %v7297_v34 }
 0x144   : > { %1599 = vrot.lane.b32.xlu1 %v7235_v7, %s6997_s27  ;;  %558 = vrot.lane.b32.xlu0 %v7249_v15, %s6998_s15 }
 0x148   : > { %2673 = vrot.lane.b32.xlu1 %v7235_v7, %s6999_s16  ;;  %1633 = vrot.lane.b32.xlu0 %v7249_v15, %s7000_s17 }
 0x14a   : > { %5504 = vmatpush3.bf16.xpose.msra.mxu1 %v645_v41 }
 0x14c   : > { %1629 = vrot.lane.b32.xlu1 %v7237_v9, %s7000_s17  ;;  %1601 = vrot.lane.b32.xlu0 %v7249_v15, %s6997_s27 }
 0x150   : > { %1597 = vrot.lane.b32.xlu1 %v7237_v9, %s6997_s27  ;;  %2707 = vrot.lane.b32.xlu0 %v7249_v15, %s7002_s20 }
 0x154   : > { %2703 = vrot.lane.b32.xlu1 %v7237_v9, %s7002_s20  ;;  %2675 = vrot.lane.b32.xlu0 %v7249_v15, %s6999_s16 }
 0x158   : > { %560 = vrot.lane.b32.xlu1 %v7247_v13, %s6998_s15  ;;  %3781 = vrot.lane.b32.xlu0 %v7249_v15, %s7001_s19 }
 0x15c   : > { %1635 = vrot.lane.b32.xlu1 %v7247_v13, %s7000_s17  ;;  %562 = vrot.lane.b32.xlu0 %v7267_v22, %s6998_s15 }
 0x160   : > { %564 = vrot.lane.b32.xlu1 %v7265_v20, %s6998_s15  ;;  %1637 = vrot.lane.b32.xlu0 %v7267_v22, %s7000_s17 }
 0x162   : > { %v7379_v42 = vpop.permute.xlu1 %1587  ;;  %v545_v43 = vpop.permute.xlu0 %544 }
 0x164   : > { %1639 = vrot.lane.b32.xlu1 %v7265_v20, %s7000_s17  ;;  %1605 = vrot.lane.b32.xlu0 %v7267_v22, %s6997_s27 }
 0x166   : > { %v7385_v44 = vpop.permute.xlu1 %2661  ;;  %v7387_v45 = vpop.permute.xlu0 %1619 }
 0x168   : > { %1607 = vrot.lane.b32.xlu1 %v7265_v20, %s6997_s27  ;;  %2711 = vrot.lane.b32.xlu0 %v7267_v22, %s7002_s20 }
 0x16a   : > { %v7393_v46 = vpop.permute.xlu1 %3767  ;;  %v7395_v47 = vpop.permute.xlu0 %2693 }
 0x16c   : > { %2713 = vrot.lane.b32.xlu1 %v7265_v20, %s7002_s20  ;;  %2679 = vrot.lane.b32.xlu0 %v7267_v22, %s6999_s16 }
 0x16e   : > { %v7401_v48 = vpop.permute.xlu1 %1617  ;;  %v543_v49 = vpop.permute.xlu0 %542 }
 0x16f   : > { %5505 = vmatprep.mubr.msk.bf16.mxu1 %vm574_vm1, %v543_v49  ;;  %v1698_v40 = vsel %vm574_vm1, %v7401_v48, 0 }
 0x170   : > { %3785 = vrot.lane.b32.xlu0 %v7267_v22, %s7001_s19  ;;  %568 = vrot.lane.b32.xlu1 %v7281_v27, %s6998_s15 }
 0x171   : > { %5506 = vmatmul.mubr.msk.bf16.vlgmr.msra.gmra.mrb[0].mxu1 %vm574_vm1, %v543_v49 }
 0x172   : > { %5507 = vmatprep.mubr.msk.bf16.mxu1 %vm574_vm1, %v545_v43  ;;  %v7410_v50 = vpop.permute.xlu1 %2691  ;;  %v7412_v51 = vpop.permute.xlu0 %1585 }
 0x174   : > { %1643 = vrot.lane.b32.xlu1 %v7281_v27, %s7000_s17  ;;  %566 = vrot.lane.b32.xlu0 %v7283_v29, %s6998_s15 }
 0x176   : > { %v7418_v52 = vpop.permute.xlu1 %3765  ;;  %v7420_v54 = vpop.permute.xlu0 %2659 }
 0x178   : > { %1611 = vrot.lane.b32.xlu1 %v7281_v27, %s6997_s27  ;;  %1641 = vrot.lane.b32.xlu0 %v7283_v29, %s7000_s17 }
 0x179   : > { %5508 = vmatmul.mubr.msk.bf16.gmra.mrb[4].mxu1 %vm574_vm1, %v545_v43 }
 0x17a   : > { %v7427_v56 = vpop.permute.xlu0 %1623  ;;  %v549_v57 = vpop.permute.xlu1 %548 }
 0x17c   : > { %2717 = vrot.lane.b32.xlu1 %v7281_v27, %s7002_s20  ;;  %1609 = vrot.lane.b32.xlu0 %v7283_v29, %s6997_s27 }
 0x17e   : > { %v7433_v58 = vpop.permute.xlu0 %2697  ;;  %v7435_v60 = vpop.permute.xlu1 %1591 }
 0x180   : > { %2715 = vrot.lane.b32.xlu0 %v7283_v29, %s7002_s20  ;;  %572 = vrot.lane.b32.xlu1 %v7297_v34, %s6998_s15 }
 0x182   : > { %v7441_v62 = vpop.permute.xlu1 %2665  ;;  %v7443_v63 = vpop.permute.xlu0 %1589 }
 0x184   : > { %1647 = vrot.lane.b32.xlu1 %v7297_v34, %s7000_s17  ;;  %570 = vrot.lane.b32.xlu0 %v7299_v36, %s6998_s15 }
 0x186   : > { %v547_v0 = vpop.permute.xlu1 %546  ;;  %v7449_v2 = vpop.permute.xlu0 %1627 }
 0x187   : > { %5509 = vmatprep.mubr.msk.bf16.mxu1 %vm574_vm1, %v547_v0 }
 0x188   : > { %1615 = vrot.lane.b32.xlu1 %v7297_v34, %s6997_s27  ;;  %1645 = vrot.lane.b32.xlu0 %v7299_v36, %s7000_s17 }
 0x189   : > { %5510 = vmatmul.mubr.msk.bf16.gmra.mrb[8].mxu1 %vm574_vm1, %v547_v0 }
 0x18a   : > { %5511 = vmatprep.mubr.msk.bf16.mxu1 %vm574_vm1, %v549_v57  ;;  %v7458_v4 = vpop.permute.xlu1 %1621  ;;  %v7460_v5 = vpop.permute.xlu0 %2701 }
 0x18c   : > { %2721 = vrot.lane.b32.xlu1 %v7297_v34, %s7002_s20  ;;  %1613 = vrot.lane.b32.xlu0 %v7299_v36, %s6997_s27 }
 0x18e   : > { %v7466_v6 = vpop.permute.xlu1 %2695  ;;  %v551_v8 = vpop.permute.xlu0 %550 }
 0x190   : > { %3771 = vrot.lane.b32.xlu1 %v7211_v59, %s7001_s19  ;;  %2719 = vrot.lane.b32.xlu0 %v7299_v36, %s7002_s20 }
 0x191   : > { %5512 = vmatmul.mubr.msk.bf16.gmra.mrb[12].mxu1 %vm574_vm1, %v549_v57 }
 0x192   : > { %5513 = vmatprep.mubr.msk.bf16.mxu1 %vm574_vm1, %v551_v8  ;;  %v7474_v10 = vpop.permute.xlu1 %2663  ;;  %v7476_v11 = vpop.permute.xlu0 %2667 }
 0x194   : > { %3773 = vrot.lane.b32.xlu1 %v7225_v3, %s7001_s19  ;;  %2681 = vrot.lane.b32.xlu0 %v7265_v20, %s6999_s16 }
 0x196   : > { %v7482_v12 = vpop.permute.xlu1 %3769  ;;  %v7484_v14 = vpop.permute.xlu0 %1631 }
 0x198   : > { %3775 = vrot.lane.b32.xlu1 %v7223_v1, %s7001_s19  ;;  %3787 = vrot.lane.b32.xlu0 %v7265_v20, %s7001_s19  ;;  %v1704_v1 = vsel %vm574_vm1, %v7458_v4, 0 }
 0x199   : > { %5514 = vmatmul.mubr.msk.bf16.gmra.mrb[16].mxu1 %vm574_vm1, %v551_v8 }
 0x19a   : > { %v553_v16 = vpop.permute.xlu1 %552  ;;  %v7491_v17 = vpop.permute.xlu0 %2705 }
 0x19b   : > { %5515 = vmatprep.mubr.msk.bf16.mxu1 %vm574_vm1, %v553_v16 }
 0x19c   : > { %3791 = vrot.lane.b32.xlu1 %v7281_v27, %s7001_s19  ;;  %2683 = vrot.lane.b32.xlu0 %v7283_v29, %s6999_s16 }
 0x19e   : > { %v7498_v18 = vpop.permute.xlu1 %1595  ;;  %v555_v19 = vpop.permute.xlu0 %554 }
 0x1a0   : > { %3789 = vrot.lane.b32.xlu0 %v7283_v29, %s7001_s19 }
 0x1a1   : > { %5516 = vmatmul.mubr.msk.bf16.gmra.mrb[20].mxu1 %vm574_vm1, %v553_v16 }
 0x1a2   : > { %5517 = vmatprep.mubr.msk.bf16.mxu1 %vm574_vm1, %v555_v19  ;;  %v7504_v21 = vpop.permute.xlu1 %2669  ;;  %v7506_v23 = vpop.permute.xlu0 %2671 }
 0x1a4   : > { %2685 = vrot.lane.b32.xlu0 %v7281_v27, %s6999_s16 }
 0x1a6   : > { %v7510_v24 = vpop.permute.xlu1 %1625  ;;  %v7512_v25 = vpop.permute.xlu0 %1603 }
 0x1a8   : > { %1392 = vrot.lane.b32.xlu0 %v7249_v15, %s7003_s21 }
 0x1a9   : > { %5518 = vmatmul.mubr.msk.bf16.gmra.mrb[24].mxu1 %vm574_vm1, %v555_v19 }
 0x1aa   : > { %v7517_v26 = vpop.permute.xlu1 %1593  ;;  %v7519_v28 = vpop.permute.xlu0 %2709 }
 0x1ae   : > { %v7521_v30 = vpop.permute.xlu1 %2699  ;;  %v7523_v31 = vpop.permute.xlu0 %2677 }
 0x1b2   : > { %v557_v32 = vpop.permute.xlu1 %556  ;;  %v7525_v33 = vpop.permute.xlu0 %3783 }
 0x1b3   : > { %5519 = vmatprep.mubr.msk.bf16.mxu1 %vm574_vm1, %v557_v32 }
 0x1b4   : > { %5520 = vmatmul.mubr.msk.bf16.gmra.mrb[28].mxu1 %vm574_vm1, %v557_v32 }
 0x1b6   : > { %v7529_v35 = vpop.permute.xlu1 %1599  ;;  %v559_v37 = vpop.permute.xlu0 %558 }
 0x1b7   : > { %5521 = vmatprep.mubr.msk.bf16.mxu1 %vm574_vm1, %v559_v37 }
 0x1ba   : > { %v7532_v38 = vpop.permute.xlu1 %2673  ;;  %v1634_v39 = vpop.permute.xlu0 %1633 }
 0x1bb   : > { %6173 = vmatprep.subr.msk.bf16.mxu1 %vm574_vm1, %v1634_v39 }
 0x1bc   : > { %5522 = vmatmul.mubr.msk.bf16.gmra.mrb[32].mxu1 %vm574_vm1, %v559_v37  ;;  %v1701_v37 = vsel %vm574_vm1, %v7387_v45, 0 }
 0x1bd   : > { %5650 = vmatpush3.bf16.xpose.msra.mxu1 %v1698_v40 }
 0x1be   : > { %v1630_v41 = vpop.permute.xlu1 %1629  ;;  %v7538_v43 = vpop.permute.xlu0 %1601 }
 0x1c2   : > { %v7540_v49 = vpop.permute.xlu1 %1597  ;;  %v7542_v57 = vpop.permute.xlu0 %2707 }
 0x1c6   : > { %v7544_v0 = vpop.permute.xlu1 %2703  ;;  %v7546_v8 = vpop.permute.xlu0 %2675 }
 0x1ca   : > { %v561_v16 = vpop.permute.xlu1 %560  ;;  %v7548_v19 = vpop.permute.xlu0 %3781 }
 0x1cb   : > { %5523 = vmatprep.mubr.msk.bf16.mxu1 %vm574_vm1, %v561_v16 }
 0x1cc   : > { %5524 = vmatmul.mubr.msk.bf16.gmra.mrb[36].mxu1 %vm574_vm1, %v561_v16 }
 0x1ce   : > { %v1636_v48 = vpop.permute.xlu1 %1635  ;;  %v563_v32 = vpop.permute.xlu0 %562 }
 0x1cf   : > { %5525 = vmatprep.mubr.msk.bf16.mxu1 %vm574_vm1, %v563_v32  ;;  %6174 = vmatprep.subr.msk.bf16.mxu1 %vm574_vm1, %v1636_v48 }
 0x1d0   : > { %5652 = vmatpush3.bf16.xpose.msra.mxu1 %v1701_v37 }
 0x1d2   : > { %v565_v39 = vpop.permute.xlu1 %564  ;;  %v1638_v40 = vpop.permute.xlu0 %1637 }
 0x1d3   : > { %6175 = vmatprep.subr.msk.bf16.mxu1 %vm574_vm1, %v1638_v40 }
 0x1d4   : > { %5526 = vmatmul.mubr.msk.bf16.gmra.mrb[40].mxu1 %vm574_vm1, %v563_v32  ;;  %v1707_v32 = vsel %vm574_vm1, %v7427_v56, 0 }
 0x1d5   : > { %5527 = vmatprep.mubr.msk.bf16.mxu1 %vm574_vm1, %v565_v39 }
 0x1d6   : > { %v1640_v15 = vpop.permute.xlu1 %1639  ;;  %v7559_v16 = vpop.permute.xlu0 %1605 }
 0x1d8   : > { %5654 = vmatpush3.bf16.xpose.msra.mxu1 %v1704_v1 }
 0x1d9   : > { %6176 = vmatprep.subr.msk.bf16.mxu1 %vm574_vm1, %v1640_v15 }
 0x1da   : > { %v7564_v45 = vpop.permute.xlu1 %1607  ;;  %v2712_v48 = vpop.permute.xlu0 %2711 }
 0x1dc   : > { %5528 = vmatmul.mubr.msk.bf16.gmra.mrb[44].mxu1 %vm574_vm1, %v565_v39  ;;  %v1710_v39 = vsel %vm574_vm1, %v7510_v24, 0 }
 0x1de   : > { %v2714_v37 = vpop.permute.xlu1 %2713  ;;  %v7567_v40 = vpop.permute.xlu0 %2679 }
 0x1e0   : > { %5656 = vmatpush3.bf16.xpose.msra.mxu1 %v1707_v32 }
 0x1e2   : > { %v7571_v27 = vpop.permute.xlu0 %3785  ;;  %v569_v3 = vpop.permute.xlu1 %568 }
 0x1e6   : > { %v1644_v29 = vpop.permute.xlu1 %1643  ;;  %v567_v4 = vpop.permute.xlu0 %566 }
 0x1e7   : > { %5529 = vmatprep.mubr.msk.bf16.mxu1 %vm574_vm1, %v567_v4 }
 0x1e8   : > { %5530 = vmatmul.mubr.msk.bf16.gmra.mrb[48].mxu1 %vm574_vm1, %v567_v4  ;;  %v1713_v4 = vsel %vm574_vm1, %v7449_v2, 0 }
 0x1e9   : > { %5531 = vmatprep.mubr.msk.bf16.mxu1 %vm574_vm1, %v569_v3 }
 0x1ea   : > { %v7576_v1 = vpop.permute.xlu1 %1611  ;;  %v1642_v15 = vpop.permute.xlu0 %1641 }
 0x1eb   : > { %6177 = vmatprep.subr.msk.bf16.mxu1 %vm574_vm1, %v1642_v15 }
 0x1ec   : > { %5658 = vmatpush3.bf16.xpose.msra.mxu1 %v1710_v39 }
 0x1ed   : > { %6178 = vmatprep.subr.msk.bf16.mxu1 %vm574_vm1, %v1644_v29  ;;  %v1716_v29 = vsel %vm574_vm1, %v1630_v41, 0 }
 0x1ee   : > { %v7582_v56 = vpop.permute.xlu0 %1609  ;;  %v2718_v32 = vpop.permute.xlu1 %2717 }
 0x1f0   : > { %5532 = vmatmul.mubr.msk.bf16.gmra.mrb[52].mxu1 %vm574_vm1, %v569_v3 }
 0x1f2   : > { %v2716_v7 = vpop.permute.xlu0 %2715  ;;  %v573_v34 = vpop.permute.xlu1 %572 }
 0x1f4   : > { %5660 = vmatpush3.bf16.xpose.msra.mxu1 %v1713_v4  ;;  %v2772_v4 = vsel %vm574_vm1, %v7410_v50, 0 }
 0x1f6   : > { %v571_v20 = vpop.permute.xlu0 %570  ;;  %v1648_v15 = vpop.permute.xlu1 %1647 }
 0x1f7   : > { %5533 = vmatprep.mubr.msk.bf16.mxu1 %vm574_vm1, %v571_v20 }
 0x1f8   : > { %5534 = vmatmul.mubr.msk.bf16.gmra.mrb[56].mxu1 %vm574_vm1, %v571_v20  ;;  %v1719_v20 = vsel %vm574_vm1, %v7484_v14, 0 }
 0x1f9   : > { %5535 = vmatprep.mubr.msk.bf16.mxu1 %vm574_vm1, %v573_v34 }
 0x1fa   : > { %v1646_v24 = vpop.permute.xlu0 %1645 }
 0x1fb   : > { %6179 = vmatprep.subr.msk.bf16.mxu1 %vm574_vm1, %v1646_v24 }
 0x1fc   : > { %5662 = vmatpush3.bf16.xpose.msra.mxu1 %v1716_v29 }
 0x1fd   : > { %6180 = vmatprep.subr.msk.bf16.mxu1 %vm574_vm1, %v1648_v15 }
 0x1fe   : > { %v7593_v3 = vpop.permute.xlu0 %1613 }
 0x200   : > { %5536 = vmatmul.mubr.msk.bf16.gmra.mrb[60].mxu1 %vm574_vm1, %v573_v34 }
 0x201   : > { %5665 = vmatprep.mubr.msk.bf16.mxu1 %vm574_vm1, %v7412_v51 }
 0x202   : > { %v2720_v2 = vpop.permute.xlu0 %2719 }
 0x204   : > { %5664 = vmatpush3.bf16.xpose.msra.mxu1 %v1719_v20 }
 0x205   : > { %6181 = vmatprep.subr.msk.bf16.mxu1 %vm574_vm1, %v7542_v57  ;;  %v2775_v57 = vsel %vm574_vm1, %v7395_v47, 0  ;;  %v2784_v47 = vsel %vm574_vm1, %v7521_v30, 0 }
 0x206   : > { %v7602_v41 = vpop.permute.xlu0 %2681 }
 0x20a   : > { %v7604_v39 = vpop.permute.xlu0 %3787 }
 0x20b   : > { %5666 = vmatmul.mubr.msk.bf16.vlgmr.msra.gmra.mrb[64].mxu1 %vm574_vm1, %v7412_v51 }
 0x20c   : > { %5667 = vmatprep.mubr.msk.bf16.mxu1 %vm574_vm1, %v7379_v42  ;;  %5810 = vmatpush3.bf16.xpose.msra.mxu1 %v2772_v4 }
 0x20d   : > { %6182 = vmatprep.subr.msk.bf16.mxu1 %vm574_vm1, %v7519_v28  ;;  %v2778_v28 = vsel %vm574_vm1, %v7466_v6, 0 }
 0x20e   : > { %v7614_v34 = vpop.permute.xlu0 %2683 }
 0x212   : > { %v7616_v14 = vpop.permute.xlu0 %3789 }
 0x213   : > { %5668 = vmatmul.mubr.msk.bf16.gmra.mrb[68].mxu1 %vm574_vm1, %v7379_v42  ;;  %v2781_v42 = vsel %vm574_vm1, %v7433_v58, 0  ;;  %v2787_v58 = vsel %vm574_vm1, %v7460_v5, 0  ;;  %v2793_v5 = vsel %vm574_vm1, %v7491_v17, 0 }
 0x214   : > { %5669 = vmatprep.mubr.msk.bf16.mxu1 %vm574_vm1, %v7443_v63  ;;  %5812 = vmatpush3.bf16.xpose.msra.mxu1 %v2775_v57 }
 0x215   : > { %6183 = vmatprep.subr.msk.bf16.mxu1 %vm574_vm1, %v2712_v48 }
 0x216   : > { %v7625_v50 = vpop.permute.xlu0 %2685 }
 0x21a   : > { %v1393_v51 = vpop.permute.xlu0 %1392 }
 0x21b   : > { %5537 = vmatprep.subr.bf16.mxu0 %v1393_v51  ;;  %5670 = vmatmul.mubr.msk.bf16.gmra.mrb[72].mxu1 %vm574_vm1, %v7443_v63 }
 0x21c   : > { %5671 = vmatprep.mubr.msk.bf16.mxu1 %vm574_vm1, %v7435_v60  ;;  %5814 = vmatpush3.bf16.xpose.msra.mxu1 %v2778_v28 }
 0x21d   : > { %6184 = vmatprep.subr.msk.bf16.mxu1 %vm574_vm1, %v2714_v37 }
 0x223   : > { %5672 = vmatmul.mubr.msk.bf16.gmra.mrb[76].mxu1 %vm574_vm1, %v7435_v60  ;;  %v2790_v60 = vsel %vm574_vm1, %v7544_v0, 0 }
 0x224   : > { %5673 = vmatprep.mubr.msk.bf16.mxu1 %vm574_vm1, %v7517_v26  ;;  %5816 = vmatpush3.bf16.xpose.msra.mxu1 %v2781_v42 }
 0x225   : > { %6185 = vmatprep.subr.msk.bf16.mxu1 %vm574_vm1, %v2716_v7  ;;  %v7655_v7 = vpop.permute.xlu1 %1615 }
 0x229   : > { %v2722_v63 = vpop.permute.xlu1 %2721 }
 0x22b   : > { %5674 = vmatmul.mubr.msk.bf16.gmra.mrb[80].mxu1 %vm574_vm1, %v7517_v26 }
 0x22c   : > { %5675 = vmatprep.mubr.msk.bf16.mxu1 %vm574_vm1, %v7498_v18  ;;  %5818 = vmatpush3.bf16.xpose.msra.mxu1 %v2784_v47 }
 0x22d   : > { %6186 = vmatprep.subr.msk.bf16.mxu1 %vm574_vm1, %v2718_v32 }
 0x233   : > { %5676 = vmatmul.mubr.msk.bf16.gmra.mrb[84].mxu1 %vm574_vm1, %v7498_v18 }
 0x234   : > { %5677 = vmatprep.mubr.msk.bf16.mxu1 %vm574_vm1, %v7540_v49  ;;  %5820 = vmatpush3.bf16.xpose.msra.mxu1 %v2787_v58 }
 0x235   : > { %6187 = vmatprep.subr.msk.bf16.mxu1 %vm574_vm1, %v2720_v2 }
 0x23b   : > { %5678 = vmatmul.mubr.msk.bf16.gmra.mrb[88].mxu1 %vm574_vm1, %v7540_v49 }
 0x23c   : > { %5679 = vmatprep.mubr.msk.bf16.mxu1 %vm574_vm1, %v7529_v35  ;;  %5822 = vmatpush3.bf16.xpose.msra.mxu1 %v2790_v60 }
 0x23d   : > { %6188 = vmatprep.subr.msk.bf16.mxu1 %vm574_vm1, %v2722_v63 }
 0x243   : > { %5680 = vmatmul.mubr.msk.bf16.gmra.mrb[92].mxu1 %vm574_vm1, %v7529_v35 }
 0x244   : > { %v7668_v6 = vpop.f32.mrb[0].mxu1  ;;  %5681 = vmatprep.mubr.msk.bf16.mxu1 %vm574_vm1, %v7538_v43  ;;  %5824 = vmatpush3.bf16.xpose.msra.mxu1 %v2793_v5 }
 0x245   : > { %v7672_v18 = vpop.f32.mrb[1].mxu1  ;;  %6189 = vmatprep.subr.msk.bf16.mxu1 %vm574_vm1, %v7548_v19 }
 0x246   : > { %v7676_v26 = vpop.f32.mrb[2].mxu1  ;;  %v864_v30 = vmax.f32 %v7668_v6, %v7672_v18 }
 0x247   : > { %v7680_v17 = vpop.f32.mrb[3].mxu1 }
 0x248   : > { %865 = vmax.xlane.f32.xlu0 %v864_v30  ;;  %v867_v35 = vmax.f32 %v7676_v26, %v7680_v17 }
 0x24a   : > { %868 = vmax.xlane.f32.xlu1 %v867_v35 }
 0x24b   : > { %5682 = vmatmul.mubr.msk.bf16.gmra.mrb[96].mxu1 %vm574_vm1, %v7538_v43 }
 0x24c   : > { %v7686_v49 = vpop.f32.mrb[4].mxu1  ;;  %5683 = vmatprep.mubr.msk.bf16.mxu1 %vm574_vm1, %v7512_v25 }
 0x24d   : > { %v7690_v0 = vpop.f32.mrb[5].mxu1 }
 0x24e   : > { %v7692_v19 = vpop.f32.mrb[6].mxu1  ;;  %v870_v48 = vmax.f32 %v7686_v49, %v7690_v0 }
 0x24f   : > { %v7696_v37 = vpop.f32.mrb[7].mxu1 }
 0x250   : > { %871 = vmax.xlane.f32.xlu0 %v870_v48  ;;  %v873_v32 = vmax.f32 %v7692_v19, %v7696_v37 }
 0x252   : > { %874 = vmax.xlane.f32.xlu1 %v873_v32 }
 0x253   : > { %5684 = vmatmul.mubr.msk.bf16.gmra.mrb[100].mxu1 %vm574_vm1, %v7512_v25 }
 0x254   : > { %5685 = vmatprep.mubr.msk.bf16.mxu1 %vm574_vm1, %v7559_v16 }
 0x25b   : > { %5686 = vmatmul.mubr.msk.bf16.gmra.mrb[104].mxu1 %vm574_vm1, %v7559_v16 }
 0x25c   : > { %v7706_v43 = vpop.f32.mrb[8].mxu1  ;;  %5687 = vmatprep.mubr.msk.bf16.mxu1 %vm574_vm1, %v7564_v45 }
 0x25d   : > { %v7710_v24 = vpop.f32.mrb[9].mxu1 }
 0x25e   : > { %v7712_v29 = vpop.f32.mrb[10].mxu1  ;;  %v876_v15 = vmax.f32 %v7706_v43, %v7710_v24 }
 0x25f   : > { %v7716_v2 = vpop.f32.mrb[11].mxu1 }
 0x260   : > { %877 = vmax.xlane.f32.xlu1 %v876_v15  ;;  %v879_v25 = vmax.f32 %v7712_v29, %v7716_v2 }
 0x263   : > { %5688 = vmatmul.mubr.msk.bf16.gmra.mrb[108].mxu1 %vm574_vm1, %v7564_v45 }
 0x264   : > { %880 = vmax.xlane.f32.xlu1 %v879_v25  ;;  %v7722_v16 = vpop.f32.mrb[12].mxu1  ;;  %5689 = vmatprep.mubr.msk.bf16.mxu1 %vm574_vm1, %v7582_v56 }
 0x265   : > { %v7726_v20 = vpop.f32.mrb[13].mxu1 }
 0x266   : > { %v882_v4 = vmax.f32 %v7722_v16, %v7726_v20  ;;  %v7730_v57 = vpop.f32.mrb[14].mxu1 }
 0x267   : > { %v7732_v51 = vpop.f32.mrb[15].mxu1 }
 0x268   : > { %883 = vmax.xlane.f32.xlu0 %v882_v4  ;;  %v885_v28 = vmax.f32 %v7730_v57, %v7732_v51 }
 0x26a   : > { %886 = vmax.xlane.f32.xlu1 %v885_v28 }
 0x26b   : > { %5690 = vmatmul.mubr.msk.bf16.gmra.mrb[112].mxu1 %vm574_vm1, %v7582_v56 }
 0x26c   : > { %v7738_v45 = vpop.f32.mrb[16].mxu1  ;;  %5691 = vmatprep.mubr.msk.bf16.mxu1 %vm574_vm1, %v7576_v1 }
 0x26d   : > { %v7742_v42 = vpop.f32.mrb[17].mxu1 }
 0x26e   : > { %v888_v47 = vmax.f32 %v7738_v45, %v7742_v42  ;;  %v7746_v58 = vpop.f32.mrb[18].mxu1 }
 0x26f   : > { %v7748_v60 = vpop.f32.mrb[19].mxu1 }
 0x270   : > { %v891_v63 = vmax.f32 %v7746_v58, %v7748_v60  ;;  %889 = vmax.xlane.f32.xlu1 %v888_v47 }
 0x272   : > { %892 = vmax.xlane.f32.xlu0 %v891_v63 }
 0x273   : > { %5692 = vmatmul.mubr.msk.bf16.gmra.mrb[116].mxu1 %vm574_vm1, %v7576_v1 }
 0x274   : > { %v7754_v56 = vpop.f32.mrb[20].mxu1  ;;  %5693 = vmatprep.mubr.msk.bf16.mxu1 %vm574_vm1, %v7593_v3 }
 0x275   : > { %v7758_v5 = vpop.f32.mrb[21].mxu1 }
 0x276   : > { %v894_v30 = vmax.f32 %v7754_v56, %v7758_v5  ;;  %v7762_v35 = vpop.f32.mrb[22].mxu1 }
 0x277   : > { %v7764_v48 = vpop.f32.mrb[23].mxu1 }
 0x278   : > { %v897_v32 = vmax.f32 %v7762_v35, %v7764_v48  ;;  %895 = vmax.xlane.f32.xlu1 %v894_v30 }
 0x27a   : > { %898 = vmax.xlane.f32.xlu0 %v897_v32 }
 0x27b   : > { %5694 = vmatmul.mubr.msk.bf16.gmra.mrb[120].mxu1 %vm574_vm1, %v7593_v3 }
 0x27c   : > { %v7770_v1 = vpop.f32.mrb[24].mxu1  ;;  %5695 = vmatprep.mubr.msk.bf16.mxu1 %vm574_vm1, %v7655_v7 }
 0x27d   : > { %v7774_v15 = vpop.f32.mrb[25].mxu1 }
 0x27e   : > { %12130 = vst [vmem:[#allocation18_spill] sm:$0xff] %v7774_v15  ;;  %v900_v25 = vmax.f32 %v7770_v1, %v7774_v15  ;;  %v7778_v4 = vpop.f32.mrb[26].mxu1 }
 0x27f   : > { %v7780_v28 = vpop.f32.mrb[27].mxu1 }
 0x280   : > { %v903_v47 = vmax.f32 %v7778_v4, %v7780_v28  ;;  %901 = vmax.xlane.f32.xlu0 %v900_v25  ;;  %v3846_v25 = vsel %vm574_vm1, %v7418_v52, 0 }
 0x282   : > { %904 = vmax.xlane.f32.xlu1 %v903_v47 }
 0x283   : > { %5696 = vmatmul.mubr.msk.bf16.gmra.mrb[124].mxu1 %vm574_vm1, %v7655_v7 }
 0x284   : > { %5825 = vmatprep.mubr.msk.bf16.mxu1 %vm574_vm1, %v7420_v54 }
 0x287   : > { %v7788_v3 = vpop.f32.mrb[28].mxu1 }
 0x288   : > { %12131 = vst [vmem:[#allocation19_spill] sm:$0xff] %v7788_v3  ;;  %v7790_v63 = vpop.f32.mrb[29].mxu1 }
 0x289   : > { %12132 = vst [vmem:[#allocation20_spill] sm:$0xff] %v7790_v63  ;;  %v906_v30 = vmax.f32 %v7788_v3, %v7790_v63  ;;  %v7794_v32 = vpop.f32.mrb[30].mxu1 }
 0x28a   : > { %12133 = vst [vmem:[#allocation21_spill] sm:$0xff] %v7794_v32  ;;  %v7796_v15 = vpop.f32.mrb[31].mxu1 }
 0x28b   : > { %12134 = vst [vmem:[#allocation22_spill] sm:$0xff] %v7796_v15  ;;  %v909_v7 = vmax.f32 %v7794_v32, %v7796_v15  ;;  %5826 = vmatmul.mubr.msk.bf16.vlgmr.msra.gmra.mrb[128].mxu1 %vm574_vm1, %v7420_v54  ;;  %907 = vmax.xlane.f32.xlu0 %v906_v30  ;;  %v3849_v54 = vsel %vm574_vm1, %v7393_v46, 0 }
 0x28c   : > { %5970 = vmatpush3.bf16.xpose.msra.mxu1 %v3846_v25  ;;  %5827 = vmatprep.mubr.msk.bf16.mxu1 %vm574_vm1, %v7385_v44  ;;  %v3852_v25 = vsel %vm574_vm1, %v7482_v12, 0 }
 0x28d   : > { %6190 = vmatprep.subr.msk.bf16.mxu1 %vm574_vm1, %v7525_v33  ;;  %910 = vmax.xlane.f32.xlu1 %v909_v7  ;;  %v3772_v33 = vpop.permute.xlu1 %3771 }
 0x28f   : > { %v7808_v47 = vpop.f32.mrb[32].mxu1 }
 0x290   : > { %12135 = vst [vmem:[#allocation23_spill] sm:$0xff] %v7808_v47  ;;  %v7810_v63 = vpop.f32.mrb[33].mxu1 }
 0x291   : > { %12136 = vst [vmem:[#allocation24_spill] sm:$0xff] %v7810_v63  ;;  %v912_v52 = vmax.f32 %v7808_v47, %v7810_v63  ;;  %v7814_v15 = vpop.f32.mrb[34].mxu1  ;;  %v3774_v46 = vpop.permute.xlu1 %3773 }
 0x292   : > { %12137 = vst [vmem:[#allocation25_spill] sm:$0xff] %v7814_v15  ;;  %v7816_v32 = vpop.f32.mrb[35].mxu1 }
 0x293   : > { %12138 = vst [vmem:[#allocation26_spill] sm:$0xff] %v7816_v32  ;;  %v915_v30 = vmax.f32 %v7814_v15, %v7816_v32  ;;  %5828 = vmatmul.mubr.msk.bf16.gmra.mrb[132].mxu1 %vm574_vm1, %v7385_v44  ;;  %913 = vmax.xlane.f32.xlu0 %v912_v52 }
 0x294   : > { %5972 = vmatpush3.bf16.xpose.msra.mxu1 %v3849_v54  ;;  %5829 = vmatprep.mubr.msk.bf16.mxu1 %vm574_vm1, %v7474_v10 }
 0x295   : > { %6191 = vmatprep.subr.msk.bf16.mxu1 %vm574_vm1, %v7571_v27  ;;  %916 = vmax.xlane.f32.xlu1 %v915_v30 }
 0x29b   : > { %5830 = vmatmul.mubr.msk.bf16.gmra.mrb[136].mxu1 %vm574_vm1, %v7474_v10  ;;  %v3855_v10 = vsel %vm574_vm1, %v3772_v33, 0 }
 0x29c   : > { %5974 = vmatpush3.bf16.xpose.msra.mxu1 %v3852_v25  ;;  %5831 = vmatprep.mubr.msk.bf16.mxu1 %vm574_vm1, %v7441_v62 }
 0x29d   : > { %6192 = vmatprep.subr.msk.bf16.mxu1 %vm574_vm1, %v7604_v39  ;;  %v3776_v39 = vpop.permute.xlu1 %3775 }
 0x29f   : > { %v7836_v44 = vpop.f32.mrb[36].mxu1 }
 0x2a0   : > { %12139 = vst [vmem:[#allocation27_spill] sm:$0xff] %v7836_v44  ;;  %v7838_v7 = vpop.f32.mrb[37].mxu1 }
 0x2a1   : > { %12140 = vst [vmem:[#allocation28_spill] sm:$0xff] %v7838_v7  ;;  %v918_v27 = vmax.f32 %v7836_v44, %v7838_v7  ;;  %v7842_v52 = vpop.f32.mrb[38].mxu1 }
 0x2a2   : > { %12141 = vst [vmem:[#allocation29_spill] sm:$0xff] %v7842_v52  ;;  %v7844_v12 = vpop.f32.mrb[39].mxu1 }
 0x2a3   : > { %12142 = vst [vmem:[#allocation30_spill] sm:$0xff] %v7844_v12  ;;  %v921_v54 = vmax.f32 %v7842_v52, %v7844_v12  ;;  %5832 = vmatmul.mubr.msk.bf16.gmra.mrb[140].mxu1 %vm574_vm1, %v7441_v62  ;;  %919 = vmax.xlane.f32.xlu0 %v918_v27  ;;  %v3858_v27 = vsel %vm574_vm1, %v3774_v46, 0 }
 0x2a4   : > { %5976 = vmatpush3.bf16.xpose.msra.mxu1 %v3855_v10  ;;  %5833 = vmatprep.mubr.msk.bf16.mxu1 %vm574_vm1, %v7476_v11 }
 0x2a5   : > { %6193 = vmatprep.subr.msk.bf16.mxu1 %vm574_vm1, %v7616_v14  ;;  %922 = vmax.xlane.f32.xlu1 %v921_v54  ;;  %v3792_v14 = vpop.permute.xlu1 %3791 }
 0x2a7   : > { %v7855_v30 = vpop.f32.mrb[40].mxu1 }
 0x2a8   : > { %12143 = vst [vmem:[#allocation31_spill] sm:$0xff] %v7855_v30  ;;  %v7857_v25 = vpop.f32.mrb[41].mxu1 }
 0x2a9   : > { %12144 = vst [vmem:[#allocation32_spill] sm:$0xff] %v7857_v25  ;;  %v924_v33 = vmax.f32 %v7855_v30, %v7857_v25  ;;  %v7861_v12 = vpop.f32.mrb[42].mxu1 }
 0x2aa   : > { %12145 = vst [vmem:[#allocation33_spill] sm:$0xff] %v7861_v12  ;;  %v7863_v62 = vpop.f32.mrb[43].mxu1 }
 0x2ab   : > { %12146 = vst [vmem:[#allocation34_spill] sm:$0xff] %v7863_v62  ;;  %v927_v10 = vmax.f32 %v7861_v12, %v7863_v62  ;;  %5834 = vmatmul.mubr.msk.bf16.gmra.mrb[144].mxu1 %vm574_vm1, %v7476_v11  ;;  %925 = vmax.xlane.f32.xlu1 %v924_v33  ;;  %v3861_v11 = vsel %vm574_vm1, %v3776_v39, 0 }
 0x2ac   : > { %5978 = vmatpush3.bf16.xpose.msra.mxu1 %v3858_v27  ;;  %5835 = vmatprep.mubr.msk.bf16.mxu1 %vm574_vm1, %v7504_v21 }
 0x2ad   : > { %6194 = vmatprep.subr.msk.bf16.mxu1 %vm574_vm1, %v3792_v14  ;;  %928 = vmax.xlane.f32.xlu0 %v927_v10 }
 0x2af   : > { %v7873_v54 = vpop.f32.mrb[44].mxu1 }
 0x2b0   : > { %12147 = vst [vmem:[#allocation35_spill] sm:$0xff] %v7873_v54  ;;  %v7875_v25 = vpop.f32.mrb[45].mxu1 }
 0x2b1   : > { %12148 = vst [vmem:[#allocation36_spill] sm:$0xff] %v7875_v25  ;;  %v930_v46 = vmax.f32 %v7873_v54, %v7875_v25  ;;  %v7879_v62 = vpop.f32.mrb[46].mxu1 }
 0x2b2   : > { %12149 = vst [vmem:[#allocation37_spill] sm:$0xff] %v7879_v62  ;;  %v7881_v12 = vpop.f32.mrb[47].mxu1 }
 0x2b3   : > { %12150 = vst [vmem:[#allocation38_spill] sm:$0xff] %v7881_v12  ;;  %v933_v33 = vmax.f32 %v7879_v62, %v7881_v12  ;;  %5836 = vmatmul.mubr.msk.bf16.gmra.mrb[148].mxu1 %vm574_vm1, %v7504_v21  ;;  %931 = vmax.xlane.f32.xlu1 %v930_v46 }
 0x2b4   : > { %5980 = vmatpush3.bf16.xpose.msra.mxu1 %v3861_v11  ;;  %5837 = vmatprep.mubr.msk.bf16.mxu1 %vm574_vm1, %v7506_v23 }
 0x2b5   : > { %934 = vmax.xlane.f32.xlu0 %v933_v33 }
 0x2bb   : > { %v7890_v27 = vpop.f32.mrb[48].mxu1  ;;  %5838 = vmatmul.mubr.msk.bf16.gmra.mrb[152].mxu1 %vm574_vm1, %v7506_v23 }
 0x2bc   : > { %12151 = vst [vmem:[#allocation39_spill] sm:$0xff] %v7890_v27  ;;  %v7894_v10 = vpop.f32.mrb[49].mxu1  ;;  %5839 = vmatprep.mubr.msk.bf16.mxu1 %vm574_vm1, %v7532_v38 }
 0x2bd   : > { %12152 = vst [vmem:[#allocation40_spill] sm:$0xff] %v7894_v10  ;;  %v7900_v21 = vpop.f32.mrb[50].mxu1 }
 0x2be   : > { %12153 = vst [vmem:[#allocation41_spill] sm:$0xff] %v7900_v21  ;;  %v7902_v14 = vpop.f32.mrb[51].mxu1 }
 0x2bf   : > { %12154 = vst [vmem:[#allocation42_spill] sm:$0xff] %v7902_v14 }
 0x2c3   : > { %v7906_v11 = vpop.f32.mrb[52].mxu1  ;;  %5840 = vmatmul.mubr.msk.bf16.gmra.mrb[156].mxu1 %vm574_vm1, %v7532_v38 }
 0x2c4   : > { %12155 = vst [vmem:[#allocation43_spill] sm:$0xff] %v7906_v11  ;;  %5841 = vmatprep.mubr.msk.bf16.mxu1 %vm574_vm1, %v7546_v8  ;;  %1394 = vrot.lane.b32.xlu1 %v7247_v13, %s7003_s21  ;;  %v7914_v23 = vpop.f32.mrb[53].mxu1 }
 0x2c5   : > { %12156 = vst [vmem:[#allocation44_spill] sm:$0xff] %v7914_v23  ;;  %v7918_v39 = vpop.f32.mrb[54].mxu1 }
 0x2c6   : > { %12157 = vst [vmem:[#allocation45_spill] sm:$0xff] %v7918_v39  ;;  %v7920_v12 = vpop.f32.mrb[55].mxu1 }
 0x2c7   : > { %12158 = vst [vmem:[#allocation46_spill] sm:$0xff] %v7920_v12 }
 0x2c8   : > { %3777 = vrot.lane.b32.xlu1 %v7237_v9, %s7001_s19 }
 0x2cb   : > { %5842 = vmatmul.mubr.msk.bf16.gmra.mrb[160].mxu1 %vm574_vm1, %v7546_v8  ;;  %1376 = vrot.lane.b32.xlu0 %v7201_v55, %s7003_s21  ;;  %v7930_v38 = vpop.f32.mrb[56].mxu1 }
 0x2cc   : > { %5843 = vmatprep.mubr.msk.bf16.mxu1 %vm574_vm1, %v7523_v31  ;;  %1396 = vrot.lane.b32.xlu1 %v7267_v22, %s7003_s21  ;;  %v7936_v33 = vpop.f32.mrb[57].mxu1 }
 0x2cd   : > { %v7940_v13 = vpop.f32.mrb[58].mxu1 }
 0x2ce   : > { %v7942_v62 = vpop.f32.mrb[59].mxu1 }
 0x2cf   : > { %12159 = vst [vmem:[#allocation47_spill] sm:$0xff] %v7942_v62  ;;  %1378 = vrot.lane.b32.xlu0 %v7199_v53, %s7003_s21 }
 0x2d3   : > { %5844 = vmatmul.mubr.msk.bf16.gmra.mrb[164].mxu1 %vm574_vm1, %v7523_v31  ;;  %2687 = vrot.lane.b32.xlu0 %v7299_v36, %s6999_s16  ;;  %v7952_v22 = vpop.f32.mrb[60].mxu1 }
 0x2d4   : > { %5845 = vmatprep.mubr.msk.bf16.mxu1 %vm574_vm1, %v7567_v40  ;;  %v7956_v46 = vpop.f32.mrb[61].mxu1 }
 0x2d5   : > { %v866_v25 = vpop.xlane.xlu0 %865  ;;  %v7960_v54 = vpop.f32.mrb[62].mxu1 }
 0x2d6   : > { %v7962_v30 = vpop.f32.mrb[63].mxu1  ;;  %v960_v52 = vsub.f32 %v7668_v6, %v866_v25  ;;  %v961_v7 = vsub.f32 %v7672_v18, %v866_v25 }
 0x2d7   : > { %3793 = vrot.lane.b32.xlu0 %v7299_v36, %s7001_s19  ;;  %v869_v44 = vpop.xlane.xlu1 %868 }
 0x2d8   : > { %v1024_v32 = vmul.f32 1.442695, %v960_v52  ;;  %v962_v8 = vsub.f32 %v7676_v26, %v869_v44  ;;  %v1026_v15 = vmul.f32 1.442695, %v961_v7  ;;  %v963_v31 = vsub.f32 %v7680_v17, %v869_v44 }
 0x2da   : > { %6221 = vpow2.f32 %v1024_v32  ;;  %v1028_v6 = vmul.f32 1.442695, %v962_v8  ;;  %v1030_v25 = vmul.f32 1.442695, %v963_v31 }
 0x2db   : > { %5846 = vmatmul.mubr.msk.bf16.gmra.mrb[168].mxu1 %vm574_vm1, %v7567_v40  ;;  %6223 = vpow2.f32 %v1026_v15 }
 0x2dc   : > { %5847 = vmatprep.mubr.msk.bf16.mxu1 %vm574_vm1, %v7602_v41  ;;  %6225 = vpow2.f32 %v1028_v6 }
 0x2dd   : > { %v872_v40 = vpop.xlane.xlu0 %871  ;;  %6227 = vpow2.f32 %v1030_v25 }
 0x2de   : > { %v7976_v63 = vpop.f32.mrb[64].mxu1  ;;  %v964_v17 = vsub.f32 %v7686_v49, %v872_v40  ;;  %v965_v15 = vsub.f32 %v7690_v0, %v872_v40 }
 0x2df   : > { %v7978_v47 = vpop.f32.mrb[65].mxu1  ;;  %v875_v32 = vpop.xlane.xlu1 %874 }
 0x2e0   : > { %v7980_v18 = vpop.f32.mrb[66].mxu1  ;;  %v1032_v31 = vmul.f32 1.442695, %v964_v17  ;;  %v966_v7 = vsub.f32 %v7692_v19, %v875_v32  ;;  %v1034_v49 = vmul.f32 1.442695, %v965_v15  ;;  %v967_v26 = vsub.f32 %v7696_v37, %v875_v32 }
 0x2e1   : > { %v7984_v52 = vpop.f32.mrb[67].mxu1 }
 0x2e2   : > { %12160 = vst [vmem:[#allocation48_spill] sm:$0xff] %v7984_v52  ;;  %6229 = vpow2.f32 %v1032_v31  ;;  %v1036_v19 = vmul.f32 1.442695, %v966_v7  ;;  %v1038_v17 = vmul.f32 1.442695, %v967_v26  ;;  %v12174_v31 = vmax.f32 %v7900_v21, %v7902_v14 }
 0x2e3   : > { %5848 = vmatmul.mubr.msk.bf16.gmra.mrb[172].mxu1 %vm574_vm1, %v7602_v41  ;;  %6231 = vpow2.f32 %v1034_v49 }
 0x2e4   : > { %5849 = vmatprep.mubr.msk.bf16.mxu1 %vm574_vm1, %v7614_v34  ;;  %v8006_v25 = vpop.eup %6221  ;;  %6233 = vpow2.f32 %v1036_v19 }
 0x2e5   : > { %v8010_v40 = vpop.eup %6223  ;;  %6235 = vpow2.f32 %v1038_v17 }
 0x2e6   : > { %v7994_v44 = vpop.f32.mrb[68].mxu1  ;;  %v8016_v37 = vpop.eup %6225  ;;  %v1152_v32 = vadd.f32 %v8010_v40, %v8006_v25 }
 0x2e7   : > { %12161 = vst [vmem:[#allocation49_spill] sm:$0xff] %v7994_v44  ;;  %v7996_v8 = vpop.f32.mrb[69].mxu1  ;;  %v8022_v0 = vpop.eup %6227 }
 0x2e8   : > { %12162 = vst [vmem:[#allocation50_spill] sm:$0xff] %v7996_v8  ;;  %v8001_v6 = vpop.f32.mrb[70].mxu1  ;;  %v1155_v49 = vadd.f32 %v8022_v0, %v8016_v37 }
 0x2e9   : > { %12163 = vst [vmem:[#allocation51_spill] sm:$0xff] %v8001_v6  ;;  %v8004_v3 = vpop.f32.mrb[71].mxu1 }
 0x2ea   : > { %12164 = vst [vmem:[#allocation52_spill] sm:$0xff] %v8004_v3 }
 0x2eb   : > { %5850 = vmatmul.mubr.msk.bf16.gmra.mrb[176].mxu1 %vm574_vm1, %v7614_v34 }
 0x2ec   : > { %5851 = vmatprep.mubr.msk.bf16.mxu1 %vm574_vm1, %v7625_v50  ;;  %v8038_v19 = vpop.eup %6229 }
 0x2ed   : > { %12169 = vst [vmem:[#allocation57_spill] sm:$0xff] %v8038_v19  ;;  %v8045_v17 = vpop.eup %6231 }
 0x2ee   : > { %v8018_v15 = vpop.f32.mrb[72].mxu1  ;;  %12172 = vst [vmem:[#allocation59_spill] sm:$0xff] %v8045_v17 }
 0x2ef   : > { %12165 = vst [vmem:[#allocation53_spill] sm:$0xff] %v8018_v15  ;;  %v8024_v41 = vpop.f32.mrb[73].mxu1 }
 0x2f0   : > { %12166 = vst [vmem:[#allocation54_spill] sm:$0xff] %v8024_v41  ;;  %1153 = vadd.xlane.f32.xlu1 %v1152_v32  ;;  %v8028_v7 = vpop.f32.mrb[74].mxu1  ;;  %v12170_v32 = vmax.f32 %v7890_v27, %v7894_v10  ;;  %v1158_v10 = vadd.f32 %v8045_v17, %v8038_v19 }
 0x2f1   : > { %12167 = vst [vmem:[#allocation55_spill] sm:$0xff] %v8028_v7  ;;  %v8030_v26 = vpop.f32.mrb[75].mxu1 }
 0x2f2   : > { %12168 = vst [vmem:[#allocation56_spill] sm:$0xff] %v8030_v26  ;;  %v8058_v26 = vpop.eup %6233 }
 0x2f3   : > { %5852 = vmatmul.mubr.msk.bf16.gmra.mrb[180].mxu1 %vm574_vm1, %v7625_v50  ;;  %12177 = vst [vmem:[#allocation63_spill] sm:$0xff] %v8058_v26  ;;  %v8064_v27 = vpop.eup %6235 }
 0x2f4   : > { %1156 = vadd.xlane.f32.xlu1 %v1155_v49  ;;  %12178 = vst [vmem:[#allocation64_spill] sm:$0xff] %v8064_v27 }
 0x2f5   : > { %v8142_v7 = vpop.xlane.xlu0 %883 }
 0x2f6   : > { %937 = vmax.xlane.f32.xlu0 %v12170_v32  ;;  %v8043_v34 = vpop.f32.mrb[76].mxu1 }
 0x2f7   : > { %12171 = vst [vmem:[#allocation58_spill] sm:$0xff] %v8043_v34  ;;  %v8047_v41 = vpop.f32.mrb[77].mxu1 }
 0x2f8   : > { %12173 = vst [vmem:[#allocation60_spill] sm:$0xff] %v8047_v41  ;;  %940 = vmax.xlane.f32.xlu1 %v12174_v31  ;;  %v8052_v15 = vpop.f32.mrb[78].mxu1  ;;  %v1161_v31 = vadd.f32 %v8064_v27, %v8058_v26 }
 0x2f9   : > { %12175 = vst [vmem:[#allocation61_spill] sm:$0xff] %v8052_v15  ;;  %v8056_v49 = vpop.f32.mrb[79].mxu1 }
 0x2fa   : > { %12176 = vst [vmem:[#allocation62_spill] sm:$0xff] %v8056_v49 }
 0x2fc   : > { %1159 = vadd.xlane.f32.xlu1 %v1158_v10 }
 0x2fe   : > { %v8066_v14 = vpop.f32.mrb[80].mxu1 }
 0x2ff   : > { %12179 = vst [vmem:[#allocation65_spill] sm:$0xff] %v8066_v14  ;;  %v8070_v21 = vpop.f32.mrb[81].mxu1  ;;  %v8150_v3 = vpop.xlane.xlu0 %892 }
 0x300   : > { %12180 = vst [vmem:[#allocation66_spill] sm:$0xff] %v8070_v21  ;;  %1162 = vadd.xlane.f32.xlu1 %v1161_v31  ;;  %v8072_v50 = vpop.f32.mrb[82].mxu1 }
 0x301   : > { %12181 = vst [vmem:[#allocation67_spill] sm:$0xff] %v8072_v50  ;;  %v8076_v32 = vpop.f32.mrb[83].mxu1 }
 0x302   : > { %12182 = vst [vmem:[#allocation68_spill] sm:$0xff] %v8076_v32 }
 0x306   : > { %v8080_v15 = vpop.f32.mrb[84].mxu1 }
 0x307   : > { %12183 = vst [vmem:[#allocation69_spill] sm:$0xff] %v8080_v15  ;;  %v8082_v10 = vpop.f32.mrb[85].mxu1 }
 0x308   : > { %12184 = vst [vmem:[#allocation70_spill] sm:$0xff] %v8082_v10  ;;  %v8084_v19 = vpop.f32.mrb[86].mxu1  ;;  %v12190_v10 = vld [vmem:[#allocation12_spill] sm:$0xff] }
 0x309   : > { %12185 = vst [vmem:[#allocation71_spill] sm:$0xff] %v8084_v19  ;;  %v8088_v31 = vpop.f32.mrb[87].mxu1  ;;  %v878_v19 = vpop.xlane.xlu1 %877 }
 0x30a   : > { %12186 = vst [vmem:[#allocation72_spill] sm:$0xff] %v8088_v31  ;;  %v12192_v31 = vld [vmem:[#allocation16_spill] sm:$0xff] }
 0x30c   : > { %1380 = vrot.lane.b32.xlu0 %v7213_v61, %s7003_s21 }
 0x30e   : > { %v8094_v41 = vpop.f32.mrb[88].mxu1 }
 0x30f   : > { %12187 = vst [vmem:[#allocation73_spill] sm:$0xff] %v8094_v41  ;;  %v8096_v49 = vpop.f32.mrb[89].mxu1 }
 0x310   : > { %12188 = vst [vmem:[#allocation74_spill] sm:$0xff] %v8096_v49  ;;  %1382 = vrot.lane.b32.xlu0 %v7211_v59, %s7003_s21  ;;  %v8100_v21 = vpop.f32.mrb[90].mxu1 }
 0x311   : > { %12189 = vst [vmem:[#allocation75_spill] sm:$0xff] %v8100_v21  ;;  %1398 = vrot.lane.b32.xlu1 %v12190_v10, %s7003_s21  ;;  %v8106_v15 = vpop.f32.mrb[91].mxu1  ;;  %v12195_v10 = vld [vmem:[#allocation8_spill] sm:$0xff]  ;;  %v12198_v21 = vld [vmem:[#allocation15_spill] sm:$0xff] }
 0x312   : > { %12191 = vst [vmem:[#allocation76_spill] sm:$0xff] %v8106_v15  ;;  %v881_v15 = vpop.xlane.xlu1 %880 }
 0x314   : > { %2689 = vrot.lane.b32.xlu0 %v12192_v31, %s6999_s16 }
 0x315   : > { %3795 = vrot.lane.b32.xlu1 %v12192_v31, %s7001_s19 }
 0x316   : > { %v8114_v14 = vpop.f32.mrb[92].mxu1  ;;  %v8134_v34 = vpop.xlane.xlu1 %886 }
 0x317   : > { %12193 = vst [vmem:[#allocation77_spill] sm:$0xff] %v8114_v14  ;;  %v8116_v32 = vpop.f32.mrb[93].mxu1 }
 0x318   : > { %12194 = vst [vmem:[#allocation78_spill] sm:$0xff] %v8116_v32  ;;  %3779 = vrot.lane.b32.xlu0 %v12195_v10, %s7001_s19  ;;  %v8122_v49 = vpop.f32.mrb[94].mxu1 }
 0x319   : > { %12196 = vst [vmem:[#allocation79_spill] sm:$0xff] %v8122_v49  ;;  %v8124_v17 = vpop.f32.mrb[95].mxu1  ;;  %v969_v49 = vsub.f32 %v7710_v24, %v878_v19  ;;  %v971_v24 = vsub.f32 %v7716_v2, %v881_v15 }
 0x31a   : > { %12197 = vst [vmem:[#allocation80_spill] sm:$0xff] %v8124_v17  ;;  %v8146_v17 = vpop.xlane.xlu1 %889 }
 0x31c   : > { %1400 = vrot.lane.b32.xlu0 %v12198_v21, %s7003_s21  ;;  %v968_v21 = vsub.f32 %v7706_v43, %v878_v19  ;;  %v1042_v43 = vmul.f32 1.442695, %v969_v49  ;;  %v8166_v19 = vpop.xlane.xlu0 %898 }
 0x31e   : > { %v8130_v50 = vpop.f32.mrb[96].mxu1  ;;  %v1040_v41 = vmul.f32 1.442695, %v968_v21 }
 0x31f   : > { %12199 = vst [vmem:[#allocation81_spill] sm:$0xff] %v8130_v50  ;;  %v8132_v27 = vpop.f32.mrb[97].mxu1  ;;  %v1046_v50 = vmul.f32 1.442695, %v971_v24 }
 0x320   : > { %12200 = vst [vmem:[#allocation82_spill] sm:$0xff] %v8132_v27  ;;  %v8138_v32 = vpop.f32.mrb[98].mxu1  ;;  %v8156_v27 = vpop.xlane.xlu1 %895  ;;  %6237 = vpow2.f32 %v1040_v41  ;;  %v12217_v41 = vmax.f32 %v7906_v11, %v7914_v23 }
 0x321   : > { %12201 = vst [vmem:[#allocation83_spill] sm:$0xff] %v8138_v32  ;;  %v8140_v14 = vpop.f32.mrb[99].mxu1  ;;  %6239 = vpow2.f32 %v1042_v43 }
 0x322   : > { %12202 = vst [vmem:[#allocation84_spill] sm:$0xff] %v8140_v14  ;;  %v970_v14 = vsub.f32 %v7712_v29, %v881_v15 }
 0x324   : > { %v8170_v59 = vpop.xlane.xlu1 %904  ;;  %v1044_v61 = vmul.f32 1.442695, %v970_v14 }
 0x326   : > { %v8152_v6 = vpop.f32.mrb[100].mxu1  ;;  %6241 = vpow2.f32 %v1044_v61 }
 0x327   : > { %12203 = vst [vmem:[#allocation85_spill] sm:$0xff] %v8152_v6  ;;  %v8154_v26 = vpop.f32.mrb[101].mxu1  ;;  %6243 = vpow2.f32 %v1046_v50 }
 0x328   : > { %12204 = vst [vmem:[#allocation86_spill] sm:$0xff] %v8154_v26  ;;  %v8160_v8 = vpop.f32.mrb[102].mxu1  ;;  %v8172_v26 = vpop.xlane.xlu0 %901 }
 0x329   : > { %12205 = vst [vmem:[#allocation87_spill] sm:$0xff] %v8160_v8  ;;  %v8163_v32 = vpop.f32.mrb[103].mxu1  ;;  %v8178_v49 = vpop.xlane.xlu1 %910 }
 0x32a   : > { %12206 = vst [vmem:[#allocation88_spill] sm:$0xff] %v8163_v32  ;;  %v8196_v8 = vpop.eup %6237 }
 0x32b   : > { %12213 = vst [vmem:[#allocation95_spill] sm:$0xff] %v8196_v8 }
 0x32c   : > { %v8186_v14 = vpop.xlane.xlu0 %907 }
 0x32d   : > { %v8190_v43 = vpop.xlane.xlu1 %916 }
 0x32e   : > { %v8174_v21 = vpop.f32.mrb[104].mxu1  ;;  %12211 = vst [vmem:[#allocation93_spill] sm:$0xff] %v8190_v43 }
 0x32f   : > { %12207 = vst [vmem:[#allocation89_spill] sm:$0xff] %v8174_v21  ;;  %v8176_v29 = vpop.f32.mrb[105].mxu1 }
 0x330   : > { %12208 = vst [vmem:[#allocation90_spill] sm:$0xff] %v8176_v29  ;;  %v8182_v15 = vpop.f32.mrb[106].mxu1  ;;  %v8192_v24 = vpop.xlane.xlu0 %913 }
 0x331   : > { %12209 = vst [vmem:[#allocation91_spill] sm:$0xff] %v8182_v15  ;;  %v8184_v44 = vpop.f32.mrb[107].mxu1  ;;  %v8200_v29 = vpop.eup %6239 }
 0x332   : > { %12210 = vst [vmem:[#allocation92_spill] sm:$0xff] %v8184_v44  ;;  %v8202_v61 = vpop.xlane.xlu1 %922  ;;  %v8217_v43 = vpop.eup %6241  ;;  %v1164_v50 = vadd.f32 %v8200_v29, %v8196_v8 }
 0x333   : > { %12215 = vst [vmem:[#allocation97_spill] sm:$0xff] %v8202_v61  ;;  %12219 = vst [vmem:[#allocation100_spill] sm:$0xff] %v8217_v43  ;;  %v12220_v61 = vmax.f32 %v7918_v39, %v7920_v12 }
 0x334   : > { %v8213_v15 = vpop.xlane.xlu0 %919 }
 0x336   : > { %v8194_v32 = vpop.f32.mrb[108].mxu1 }
 0x337   : > { %12212 = vst [vmem:[#allocation94_spill] sm:$0xff] %v8194_v32  ;;  %v8198_v2 = vpop.f32.mrb[109].mxu1 }
 0x338   : > { %12214 = vst [vmem:[#allocation96_spill] sm:$0xff] %v8198_v2  ;;  %v8206_v21 = vpop.f32.mrb[110].mxu1  ;;  %v8224_v2 = vpop.eup %6243 }
 0x339   : > { %12216 = vst [vmem:[#allocation98_spill] sm:$0xff] %v8206_v21  ;;  %943 = vmax.xlane.f32.xlu1 %v12217_v41  ;;  %v8211_v44 = vpop.f32.mrb[111].mxu1  ;;  %v8226_v32 = vpop.xlane.xlu1 %925  ;;  %v1167_v6 = vadd.f32 %v8224_v2, %v8217_v43 }
 0x33a   : > { %12218 = vst [vmem:[#allocation99_spill] sm:$0xff] %v8211_v44  ;;  %12221 = vst [vmem:[#allocation101_spill] sm:$0xff] %v8226_v32  ;;  %v8228_v41 = vpop.xlane.xlu0 %928 }
 0x33b   : > { %946 = vmax.xlane.f32.xlu0 %v12220_v61  ;;  %12222 = vst [vmem:[#allocation102_spill] sm:$0xff] %v8228_v41 }
 0x33d   : > { %1165 = vadd.xlane.f32.xlu1 %v1164_v50  ;;  %v12236_v50 = vld [vmem:[#allocation7_spill] sm:$0xff] }
 0x33e   : > { %v8230_v23 = vpop.f32.mrb[112].mxu1 }
 0x33f   : > { %12223 = vst [vmem:[#allocation103_spill] sm:$0xff] %v8230_v23  ;;  %v8232_v11 = vpop.f32.mrb[113].mxu1 }
 0x340   : > { %12224 = vst [vmem:[#allocation104_spill] sm:$0xff] %v8232_v11  ;;  %v8238_v44 = vpop.xlane.xlu1 %931  ;;  %v8240_v21 = vpop.f32.mrb[114].mxu1 }
 0x341   : > { %12225 = vst [vmem:[#allocation105_spill] sm:$0xff] %v8238_v44  ;;  %12226 = vst [vmem:[#allocation106_spill] sm:$0xff] %v8240_v21  ;;  %1168 = vadd.xlane.f32.xlu1 %v1167_v6  ;;  %v8242_v12 = vpop.f32.mrb[115].mxu1 }
 0x342   : > { %12227 = vst [vmem:[#allocation107_spill] sm:$0xff] %v8242_v12  ;;  %v8246_v39 = vpop.xlane.xlu0 %934 }
 0x343   : > { %12228 = vst [vmem:[#allocation108_spill] sm:$0xff] %v8246_v39 }
 0x344   : > { %v1395_v41 = vpop.permute.xlu1 %1394 }
 0x346   : > { %v1377_v32 = vpop.permute.xlu0 %1376  ;;  %v8248_v8 = vpop.f32.mrb[116].mxu1 }
 0x347   : > { %12229 = vst [vmem:[#allocation109_spill] sm:$0xff] %v8248_v8  ;;  %5538 = vmatpush3.bf16.msra.mxu0 %v1377_v32  ;;  %v8250_v43 = vpop.f32.mrb[117].mxu1 }
 0x348   : > { %12230 = vst [vmem:[#allocation110_spill] sm:$0xff] %v8250_v43  ;;  %v3778_v11 = vpop.permute.xlu1 %3777  ;;  %5539 = vmatprep.subr.bf16.mxu0 %v1395_v41  ;;  %v8254_v6 = vpop.f32.mrb[118].mxu1  ;;  %v12239_v41 = vld [vmem:[#allocation6_spill] sm:$0xff] }
 0x349   : > { %12231 = vst [vmem:[#allocation111_spill] sm:$0xff] %v8254_v6  ;;  %v8256_v23 = vpop.f32.mrb[119].mxu1  ;;  %v12238_v6 = vld [vmem:[#allocation14_spill] sm:$0xff]  ;;  %v3864_v43 = vsel %vm574_vm1, %v3778_v11, 0 }
 0x34a   : > { %12232 = vst [vmem:[#allocation112_spill] sm:$0xff] %v8256_v23  ;;  %v1379_v12 = vpop.permute.xlu0 %1378 }
 0x34b   : > { %5540 = vmatpush3.bf16.msra.mxu0 %v1379_v12 }
 0x34c   : > { %v1397_v21 = vpop.permute.xlu1 %1396 }
 0x34d   : > { %5541 = vmatprep.subr.bf16.mxu0 %v1397_v21 }
 0x34e   : > { %v2688_v39 = vpop.permute.xlu0 %2687  ;;  %v8260_v32 = vpop.f32.mrb[120].mxu1 }
 0x34f   : > { %12233 = vst [vmem:[#allocation113_spill] sm:$0xff] %v8260_v32  ;;  %v8262_v44 = vpop.f32.mrb[121].mxu1  ;;  %5853 = vmatprep.mubr.msk.bf16.mxu1 %vm574_vm1, %v2688_v39 }
 0x350   : > { %12234 = vst [vmem:[#allocation114_spill] sm:$0xff] %v8262_v44  ;;  %v8267_v61 = vpop.f32.mrb[122].mxu1  ;;  %5854 = vmatmul.mubr.msk.bf16.gmra.mrb[184].mxu1 %vm574_vm1, %v2688_v39 }
 0x351   : > { %12235 = vst [vmem:[#allocation115_spill] sm:$0xff] %v8267_v61  ;;  %1384 = vrot.lane.b32.xlu0 %v12236_v50, %s7003_s21  ;;  %v8272_v12 = vpop.f32.mrb[123].mxu1 }
 0x352   : > { %12237 = vst [vmem:[#allocation116_spill] sm:$0xff] %v8272_v12  ;;  %v3794_v23 = vpop.permute.xlu0 %3793  ;;  %1402 = vrot.lane.b32.xlu1 %v12238_v6, %s7003_s21 }
 0x353   : > { %6195 = vmatprep.subr.msk.bf16.mxu1 %vm574_vm1, %v3794_v23  ;;  %v973_v23 = vsub.f32 %v7726_v20, %v8142_v7  ;;  %v975_v20 = vsub.f32 %v7732_v51, %v8134_v34 }
 0x354   : > { %5982 = vmatpush3.bf16.xpose.msra.mxu1 %v3864_v43 }
 0x355   : > { %1386 = vrot.lane.b32.xlu0 %v12239_v41, %s7003_s21  ;;  %v1054_v32 = vmul.f32 1.442695, %v975_v20 }
 0x356   : > { %1404 = vrot.lane.b32.xlu1 %v7299_v36, %s7003_s21  ;;  %v8284_v39 = vpop.f32.mrb[124].mxu1 }
 0x357   : > { %12240 = vst [vmem:[#allocation117_spill] sm:$0xff] %v8284_v39  ;;  %v8286_v44 = vpop.f32.mrb[125].mxu1  ;;  %v972_v39 = vsub.f32 %v7722_v16, %v8142_v7 }
 0x358   : > { %12241 = vst [vmem:[#allocation118_spill] sm:$0xff] %v8286_v44  ;;  %v8290_v12 = vpop.f32.mrb[126].mxu1  ;;  %v974_v44 = vsub.f32 %v7730_v57, %v8134_v34 }
 0x359   : > { %12242 = vst [vmem:[#allocation119_spill] sm:$0xff] %v8290_v12  ;;  %3733 = vrot.lane.b32.xlu0 %v7201_v55, %s7004_s22  ;;  %v8294_v11 = vpop.f32.mrb[127].mxu1 }
 0x35a   : > { %12243 = vst [vmem:[#allocation120_spill] sm:$0xff] %v8294_v11  ;;  %v1052_v7 = vmul.f32 1.442695, %v974_v44 }
 0x35e   : > { %v8298_v43 = vpop.f32.mrb[128].mxu1 }
 0x35f   : > { %12244 = vst [vmem:[#allocation121_spill] sm:$0xff] %v8298_v43  ;;  %v8300_v61 = vpop.f32.mrb[129].mxu1  ;;  %v1048_v43 = vmul.f32 1.442695, %v972_v39 }
 0x360   : > { %12245 = vst [vmem:[#allocation122_spill] sm:$0xff] %v8300_v61  ;;  %v8304_v8 = vpop.f32.mrb[130].mxu1 }
 0x361   : > { %12246 = vst [vmem:[#allocation123_spill] sm:$0xff] %v8304_v8  ;;  %v8306_v21 = vpop.f32.mrb[131].mxu1  ;;  %6245 = vpow2.f32 %v1048_v43  ;;  %v12258_v43 = vmax.f32 %v7930_v38, %v7936_v33 }
 0x362   : > { %12247 = vst [vmem:[#allocation124_spill] sm:$0xff] %v8306_v21  ;;  %v1050_v21 = vmul.f32 1.442695, %v973_v23  ;;  %v12261_v23 = vmax.f32 %v7940_v13, %v7942_v62 }
 0x364   : > { %6247 = vpow2.f32 %v1050_v21 }
 0x365   : > { %6249 = vpow2.f32 %v1052_v7 }
 0x366   : > { %v8312_v36 = vpop.f32.mrb[132].mxu1  ;;  %6251 = vpow2.f32 %v1054_v32 }
 0x367   : > { %12248 = vst [vmem:[#allocation125_spill] sm:$0xff] %v8312_v36  ;;  %v8316_v11 = vpop.f32.mrb[133].mxu1 }
 0x368   : > { %12249 = vst [vmem:[#allocation126_spill] sm:$0xff] %v8316_v11  ;;  %v8320_v12 = vpop.f32.mrb[134].mxu1 }
 0x369   : > { %12250 = vst [vmem:[#allocation127_spill] sm:$0xff] %v8320_v12  ;;  %v8322_v61 = vpop.f32.mrb[135].mxu1 }
 0x36a   : > { %12251 = vst [vmem:[#allocation128_spill] sm:$0xff] %v8322_v61 }
 0x36b   : > { %v8346_v34 = vpop.eup %6245 }
 0x36e   : > { %v8330_v8 = vpop.f32.mrb[136].mxu1  ;;  %v8355_v7 = vpop.eup %6247 }
 0x36f   : > { %12252 = vst [vmem:[#allocation129_spill] sm:$0xff] %v8330_v8  ;;  %v8332_v11 = vpop.f32.mrb[137].mxu1  ;;  %v8364_v16 = vpop.eup %6249  ;;  %v1170_v21 = vadd.f32 %v8355_v7, %v8346_v34 }
 0x370   : > { %12253 = vst [vmem:[#allocation130_spill] sm:$0xff] %v8332_v11  ;;  %v8336_v36 = vpop.f32.mrb[138].mxu1 }
 0x371   : > { %12254 = vst [vmem:[#allocation131_spill] sm:$0xff] %v8336_v36  ;;  %v8338_v57 = vpop.f32.mrb[139].mxu1 }
 0x372   : > { %12255 = vst [vmem:[#allocation132_spill] sm:$0xff] %v8338_v57 }
 0x376   : > { %v8342_v51 = vpop.f32.mrb[140].mxu1 }
 0x377   : > { %12256 = vst [vmem:[#allocation133_spill] sm:$0xff] %v8342_v51  ;;  %v8344_v44 = vpop.f32.mrb[141].mxu1 }
 0x378   : > { %12257 = vst [vmem:[#allocation134_spill] sm:$0xff] %v8344_v44  ;;  %949 = vmax.xlane.f32.xlu0 %v12258_v43  ;;  %v8353_v20 = vpop.f32.mrb[142].mxu1  ;;  %v8368_v44 = vpop.eup %6251 }
 0x379   : > { %12259 = vst [vmem:[#allocation135_spill] sm:$0xff] %v8353_v20  ;;  %v8357_v39 = vpop.f32.mrb[143].mxu1 }
 0x37a   : > { %12260 = vst [vmem:[#allocation136_spill] sm:$0xff] %v8357_v39  ;;  %952 = vmax.xlane.f32.xlu1 %v12261_v23  ;;  %v1173_v23 = vadd.f32 %v8368_v44, %v8364_v16 }
 0x37d   : > { %v1154_v43 = vpop.xlane.xlu1 %1153 }
 0x37e   : > { %1171 = vadd.xlane.f32.xlu1 %v1170_v21  ;;  %v8370_v51 = vpop.f32.mrb[144].mxu1  ;;  %6253 = vrcp.f32 %v1154_v43 }
 0x37f   : > { %12262 = vst [vmem:[#allocation137_spill] sm:$0xff] %v8370_v51  ;;  %v8372_v11 = vpop.f32.mrb[145].mxu1 }
 0x380   : > { %12263 = vst [vmem:[#allocation138_spill] sm:$0xff] %v8372_v11  ;;  %v8376_v39 = vpop.f32.mrb[146].mxu1 }
 0x381   : > { %12264 = vst [vmem:[#allocation139_spill] sm:$0xff] %v8376_v39  ;;  %v1157_v20 = vpop.xlane.xlu1 %1156  ;;  %v8380_v8 = vpop.f32.mrb[147].mxu1 }
 0x382   : > { %12265 = vst [vmem:[#allocation140_spill] sm:$0xff] %v8380_v8  ;;  %6255 = vrcp.f32 %v1157_v20  ;;  %1174 = vadd.xlane.f32.xlu1 %v1173_v23 }
 0x383   : > { %v8384_v57 = vpop.xlane.xlu0 %937 }
 0x385   : > { %v8386_v36 = vpop.xlane.xlu1 %940 }
 0x386   : > { %v8388_v43 = vpop.f32.mrb[148].mxu1 }
 0x387   : > { %12266 = vst [vmem:[#allocation141_spill] sm:$0xff] %v8388_v43  ;;  %v1381_v32 = vpop.permute.xlu0 %1380  ;;  %v8390_v11 = vpop.f32.mrb[149].mxu1 }
 0x388   : > { %12267 = vst [vmem:[#allocation142_spill] sm:$0xff] %v8390_v11  ;;  %5542 = vmatpush3.bf16.msra.mxu0 %v1381_v32  ;;  %v8394_v61 = vpop.f32.mrb[150].mxu1  ;;  %v6254_v23 = vpop.eup %6253 }
 0x389   : > { %12268 = vst [vmem:[#allocation143_spill] sm:$0xff] %v8394_v61  ;;  %v8396_v20 = vpop.xlane.xlu1 %1159  ;;  %v8398_v12 = vpop.f32.mrb[151].mxu1  ;;  %v8403_v55 = vmul.f32 %v6254_v23, %v8006_v25  ;;  %v1281_v32 = vmul.f32 %v6254_v23, %v8010_v40 }
 0x38a   : > { %12269 = vst [vmem:[#allocation144_spill] sm:$0xff] %v8398_v12 }
 0x38b   : > { %v1383_v8 = vpop.permute.xlu0 %1382 }
 0x38c   : > { %v6256_v39 = vpop.eup %6255 }
 0x38d   : > { %v8406_v6 = vmul.f32 %v6256_v39, %v8016_v37  ;;  %v8408_v51 = vpop.xlane.xlu1 %1162  ;;  %v1283_v11 = vmul.f32 %v6256_v39, %v8022_v0 }
 0x38e   : > { %1388 = vrot.lane.b32.xlu0 %v7237_v9, %s7003_s21  ;;  %v8414_v43 = vpop.f32.mrb[152].mxu1 }
 0x38f   : > { %12270 = vst [vmem:[#allocation145_spill] sm:$0xff] %v8414_v43  ;;  %v2690_v21 = vpop.permute.xlu0 %2689  ;;  %v8416_v12 = vpop.f32.mrb[153].mxu1  ;;  %v1345_v61 = vpack.c.bf16 %v1283_v11, %v1281_v32 }
 0x390   : > { %12271 = vst [vmem:[#allocation146_spill] sm:$0xff] %v8416_v12  ;;  %v8422_v62 = vpop.f32.mrb[154].mxu1  ;;  %5855 = vmatprep.mubr.msk.bf16.mxu1 %vm574_vm1, %v2690_v21  ;;  %v979_v12 = vsub.f32 %v7748_v60, %v8150_v3 }
 0x391   : > { %12272 = vst [vmem:[#allocation147_spill] sm:$0xff] %v8422_v62  ;;  %1456 = vmatprep.mubr.bf16.mxu0 %v1345_v61  ;;  %5856 = vmatmul.mubr.msk.bf16.gmra.mrb[188].mxu1 %vm574_vm1, %v2690_v21  ;;  %v1399_v0 = vpop.permute.xlu1 %1398  ;;  %v8426_v40 = vpop.f32.mrb[155].mxu1 }
 0x392   : > { %12273 = vst [vmem:[#allocation148_spill] sm:$0xff] %v8426_v40  ;;  %5543 = vmatprep.subr.bf16.mxu0 %v1399_v0  ;;  %1390 = vrot.lane.b32.xlu0 %v12195_v10, %s7003_s21 }
 0x393   : > { %v3780_v11 = vpop.permute.xlu0 %3779  ;;  %5544 = vmatpush3.bf16.msra.mxu0 %v1383_v8  ;;  %1406 = vrot.lane.b32.xlu1 %v12192_v31, %s7003_s21  ;;  %v977_v8 = vsub.f32 %v7742_v42, %v8146_v17 }
 0x394   : > { %v3867_v61 = vsel %vm574_vm1, %v3780_v11, 0  ;;  %v12290_v11 = vmax.f32 %v7952_v22, %v7956_v46 }
 0x395   : > { %v3796_v23 = vpop.permute.xlu1 %3795 }
 0x396   : > { %6196 = vmatprep.subr.msk.bf16.mxu1 %vm574_vm1, %v3796_v23  ;;  %3735 = vrot.lane.b32.xlu0 %v7199_v53, %s7004_s22  ;;  %v8438_v21 = vpop.f32.mrb[156].mxu1 }
 0x397   : > { %12274 = vst [vmem:[#allocation149_spill] sm:$0xff] %v8438_v21  ;;  %v1401_v32 = vpop.permute.xlu0 %1400  ;;  %v8440_v0 = vpop.f32.mrb[157].mxu1  ;;  %5984 = vmatpush3.bf16.xpose.msra.mxu1 %v3867_v61  ;;  %v976_v61 = vsub.f32 %v7738_v45, %v8146_v17  ;;  %v978_v21 = vsub.f32 %v7746_v58, %v8150_v3 }
 0x398   : > { %12275 = vst [vmem:[#allocation150_spill] sm:$0xff] %v8440_v0  ;;  %5545 = vmatprep.subr.bf16.mxu0 %v1401_v32  ;;  %v8444_v37 = vpop.f32.mrb[158].mxu1 }
 0x399   : > { %12276 = vst [vmem:[#allocation151_spill] sm:$0xff] %v8444_v37  ;;  %v8446_v39 = vpop.f32.mrb[159].mxu1  ;;  %v1056_v0 = vmul.f32 1.442695, %v976_v61  ;;  %v1060_v42 = vmul.f32 1.442695, %v978_v21  ;;  %v980_v21 = vsub.f32 %v7754_v56, %v8156_v27 }
 0x39a   : > { %12277 = vst [vmem:[#allocation152_spill] sm:$0xff] %v8446_v39  ;;  %v1058_v39 = vmul.f32 1.442695, %v977_v8  ;;  %v1062_v61 = vmul.f32 1.442695, %v979_v12  ;;  %v981_v12 = vsub.f32 %v7758_v5, %v8156_v27  ;;  %v982_v8 = vsub.f32 %v7762_v35, %v8166_v19 }
 0x39b   : > { %6257 = vpow2.f32 %v1056_v0  ;;  %v1064_v58 = vmul.f32 1.442695, %v980_v21  ;;  %v12293_v21 = vmax.f32 %v7960_v54, %v7962_v30 }
 0x39c   : > { %6259 = vpow2.f32 %v1058_v39  ;;  %v1066_v56 = vmul.f32 1.442695, %v981_v12 }
 0x39d   : > { %6261 = vpow2.f32 %v1060_v42 }
 0x39e   : > { %v8450_v23 = vpop.f32.mrb[160].mxu1  ;;  %6263 = vpow2.f32 %v1062_v61 }
 0x39f   : > { %12278 = vst [vmem:[#allocation153_spill] sm:$0xff] %v8450_v23  ;;  %v8452_v25 = vpop.f32.mrb[161].mxu1  ;;  %6265 = vpow2.f32 %v1064_v58  ;;  %v12296_v58 = vld [vmem:[#allocation18_spill] sm:$0xff] }
 0x3a0   : > { %12279 = vst [vmem:[#allocation154_spill] sm:$0xff] %v8452_v25  ;;  %v8456_v43 = vpop.f32.mrb[162].mxu1  ;;  %6267 = vpow2.f32 %v1066_v56 }
 0x3a1   : > { %12280 = vst [vmem:[#allocation155_spill] sm:$0xff] %v8456_v43  ;;  %v8460_v32 = vpop.f32.mrb[163].mxu1 }
 0x3a2   : > { %12281 = vst [vmem:[#allocation156_spill] sm:$0xff] %v8460_v32  ;;  %v12313_v32 = vld [vmem:[#allocation20_spill] sm:$0xff] }
 0x3a3   : > { %v989_v43 = vsub.f32 %v12313_v32, %v8186_v14 }
 0x3a5   : > { %v8498_v42 = vpop.eup %6257  ;;  %v1082_v31 = vmul.f32 1.442695, %v989_v43  ;;  %v12319_v43 = vld [vmem:[#allocation55_spill] sm:$0xff] }
 0x3a6   : > { %v8470_v25 = vpop.f32.mrb[164].mxu1  ;;  %v8500_v61 = vpop.eup %6259 }
 0x3a7   : > { %12282 = vst [vmem:[#allocation157_spill] sm:$0xff] %v8470_v25  ;;  %v8472_v23 = vpop.f32.mrb[165].mxu1  ;;  %v8511_v27 = vpop.eup %6261  ;;  %v1176_v35 = vadd.f32 %v8500_v61, %v8498_v42 }
 0x3a8   : > { %12283 = vst [vmem:[#allocation158_spill] sm:$0xff] %v8472_v23  ;;  %v8476_v37 = vpop.f32.mrb[166].mxu1  ;;  %v984_v23 = vsub.f32 %v7770_v1, %v8172_v26  ;;  %v12300_v1 = vmax.f32 %v7976_v63, %v7978_v47 }
 0x3a9   : > { %12284 = vst [vmem:[#allocation159_spill] sm:$0xff] %v8476_v37  ;;  %v8478_v17 = vpop.f32.mrb[167].mxu1 }
 0x3aa   : > { %12285 = vst [vmem:[#allocation160_spill] sm:$0xff] %v8478_v17 }
 0x3ae   : > { %v8482_v60 = vpop.f32.mrb[168].mxu1 }
 0x3af   : > { %12286 = vst [vmem:[#allocation161_spill] sm:$0xff] %v8482_v60  ;;  %v8484_v3 = vpop.f32.mrb[169].mxu1 }
 0x3b0   : > { %12287 = vst [vmem:[#allocation162_spill] sm:$0xff] %v8484_v3  ;;  %v8488_v45 = vpop.f32.mrb[170].mxu1  ;;  %v983_v3 = vsub.f32 %v7764_v48, %v8166_v19  ;;  %v1068_v48 = vmul.f32 1.442695, %v982_v8  ;;  %v985_v8 = vsub.f32 %v12296_v58, %v8172_v26 }
 0x3b1   : > { %12288 = vst [vmem:[#allocation163_spill] sm:$0xff] %v8488_v45  ;;  %v8492_v0 = vpop.f32.mrb[171].mxu1 }
 0x3b2   : > { %12289 = vst [vmem:[#allocation164_spill] sm:$0xff] %v8492_v0  ;;  %v8520_v0 = vpop.eup %6263  ;;  %v1070_v45 = vmul.f32 1.442695, %v983_v3  ;;  %6269 = vpow2.f32 %v1068_v48  ;;  %v986_v48 = vsub.f32 %v7778_v4, %v8170_v59  ;;  %v1074_v26 = vmul.f32 1.442695, %v985_v8 }
 0x3b3   : > { %v1179_v60 = vadd.f32 %v8520_v0, %v8511_v27  ;;  %v8555_v3 = vpop.eup %6265  ;;  %v12302_v4 = vmax.f32 %v7980_v18, %v7984_v52  ;;  %v12340_v52 = vld [vmem:[#allocation100_spill] sm:$0xff] }
 0x3b4   : > { %6271 = vpow2.f32 %v1070_v45 }
 0x3b5   : > { %955 = vmax.xlane.f32.xlu0 %v12290_v11 }
 0x3b6   : > { %v8509_v5 = vpop.f32.mrb[172].mxu1 }
 0x3b7   : > { %12291 = vst [vmem:[#allocation165_spill] sm:$0xff] %v8509_v5  ;;  %v8513_v39 = vpop.f32.mrb[173].mxu1  ;;  %958 = vmax.xlane.f32.xlu1 %v12293_v21  ;;  %v1072_v21 = vmul.f32 1.442695, %v984_v23  ;;  %v1076_v23 = vmul.f32 1.442695, %v986_v48 }
 0x3b8   : > { %12292 = vst [vmem:[#allocation166_spill] sm:$0xff] %v8513_v39  ;;  %v8524_v12 = vpop.f32.mrb[174].mxu1  ;;  %v12309_v39 = vld [vmem:[#allocation49_spill] sm:$0xff]  ;;  %v12310_v5 = vld [vmem:[#allocation50_spill] sm:$0xff] }
 0x3b9   : > { %12294 = vst [vmem:[#allocation167_spill] sm:$0xff] %v8524_v12  ;;  %1177 = vadd.xlane.f32.xlu0 %v1176_v35  ;;  %v8526_v19 = vpop.f32.mrb[175].mxu1  ;;  %6273 = vpow2.f32 %v1072_v21 }
 0x3ba   : > { %12295 = vst [vmem:[#allocation168_spill] sm:$0xff] %v8526_v19  ;;  %6275 = vpow2.f32 %v1074_v26 }
 0x3bb   : > { %6277 = vpow2.f32 %v1076_v23 }
 0x3bd   : > { %1180 = vadd.xlane.f32.xlu0 %v1179_v60  ;;  %v987_v60 = vsub.f32 %v7780_v28, %v8170_v59 }
 0x3be   : > { %v8536_v35 = vpop.f32.mrb[176].mxu1 }
 0x3bf   : > { %12297 = vst [vmem:[#allocation18_spill] sm:$0xff] %v8536_v35  ;;  %v8538_v11 = vpop.f32.mrb[177].mxu1 }
 0x3c0   : > { %12298 = vst [vmem:[#allocation169_spill] sm:$0xff] %v8538_v11  ;;  %v8542_v56 = vpop.f32.mrb[178].mxu1  ;;  %v8557_v11 = vpop.eup %6267 }
 0x3c1   : > { %12299 = vst [vmem:[#allocation170_spill] sm:$0xff] %v8542_v56  ;;  %1939 = vmax.xlane.f32.xlu0 %v12300_v1  ;;  %v8549_v45 = vpop.f32.mrb[179].mxu1  ;;  %v1078_v1 = vmul.f32 1.442695, %v987_v60  ;;  %v8566_v59 = vpop.eup %6269  ;;  %v1182_v58 = vadd.f32 %v8557_v11, %v8555_v3  ;;  %v12306_v60 = vld [vmem:[#allocation5_spill] sm:$0xff]  ;;  %v12311_v56 = vmax.f32 %v12309_v39, %v12310_v5  ;;  %v12326_v39 = vld [vmem:[#allocation26_spill] sm:$0xff] }
 0x3c2   : > { %12301 = vst [vmem:[#allocation171_spill] sm:$0xff] %v8549_v45  ;;  %v8572_v45 = vpop.eup %6271 }
 0x3c3   : > { %6279 = vpow2.f32 %v1078_v1  ;;  %v1185_v21 = vadd.f32 %v8572_v45, %v8566_v59  ;;  %v8592_v23 = vpop.eup %6273 }
 0x3c5   : > { %1942 = vmax.xlane.f32.xlu0 %v12302_v4 }
 0x3c6   : > { %v8562_v35 = vpop.xlane.xlu1 %943  ;;  %v8564_v8 = vpop.f32.mrb[180].mxu1 }
 0x3c7   : > { %12303 = vst [vmem:[#allocation172_spill] sm:$0xff] %v8564_v8  ;;  %v8568_v28 = vpop.f32.mrb[181].mxu1  ;;  %v12308_v8 = vld [vmem:[#allocation4_spill] sm:$0xff] }
 0x3c8   : > { %12304 = vst [vmem:[#allocation173_spill] sm:$0xff] %v8568_v28  ;;  %v8576_v48 = vpop.xlane.xlu0 %946  ;;  %v8578_v26 = vpop.f32.mrb[182].mxu1  ;;  %3737 = vrot.lane.b32.xlu1 %v12306_v60, %s7004_s22 }
 0x3c9   : > { %12305 = vst [vmem:[#allocation174_spill] sm:$0xff] %v8578_v26  ;;  %1183 = vadd.xlane.f32.xlu0 %v1182_v58  ;;  %v8582_v4 = vpop.f32.mrb[183].mxu1  ;;  %v8594_v58 = vpop.eup %6275 }
 0x3ca   : > { %12307 = vst [vmem:[#allocation175_spill] sm:$0xff] %v8582_v4  ;;  %v8586_v19 = vpop.xlane.xlu1 %1165  ;;  %v8599_v26 = vpop.eup %6277  ;;  %v1188_v25 = vadd.f32 %v8594_v58, %v8592_v23 }
 0x3cc   : > { %v1385_v28 = vpop.permute.xlu0 %1384  ;;  %3739 = vrot.lane.b32.xlu1 %v12308_v8, %s7004_s22 }
 0x3cd   : > { %5546 = vmatpush3.bf16.msra.mxu0 %v1385_v28  ;;  %1186 = vadd.xlane.f32.xlu0 %v1185_v21  ;;  %v8603_v17 = vpop.eup %6279 }
 0x3ce   : > { %v1169_v12 = vpop.xlane.xlu1 %1168 }
 0x3d0   : > { %v1387_v1 = vpop.permute.xlu0 %1386 }
 0x3d1   : > { %1945 = vmax.xlane.f32.xlu0 %v12311_v56  ;;  %v1191_v56 = vadd.f32 %v8603_v17, %v8599_v26 }
 0x3d2   : > { %v1403_v4 = vpop.permute.xlu1 %1402 }
 0x3d3   : > { %5547 = vmatprep.subr.bf16.mxu0 %v1403_v4  ;;  %v12312_v4 = vld [vmem:[#allocation19_spill] sm:$0xff] }
 0x3d4   : > { %5548 = vmatpush3.bf16.msra.mxu0 %v1387_v1  ;;  %v3734_v28 = vpop.permute.xlu0 %3733  ;;  %v988_v37 = vsub.f32 %v12312_v4, %v8186_v14  ;;  %v12314_v1 = vld [vmem:[#allocation21_spill] sm:$0xff]  ;;  %v12317_v4 = vld [vmem:[#allocation52_spill] sm:$0xff] }
 0x3d5   : > { %5985 = vmatprep.mubr.msk.bf16.mxu1 %vm574_vm1, %v3734_v28  ;;  %1189 = vadd.xlane.f32.xlu0 %v1188_v25  ;;  %v990_v62 = vsub.f32 %v12314_v1, %v8178_v49  ;;  %v12315_v25 = vld [vmem:[#allocation22_spill] sm:$0xff]  ;;  %v12320_v1 = vld [vmem:[#allocation56_spill] sm:$0xff] }
 0x3d6   : > { %v1405_v21 = vpop.permute.xlu1 %1404  ;;  %5986 = vmatmul.mubr.msk.bf16.vlgmr.msra.gmra.mrb[192].mxu1 %vm574_vm1, %v3734_v28  ;;  %v1080_v40 = vmul.f32 1.442695, %v988_v37  ;;  %v991_v8 = vsub.f32 %v12315_v25, %v8178_v49  ;;  %v12321_v49 = vmax.f32 %v12319_v43, %v12320_v1  ;;  %v12322_v25 = vld [vmem:[#allocation23_spill] sm:$0xff]  ;;  %v12325_v1 = vld [vmem:[#allocation25_spill] sm:$0xff] }
 0x3d7   : > { %5549 = vmatprep.subr.bf16.mxu0 %v1405_v21  ;;  %v1084_v28 = vmul.f32 1.442695, %v990_v62 }
 0x3d8   : > { %6281 = vpow2.f32 %v1080_v40  ;;  %v1086_v21 = vmul.f32 1.442695, %v991_v8 }
 0x3d9   : > { %1192 = vadd.xlane.f32.xlu0 %v1191_v56  ;;  %6283 = vpow2.f32 %v1082_v31  ;;  %v12316_v56 = vld [vmem:[#allocation51_spill] sm:$0xff] }
 0x3da   : > { %6285 = vpow2.f32 %v1084_v28  ;;  %v12318_v14 = vmax.f32 %v12316_v56, %v12317_v4  ;;  %v992_v28 = vsub.f32 %v12322_v25, %v8192_v24 }
 0x3db   : > { %6287 = vpow2.f32 %v1086_v21  ;;  %v12323_v21 = vld [vmem:[#allocation24_spill] sm:$0xff] }
 0x3e2   : > { %v8622_v37 = vpop.eup %6281 }
 0x3e3   : > { %v8624_v32 = vpop.eup %6283 }
 0x3e4   : > { %v8629_v62 = vpop.eup %6285  ;;  %v1194_v31 = vadd.f32 %v8624_v32, %v8622_v37 }
 0x3e5   : > { %v8633_v40 = vpop.eup %6287 }
 0x3e6   : > { %v1197_v8 = vadd.f32 %v8633_v40, %v8629_v62 }
 0x3ef   : > { %3741 = vrot.lane.b32.xlu0 %v12236_v50, %s7004_s22  ;;  %v1088_v50 = vmul.f32 1.442695, %v992_v28 }
 0x3f0   : > { %1948 = vmax.xlane.f32.xlu1 %v12318_v14  ;;  %v993_v14 = vsub.f32 %v12323_v21, %v8192_v24 }
 0x3f1   : > { %6289 = vpow2.f32 %v1088_v50  ;;  %v12327_v50 = vld [vmem:[#allocation53_spill] sm:$0xff] }
 0x3f2   : > { %v1090_v5 = vmul.f32 1.442695, %v993_v14  ;;  %6291 = vrcp.f32 %v8408_v51  ;;  %v12330_v14 = vld [vmem:[#allocation58_spill] sm:$0xff] }
 0x3f4   : > { %1954 = vmax.xlane.f32.xlu1 %v12321_v49  ;;  %v12324_v49 = vld [vmem:[#allocation93_spill] sm:$0xff]  ;;  %6293 = vpow2.f32 %v1090_v5 }
 0x3f5   : > { %v994_v43 = vsub.f32 %v12325_v1, %v12324_v49  ;;  %v995_v60 = vsub.f32 %v12326_v39, %v12324_v49  ;;  %6295 = vrcp.f32 %v8396_v20  ;;  %v12328_v39 = vld [vmem:[#allocation54_spill] sm:$0xff]  ;;  %v12331_v49 = vld [vmem:[#allocation60_spill] sm:$0xff] }
 0x3f7   : > { %v1092_v4 = vmul.f32 1.442695, %v994_v43  ;;  %v12329_v43 = vmax.f32 %v12327_v50, %v12328_v39  ;;  %v12334_v50 = vld [vmem:[#allocation59_spill] sm:$0xff] }
 0x3f8   : > { %1195 = vadd.xlane.f32.xlu1 %v1194_v31 }
 0x3f9   : > { %6297 = vpow2.f32 %v1092_v4 }
 0x3fb   : > { %v8656_v51 = vpop.eup %6289 }
 0x3fc   : > { %1198 = vadd.xlane.f32.xlu1 %v1197_v8  ;;  %v1094_v8 = vmul.f32 1.442695, %v995_v60  ;;  %v6292_v60 = vpop.eup %6291 }
 0x3fe   : > { %6299 = vpow2.f32 %v1094_v8  ;;  %v8659_v20 = vpop.eup %6293  ;;  %v12332_v8 = vmax.f32 %v12330_v14, %v12331_v49  ;;  %v12336_v14 = vld [vmem:[#allocation63_spill] sm:$0xff] }
 0x3ff   : > { %6301 = vrcp.f32 %v1169_v12  ;;  %v6296_v21 = vpop.eup %6295  ;;  %v1286_v53 = vmul.f32 %v6292_v60, %v12336_v14 }
 0x400   : > { %6303 = vrcp.f32 %v8586_v19  ;;  %v1200_v19 = vadd.f32 %v8659_v20, %v8656_v51  ;;  %v1285_v56 = vmul.f32 %v6296_v21, %v12334_v50  ;;  %v12337_v50 = vld [vmem:[#allocation57_spill] sm:$0xff] }
 0x405   : > { %v8645_v31 = vpop.xlane.xlu0 %949 }
 0x407   : > { %v8648_v25 = vpop.xlane.xlu1 %952 }
 0x409   : > { %v1389_v24 = vpop.permute.xlu0 %1388 }
 0x40a   : > { %5550 = vmatpush3.bf16.msra.mxu0 %v1389_v24  ;;  %v12333_v24 = vld [vmem:[#allocation64_spill] sm:$0xff] }
 0x40b   : > { %v1172_v1 = vpop.xlane.xlu1 %1171 }
 0x40d   : > { %v1391_v28 = vpop.permute.xlu0 %1390  ;;  %3743 = vrot.lane.b32.xlu1 %v12239_v41, %s7004_s22  ;;  %v8667_v41 = vpop.eup %6297 }
 0x40e   : > { %1951 = vmax.xlane.f32.xlu0 %v12329_v43  ;;  %v1287_v43 = vmul.f32 %v6292_v60, %v12333_v24  ;;  %v8671_v39 = vpop.eup %6299 }
 0x40f   : > { %v1175_v5 = vpop.xlane.xlu1 %1174 }
 0x410   : > { %6305 = vrcp.f32 %v1175_v5  ;;  %v1347_v49 = vpack.c.bf16 %v1287_v43, %v1285_v56  ;;  %v1284_v5 = vmul.f32 %v6296_v21, %v12337_v50  ;;  %v12344_v50 = vld [vmem:[#allocation97_spill] sm:$0xff] }
 0x411   : > { %v3736_v4 = vpop.permute.xlu0 %3735  ;;  %6307 = vrcp.f32 %v1172_v1 }
 0x412   : > { %5987 = vmatprep.mubr.msk.bf16.mxu1 %vm574_vm1, %v3736_v4  ;;  %1957 = vmax.xlane.f32.xlu0 %v12332_v8  ;;  %v6302_v8 = vpop.eup %6301  ;;  %v1346_v43 = vpack.c.bf16 %v1286_v53, %v1284_v5  ;;  %v12343_v53 = vld [vmem:[#allocation95_spill] sm:$0xff]  ;;  %v12345_v5 = vld [vmem:[#allocation29_spill] sm:$0xff] }
 0x413   : > { %5988 = vmatmul.mubr.msk.bf16.gmra.mrb[196].mxu1 %vm574_vm1, %v3736_v4  ;;  %v1407_v12 = vpop.permute.xlu1 %1406  ;;  %v12335_v4 = vpack.c.bf16 %v8406_v6, %v8403_v55  ;;  %v6304_v24 = vpop.eup %6303  ;;  %v12338_v55 = vld [vmem:[#allocation27_spill] sm:$0xff]  ;;  %v1290_v60 = vmul.f32 %v6302_v8, %v12340_v52 }
 0x414   : > { %5551 = vmatprep.subr.bf16.mxu0 %v1407_v12  ;;  %v1203_v12 = vadd.f32 %v8671_v39, %v8667_v41  ;;  %v1289_v56 = vmul.f32 %v6304_v24, %v8200_v29  ;;  %v996_v6 = vsub.f32 %v12338_v55, %v8213_v15  ;;  %v1288_v29 = vmul.f32 %v6304_v24, %v12343_v53 }
 0x415   : > { %5552 = vmatpush3.bf16.msra.mxu0 %v1391_v28  ;;  %v1291_v28 = vmul.f32 %v6302_v8, %v8224_v2  ;;  %v12347_v8 = vld [vmem:[#allocation30_spill] sm:$0xff] }
 0x416   : > { %1201 = vadd.xlane.f32.xlu0 %v1200_v19  ;;  %v999_v55 = vsub.f32 %v12347_v8, %v12344_v50  ;;  %v12356_v8 = vld [vmem:[#allocation31_spill] sm:$0xff] }
 0x417   : > { %v1349_v1 = vpack.c.bf16 %v1291_v28, %v1289_v56  ;;  %v1096_v28 = vmul.f32 1.442695, %v996_v6  ;;  %v998_v56 = vsub.f32 %v12345_v5, %v12344_v50 }
 0x418   : > { %1457 = vmatmul.mubr.bf16.vlgmr.msra.gmra.mrb[32].mxu0 %v12335_v4  ;;  %v1102_v5 = vmul.f32 1.442695, %v999_v55 }
 0x419   : > { %1464 = vmatprep.mubr.bf16.mxu0 %v1347_v49  ;;  %v12339_v49 = vld [vmem:[#allocation28_spill] sm:$0xff]  ;;  %6309 = vpow2.f32 %v1096_v28  ;;  %v1100_v53 = vmul.f32 1.442695, %v998_v56  ;;  %v12352_v56 = vld [vmem:[#allocation67_spill] sm:$0xff] }
 0x41a   : > { %1204 = vadd.xlane.f32.xlu0 %v1203_v12  ;;  %v6306_v19 = vpop.eup %6305  ;;  %v997_v12 = vsub.f32 %v12339_v49, %v8213_v15  ;;  %v1348_v49 = vpack.c.bf16 %v1290_v60, %v1288_v29  ;;  %v12349_v60 = vld [vmem:[#allocation61_spill] sm:$0xff]  ;;  %v12350_v29 = vld [vmem:[#allocation62_spill] sm:$0xff] }
 0x41b   : > { %v6308_v4 = vpop.eup %6307  ;;  %v1295_v2 = vmul.f32 %v6306_v19, %v8368_v44 }
 0x41c   : > { %v1293_v15 = vmul.f32 %v6308_v4, %v8355_v7  ;;  %v1098_v52 = vmul.f32 1.442695, %v997_v12  ;;  %v1292_v7 = vmul.f32 %v6308_v4, %v8346_v34 }
 0x41e   : > { %v1351_v6 = vpack.c.bf16 %v1295_v2, %v1293_v15  ;;  %6311 = vpow2.f32 %v1098_v52  ;;  %v12351_v2 = vmax.f32 %v12349_v60, %v12350_v29  ;;  %v12353_v15 = vld [vmem:[#allocation68_spill] sm:$0xff]  ;;  %v12355_v52 = vld [vmem:[#allocation101_spill] sm:$0xff] }
 0x41f   : > { %6313 = vpow2.f32 %v1100_v53  ;;  %v1000_v55 = vsub.f32 %v12356_v8, %v12355_v52  ;;  %v12358_v53 = vld [vmem:[#allocation102_spill] sm:$0xff] }
 0x420   : > { %1465 = vmatmul.mubr.bf16.gmra.mrb[36].mxu0 %v1346_v43  ;;  %v1294_v43 = vmul.f32 %v6306_v19, %v8364_v16  ;;  %6315 = vpow2.f32 %v1102_v5  ;;  %v12354_v16 = vmax.f32 %v12352_v56, %v12353_v15  ;;  %v12359_v5 = vld [vmem:[#allocation33_spill] sm:$0xff] }
 0x421   : > { %1472 = vmatprep.mubr.bf16.mxu0 %v1349_v1  ;;  %v1104_v24 = vmul.f32 1.442695, %v1000_v55 }
 0x422   : > { %v1350_v12 = vpack.c.bf16 %v1294_v43, %v1292_v7  ;;  %v1002_v7 = vsub.f32 %v12359_v5, %v12358_v53 }
 0x423   : > { %v8688_v14 = vpop.f32.mrb[184].mxu1  ;;  %v8714_v28 = vpop.eup %6309  ;;  %6317 = vpow2.f32 %v1104_v24  ;;  %v12361_v24 = vld [vmem:[#allocation65_spill] sm:$0xff] }
 0x424   : > { %12341 = vst [vmem:[#allocation19_spill] sm:$0xff] %v8688_v14  ;;  %v8691_v21 = vpop.f32.mrb[185].mxu1 }
 0x425   : > { %12342 = vst [vmem:[#allocation20_spill] sm:$0xff] %v8691_v21  ;;  %v8698_v1 = vpop.f32.mrb[186].mxu1 }
 0x426   : > { %12346 = vst [vmem:[#allocation21_spill] sm:$0xff] %v8698_v1  ;;  %v8703_v44 = vpop.f32.mrb[187].mxu1  ;;  %v1108_v1 = vmul.f32 1.442695, %v1002_v7 }
 0x427   : > { %12348 = vst [vmem:[#allocation22_spill] sm:$0xff] %v8703_v44 }
 0x428   : > { %1473 = vmatmul.mubr.bf16.gmra.mrb[40].mxu0 %v1348_v49  ;;  %v8716_v50 = vpop.eup %6311  ;;  %v12357_v49 = vld [vmem:[#allocation32_spill] sm:$0xff] }
 0x429   : > { %1480 = vmatprep.mubr.bf16.mxu0 %v1351_v6  ;;  %v8721_v34 = vpop.eup %6313  ;;  %v1206_v19 = vadd.f32 %v8716_v50, %v8714_v28  ;;  %v1001_v6 = vsub.f32 %v12357_v49, %v12355_v52 }
 0x42a   : > { %v8725_v4 = vpop.eup %6315 }
 0x42b   : > { %v1209_v43 = vadd.f32 %v8725_v4, %v8721_v34 }
 0x430   : > { %1481 = vmatmul.mubr.bf16.gmra.mrb[44].mxu0 %v1350_v12  ;;  %3745 = vrot.lane.b32.xlu0 %v7237_v9, %s7004_s22  ;;  %v12360_v12 = vld [vmem:[#allocation34_spill] sm:$0xff] }
 0x431   : > { %1960 = vmax.xlane.f32.xlu1 %v12351_v2  ;;  %v1003_v2 = vsub.f32 %v12360_v12, %v12358_v53  ;;  %v12364_v12 = vld [vmem:[#allocation69_spill] sm:$0xff] }
 0x435   : > { %1966 = vmax.xlane.f32.xlu1 %v12354_v16 }
 0x439   : > { %1207 = vadd.xlane.f32.xlu1 %v1206_v19  ;;  %v1106_v19 = vmul.f32 1.442695, %v1001_v6  ;;  %v12362_v6 = vld [vmem:[#allocation66_spill] sm:$0xff] }
 0x43a   : > { %v12363_v53 = vmax.f32 %v12361_v24, %v12362_v6 }
 0x43b   : > { %6319 = vpow2.f32 %v1106_v19 }
 0x43c   : > { %6321 = vpow2.f32 %v1108_v1  ;;  %v8751_v1 = vpop.eup %6317 }
 0x43d   : > { %1210 = vadd.xlane.f32.xlu1 %v1209_v43  ;;  %v1110_v43 = vmul.f32 1.442695, %v1003_v2  ;;  %v12365_v2 = vld [vmem:[#allocation70_spill] sm:$0xff] }
 0x43e   : > { %v12366_v19 = vmax.f32 %v12364_v12, %v12365_v2 }
 0x43f   : > { %6323 = vpow2.f32 %v1110_v43 }
 0x442   : > { %v8737_v16 = vpop.xlane.xlu0 %955 }
 0x444   : > { %v8739_v44 = vpop.xlane.xlu1 %958 }
 0x445   : > { %v8753_v5 = vpop.eup %6319 }
 0x446   : > { %v1178_v21 = vpop.xlane.xlu0 %1177 }
 0x447   : > { %6325 = vrcp.f32 %v1178_v21  ;;  %v8758_v21 = vpop.eup %6321 }
 0x448   : > { %v3738_v8 = vpop.permute.xlu1 %3737 }
 0x449   : > { %5989 = vmatprep.mubr.msk.bf16.mxu1 %vm574_vm1, %v3738_v8  ;;  %v8763_v43 = vpop.eup %6323 }
 0x44a   : > { %v1181_v52 = vpop.xlane.xlu0 %1180  ;;  %5990 = vmatmul.mubr.msk.bf16.gmra.mrb[200].mxu1 %vm574_vm1, %v3738_v8  ;;  %v1215_v12 = vadd.f32 %v8763_v43, %v8758_v21 }
 0x44b   : > { %6327 = vrcp.f32 %v1181_v52  ;;  %v1212_v52 = vadd.f32 %v8753_v5, %v8751_v1 }
 0x44c   : > { %v3740_v49 = vpop.permute.xlu1 %3739 }
 0x44d   : > { %5991 = vmatprep.mubr.msk.bf16.mxu1 %vm574_vm1, %v3740_v49 }
 0x44e   : > { %v8744_v55 = vpop.xlane.xlu0 %1939  ;;  %3747 = vrot.lane.b32.xlu1 %v12195_v10, %s7004_s22  ;;  %v12368_v10 = vld [vmem:[#allocation35_spill] sm:$0xff] }
 0x44f   : > { %1963 = vmax.xlane.f32.xlu0 %v12363_v53 }
 0x451   : > { %v6326_v8 = vpop.eup %6325 }
 0x452   : > { %v8755_v7 = vpop.xlane.xlu0 %1942  ;;  %5992 = vmatmul.mubr.msk.bf16.gmra.mrb[204].mxu1 %vm574_vm1, %v3740_v49  ;;  %v1297_v15 = vmul.f32 %v6326_v8, %v8500_v61  ;;  %v1296_v49 = vmul.f32 %v6326_v8, %v8498_v42  ;;  %v12367_v61 = vld [vmem:[#allocation105_spill] sm:$0xff]  ;;  %v12371_v8 = vld [vmem:[#allocation108_spill] sm:$0xff] }
 0x453   : > { %1969 = vmax.xlane.f32.xlu0 %v12366_v19 }
 0x455   : > { %v6328_v53 = vpop.eup %6327 }
 0x456   : > { %v1184_v14 = vpop.xlane.xlu0 %1183  ;;  %v1299_v56 = vmul.f32 %v6328_v53, %v8520_v0  ;;  %v1298_v6 = vmul.f32 %v6328_v53, %v8511_v27  ;;  %v1004_v0 = vsub.f32 %v12368_v10, %v12367_v61  ;;  %v12369_v27 = vld [vmem:[#allocation36_spill] sm:$0xff]  ;;  %v12372_v53 = vld [vmem:[#allocation37_spill] sm:$0xff] }
 0x457   : > { %1213 = vadd.xlane.f32.xlu0 %v1212_v52  ;;  %6329 = vrcp.f32 %v1184_v14  ;;  %v1005_v14 = vsub.f32 %v12369_v27, %v12367_v61 }
 0x458   : > { %v1353_v2 = vpack.c.bf16 %v1299_v56, %v1297_v15  ;;  %v1352_v19 = vpack.c.bf16 %v1298_v6, %v1296_v49  ;;  %v1112_v6 = vmul.f32 1.442695, %v1004_v0 }
 0x459   : > { %v1114_v29 = vmul.f32 1.442695, %v1005_v14  ;;  %v12377_v14 = vld [vmem:[#allocation11_spill] sm:$0xff] }
 0x45a   : > { %v1187_v24 = vpop.xlane.xlu0 %1186  ;;  %1488 = vmatprep.mubr.bf16.mxu0 %v1353_v2  ;;  %v1006_v2 = vsub.f32 %v12372_v53, %v12371_v8  ;;  %v12375_v53 = vld [vmem:[#allocation38_spill] sm:$0xff] }
 0x45b   : > { %6331 = vrcp.f32 %v1187_v24  ;;  %1216 = vadd.xlane.f32.xlu0 %v1215_v12  ;;  %1489 = vmatmul.mubr.bf16.gmra.mrb[48].mxu0 %v1352_v19 }
 0x45e   : > { %v8773_v52 = vpop.xlane.xlu0 %1945 }
 0x461   : > { %v6330_v42 = vpop.eup %6329 }
 0x462   : > { %v1190_v9 = vpop.xlane.xlu0 %1189  ;;  %v1301_v12 = vmul.f32 %v6330_v42, %v8557_v11  ;;  %v1300_v27 = vmul.f32 %v6330_v42, %v8555_v3 }
 0x463   : > { %6333 = vrcp.f32 %v1190_v9  ;;  %v1007_v9 = vsub.f32 %v12375_v53, %v12371_v8  ;;  %v12379_v8 = vld [vmem:[#allocation72_spill] sm:$0xff] }
 0x464   : > { %v8779_v56 = vpop.f32.mrb[188].mxu1 }
 0x465   : > { %12370 = vst [vmem:[#allocation23_spill] sm:$0xff] %v8779_v56  ;;  %v6332_v15 = vpop.eup %6331  ;;  %v8783_v24 = vpop.f32.mrb[189].mxu1  ;;  %v1116_v56 = vmul.f32 1.442695, %v1006_v2  ;;  %v1118_v3 = vmul.f32 1.442695, %v1007_v9 }
 0x466   : > { %12373 = vst [vmem:[#allocation24_spill] sm:$0xff] %v8783_v24  ;;  %v1193_v49 = vpop.xlane.xlu0 %1192  ;;  %v8788_v19 = vpop.f32.mrb[190].mxu1  ;;  %v1303_v61 = vmul.f32 %v6332_v15, %v8572_v45  ;;  %v1302_v0 = vmul.f32 %v6332_v15, %v8566_v59  ;;  %v12378_v15 = vld [vmem:[#allocation71_spill] sm:$0xff] }
 0x467   : > { %12374 = vst [vmem:[#allocation93_spill] sm:$0xff] %v8788_v19  ;;  %6335 = vrcp.f32 %v1193_v49  ;;  %v8795_v60 = vpop.f32.mrb[191].mxu1 }
 0x468   : > { %12376 = vst [vmem:[#allocation25_spill] sm:$0xff] %v8795_v60  ;;  %v1355_v10 = vpack.c.bf16 %v1303_v61, %v1301_v12  ;;  %v1354_v24 = vpack.c.bf16 %v1302_v0, %v1300_v27  ;;  %6337 = vpow2.f32 %v1112_v6  ;;  %v12380_v6 = vmax.f32 %v12378_v15, %v12379_v8  ;;  %v12381_v27 = vld [vmem:[#allocation75_spill] sm:$0xff]  ;;  %v12382_v0 = vld [vmem:[#allocation76_spill] sm:$0xff] }
 0x469   : > { %6339 = vpow2.f32 %v1114_v29  ;;  %v12383_v53 = vmax.f32 %v12381_v27, %v12382_v0 }
 0x46a   : > { %1496 = vmatprep.mubr.bf16.mxu0 %v1355_v10  ;;  %v3742_v45 = vpop.permute.xlu0 %3741  ;;  %6341 = vpow2.f32 %v1116_v56 }
 0x46b   : > { %1497 = vmatmul.mubr.bf16.gmra.mrb[52].mxu0 %v1354_v24  ;;  %5993 = vmatprep.mubr.msk.bf16.mxu1 %vm574_vm1, %v3742_v45  ;;  %6343 = vpow2.f32 %v1118_v3 }
 0x46c   : > { %5994 = vmatmul.mubr.msk.bf16.gmra.mrb[208].mxu1 %vm574_vm1, %v3742_v45  ;;  %v12384_v45 = vld [vmem:[#allocation39_spill] sm:$0xff] }
 0x46d   : > { %v6334_v59 = vpop.eup %6333  ;;  %v1008_v3 = vsub.f32 %v12384_v45, %v8384_v57 }
 0x46e   : > { %v1305_v2 = vmul.f32 %v6334_v59, %v8594_v58  ;;  %v1304_v24 = vmul.f32 %v6334_v59, %v8592_v23  ;;  %v12385_v59 = vld [vmem:[#allocation40_spill] sm:$0xff] }
 0x471   : > { %v6336_v42 = vpop.eup %6335  ;;  %3749 = vrot.lane.b32.xlu0 %v12377_v14, %s7004_s22 }
 0x472   : > { %1972 = vmax.xlane.f32.xlu1 %v12380_v6  ;;  %v1307_v29 = vmul.f32 %v6336_v42, %v8603_v17  ;;  %v1306_v12 = vmul.f32 %v6336_v42, %v8599_v26  ;;  %v8810_v10 = vpop.eup %6337  ;;  %v1009_v42 = vsub.f32 %v12385_v59, %v8384_v57  ;;  %v12389_v59 = vld [vmem:[#allocation73_spill] sm:$0xff] }
 0x473   : > { %v8812_v61 = vpop.eup %6339 }
 0x474   : > { %v1357_v56 = vpack.c.bf16 %v1307_v29, %v1305_v2  ;;  %v1356_v49 = vpack.c.bf16 %v1306_v12, %v1304_v24  ;;  %v8817_v9 = vpop.eup %6341  ;;  %v1218_v17 = vadd.f32 %v8812_v61, %v8810_v10  ;;  %v1120_v2 = vmul.f32 1.442695, %v1008_v3  ;;  %v12386_v29 = vld [vmem:[#allocation41_spill] sm:$0xff]  ;;  %v12388_v3 = vld [vmem:[#allocation10_spill] sm:$0xff] }
 0x475   : > { %v8821_v23 = vpop.eup %6343  ;;  %v1010_v24 = vsub.f32 %v12386_v29, %v8386_v36  ;;  %v1122_v12 = vmul.f32 1.442695, %v1009_v42 }
 0x476   : > { %1504 = vmatprep.mubr.bf16.mxu0 %v1357_v56  ;;  %1978 = vmax.xlane.f32.xlu1 %v12383_v53  ;;  %v1221_v26 = vadd.f32 %v8821_v23, %v8817_v9  ;;  %v12387_v56 = vld [vmem:[#allocation42_spill] sm:$0xff]  ;;  %6345 = vpow2.f32 %v1120_v2 }
 0x477   : > { %1505 = vmatmul.mubr.bf16.gmra.mrb[56].mxu0 %v1356_v49  ;;  %v1011_v49 = vsub.f32 %v12387_v56, %v8386_v36  ;;  %v12390_v36 = vld [vmem:[#allocation74_spill] sm:$0xff]  ;;  %v12392_v56 = vld [vmem:[#allocation77_spill] sm:$0xff] }
 0x478   : > { %v12391_v42 = vmax.f32 %v12389_v59, %v12390_v36 }
 0x47a   : > { %1219 = vadd.xlane.f32.xlu1 %v1218_v17  ;;  %v1124_v17 = vmul.f32 1.442695, %v1010_v24 }
 0x47d   : > { %v8825_v58 = vpop.xlane.xlu1 %1948 }
 0x47e   : > { %1222 = vadd.xlane.f32.xlu1 %v1221_v26  ;;  %v1126_v26 = vmul.f32 1.442695, %v1011_v49  ;;  %v12393_v49 = vld [vmem:[#allocation78_spill] sm:$0xff] }
 0x480   : > { %v8844_v2 = vpop.eup %6345 }
 0x481   : > { %v8831_v6 = vpop.xlane.xlu1 %1954 }
 0x485   : > { %v1196_v53 = vpop.xlane.xlu1 %1195 }
 0x486   : > { %6347 = vrcp.f32 %v1196_v53  ;;  %v12394_v53 = vmax.f32 %v12392_v56, %v12393_v49 }
 0x487   : > { %6349 = vpow2.f32 %v1122_v12 }
 0x489   : > { %v1199_v45 = vpop.xlane.xlu1 %1198 }
 0x48a   : > { %6351 = vrcp.f32 %v1199_v45 }
 0x48b   : > { %6353 = vpow2.f32 %v1124_v17 }
 0x48c   : > { %6355 = vpow2.f32 %v1126_v26 }
 0x48d   : > { %v3744_v57 = vpop.permute.xlu1 %3743 }
 0x48e   : > { %5995 = vmatprep.mubr.msk.bf16.mxu1 %vm574_vm1, %v3744_v57 }
 0x48f   : > { %3751 = vrot.lane.b32.xlu1 %v12388_v3, %s7004_s22  ;;  %5996 = vmatmul.mubr.msk.bf16.gmra.mrb[212].mxu1 %vm574_vm1, %v3744_v57 }
 0x490   : > { %1975 = vmax.xlane.f32.xlu0 %v12391_v42  ;;  %v6348_v29 = vpop.eup %6347 }
 0x491   : > { %v8846_v24 = vpop.eup %6349  ;;  %v1309_v17 = vmul.f32 %v6348_v29, %v8624_v32  ;;  %v1308_v45 = vmul.f32 %v6348_v29, %v8622_v37 }
 0x492   : > { %v1224_v42 = vadd.f32 %v8846_v24, %v8844_v2 }
 0x494   : > { %v6352_v12 = vpop.eup %6351  ;;  %1981 = vmax.xlane.f32.xlu0 %v12394_v53  ;;  %v12396_v53 = vld [vmem:[#allocation44_spill] sm:$0xff] }
 0x495   : > { %v1311_v26 = vmul.f32 %v6352_v12, %v8633_v40  ;;  %v1310_v57 = vmul.f32 %v6352_v12, %v8629_v62  ;;  %v8855_v11 = vpop.eup %6353  ;;  %v12395_v62 = vld [vmem:[#allocation43_spill] sm:$0xff]  ;;  %v1013_v49 = vsub.f32 %v12396_v53, %v8562_v35 }
 0x496   : > { %v8859_v60 = vpop.eup %6355  ;;  %v1012_v29 = vsub.f32 %v12395_v62, %v8562_v35 }
 0x497   : > { %v1359_v19 = vpack.c.bf16 %v1311_v26, %v1309_v17  ;;  %v1358_v36 = vpack.c.bf16 %v1310_v57, %v1308_v45  ;;  %v1227_v32 = vadd.f32 %v8859_v60, %v8855_v11  ;;  %v1130_v45 = vmul.f32 1.442695, %v1013_v49  ;;  %v12398_v57 = vld [vmem:[#allocation46_spill] sm:$0xff] }
 0x498   : > { %1225 = vadd.xlane.f32.xlu0 %v1224_v42  ;;  %v1128_v17 = vmul.f32 1.442695, %v1012_v29  ;;  %v1015_v42 = vsub.f32 %v12398_v57, %v8576_v48  ;;  %v12405_v57 = vld [vmem:[#allocation80_spill] sm:$0xff] }
 0x499   : > { %1512 = vmatprep.mubr.bf16.mxu0 %v1359_v19  ;;  %v12397_v19 = vld [vmem:[#allocation45_spill] sm:$0xff] }
 0x49a   : > { %1513 = vmatmul.mubr.bf16.gmra.mrb[60].mxu0 %v1358_v36  ;;  %v1014_v36 = vsub.f32 %v12397_v19, %v8576_v48  ;;  %v1134_v53 = vmul.f32 1.442695, %v1015_v42 }
 0x49b   : > { %v8863_v40 = vpop.xlane.xlu0 %1951 }
 0x49c   : > { %1228 = vadd.xlane.f32.xlu0 %v1227_v32  ;;  %v1132_v62 = vmul.f32 1.442695, %v1014_v36  ;;  %v12403_v36 = vld [vmem:[#allocation13_spill] sm:$0xff] }
 0x49f   : > { %v8865_v37 = vpop.xlane.xlu0 %1957 }
 0x4a3   : > { %v1202_v12 = vpop.xlane.xlu0 %1201 }
 0x4a4   : > { %6357 = vrcp.f32 %v1202_v12 }
 0x4a7   : > { %v1205_v26 = vpop.xlane.xlu0 %1204 }
 0x4a8   : > { %6359 = vrcp.f32 %v1205_v26  ;;  %v12404_v26 = vld [vmem:[#allocation79_spill] sm:$0xff] }
 0x4a9   : > { %v8875_v32 = vpop.f32.mrb[192].mxu1  ;;  %6361 = vpow2.f32 %v1128_v17 }
 0x4aa   : > { %12399 = vst [vmem:[#allocation26_spill] sm:$0xff] %v8875_v32  ;;  %v8877_v56 = vpop.f32.mrb[193].mxu1  ;;  %6363 = vpow2.f32 %v1130_v45  ;;  %v12406_v45 = vmax.f32 %v12404_v26, %v12405_v57  ;;  %v12408_v32 = vld [vmem:[#allocation84_spill] sm:$0xff] }
 0x4ab   : > { %12400 = vst [vmem:[#allocation64_spill] sm:$0xff] %v8877_v56  ;;  %v3746_v12 = vpop.permute.xlu0 %3745  ;;  %v8881_v29 = vpop.f32.mrb[194].mxu1  ;;  %6365 = vpow2.f32 %v1132_v62 }
 0x4ac   : > { %12401 = vst [vmem:[#allocation59_spill] sm:$0xff] %v8881_v29  ;;  %v8883_v19 = vpop.f32.mrb[195].mxu1  ;;  %5997 = vmatprep.mubr.msk.bf16.mxu1 %vm574_vm1, %v3746_v12  ;;  %6367 = vpow2.f32 %v1134_v53  ;;  %v12407_v29 = vld [vmem:[#allocation83_spill] sm:$0xff] }
 0x4ad   : > { %12402 = vst [vmem:[#allocation63_spill] sm:$0xff] %v8883_v19  ;;  %5998 = vmatmul.mubr.msk.bf16.gmra.mrb[216].mxu1 %vm574_vm1, %v3746_v12  ;;  %v12409_v59 = vmax.f32 %v12407_v29, %v12408_v32 }
 0x4ae   : > { %v6358_v49 = vpop.eup %6357 }
 0x4af   : > { %v1313_v42 = vmul.f32 %v6358_v49, %v8659_v20  ;;  %v1312_v56 = vmul.f32 %v6358_v49, %v8656_v51  ;;  %v1018_v49 = vsub.f32 %v7940_v13, %v8648_v25  ;;  %v12412_v13 = vld [vmem:[#allocation81_spill] sm:$0xff] }
 0x4b2   : > { %v6360_v17 = vpop.eup %6359  ;;  %3753 = vrot.lane.b32.xlu0 %v12403_v36, %s7004_s22 }
 0x4b3   : > { %1984 = vmax.xlane.f32.xlu1 %v12406_v45  ;;  %v1315_v35 = vmul.f32 %v6360_v17, %v8671_v39  ;;  %v1314_v48 = vmul.f32 %v6360_v17, %v8667_v41  ;;  %v8898_v12 = vpop.eup %6361 }
 0x4b4   : > { %v8900_v19 = vpop.eup %6363 }
 0x4b5   : > { %v1361_v62 = vpack.c.bf16 %v1315_v35, %v1313_v42  ;;  %v1360_v53 = vpack.c.bf16 %v1314_v48, %v1312_v56  ;;  %v8905_v45 = vpop.eup %6365  ;;  %v1230_v39 = vadd.f32 %v8900_v19, %v8898_v12  ;;  %v1016_v56 = vsub.f32 %v7930_v38, %v8645_v31  ;;  %v12410_v42 = vld [vmem:[#allocation47_spill] sm:$0xff] }
 0x4b6   : > { %v8909_v51 = vpop.eup %6367 }
 0x4b7   : > { %1990 = vmax.xlane.f32.xlu1 %v12409_v59  ;;  %1520 = vmatprep.mubr.bf16.mxu0 %v1361_v62  ;;  %v1233_v41 = vadd.f32 %v8909_v51, %v8905_v45  ;;  %v1017_v59 = vsub.f32 %v7936_v33, %v8645_v31  ;;  %v1136_v48 = vmul.f32 1.442695, %v1016_v56  ;;  %v1019_v62 = vsub.f32 %v12410_v42, %v8648_v25  ;;  %v12411_v31 = vld [vmem:[#allocation12_spill] sm:$0xff]  ;;  %v12413_v25 = vld [vmem:[#allocation82_spill] sm:$0xff]  ;;  %v12415_v42 = vld [vmem:[#allocation85_spill] sm:$0xff] }
 0x4b8   : > { %1521 = vmatmul.mubr.bf16.gmra.mrb[64].mxu0 %v1360_v53  ;;  %v12414_v56 = vmax.f32 %v12412_v13, %v12413_v25 }
 0x4b9   : > { %v1138_v17 = vmul.f32 1.442695, %v1017_v59  ;;  %6369 = vpow2.f32 %v1136_v48 }
 0x4bb   : > { %1231 = vadd.xlane.f32.xlu1 %v1230_v39  ;;  %v1140_v39 = vmul.f32 1.442695, %v1018_v49 }
 0x4be   : > { %v8913_v20 = vpop.xlane.xlu1 %1960 }
 0x4bf   : > { %1234 = vadd.xlane.f32.xlu1 %v1233_v41  ;;  %v1142_v41 = vmul.f32 1.442695, %v1019_v62  ;;  %v12416_v62 = vld [vmem:[#allocation86_spill] sm:$0xff] }
 0x4c2   : > { %v8919_v35 = vpop.xlane.xlu1 %1966 }
 0x4c3   : > { %v8932_v59 = vpop.eup %6369 }
 0x4c6   : > { %v1208_v53 = vpop.xlane.xlu1 %1207 }
 0x4c7   : > { %6371 = vrcp.f32 %v1208_v53  ;;  %v12417_v53 = vmax.f32 %v12415_v42, %v12416_v62 }
 0x4c8   : > { %6373 = vpow2.f32 %v1138_v17 }
 0x4ca   : > { %v1211_v38 = vpop.xlane.xlu1 %1210 }
 0x4cb   : > { %6375 = vrcp.f32 %v1211_v38 }
 0x4cc   : > { %6377 = vpow2.f32 %v1140_v39 }
 0x4cd   : > { %6379 = vpow2.f32 %v1142_v41 }
 0x4ce   : > { %v3748_v33 = vpop.permute.xlu1 %3747 }
 0x4cf   : > { %5999 = vmatprep.mubr.msk.bf16.mxu1 %vm574_vm1, %v3748_v33 }
 0x4d0   : > { %3755 = vrot.lane.b32.xlu1 %v12411_v31, %s7004_s22  ;;  %6000 = vmatmul.mubr.msk.bf16.gmra.mrb[220].mxu1 %vm574_vm1, %v3748_v33 }
 0x4d1   : > { %1987 = vmax.xlane.f32.xlu0 %v12414_v56  ;;  %v6372_v48 = vpop.eup %6371 }
 0x4d2   : > { %v8934_v49 = vpop.eup %6373  ;;  %v1317_v39 = vmul.f32 %v6372_v48, %v8716_v50  ;;  %v1316_v38 = vmul.f32 %v6372_v48, %v8714_v28 }
 0x4d3   : > { %v1236_v56 = vadd.f32 %v8934_v49, %v8932_v59 }
 0x4d5   : > { %v6376_v17 = vpop.eup %6375  ;;  %1993 = vmax.xlane.f32.xlu0 %v12417_v53 }
 0x4d6   : > { %v1319_v41 = vmul.f32 %v6376_v17, %v8725_v4  ;;  %v1318_v33 = vmul.f32 %v6376_v17, %v8721_v34  ;;  %v8943_v25 = vpop.eup %6377  ;;  %v1020_v34 = vsub.f32 %v7952_v22, %v8737_v16  ;;  %v1021_v17 = vsub.f32 %v7956_v46, %v8737_v16 }
 0x4d7   : > { %v8947_v13 = vpop.eup %6379 }
 0x4d8   : > { %v1363_v32 = vpack.c.bf16 %v1319_v41, %v1317_v39  ;;  %v1362_v29 = vpack.c.bf16 %v1318_v33, %v1316_v38  ;;  %v1239_v50 = vadd.f32 %v8947_v13, %v8943_v25  ;;  %v1022_v39 = vsub.f32 %v7960_v54, %v8739_v44 }
 0x4d9   : > { %1237 = vadd.xlane.f32.xlu0 %v1236_v56  ;;  %v1146_v22 = vmul.f32 1.442695, %v1021_v17  ;;  %v1023_v56 = vsub.f32 %v7962_v30, %v8739_v44 }
 0x4da   : > { %1528 = vmatprep.mubr.bf16.mxu0 %v1363_v32 }
 0x4db   : > { %1529 = vmatmul.mubr.bf16.gmra.mrb[68].mxu0 %v1362_v29  ;;  %v1144_v29 = vmul.f32 1.442695, %v1020_v34  ;;  %v1148_v34 = vmul.f32 1.442695, %v1022_v39  ;;  %v1150_v41 = vmul.f32 1.442695, %v1023_v56 }
 0x4dc   : > { %v8951_v4 = vpop.xlane.xlu0 %1963  ;;  %v12424_v39 = vld [vmem:[#allocation15_spill] sm:$0xff] }
 0x4dd   : > { %1240 = vadd.xlane.f32.xlu0 %v1239_v50  ;;  %v12425_v56 = vld [vmem:[#allocation87_spill] sm:$0xff] }
 0x4e0   : > { %v8953_v28 = vpop.xlane.xlu0 %1969 }
 0x4e4   : > { %v1214_v48 = vpop.xlane.xlu0 %1213 }
 0x4e5   : > { %6381 = vrcp.f32 %v1214_v48 }
 0x4e6   : > { %v8959_v53 = vpop.f32.mrb[196].mxu1 }
 0x4e7   : > { %12418 = vst [vmem:[#allocation57_spill] sm:$0xff] %v8959_v53  ;;  %v8961_v32 = vpop.f32.mrb[197].mxu1 }
 0x4e8   : > { %12419 = vst [vmem:[#allocation27_spill] sm:$0xff] %v8961_v32  ;;  %v1217_v38 = vpop.xlane.xlu0 %1216  ;;  %v8967_v33 = vpop.f32.mrb[198].mxu1 }
 0x4e9   : > { %12420 = vst [vmem:[#allocation28_spill] sm:$0xff] %v8967_v33  ;;  %6383 = vrcp.f32 %v1217_v38  ;;  %v8971_v46 = vpop.f32.mrb[199].mxu1 }
 0x4ea   : > { %12421 = vst [vmem:[#allocation100_spill] sm:$0xff] %v8971_v46  ;;  %6385 = vpow2.f32 %v1144_v29 }
 0x4eb   : > { %v5553_v50 = vpop.f32.mrb[32].mxu0  ;;  %6387 = vpow2.f32 %v1146_v22 }
 0x4ec   : > { %v5554_v54 = vpop.f32.mrb[33].mxu0  ;;  %v3750_v48 = vpop.permute.xlu0 %3749  ;;  %6389 = vpow2.f32 %v1148_v34 }
 0x4ed   : > { %v8975_v32 = vadd.f32 %v5554_v54, %v5553_v50  ;;  %v5556_v53 = vpop.f32.mrb[34].mxu0  ;;  %6001 = vmatprep.mubr.msk.bf16.mxu1 %vm574_vm1, %v3750_v48  ;;  %6391 = vpow2.f32 %v1150_v41  ;;  %v12426_v50 = vld [vmem:[#allocation88_spill] sm:$0xff] }
 0x4ee   : > { %v5557_v17 = vpop.f32.mrb[35].mxu0  ;;  %6002 = vmatmul.mubr.msk.bf16.gmra.mrb[224].mxu1 %vm574_vm1, %v3750_v48  ;;  %v12427_v54 = vmax.f32 %v12425_v56, %v12426_v50 }
 0x4ef   : > { %12422 = vst [vmem:[#allocation95_spill] sm:$0xff] %v8975_v32  ;;  %v8979_v30 = vadd.f32 %v5557_v17, %v5556_v53  ;;  %v6382_v44 = vpop.eup %6381 }
 0x4f0   : > { %v1321_v16 = vmul.f32 %v6382_v44, %v8753_v5  ;;  %v1320_v53 = vmul.f32 %v6382_v44, %v8751_v1  ;;  %v12431_v5 = vld [vmem:[#allocation92_spill] sm:$0xff] }
 0x4f1   : > { %12423 = vst [vmem:[#allocation97_spill] sm:$0xff] %v8979_v30 }
 0x4f3   : > { %v6384_v38 = vpop.eup %6383  ;;  %v5559_v29 = vpop.f32.mrb[36].mxu0  ;;  %3757 = vrot.lane.b32.xlu0 %v12424_v39, %s7004_s22 }
 0x4f4   : > { %v5560_v22 = vpop.f32.mrb[37].mxu0  ;;  %1996 = vmax.xlane.f32.xlu1 %v12427_v54  ;;  %v1323_v32 = vmul.f32 %v6384_v38, %v8763_v43  ;;  %v1322_v34 = vmul.f32 %v6384_v38, %v8758_v21  ;;  %v8992_v17 = vpop.eup %6385  ;;  %v12430_v54 = vld [vmem:[#allocation91_spill] sm:$0xff] }
 0x4f5   : > { %v8990_v48 = vadd.f32 %v5560_v22, %v5559_v29  ;;  %v5562_v41 = vpop.f32.mrb[38].mxu0  ;;  %v8994_v62 = vpop.eup %6387  ;;  %v12432_v56 = vmax.f32 %v12430_v54, %v12431_v5 }
 0x4f6   : > { %v5563_v30 = vpop.f32.mrb[39].mxu0  ;;  %v1365_v46 = vpack.c.bf16 %v1323_v32, %v1321_v16  ;;  %v1364_v33 = vpack.c.bf16 %v1322_v34, %v1320_v53  ;;  %v9001_v1 = vpop.eup %6389  ;;  %v1242_v21 = vadd.f32 %v8994_v62, %v8992_v17 }
 0x4f7   : > { %12428 = vst [vmem:[#allocation29_spill] sm:$0xff] %v8990_v48  ;;  %v8996_v50 = vadd.f32 %v5563_v30, %v5562_v41  ;;  %v9005_v43 = vpop.eup %6391 }
 0x4f8   : > { %2002 = vmax.xlane.f32.xlu1 %v12432_v56  ;;  %1536 = vmatprep.mubr.bf16.mxu0 %v1365_v46  ;;  %v1245_v29 = vadd.f32 %v9005_v43, %v9001_v1 }
 0x4f9   : > { %12429 = vst [vmem:[#allocation30_spill] sm:$0xff] %v8996_v50  ;;  %1537 = vmatmul.mubr.bf16.gmra.mrb[72].mxu0 %v1364_v33 }
 0x4fb   : > { %v5565_v44 = vpop.f32.mrb[40].mxu0 }
 0x4fc   : > { %v5566_v32 = vpop.f32.mrb[41].mxu0  ;;  %1243 = vadd.xlane.f32.xlu1 %v1242_v21 }
 0x4fd   : > { %v9007_v16 = vadd.f32 %v5566_v32, %v5565_v44  ;;  %v5568_v30 = vpop.f32.mrb[42].mxu0 }
 0x4fe   : > { %v5569_v38 = vpop.f32.mrb[43].mxu0 }
 0x4ff   : > { %12433 = vst [vmem:[#allocation101_spill] sm:$0xff] %v9007_v16  ;;  %v9011_v22 = vadd.f32 %v5569_v38, %v5568_v30  ;;  %v9013_v33 = vpop.xlane.xlu1 %1972  ;;  %v12437_v30 = vld [vmem:[#allocation14_spill] sm:$0xff]  ;;  %v12438_v38 = vld [vmem:[#allocation89_spill] sm:$0xff] }
 0x500   : > { %1246 = vadd.xlane.f32.xlu1 %v1245_v29  ;;  %v12439_v29 = vld [vmem:[#allocation90_spill] sm:$0xff] }
 0x501   : > { %12434 = vst [vmem:[#allocation31_spill] sm:$0xff] %v9011_v22 }
 0x503   : > { %v5571_v46 = vpop.f32.mrb[44].mxu0  ;;  %v9015_v56 = vpop.xlane.xlu1 %1978 }
 0x504   : > { %v5572_v53 = vpop.f32.mrb[45].mxu0 }
 0x505   : > { %v9017_v34 = vadd.f32 %v5572_v53, %v5571_v46  ;;  %v5574_v41 = vpop.f32.mrb[46].mxu0  ;;  %v12440_v46 = vmax.f32 %v12438_v38, %v12439_v29 }
 0x506   : > { %v5575_v21 = vpop.f32.mrb[47].mxu0 }
 0x507   : > { %12435 = vst [vmem:[#allocation32_spill] sm:$0xff] %v9017_v34  ;;  %v9019_v44 = vadd.f32 %v5575_v21, %v5574_v41  ;;  %v1220_v32 = vpop.xlane.xlu1 %1219 }
 0x508   : > { %6393 = vrcp.f32 %v1220_v32 }
 0x509   : > { %12436 = vst [vmem:[#allocation102_spill] sm:$0xff] %v9019_v44 }
 0x50b   : > { %v1223_v16 = vpop.xlane.xlu1 %1222 }
 0x50c   : > { %6395 = vrcp.f32 %v1223_v16 }
 0x50f   : > { %v3752_v48 = vpop.permute.xlu1 %3751 }
 0x510   : > { %6003 = vmatprep.mubr.msk.bf16.mxu1 %vm574_vm1, %v3752_v48 }
 0x511   : > { %3759 = vrot.lane.b32.xlu1 %v12437_v30, %s7004_s22  ;;  %6004 = vmatmul.mubr.msk.bf16.gmra.mrb[228].mxu1 %vm574_vm1, %v3752_v48 }
 0x512   : > { %1999 = vmax.xlane.f32.xlu0 %v12440_v46  ;;  %v6394_v53 = vpop.eup %6393 }
 0x513   : > { %v1325_v41 = vmul.f32 %v6394_v53, %v8812_v61  ;;  %v1324_v16 = vmul.f32 %v6394_v53, %v8810_v10 }
 0x516   : > { %v6396_v34 = vpop.eup %6395 }
 0x517   : > { %v1327_v21 = vmul.f32 %v6396_v34, %v8821_v23  ;;  %v1326_v32 = vmul.f32 %v6396_v34, %v8817_v9 }
 0x519   : > { %v1367_v44 = vpack.c.bf16 %v1327_v21, %v1325_v41  ;;  %v1366_v22 = vpack.c.bf16 %v1326_v32, %v1324_v16 }
 0x51b   : > { %1544 = vmatprep.mubr.bf16.mxu0 %v1367_v44 }
 0x51c   : > { %1545 = vmatmul.mubr.bf16.gmra.mrb[76].mxu0 %v1366_v22 }
 0x51d   : > { %v9032_v50 = vpop.xlane.xlu0 %1975  ;;  %v9034_v48 = vpop.f32.mrb[200].mxu1 }
 0x51e   : > { %12441 = vst [vmem:[#allocation33_spill] sm:$0xff] %v9034_v48  ;;  %v9036_v29 = vpop.f32.mrb[201].mxu1 }
 0x51f   : > { %12442 = vst [vmem:[#allocation34_spill] sm:$0xff] %v9036_v29  ;;  %v9040_v61 = vpop.f32.mrb[202].mxu1 }
 0x520   : > { %12443 = vst [vmem:[#allocation105_spill] sm:$0xff] %v9040_v61  ;;  %v9042_v23 = vpop.f32.mrb[203].mxu1 }
 0x521   : > { %12444 = vst [vmem:[#allocation35_spill] sm:$0xff] %v9042_v23  ;;  %v9046_v9 = vpop.xlane.xlu0 %1981 }
 0x525   : > { %v1226_v34 = vpop.xlane.xlu0 %1225  ;;  %v9048_v22 = vpop.f32.mrb[204].mxu1 }
 0x526   : > { %12445 = vst [vmem:[#allocation36_spill] sm:$0xff] %v9048_v22  ;;  %v9050_v44 = vpop.f32.mrb[205].mxu1  ;;  %6397 = vrcp.f32 %v1226_v34  ;;  %v2034_v22 = vsub.f32 %v7976_v63, %v8744_v55 }
 0x527   : > { %12446 = vst [vmem:[#allocation108_spill] sm:$0xff] %v9050_v44  ;;  %v9054_v41 = vpop.f32.mrb[206].mxu1 }
 0x528   : > { %12447 = vst [vmem:[#allocation37_spill] sm:$0xff] %v9054_v41  ;;  %2466 = vrot.lane.b32.xlu0 %v12377_v14, %s7005_s23  ;;  %v9058_v21 = vpop.f32.mrb[207].mxu1  ;;  %v12452_v41 = vld [vmem:[#allocation96_spill] sm:$0xff]  ;;  %v2098_v14 = vmul.f32 1.442695, %v2034_v22 }
 0x529   : > { %12448 = vst [vmem:[#allocation38_spill] sm:$0xff] %v9058_v21  ;;  %v1229_v32 = vpop.xlane.xlu0 %1228  ;;  %v12451_v21 = vld [vmem:[#allocation94_spill] sm:$0xff] }
 0x52a   : > { %6399 = vrcp.f32 %v1229_v32  ;;  %v2035_v32 = vsub.f32 %v7978_v47, %v8744_v55  ;;  %v12453_v48 = vmax.f32 %v12451_v21, %v12452_v41 }
 0x52b   : > { %6401 = vpow2.f32 %v2098_v14 }
 0x52d   : > { %v3754_v10 = vpop.permute.xlu0 %3753 }
 0x52e   : > { %6005 = vmatprep.mubr.msk.bf16.mxu1 %vm574_vm1, %v3754_v10  ;;  %v5577_v46 = vpop.f32.mrb[48].mxu0 }
 0x52f   : > { %6006 = vmatmul.mubr.msk.bf16.gmra.mrb[232].mxu1 %vm574_vm1, %v3754_v10  ;;  %v5578_v53 = vpop.f32.mrb[49].mxu0 }
 0x530   : > { %v9064_v23 = vadd.f32 %v5578_v53, %v5577_v46  ;;  %v5580_v34 = vpop.f32.mrb[50].mxu0  ;;  %v6398_v61 = vpop.eup %6397 }
 0x531   : > { %v5581_v44 = vpop.f32.mrb[51].mxu0  ;;  %v1329_v10 = vmul.f32 %v6398_v61, %v8846_v24  ;;  %v1328_v53 = vmul.f32 %v6398_v61, %v8844_v2 }
 0x532   : > { %12449 = vst [vmem:[#allocation71_spill] sm:$0xff] %v9064_v23  ;;  %v9068_v29 = vadd.f32 %v5581_v44, %v5580_v34  ;;  %v2100_v34 = vmul.f32 1.442695, %v2035_v32 }
 0x534   : > { %12450 = vst [vmem:[#allocation72_spill] sm:$0xff] %v9068_v29  ;;  %v6400_v16 = vpop.eup %6399  ;;  %6403 = vpow2.f32 %v2100_v34 }
 0x535   : > { %2005 = vmax.xlane.f32.xlu1 %v12453_v48  ;;  %v1331_v46 = vmul.f32 %v6400_v16, %v8859_v60  ;;  %v1330_v23 = vmul.f32 %v6400_v16, %v8855_v11  ;;  %v9097_v32 = vpop.eup %6401 }
 0x537   : > { %v1369_v63 = vpack.c.bf16 %v1331_v46, %v1329_v10  ;;  %v1368_v44 = vpack.c.bf16 %v1330_v23, %v1328_v53  ;;  %v12460_v53 = vld [vmem:[#allocation3_spill] sm:$0xff] }
 0x539   : > { %1552 = vmatprep.mubr.bf16.mxu0 %v1369_v63  ;;  %v12461_v63 = vld [vmem:[#allocation98_spill] sm:$0xff] }
 0x53a   : > { %1553 = vmatmul.mubr.bf16.gmra.mrb[80].mxu0 %v1368_v44  ;;  %v12462_v44 = vld [vmem:[#allocation99_spill] sm:$0xff] }
 0x53b   : > { %v12463_v34 = vmax.f32 %v12461_v63, %v12462_v44 }
 0x53e   : > { %v5583_v47 = vpop.f32.mrb[52].mxu0  ;;  %v9101_v46 = vpop.eup %6403 }
 0x53f   : > { %v5584_v55 = vpop.f32.mrb[53].mxu0  ;;  %v9079_v29 = vpop.f32.mrb[208].mxu1 }
 0x540   : > { %12454 = vst [vmem:[#allocation75_spill] sm:$0xff] %v9079_v29  ;;  %v9081_v48 = vadd.f32 %v5584_v55, %v5583_v47  ;;  %v5586_v24 = vpop.f32.mrb[54].mxu0  ;;  %v9083_v60 = vpop.f32.mrb[209].mxu1  ;;  %v2226_v55 = vadd.f32 %v9101_v46, %v9097_v32 }
 0x541   : > { %12456 = vst [vmem:[#allocation39_spill] sm:$0xff] %v9083_v60  ;;  %v9087_v2 = vpop.xlane.xlu1 %1984  ;;  %v5587_v61 = vpop.f32.mrb[55].mxu0  ;;  %v12466_v60 = vld [vmem:[#allocation48_spill] sm:$0xff] }
 0x542   : > { %12455 = vst [vmem:[#allocation76_spill] sm:$0xff] %v9081_v48  ;;  %v9089_v23 = vadd.f32 %v5587_v61, %v5586_v24  ;;  %v9091_v22 = vpop.f32.mrb[210].mxu1  ;;  %v2037_v29 = vsub.f32 %v12466_v60, %v8755_v7 }
 0x543   : > { %12458 = vst [vmem:[#allocation41_spill] sm:$0xff] %v9091_v22  ;;  %v9093_v14 = vpop.f32.mrb[211].mxu1 }
 0x544   : > { %12457 = vst [vmem:[#allocation40_spill] sm:$0xff] %v9089_v23  ;;  %12459 = vst [vmem:[#allocation42_spill] sm:$0xff] %v9093_v14 }
 0x545   : > { %v9099_v10 = vpop.xlane.xlu1 %1990 }
 0x546   : > { %2450 = vrot.lane.b32.xlu1 %v12460_v53, %s7005_s23  ;;  %v12479_v53 = vld [vmem:[#allocation52_spill] sm:$0xff] }
 0x547   : > { %2008 = vmax.xlane.f32.xlu0 %v12463_v34  ;;  %v2036_v34 = vsub.f32 %v7980_v18, %v8755_v7 }
 0x549   : > { %v1232_v47 = vpop.xlane.xlu1 %1231 }
 0x54a   : > { %v5589_v24 = vpop.f32.mrb[56].mxu0  ;;  %6405 = vrcp.f32 %v1232_v47 }
 0x54b   : > { %v5590_v61 = vpop.f32.mrb[57].mxu0  ;;  %2227 = vadd.xlane.f32.xlu0 %v2226_v55  ;;  %v2102_v55 = vmul.f32 1.442695, %v2036_v34 }
 0x54c   : > { %v9110_v16 = vadd.f32 %v5590_v61, %v5589_v24  ;;  %v5592_v11 = vpop.f32.mrb[58].mxu0  ;;  %v2104_v24 = vmul.f32 1.442695, %v2037_v29 }
 0x54d   : > { %v1235_v48 = vpop.xlane.xlu1 %1234  ;;  %v5593_v23 = vpop.f32.mrb[59].mxu0 }
 0x54e   : > { %12464 = vst [vmem:[#allocation43_spill] sm:$0xff] %v9110_v16  ;;  %6407 = vrcp.f32 %v1235_v48  ;;  %v9112_v14 = vadd.f32 %v5593_v23, %v5592_v11 }
 0x54f   : > { %6409 = vpow2.f32 %v2102_v55 }
 0x550   : > { %12465 = vst [vmem:[#allocation44_spill] sm:$0xff] %v9112_v14  ;;  %6411 = vpow2.f32 %v2104_v24  ;;  %v12472_v24 = vld [vmem:[#allocation17_spill] sm:$0xff] }
 0x551   : > { %v3756_v22 = vpop.permute.xlu1 %3755 }
 0x552   : > { %6007 = vmatprep.mubr.msk.bf16.mxu1 %vm574_vm1, %v3756_v22 }
 0x553   : > { %6008 = vmatmul.mubr.msk.bf16.gmra.mrb[236].mxu1 %vm574_vm1, %v3756_v22 }
 0x554   : > { %v6406_v47 = vpop.eup %6405 }
 0x555   : > { %v1333_v16 = vmul.f32 %v6406_v47, %v8900_v19  ;;  %v1332_v11 = vmul.f32 %v6406_v47, %v8898_v12 }
 0x558   : > { %v6408_v61 = vpop.eup %6407 }
 0x559   : > { %v1335_v48 = vmul.f32 %v6408_v61, %v8909_v51  ;;  %v1334_v23 = vmul.f32 %v6408_v61, %v8905_v45  ;;  %v9134_v12 = vpop.eup %6409 }
 0x55a   : > { %v9140_v22 = vpop.eup %6411 }
 0x55b   : > { %v1371_v18 = vpack.c.bf16 %v1335_v48, %v1333_v16  ;;  %v1370_v14 = vpack.c.bf16 %v1334_v23, %v1332_v11  ;;  %v2229_v55 = vadd.f32 %v9140_v22, %v9134_v12  ;;  %v12473_v23 = vld [vmem:[#allocation106_spill] sm:$0xff] }
 0x55d   : > { %1560 = vmatprep.mubr.bf16.mxu0 %v1371_v18  ;;  %v12474_v18 = vld [vmem:[#allocation107_spill] sm:$0xff] }
 0x55e   : > { %1561 = vmatmul.mubr.bf16.gmra.mrb[84].mxu0 %v1370_v14  ;;  %v9124_v7 = vpop.xlane.xlu0 %1987  ;;  %v12470_v14 = vld [vmem:[#allocation2_spill] sm:$0xff]  ;;  %v12475_v45 = vmax.f32 %v12473_v23, %v12474_v18 }
 0x561   : > { %2468 = vrot.lane.b32.xlu0 %v12388_v3, %s7005_s23 }
 0x562   : > { %v9128_v29 = vpop.xlane.xlu0 %1993  ;;  %v9130_v19 = vpop.f32.mrb[212].mxu1 }
 0x563   : > { %12467 = vst [vmem:[#allocation45_spill] sm:$0xff] %v9130_v19  ;;  %v9132_v51 = vpop.f32.mrb[213].mxu1 }
 0x564   : > { %12468 = vst [vmem:[#allocation46_spill] sm:$0xff] %v9132_v51  ;;  %v9138_v60 = vpop.f32.mrb[214].mxu1 }
 0x565   : > { %12469 = vst [vmem:[#allocation79_spill] sm:$0xff] %v9138_v60  ;;  %2452 = vrot.lane.b32.xlu0 %v12470_v14, %s7005_s23  ;;  %v9144_v16 = vpop.f32.mrb[215].mxu1 }
 0x566   : > { %12471 = vst [vmem:[#allocation80_spill] sm:$0xff] %v9144_v16  ;;  %v1238_v47 = vpop.xlane.xlu0 %1237 }
 0x567   : > { %6413 = vrcp.f32 %v1238_v47 }
 0x569   : > { %3761 = vrot.lane.b32.xlu0 %v12472_v24, %s7004_s22 }
 0x56a   : > { %v1241_v61 = vpop.xlane.xlu0 %1240  ;;  %2230 = vadd.xlane.f32.xlu1 %v2229_v55 }
 0x56b   : > { %6415 = vrcp.f32 %v1241_v61 }
 0x56d   : > { %2470 = vrot.lane.b32.xlu0 %v12403_v36, %s7005_s23  ;;  %v5595_v48 = vpop.f32.mrb[60].mxu0 }
 0x56e   : > { %v3758_v11 = vpop.permute.xlu0 %3757  ;;  %2014 = vmax.xlane.f32.xlu1 %v12475_v45  ;;  %v5596_v34 = vpop.f32.mrb[61].mxu0 }
 0x56f   : > { %v9157_v16 = vadd.f32 %v5596_v34, %v5595_v48  ;;  %v5598_v60 = vpop.f32.mrb[62].mxu0  ;;  %6009 = vmatprep.mubr.msk.bf16.mxu1 %vm574_vm1, %v3758_v11  ;;  %v12478_v34 = vld [vmem:[#allocation51_spill] sm:$0xff] }
 0x570   : > { %v5599_v47 = vpop.f32.mrb[63].mxu0  ;;  %6010 = vmatmul.mubr.msk.bf16.gmra.mrb[240].mxu1 %vm574_vm1, %v3758_v11  ;;  %v2040_v48 = vsub.f32 %v12478_v34, %v8825_v58  ;;  %v2041_v11 = vsub.f32 %v12479_v53, %v8825_v58 }
 0x571   : > { %12476 = vst [vmem:[#allocation47_spill] sm:$0xff] %v9157_v16  ;;  %v9161_v55 = vadd.f32 %v5599_v47, %v5598_v60  ;;  %v6414_v61 = vpop.eup %6413 }
 0x572   : > { %v1337_v19 = vmul.f32 %v6414_v61, %v8934_v49  ;;  %v1336_v36 = vmul.f32 %v6414_v61, %v8932_v59  ;;  %v2110_v60 = vmul.f32 1.442695, %v2040_v48  ;;  %v2112_v47 = vmul.f32 1.442695, %v2041_v11  ;;  %v12480_v49 = vld [vmem:[#allocation5_spill] sm:$0xff]  ;;  %v12487_v48 = vld [vmem:[#allocation50_spill] sm:$0xff] }
 0x573   : > { %12477 = vst [vmem:[#allocation85_spill] sm:$0xff] %v9161_v55  ;;  %v12486_v61 = vld [vmem:[#allocation49_spill] sm:$0xff]  ;;  %v2039_v11 = vsub.f32 %v12487_v48, %v8773_v52 }
 0x574   : > { %6417 = vpow2.f32 %v2110_v60  ;;  %v12488_v60 = vld [vmem:[#allocation103_spill] sm:$0xff] }
 0x575   : > { %v6416_v51 = vpop.eup %6415  ;;  %6419 = vpow2.f32 %v2112_v47  ;;  %v12489_v47 = vld [vmem:[#allocation104_spill] sm:$0xff]  ;;  %v2108_v18 = vmul.f32 1.442695, %v2039_v11 }
 0x576   : > { %v1339_v14 = vmul.f32 %v6416_v51, %v8947_v13  ;;  %v1338_v45 = vmul.f32 %v6416_v51, %v8943_v25 }
 0x578   : > { %v1373_v16 = vpack.c.bf16 %v1339_v14, %v1337_v19  ;;  %v1372_v3 = vpack.c.bf16 %v1338_v45, %v1336_v36  ;;  %v2038_v45 = vsub.f32 %v12486_v61, %v8773_v52  ;;  %v12490_v36 = vmax.f32 %v12488_v60, %v12489_v47 }
 0x57a   : > { %1568 = vmatprep.mubr.bf16.mxu0 %v1373_v16  ;;  %v2106_v61 = vmul.f32 1.442695, %v2038_v45 }
 0x57b   : > { %1569 = vmatmul.mubr.bf16.gmra.mrb[88].mxu0 %v1372_v3 }
 0x57e   : > { %v9189_v14 = vpop.eup %6417 }
 0x57f   : > { %2454 = vrot.lane.b32.xlu1 %v12480_v49, %s7005_s23  ;;  %12485 = vst [vmem:[#allocation96_spill] sm:$0xff] %v9189_v14  ;;  %v9191_v16 = vpop.eup %6419 }
 0x580   : > { %v9173_v13 = vpop.f32.mrb[216].mxu1 }
 0x581   : > { %12481 = vst [vmem:[#allocation91_spill] sm:$0xff] %v9173_v13  ;;  %v9175_v25 = vpop.f32.mrb[217].mxu1  ;;  %v9177_v59 = vpop.xlane.xlu1 %1996  ;;  %v2235_v13 = vadd.f32 %v9191_v16, %v9189_v14 }
 0x582   : > { %12482 = vst [vmem:[#allocation92_spill] sm:$0xff] %v9175_v25  ;;  %v9181_v19 = vpop.f32.mrb[218].mxu1 }
 0x583   : > { %12483 = vst [vmem:[#allocation89_spill] sm:$0xff] %v9181_v19  ;;  %v9183_v58 = vpop.f32.mrb[219].mxu1 }
 0x584   : > { %12484 = vst [vmem:[#allocation94_spill] sm:$0xff] %v9183_v58 }
 0x585   : > { %v9187_v53 = vpop.xlane.xlu1 %2002 }
 0x589   : > { %v1244_v51 = vpop.xlane.xlu1 %1243 }
 0x58a   : > { %6421 = vrcp.f32 %v1244_v51 }
 0x58b   : > { %v5601_v34 = vpop.f32.mrb[64].mxu0 }
 0x58c   : > { %2011 = vmax.xlane.f32.xlu0 %v12490_v36  ;;  %v5602_v3 = vpop.f32.mrb[65].mxu0 }
 0x58d   : > { %v9200_v55 = vadd.f32 %v5602_v3, %v5601_v34  ;;  %v5604_v58 = vpop.f32.mrb[66].mxu0  ;;  %v1247_v19 = vpop.xlane.xlu1 %1246 }
 0x58e   : > { %6423 = vrcp.f32 %v1247_v19  ;;  %v5605_v25 = vpop.f32.mrb[67].mxu0 }
 0x58f   : > { %12491 = vst [vmem:[#allocation98_spill] sm:$0xff] %v9200_v55  ;;  %v9204_v49 = vadd.f32 %v5605_v25, %v5604_v58  ;;  %6425 = vpow2.f32 %v2106_v61  ;;  %v12509_v55 = vld [vmem:[#allocation56_spill] sm:$0xff] }
 0x590   : > { %2236 = vadd.xlane.f32.xlu0 %v2235_v13  ;;  %6427 = vpow2.f32 %v2108_v18 }
 0x591   : > { %12492 = vst [vmem:[#allocation99_spill] sm:$0xff] %v9204_v49  ;;  %v3760_v52 = vpop.permute.xlu1 %3759 }
 0x592   : > { %6011 = vmatprep.mubr.msk.bf16.mxu1 %vm574_vm1, %v3760_v52 }
 0x593   : > { %6012 = vmatmul.mubr.msk.bf16.gmra.mrb[244].mxu1 %vm574_vm1, %v3760_v52 }
 0x594   : > { %v6422_v36 = vpop.eup %6421 }
 0x595   : > { %v1341_v19 = vmul.f32 %v6422_v36, %v8994_v62  ;;  %v1340_v34 = vmul.f32 %v6422_v36, %v8992_v17 }
 0x598   : > { %v6424_v3 = vpop.eup %6423 }
 0x599   : > { %v1343_v51 = vmul.f32 %v6424_v3, %v9005_v43  ;;  %v1342_v25 = vmul.f32 %v6424_v3, %v9001_v1  ;;  %v9212_v13 = vpop.eup %6425  ;;  %v12498_v3 = vld [vmem:[#allocation4_spill] sm:$0xff] }
 0x59a   : > { %12493 = vst [vmem:[#allocation48_spill] sm:$0xff] %v9212_v13  ;;  %v9214_v48 = vpop.eup %6427 }
 0x59b   : > { %v1375_v58 = vpack.c.bf16 %v1343_v51, %v1341_v19  ;;  %v1374_v45 = vpack.c.bf16 %v1342_v25, %v1340_v34  ;;  %v2232_v18 = vadd.f32 %v9214_v48, %v9212_v13 }
 0x59d   : > { %1576 = vmatprep.mubr.bf16.mxu0 %v1375_v58 }
 0x59e   : > { %1577 = vmatmul.mubr.bf16.gmra.mrb[92].mxu0 %v1374_v45 }
 0x59f   : > { %v9216_v11 = vpop.xlane.xlu0 %1999 }
 0x5a3   : > { %v2467_v62 = vpop.permute.xlu0 %2466  ;;  %2233 = vadd.xlane.f32.xlu1 %v2232_v18  ;;  %v9220_v43 = vpop.f32.mrb[220].mxu1  ;;  %v12501_v18 = vld [vmem:[#allocation16_spill] sm:$0xff] }
 0x5a4   : > { %12494 = vst [vmem:[#allocation106_spill] sm:$0xff] %v9220_v43  ;;  %5697 = vmatprep.subr.bf16.mxu0 %v2467_v62  ;;  %v9222_v17 = vpop.f32.mrb[221].mxu1 }
 0x5a5   : > { %12495 = vst [vmem:[#allocation51_spill] sm:$0xff] %v9222_v17  ;;  %v9226_v61 = vpop.f32.mrb[222].mxu1 }
 0x5a6   : > { %12496 = vst [vmem:[#allocation52_spill] sm:$0xff] %v9226_v61  ;;  %2472 = vrot.lane.b32.xlu0 %v12411_v31, %s7005_s23  ;;  %v9230_v52 = vpop.f32.mrb[223].mxu1  ;;  %v12508_v61 = vld [vmem:[#allocation55_spill] sm:$0xff] }
 0x5a7   : > { %12497 = vst [vmem:[#allocation49_spill] sm:$0xff] %v9230_v52  ;;  %v2044_v17 = vsub.f32 %v12508_v61, %v8831_v6 }
 0x5a9   : > { %v2118_v31 = vmul.f32 1.442695, %v2044_v17 }
 0x5aa   : > { %2456 = vrot.lane.b32.xlu0 %v12498_v3, %s7005_s23  ;;  %v12510_v3 = vld [vmem:[#allocation109_spill] sm:$0xff] }
 0x5ae   : > { %2474 = vrot.lane.b32.xlu0 %v12424_v39, %s7005_s23  ;;  %v5607_v19 = vpop.f32.mrb[68].mxu0 }
 0x5af   : > { %v5608_v51 = vpop.f32.mrb[69].mxu0 }
 0x5b0   : > { %v9238_v34 = vadd.f32 %v5608_v51, %v5607_v19  ;;  %v5610_v25 = vpop.f32.mrb[70].mxu0  ;;  %v12505_v19 = vld [vmem:[#allocation53_spill] sm:$0xff] }
 0x5b1   : > { %v5611_v58 = vpop.f32.mrb[71].mxu0  ;;  %v2042_v51 = vsub.f32 %v12505_v19, %v8863_v40 }
 0x5b2   : > { %12499 = vst [vmem:[#allocation50_spill] sm:$0xff] %v9238_v34  ;;  %v9240_v45 = vadd.f32 %v5611_v58, %v5610_v25  ;;  %v12507_v25 = vld [vmem:[#allocation54_spill] sm:$0xff] }
 0x5b3   : > { %v2043_v58 = vsub.f32 %v12507_v25, %v8863_v40  ;;  %v2114_v43 = vmul.f32 1.442695, %v2042_v51  ;;  %v12511_v40 = vld [vmem:[#allocation110_spill] sm:$0xff] }
 0x5b4   : > { %12500 = vst [vmem:[#allocation103_spill] sm:$0xff] %v9240_v45  ;;  %3763 = vrot.lane.b32.xlu1 %v12501_v18, %s7004_s22  ;;  %v12512_v25 = vmax.f32 %v12510_v3, %v12511_v40 }
 0x5b5   : > { %6429 = vpow2.f32 %v2114_v43 }
 0x5c1   : > { %v9244_v62 = vpop.f32.mrb[224].mxu1 }
 0x5c2   : > { %12502 = vst [vmem:[#allocation104_spill] sm:$0xff] %v9244_v62  ;;  %v9246_v36 = vpop.f32.mrb[225].mxu1  ;;  %v9248_v1 = vpop.xlane.xlu1 %2005  ;;  %v2116_v62 = vmul.f32 1.442695, %v2043_v58 }
 0x5c3   : > { %12503 = vst [vmem:[#allocation176_spill] sm:$0xff] %v9246_v36  ;;  %v9252_v49 = vpop.f32.mrb[226].mxu1  ;;  %v2045_v36 = vsub.f32 %v12509_v55, %v8831_v6  ;;  %v9275_v55 = vpop.eup %6429 }
 0x5c4   : > { %12504 = vst [vmem:[#allocation177_spill] sm:$0xff] %v9252_v49  ;;  %v9256_v34 = vpop.f32.mrb[227].mxu1  ;;  %6431 = vpow2.f32 %v2116_v62  ;;  %12515 = vst [vmem:[#allocation56_spill] sm:$0xff] %v9275_v55  ;;  %v12518_v62 = vld [vmem:[#allocation112_spill] sm:$0xff] }
 0x5c5   : > { %12506 = vst [vmem:[#allocation53_spill] sm:$0xff] %v9256_v34  ;;  %v2120_v39 = vmul.f32 1.442695, %v2045_v36  ;;  %6433 = vpow2.f32 %v2118_v31  ;;  %v12517_v36 = vld [vmem:[#allocation111_spill] sm:$0xff] }
 0x5c6   : > { %v2451_v52 = vpop.permute.xlu1 %2450  ;;  %v12519_v51 = vmax.f32 %v12517_v36, %v12518_v62 }
 0x5c7   : > { %5698 = vmatpush3.bf16.msra.mxu0 %v2451_v52  ;;  %6435 = vpow2.f32 %v2120_v39 }
 0x5cc   : > { %v5613_v19 = vpop.f32.mrb[72].mxu0 }
 0x5cd   : > { %2017 = vmax.xlane.f32.xlu0 %v12512_v25  ;;  %v5614_v45 = vpop.f32.mrb[73].mxu0  ;;  %v12522_v25 = vld [vmem:[#allocation7_spill] sm:$0xff] }
 0x5ce   : > { %v9269_v34 = vadd.f32 %v5614_v45, %v5613_v19  ;;  %v5616_v52 = vpop.f32.mrb[74].mxu0  ;;  %v9277_v43 = vpop.eup %6431 }
 0x5cf   : > { %v5617_v49 = vpop.f32.mrb[75].mxu0  ;;  %12516 = vst [vmem:[#allocation109_spill] sm:$0xff] %v9277_v43  ;;  %v9282_v58 = vpop.eup %6433  ;;  %v2238_v45 = vadd.f32 %v9277_v43, %v9275_v55 }
 0x5d0   : > { %12513 = vst [vmem:[#allocation54_spill] sm:$0xff] %v9269_v34  ;;  %v9271_v61 = vadd.f32 %v5617_v49, %v5616_v52  ;;  %12520 = vst [vmem:[#allocation110_spill] sm:$0xff] %v9282_v58 }
 0x5d1   : > { %v9286_v31 = vpop.eup %6435 }
 0x5d2   : > { %12514 = vst [vmem:[#allocation55_spill] sm:$0xff] %v9271_v61  ;;  %12521 = vst [vmem:[#allocation111_spill] sm:$0xff] %v9286_v31  ;;  %v2241_v39 = vadd.f32 %v9286_v31, %v9282_v58 }
 0x5d4   : > { %v9273_v6 = vpop.xlane.xlu0 %2008 }
 0x5d8   : > { %v2228_v17 = vpop.xlane.xlu0 %2227  ;;  %2020 = vmax.xlane.f32.xlu1 %v12519_v51 }
 0x5d9   : > { %6437 = vrcp.f32 %v2228_v17 }
 0x5dc   : > { %v2469_v49 = vpop.permute.xlu0 %2468  ;;  %2239 = vadd.xlane.f32.xlu1 %v2238_v45 }
 0x5dd   : > { %5699 = vmatprep.subr.bf16.mxu0 %v2469_v49 }
 0x5e0   : > { %v2453_v19 = vpop.permute.xlu0 %2452  ;;  %2242 = vadd.xlane.f32.xlu1 %v2241_v39 }
 0x5e1   : > { %5700 = vmatpush3.bf16.msra.mxu0 %v2453_v19 }
 0x5e3   : > { %2458 = vrot.lane.b32.xlu0 %v12522_v25, %s7005_s23 }
 0x5e4   : > { %v3762_v52 = vpop.permute.xlu0 %3761  ;;  %v9292_v51 = vpop.f32.mrb[228].mxu1 }
 0x5e5   : > { %12523 = vst [vmem:[#allocation112_spill] sm:$0xff] %v9292_v51  ;;  %v9294_v34 = vpop.f32.mrb[229].mxu1  ;;  %6013 = vmatprep.mubr.msk.bf16.mxu1 %vm574_vm1, %v3762_v52 }
 0x5e6   : > { %12524 = vst [vmem:[#allocation178_spill] sm:$0xff] %v9294_v34  ;;  %v9299_v49 = vpop.f32.mrb[230].mxu1  ;;  %6014 = vmatmul.mubr.msk.bf16.gmra.mrb[248].mxu1 %vm574_vm1, %v3762_v52  ;;  %v12528_v34 = vld [vmem:[#allocation6_spill] sm:$0xff] }
 0x5e7   : > { %12525 = vst [vmem:[#allocation179_spill] sm:$0xff] %v9299_v49  ;;  %2476 = vrot.lane.b32.xlu0 %v12437_v30, %s7005_s23  ;;  %v9304_v39 = vpop.f32.mrb[231].mxu1  ;;  %v12530_v49 = vld [vmem:[#allocation58_spill] sm:$0xff] }
 0x5e8   : > { %12526 = vst [vmem:[#allocation180_spill] sm:$0xff] %v9304_v39  ;;  %v2471_v61 = vpop.permute.xlu0 %2470  ;;  %v6438_v39 = vpop.eup %6437 }
 0x5e9   : > { %5701 = vmatprep.subr.bf16.mxu0 %v2471_v61 }
 0x5eb   : > { %2478 = vrot.lane.b32.xlu0 %v12472_v24, %s7005_s23  ;;  %v2046_v24 = vsub.f32 %v12530_v49, %v8865_v37  ;;  %v12539_v49 = vld [vmem:[#allocation113_spill] sm:$0xff] }
 0x5ef   : > { %v5619_v25 = vpop.f32.mrb[76].mxu0 }
 0x5f0   : > { %v5620_v55 = vpop.f32.mrb[77].mxu0 }
 0x5f1   : > { %v9310_v45 = vadd.f32 %v5620_v55, %v5619_v25  ;;  %2460 = vrot.lane.b32.xlu1 %v12528_v34, %s7005_s23  ;;  %v5622_v52 = vpop.f32.mrb[78].mxu0  ;;  %v12531_v25 = vld [vmem:[#allocation60_spill] sm:$0xff] }
 0x5f2   : > { %v5623_v51 = vpop.f32.mrb[79].mxu0 }
 0x5f3   : > { %12527 = vst [vmem:[#allocation181_spill] sm:$0xff] %v9310_v45  ;;  %v9314_v30 = vadd.f32 %v5623_v51, %v5622_v52  ;;  %v2047_v45 = vsub.f32 %v12531_v25, %v8865_v37  ;;  %v9325_v51 = vmul.f32 %v6438_v39, %v9097_v32  ;;  %v2355_v52 = vmul.f32 %v6438_v39, %v9101_v46  ;;  %v12536_v25 = vld [vmem:[#allocation61_spill] sm:$0xff]  ;;  %v12538_v46 = vld [vmem:[#allocation62_spill] sm:$0xff] }
 0x5f4   : > { %v2122_v37 = vmul.f32 1.442695, %v2046_v24  ;;  %v2048_v43 = vsub.f32 %v12536_v25, %v8913_v20  ;;  %v2049_v39 = vsub.f32 %v12538_v46, %v8913_v20  ;;  %v12540_v25 = vld [vmem:[#allocation114_spill] sm:$0xff] }
 0x5f5   : > { %12529 = vst [vmem:[#allocation182_spill] sm:$0xff] %v9314_v30  ;;  %12533 = vst [vmem:[#allocation60_spill] sm:$0xff] %v9325_v51  ;;  %v2124_v31 = vmul.f32 1.442695, %v2047_v45 }
 0x5f6   : > { %v2128_v24 = vmul.f32 1.442695, %v2049_v39 }
 0x5f7   : > { %v2231_v58 = vpop.xlane.xlu1 %2230 }
 0x5f8   : > { %6439 = vrcp.f32 %v2231_v58 }
 0x5f9   : > { %6441 = vpow2.f32 %v2122_v37 }
 0x5fa   : > { %6443 = vpow2.f32 %v2124_v31  ;;  %v12547_v31 = vld [vmem:[#allocation116_spill] sm:$0xff] }
 0x5fb   : > { %v9316_v19 = vpop.xlane.xlu1 %2014 }
 0x5ff   : > { %v2455_v61 = vpop.permute.xlu1 %2454 }
 0x600   : > { %5702 = vmatpush3.bf16.msra.mxu0 %v2455_v61 }
 0x602   : > { %v6440_v55 = vpop.eup %6439  ;;  %v9322_v34 = vpop.f32.mrb[232].mxu1 }
 0x603   : > { %12532 = vst [vmem:[#allocation58_spill] sm:$0xff] %v9322_v34  ;;  %v9328_v17 = vmul.f32 %v6440_v55, %v9134_v12  ;;  %v9330_v58 = vpop.f32.mrb[233].mxu1  ;;  %v2357_v61 = vmul.f32 %v6440_v55, %v9140_v22  ;;  %v2126_v55 = vmul.f32 1.442695, %v2048_v43  ;;  %v9355_v22 = vpop.eup %6441  ;;  %v12546_v43 = vld [vmem:[#allocation115_spill] sm:$0xff]  ;;  %v12556_v34 = vld [vmem:[#allocation8_spill] sm:$0xff] }
 0x604   : > { %12534 = vst [vmem:[#allocation183_spill] sm:$0xff] %v9330_v58  ;;  %v9336_v30 = vpop.f32.mrb[234].mxu1  ;;  %v12541_v58 = vmax.f32 %v12539_v49, %v12540_v25  ;;  %12544 = vst [vmem:[#allocation114_spill] sm:$0xff] %v9355_v22  ;;  %v12548_v37 = vmax.f32 %v12546_v43, %v12547_v31 }
 0x605   : > { %12535 = vst [vmem:[#allocation184_spill] sm:$0xff] %v9336_v30  ;;  %v9340_v32 = vpop.f32.mrb[235].mxu1  ;;  %v2419_v14 = vpack.c.bf16 %v2357_v61, %v2355_v52  ;;  %6445 = vpow2.f32 %v2126_v55 }
 0x606   : > { %12537 = vst [vmem:[#allocation61_spill] sm:$0xff] %v9340_v32  ;;  %6447 = vpow2.f32 %v2128_v24 }
 0x607   : > { %2530 = vmatprep.mubr.bf16.mxu0 %v2419_v14  ;;  %v9357_v14 = vpop.eup %6443 }
 0x608   : > { %12545 = vst [vmem:[#allocation185_spill] sm:$0xff] %v9357_v14 }
 0x60a   : > { %2023 = vmax.xlane.f32.xlu0 %v12541_v58  ;;  %v2244_v58 = vadd.f32 %v9357_v14, %v9355_v22 }
 0x60d   : > { %v5625_v52 = vpop.f32.mrb[80].mxu0 }
 0x60e   : > { %v5626_v61 = vpop.f32.mrb[81].mxu0 }
 0x60f   : > { %v9351_v45 = vadd.f32 %v5626_v61, %v5625_v52  ;;  %v5628_v12 = vpop.f32.mrb[82].mxu0  ;;  %v9362_v39 = vpop.eup %6445  ;;  %v12551_v61 = vld [vmem:[#allocation9_spill] sm:$0xff] }
 0x610   : > { %v5629_v20 = vpop.f32.mrb[83].mxu0  ;;  %12549 = vst [vmem:[#allocation115_spill] sm:$0xff] %v9362_v39  ;;  %v9366_v55 = vpop.eup %6447 }
 0x611   : > { %12542 = vst [vmem:[#allocation62_spill] sm:$0xff] %v9351_v45  ;;  %v9353_v46 = vadd.f32 %v5629_v20, %v5628_v12  ;;  %12550 = vst [vmem:[#allocation116_spill] sm:$0xff] %v9366_v55  ;;  %v2247_v12 = vadd.f32 %v9366_v55, %v9362_v39 }
 0x613   : > { %12543 = vst [vmem:[#allocation113_spill] sm:$0xff] %v9353_v46 }
 0x615   : > { %2026 = vmax.xlane.f32.xlu1 %v12548_v37 }
 0x619   : > { %v9368_v24 = vpop.xlane.xlu0 %2011  ;;  %2245 = vadd.xlane.f32.xlu1 %v2244_v58 }
 0x61d   : > { %v9372_v52 = vpop.xlane.xlu0 %2236  ;;  %2248 = vadd.xlane.f32.xlu1 %v2247_v12 }
 0x620   : > { %2462 = vrot.lane.b32.xlu0 %v12551_v61, %s7005_s23  ;;  %v12558_v61 = vld [vmem:[#allocation66_spill] sm:$0xff] }
 0x621   : > { %v2473_v20 = vpop.permute.xlu0 %2472  ;;  %v2051_v22 = vsub.f32 %v12558_v61, %v8951_v4 }
 0x622   : > { %5703 = vmatprep.subr.bf16.mxu0 %v2473_v20  ;;  %v12561_v20 = vld [vmem:[#allocation68_spill] sm:$0xff] }
 0x624   : > { %2480 = vrot.lane.b32.xlu0 %v12501_v18, %s7005_s23  ;;  %v12557_v18 = vld [vmem:[#allocation65_spill] sm:$0xff] }
 0x625   : > { %v2457_v37 = vpop.permute.xlu0 %2456 }
 0x626   : > { %v9378_v45 = vpop.f32.mrb[236].mxu1  ;;  %5704 = vmatpush3.bf16.msra.mxu0 %v2457_v37  ;;  %v2050_v37 = vsub.f32 %v12557_v18, %v8951_v4 }
 0x627   : > { %12552 = vst [vmem:[#allocation186_spill] sm:$0xff] %v9378_v45  ;;  %v9380_v46 = vpop.f32.mrb[237].mxu1  ;;  %v12559_v45 = vld [vmem:[#allocation67_spill] sm:$0xff] }
 0x628   : > { %12553 = vst [vmem:[#allocation187_spill] sm:$0xff] %v9380_v46  ;;  %v9384_v32 = vpop.f32.mrb[238].mxu1  ;;  %v2052_v14 = vsub.f32 %v12559_v45, %v8919_v35  ;;  %v2130_v55 = vmul.f32 1.442695, %v2050_v37  ;;  %v12563_v45 = vld [vmem:[#allocation69_spill] sm:$0xff] }
 0x629   : > { %12554 = vst [vmem:[#allocation188_spill] sm:$0xff] %v9384_v32  ;;  %v9386_v12 = vpop.f32.mrb[239].mxu1  ;;  %v2475_v30 = vpop.permute.xlu0 %2474  ;;  %v2132_v32 = vmul.f32 1.442695, %v2051_v22  ;;  %v12564_v22 = vld [vmem:[#allocation70_spill] sm:$0xff]  ;;  %v12565_v37 = vld [vmem:[#allocation117_spill] sm:$0xff] }
 0x62a   : > { %12555 = vst [vmem:[#allocation189_spill] sm:$0xff] %v9386_v12  ;;  %5705 = vmatprep.subr.bf16.mxu0 %v2475_v30  ;;  %v2053_v12 = vsub.f32 %v12561_v20, %v8919_v35  ;;  %v2134_v4 = vmul.f32 1.442695, %v2052_v14  ;;  %6449 = vpow2.f32 %v2130_v55  ;;  %v2056_v35 = vsub.f32 %v12378_v15, %v9013_v33 }
 0x62b   : > { %6451 = vpow2.f32 %v2132_v32 }
 0x62c   : > { %v2136_v61 = vmul.f32 1.442695, %v2053_v12  ;;  %6453 = vpow2.f32 %v2134_v4  ;;  %v2142_v32 = vmul.f32 1.442695, %v2056_v35 }
 0x62e   : > { %2464 = vrot.lane.b32.xlu1 %v12556_v34, %s7005_s23  ;;  %6455 = vpow2.f32 %v2136_v61 }
 0x630   : > { %v9396_v39 = vpop.xlane.xlu1 %2233 }
 0x631   : > { %v5631_v58 = vpop.f32.mrb[84].mxu0 }
 0x632   : > { %v5632_v46 = vpop.f32.mrb[85].mxu0 }
 0x633   : > { %v9400_v13 = vadd.f32 %v5632_v46, %v5631_v58  ;;  %v5634_v30 = vpop.f32.mrb[86].mxu0  ;;  %v2054_v46 = vsub.f32 %v12563_v45, %v8953_v28  ;;  %v2055_v58 = vsub.f32 %v12564_v22, %v8953_v28  ;;  %v2060_v28 = vsub.f32 %v12381_v27, %v9015_v56 }
 0x634   : > { %v5635_v34 = vpop.f32.mrb[87].mxu0  ;;  %v3764_v18 = vpop.permute.xlu1 %3763 }
 0x635   : > { %12560 = vst [vmem:[#allocation65_spill] sm:$0xff] %v9400_v13  ;;  %v9404_v51 = vadd.f32 %v5635_v34, %v5634_v30  ;;  %6015 = vmatprep.mubr.msk.bf16.mxu1 %vm574_vm1, %v3764_v18  ;;  %v2057_v34 = vsub.f32 %v12379_v8, %v9013_v33  ;;  %v9416_v20 = vpop.eup %6449  ;;  %v2138_v14 = vmul.f32 1.442695, %v2054_v46  ;;  %v12566_v30 = vld [vmem:[#allocation118_spill] sm:$0xff]  ;;  %v2140_v15 = vmul.f32 1.442695, %v2055_v58 }
 0x636   : > { %6016 = vmatmul.mubr.msk.bf16.gmra.mrb[252].mxu1 %vm574_vm1, %v3764_v18  ;;  %v9418_v55 = vpop.eup %6451  ;;  %v12567_v18 = vmax.f32 %v12565_v37, %v12566_v30  ;;  %v12572_v58 = vld [vmem:[#allocation73_spill] sm:$0xff]  ;;  %v2150_v13 = vmul.f32 1.442695, %v2060_v28 }
 0x637   : > { %12562 = vst [vmem:[#allocation66_spill] sm:$0xff] %v9404_v51  ;;  %v2144_v12 = vmul.f32 1.442695, %v2057_v34  ;;  %v9427_v8 = vpop.eup %6453  ;;  %6457 = vpow2.f32 %v2138_v14  ;;  %v2250_v46 = vadd.f32 %v9418_v55, %v9416_v20  ;;  %v2061_v34 = vsub.f32 %v12382_v0, %v9015_v56  ;;  %v12576_v28 = vld [vmem:[#allocation121_spill] sm:$0xff] }
 0x638   : > { %v9437_v35 = vpop.eup %6455  ;;  %6459 = vpow2.f32 %v2142_v32  ;;  %v2058_v27 = vsub.f32 %v12572_v58, %v9032_v50 }
 0x639   : > { %6461 = vpow2.f32 %v2144_v12  ;;  %v2253_v32 = vadd.f32 %v9437_v35, %v9427_v8  ;;  %v2152_v51 = vmul.f32 1.442695, %v2061_v34  ;;  %v12574_v12 = vld [vmem:[#allocation77_spill] sm:$0xff]  ;;  %v12577_v34 = vld [vmem:[#allocation122_spill] sm:$0xff] }
 0x63a   : > { %6463 = vpow2.f32 %v2140_v15  ;;  %v2146_v0 = vmul.f32 1.442695, %v2058_v27  ;;  %v2062_v58 = vsub.f32 %v12574_v12, %v9046_v9  ;;  %v12578_v27 = vmax.f32 %v12576_v28, %v12577_v34  ;;  %v12585_v34 = vld [vmem:[#allocation123_spill] sm:$0xff]  ;;  %v12586_v28 = vld [vmem:[#allocation124_spill] sm:$0xff] }
 0x63b   : > { %6465 = vpow2.f32 %v2150_v13 }
 0x63c   : > { %6467 = vpow2.f32 %v2152_v51  ;;  %v12579_v51 = vld [vmem:[#allocation78_spill] sm:$0xff] }
 0x63d   : > { %6469 = vpow2.f32 %v2146_v0  ;;  %v2154_v0 = vmul.f32 1.442695, %v2062_v58  ;;  %v12588_v58 = vld [vmem:[#allocation83_spill] sm:$0xff] }
 0x641   : > { %v9455_v14 = vpop.eup %6457 }
 0x642   : > { %12575 = vst [vmem:[#allocation117_spill] sm:$0xff] %v9455_v14  ;;  %v9462_v13 = vpop.eup %6459 }
 0x643   : > { %2029 = vmax.xlane.f32.xlu0 %v12567_v18  ;;  %v9423_v4 = vpop.f32.mrb[240].mxu1  ;;  %v12573_v18 = vld [vmem:[#allocation74_spill] sm:$0xff]  ;;  %v9468_v12 = vpop.eup %6461 }
 0x644   : > { %12568 = vst [vmem:[#allocation67_spill] sm:$0xff] %v9423_v4  ;;  %v9425_v61 = vpop.f32.mrb[241].mxu1  ;;  %v2059_v33 = vsub.f32 %v12573_v18, %v9032_v50  ;;  %v2065_v50 = vsub.f32 %v12405_v57, %v9087_v2  ;;  %v2063_v18 = vsub.f32 %v12579_v51, %v9046_v9  ;;  %v12587_v9 = vmax.f32 %v12585_v34, %v12586_v28  ;;  %v12598_v34 = vld [vmem:[#allocation126_spill] sm:$0xff] }
 0x645   : > { %12569 = vst [vmem:[#allocation68_spill] sm:$0xff] %v9425_v61  ;;  %v9433_v45 = vpop.f32.mrb[242].mxu1  ;;  %v12583_v61 = vld [vmem:[#allocation120_spill] sm:$0xff]  ;;  %v2068_v51 = vsub.f32 %v12588_v58, %v9099_v10 }
 0x646   : > { %12570 = vst [vmem:[#allocation69_spill] sm:$0xff] %v9433_v45  ;;  %v9441_v22 = vpop.f32.mrb[243].mxu1  ;;  %v2148_v56 = vmul.f32 1.442695, %v2059_v33  ;;  %v9470_v45 = vpop.eup %6463 }
 0x647   : > { %12571 = vst [vmem:[#allocation70_spill] sm:$0xff] %v9441_v22  ;;  %2251 = vadd.xlane.f32.xlu0 %v2250_v46  ;;  %v2064_v46 = vsub.f32 %v12404_v26, %v9087_v2 }
 0x648   : > { %6471 = vpow2.f32 %v2148_v56  ;;  %v2160_v56 = vmul.f32 1.442695, %v2065_v50  ;;  %v9488_v50 = vpop.eup %6465 }
 0x649   : > { %v2158_v57 = vmul.f32 1.442695, %v2064_v46  ;;  %6473 = vpow2.f32 %v2154_v0  ;;  %v12589_v46 = vld [vmem:[#allocation84_spill] sm:$0xff]  ;;  %v12591_v0 = vld [vmem:[#allocation82_spill] sm:$0xff] }
 0x64a   : > { %v2067_v58 = vsub.f32 %v12591_v0, %v9124_v7  ;;  %v12600_v0 = vld [vmem:[#allocation87_spill] sm:$0xff] }
 0x64b   : > { %2254 = vadd.xlane.f32.xlu0 %v2253_v32  ;;  %6475 = vpow2.f32 %v2158_v57  ;;  %v2166_v57 = vmul.f32 1.442695, %v2068_v51  ;;  %v2070_v51 = vsub.f32 %v12415_v42, %v9128_v29  ;;  %v12603_v42 = vld [vmem:[#allocation86_spill] sm:$0xff] }
 0x64c   : > { %6477 = vpow2.f32 %v2160_v56  ;;  %v12595_v56 = vld [vmem:[#allocation128_spill] sm:$0xff] }
 0x64e   : > { %v5637_v15 = vpop.f32.mrb[88].mxu0 }
 0x64f   : > { %3013 = vmax.xlane.f32.xlu0 %v12578_v27  ;;  %v5638_v33 = vpop.f32.mrb[89].mxu0  ;;  %v12582_v27 = vld [vmem:[#allocation119_spill] sm:$0xff] }
 0x650   : > { %v9466_v32 = vadd.f32 %v5638_v33, %v5637_v15  ;;  %v5640_v26 = vpop.f32.mrb[90].mxu0  ;;  %v12584_v4 = vmax.f32 %v12582_v27, %v12583_v61  ;;  %v2156_v15 = vmul.f32 1.442695, %v2063_v18  ;;  %v2259_v33 = vadd.f32 %v9468_v12, %v9462_v13  ;;  %v12590_v18 = vld [vmem:[#allocation81_spill] sm:$0xff] }
 0x651   : > { %v5641_v22 = vpop.f32.mrb[91].mxu0 }
 0x652   : > { %12580 = vst [vmem:[#allocation118_spill] sm:$0xff] %v9466_v32  ;;  %v9472_v2 = vadd.f32 %v5641_v22, %v5640_v26  ;;  %2032 = vmax.xlane.f32.xlu1 %v12584_v4  ;;  %v2256_v22 = vadd.f32 %v9470_v45, %v9455_v14  ;;  %v2069_v4 = vsub.f32 %v12589_v46, %v9099_v10  ;;  %6479 = vpow2.f32 %v2156_v15  ;;  %v12594_v46 = vld [vmem:[#allocation127_spill] sm:$0xff] }
 0x653   : > { %3016 = vmax.xlane.f32.xlu0 %v12587_v9  ;;  %v2066_v26 = vsub.f32 %v12590_v18, %v9124_v7  ;;  %v9492_v9 = vpop.eup %6467  ;;  %v12596_v28 = vmax.f32 %v12594_v46, %v12595_v56  ;;  %v2164_v15 = vmul.f32 1.442695, %v2067_v58  ;;  %6481 = vpow2.f32 %v2166_v57 }
 0x654   : > { %12581 = vst [vmem:[#allocation73_spill] sm:$0xff] %v9472_v2  ;;  %v9496_v32 = vpop.eup %6469  ;;  %v2168_v10 = vmul.f32 1.442695, %v2069_v4  ;;  %v2265_v7 = vadd.f32 %v9492_v9, %v9488_v50  ;;  %v2071_v46 = vsub.f32 %v12603_v42, %v9128_v29 }
 0x655   : > { %12592 = vst [vmem:[#allocation74_spill] sm:$0xff] %v9496_v32  ;;  %v9498_v2 = vpop.eup %6471  ;;  %v2162_v18 = vmul.f32 1.442695, %v2066_v26 }
 0x656   : > { %2260 = vadd.xlane.f32.xlu1 %v2259_v33  ;;  %12593 = vst [vmem:[#allocation77_spill] sm:$0xff] %v9498_v2  ;;  %v2262_v4 = vadd.f32 %v9498_v2, %v9496_v32  ;;  %6483 = vpow2.f32 %v2168_v10  ;;  %v9516_v56 = vpop.eup %6473  ;;  %v12605_v32 = vld [vmem:[#allocation131_spill] sm:$0xff] }
 0x657   : > { %2257 = vadd.xlane.f32.xlu0 %v2256_v22  ;;  %v12597_v22 = vld [vmem:[#allocation125_spill] sm:$0xff]  ;;  %12601 = vst [vmem:[#allocation78_spill] sm:$0xff] %v9516_v56  ;;  %6485 = vpow2.f32 %v2162_v18  ;;  %v9520_v57 = vpop.eup %6475  ;;  %v12606_v18 = vld [vmem:[#allocation132_spill] sm:$0xff] }
 0x658   : > { %v12599_v14 = vmax.f32 %v12597_v22, %v12598_v34  ;;  %6487 = vpow2.f32 %v2164_v15  ;;  %v9524_v10 = vpop.eup %6477  ;;  %v2170_v34 = vmul.f32 1.442695, %v2070_v51  ;;  %v12607_v2 = vmax.f32 %v12605_v32, %v12606_v18 }
 0x659   : > { %v2172_v15 = vmul.f32 1.442695, %v2071_v46  ;;  %v2271_v29 = vadd.f32 %v9524_v10, %v9520_v57  ;;  %v2076_v51 = vsub.f32 %v12430_v54, %v9187_v53 }
 0x65a   : > { %v9500_v33 = vpop.xlane.xlu0 %2017  ;;  %3022 = vmax.xlane.f32.xlu1 %v12596_v28  ;;  %v2072_v28 = vsub.f32 %v12600_v0, %v9177_v59  ;;  %6489 = vpow2.f32 %v2170_v34  ;;  %v2074_v34 = vsub.f32 %v12438_v38, %v9216_v11 }
 0x65b   : > { %3019 = vmax.xlane.f32.xlu0 %v12599_v14  ;;  %v12602_v14 = vld [vmem:[#allocation88_spill] sm:$0xff] }
 0x65c   : > { %v2073_v58 = vsub.f32 %v12602_v14, %v9177_v59  ;;  %v9526_v0 = vpop.eup %6479 }
 0x65d   : > { %12604 = vst [vmem:[#allocation119_spill] sm:$0xff] %v9526_v0  ;;  %v2268_v42 = vadd.f32 %v9526_v0, %v9516_v56  ;;  %v9546_v46 = vpop.eup %6481 }
 0x65e   : > { %v2459_v26 = vpop.permute.xlu0 %2458  ;;  %2266 = vadd.xlane.f32.xlu1 %v2265_v7  ;;  %v2174_v7 = vmul.f32 1.442695, %v2072_v28  ;;  %v2176_v59 = vmul.f32 1.442695, %v2073_v58  ;;  %12612 = vst [vmem:[#allocation83_spill] sm:$0xff] %v9546_v46 }
 0x65f   : > { %2263 = vadd.xlane.f32.xlu0 %v2262_v4  ;;  %5706 = vmatpush3.bf16.msra.mxu0 %v2459_v26  ;;  %v12608_v4 = vld [vmem:[#allocation129_spill] sm:$0xff]  ;;  %v12609_v26 = vld [vmem:[#allocation130_spill] sm:$0xff] }
 0x660   : > { %v12610_v14 = vmax.f32 %v12608_v4, %v12609_v26  ;;  %6491 = vpow2.f32 %v2174_v7  ;;  %v12614_v7 = vld [vmem:[#allocation90_spill] sm:$0xff]  ;;  %v12617_v26 = vld [vmem:[#allocation135_spill] sm:$0xff] }
 0x661   : > { %6493 = vpow2.f32 %v2176_v59  ;;  %v2182_v59 = vmul.f32 1.442695, %v2076_v51 }
 0x662   : > { %v2477_v22 = vpop.permute.xlu0 %2476  ;;  %3028 = vmax.xlane.f32.xlu1 %v12607_v2  ;;  %v2077_v2 = vsub.f32 %v12431_v5, %v9187_v53  ;;  %6495 = vpow2.f32 %v2172_v15  ;;  %v2178_v5 = vmul.f32 1.442695, %v2074_v34  ;;  %v2080_v34 = vsub.f32 %v12461_v63, %v9273_v6 }
 0x663   : > { %3025 = vmax.xlane.f32.xlu0 %v12610_v14  ;;  %5707 = vmatprep.subr.bf16.mxu0 %v2477_v22  ;;  %v9552_v22 = vpop.eup %6483  ;;  %v2075_v14 = vsub.f32 %v12614_v7, %v9216_v11  ;;  %v12618_v11 = vld [vmem:[#allocation136_spill] sm:$0xff]  ;;  %6497 = vpow2.f32 %v2182_v59 }
 0x664   : > { %v2184_v32 = vmul.f32 1.442695, %v2077_v2  ;;  %v12619_v7 = vmax.f32 %v12617_v26, %v12618_v11  ;;  %v2277_v56 = vadd.f32 %v9552_v22, %v9546_v46  ;;  %v2078_v2 = vsub.f32 %v12451_v21, %v9248_v1  ;;  %v12624_v26 = vld [vmem:[#allocation140_spill] sm:$0xff] }
 0x665   : > { %v9538_v28 = vpop.xlane.xlu1 %2020  ;;  %v2180_v51 = vmul.f32 1.442695, %v2075_v14  ;;  %v2079_v21 = vsub.f32 %v12452_v41, %v9248_v1  ;;  %v12628_v41 = vld [vmem:[#allocation138_spill] sm:$0xff] }
 0x666   : > { %2272 = vadd.xlane.f32.xlu1 %v2271_v29  ;;  %v9544_v58 = vpop.f32.mrb[244].mxu1  ;;  %v9560_v29 = vpop.eup %6485  ;;  %6499 = vpow2.f32 %v2184_v32  ;;  %v2186_v32 = vmul.f32 1.442695, %v2078_v2 }
 0x667   : > { %12611 = vst [vmem:[#allocation120_spill] sm:$0xff] %v9544_v58  ;;  %2269 = vadd.xlane.f32.xlu0 %v2268_v42  ;;  %v9550_v54 = vpop.f32.mrb[245].mxu1  ;;  %v9566_v42 = vpop.eup %6487  ;;  %v12621_v58 = vld [vmem:[#allocation134_spill] sm:$0xff]  ;;  %6501 = vpow2.f32 %v2178_v5  ;;  %v12623_v5 = vld [vmem:[#allocation139_spill] sm:$0xff] }
 0x668   : > { %12613 = vst [vmem:[#allocation84_spill] sm:$0xff] %v9550_v54  ;;  %v9558_v53 = vpop.f32.mrb[246].mxu1  ;;  %v12620_v54 = vld [vmem:[#allocation133_spill] sm:$0xff]  ;;  %v2274_v15 = vadd.f32 %v9566_v42, %v9560_v29  ;;  %6503 = vpow2.f32 %v2180_v51  ;;  %v2479_v11 = vpop.permute.xlu0 %2478 }
 0x669   : > { %12615 = vst [vmem:[#allocation81_spill] sm:$0xff] %v9558_v53  ;;  %v9562_v18 = vpop.f32.mrb[247].mxu1  ;;  %v9564_v38 = vpop.xlane.xlu1 %2239  ;;  %v12622_v4 = vmax.f32 %v12620_v54, %v12621_v58  ;;  %v12625_v58 = vmax.f32 %v12623_v5, %v12624_v26  ;;  %v12627_v51 = vld [vmem:[#allocation137_spill] sm:$0xff]  ;;  %v2188_v54 = vmul.f32 1.442695, %v2079_v21  ;;  %6505 = vpow2.f32 %v2186_v32 }
 0x66a   : > { %12616 = vst [vmem:[#allocation82_spill] sm:$0xff] %v9562_v18  ;;  %3034 = vmax.xlane.f32.xlu1 %v12619_v7  ;;  %v9586_v7 = vpop.eup %6489  ;;  %v12629_v1 = vmax.f32 %v12627_v51, %v12628_v41  ;;  %v2082_v21 = vsub.f32 %v12488_v60, %v9368_v24  ;;  %v12636_v60 = vld [vmem:[#allocation142_spill] sm:$0xff] }
 0x66b   : > { %3031 = vmax.xlane.f32.xlu0 %v12622_v4  ;;  %v2081_v4 = vsub.f32 %v12462_v44, %v9273_v6  ;;  %v9590_v14 = vpop.eup %6491 }
 0x66c   : > { %v9594_v59 = vpop.eup %6493 }
 0x66d   : > { %v9580_v0 = vpop.xlane.xlu1 %2242  ;;  %v9596_v63 = vpop.eup %6495  ;;  %v2192_v6 = vmul.f32 1.442695, %v2081_v4 }
 0x66e   : > { %2278 = vadd.xlane.f32.xlu1 %v2277_v56  ;;  %v2190_v56 = vmul.f32 1.442695, %v2080_v34  ;;  %v2283_v34 = vadd.f32 %v9594_v59, %v9590_v14 }
 0x66f   : > { %2275 = vadd.xlane.f32.xlu0 %v2274_v15 }
 0x670   : > { %6507 = vpow2.f32 %v2190_v56 }
 0x671   : > { %v5643_v18 = vpop.f32.mrb[92].mxu0  ;;  %v2461_v53 = vpop.permute.xlu1 %2460  ;;  %6509 = vpow2.f32 %v2192_v6  ;;  %v2194_v6 = vmul.f32 1.442695, %v2082_v21  ;;  %v2089_v21 = vsub.f32 %v12518_v62, %v9538_v28  ;;  %v12642_v62 = vld [vmem:[#allocation146_spill] sm:$0xff] }
 0x672   : > { %3040 = vmax.xlane.f32.xlu1 %v12625_v58  ;;  %v5644_v44 = vpop.f32.mrb[93].mxu0  ;;  %5708 = vmatpush3.bf16.msra.mxu0 %v2461_v53  ;;  %v2084_v58 = vsub.f32 %v12473_v23, %v9316_v19  ;;  %v12631_v53 = vld [vmem:[#allocation107_spill] sm:$0xff]  ;;  %6511 = vpow2.f32 %v2188_v54  ;;  %v2083_v23 = vsub.f32 %v12489_v47, %v9368_v24  ;;  %v2086_v47 = vsub.f32 %v12510_v3, %v9500_v33 }
 0x673   : > { %v9601_v15 = vadd.f32 %v5644_v44, %v5643_v18  ;;  %3037 = vmax.xlane.f32.xlu0 %v12629_v1  ;;  %v5646_v2 = vpop.f32.mrb[94].mxu0  ;;  %5709 = vmatprep.subr.bf16.mxu0 %v2479_v11  ;;  %v2280_v18 = vadd.f32 %v9596_v63, %v9586_v7  ;;  %v2085_v4 = vsub.f32 %v12631_v53, %v9316_v19  ;;  %v9616_v11 = vpop.eup %6497  ;;  %v12632_v1 = vld [vmem:[#allocation143_spill] sm:$0xff]  ;;  %v12635_v53 = vld [vmem:[#allocation141_spill] sm:$0xff] }
 0x674   : > { %v5647_v46 = vpop.f32.mrb[95].mxu0  ;;  %v9620_v32 = vpop.eup %6499  ;;  %v2198_v56 = vmul.f32 1.442695, %v2084_v58  ;;  %v2088_v58 = vsub.f32 %v12517_v36, %v9538_v28  ;;  %v2087_v3 = vsub.f32 %v12511_v40, %v9500_v33 }
 0x675   : > { %12626 = vst [vmem:[#allocation87_spill] sm:$0xff] %v9601_v15  ;;  %v9610_v26 = vadd.f32 %v5647_v46, %v5646_v2  ;;  %v9624_v46 = vpop.eup %6501  ;;  %v2200_v19 = vmul.f32 1.442695, %v2085_v4  ;;  %v12633_v2 = vld [vmem:[#allocation144_spill] sm:$0xff]  ;;  %v2196_v15 = vmul.f32 1.442695, %v2083_v23  ;;  %v2289_v54 = vadd.f32 %v9620_v32, %v9616_v11 }
 0x676   : > { %2284 = vadd.xlane.f32.xlu1 %v2283_v34  ;;  %v9626_v44 = vpop.eup %6503  ;;  %v12634_v34 = vmax.f32 %v12632_v1, %v12633_v2  ;;  %6513 = vpow2.f32 %v2198_v56  ;;  %v2206_v36 = vmul.f32 1.442695, %v2088_v58  ;;  %v12641_v2 = vld [vmem:[#allocation145_spill] sm:$0xff] }
 0x677   : > { %12630 = vst [vmem:[#allocation88_spill] sm:$0xff] %v9610_v26  ;;  %2281 = vadd.xlane.f32.xlu0 %v2280_v18  ;;  %v12637_v18 = vmax.f32 %v12635_v53, %v12636_v60  ;;  %v2286_v24 = vadd.f32 %v9626_v44, %v9624_v46  ;;  %6515 = vpow2.f32 %v2200_v19  ;;  %v9642_v4 = vpop.eup %6505  ;;  %v2202_v19 = vmul.f32 1.442695, %v2086_v47 }
 0x678   : > { %6517 = vpow2.f32 %v2194_v6  ;;  %v2208_v6 = vmul.f32 1.442695, %v2089_v21  ;;  %v12643_v28 = vmax.f32 %v12641_v2, %v12642_v62  ;;  %v12644_v21 = vld [vmem:[#allocation151_spill] sm:$0xff] }
 0x679   : > { %6519 = vpow2.f32 %v2196_v15 }
 0x67a   : > { %3046 = vmax.xlane.f32.xlu1 %v12634_v34  ;;  %v9646_v23 = vpop.eup %6507  ;;  %6521 = vpow2.f32 %v2202_v19  ;;  %v12647_v19 = vld [vmem:[#allocation149_spill] sm:$0xff] }
 0x67b   : > { %3043 = vmax.xlane.f32.xlu0 %v12637_v18  ;;  %v9650_v56 = vpop.eup %6509  ;;  %v12638_v18 = vld [vmem:[#allocation147_spill] sm:$0xff]  ;;  %6523 = vpow2.f32 %v2206_v36 }
 0x67c   : > { %v9652_v34 = vpop.eup %6511  ;;  %v2295_v15 = vadd.f32 %v9650_v56, %v9646_v23  ;;  %6525 = vpow2.f32 %v2208_v6 }
 0x67d   : > { %v2292_v40 = vadd.f32 %v9652_v34, %v9642_v4 }
 0x67e   : > { %2290 = vadd.xlane.f32.xlu1 %v2289_v54  ;;  %v12639_v54 = vld [vmem:[#allocation148_spill] sm:$0xff] }
 0x67f   : > { %2287 = vadd.xlane.f32.xlu0 %v2286_v24  ;;  %v12640_v26 = vmax.f32 %v12638_v18, %v12639_v54  ;;  %v2204_v24 = vmul.f32 1.442695, %v2087_v3  ;;  %v12645_v3 = vld [vmem:[#allocation152_spill] sm:$0xff]  ;;  %v12648_v54 = vld [vmem:[#allocation150_spill] sm:$0xff] }
 0x680   : > { %v9664_v33 = vpop.eup %6513  ;;  %v12649_v18 = vmax.f32 %v12647_v19, %v12648_v54  ;;  %v12654_v19 = vld [vmem:[#allocation154_spill] sm:$0xff] }
 0x681   : > { %6527 = vpow2.f32 %v2204_v24 }
 0x682   : > { %3052 = vmax.xlane.f32.xlu1 %v12640_v26  ;;  %v9666_v26 = vpop.eup %6515 }
 0x683   : > { %3049 = vmax.xlane.f32.xlu0 %v12643_v28  ;;  %v9668_v47 = vpop.eup %6517  ;;  %v12646_v28 = vmax.f32 %v12644_v21, %v12645_v3  ;;  %v2301_v36 = vadd.f32 %v9666_v26, %v9664_v33  ;;  %v12651_v21 = vld [vmem:[#allocation156_spill] sm:$0xff] }
 0x684   : > { %v9670_v58 = vpop.eup %6519 }
 0x685   : > { %v2298_v6 = vadd.f32 %v9670_v58, %v9668_v47  ;;  %v9682_v24 = vpop.eup %6521 }
 0x686   : > { %2296 = vadd.xlane.f32.xlu1 %v2295_v15  ;;  %v9684_v15 = vpop.eup %6523 }
 0x687   : > { %2293 = vadd.xlane.f32.xlu0 %v2292_v40  ;;  %v9686_v40 = vpop.eup %6525 }
 0x68a   : > { %3058 = vmax.xlane.f32.xlu1 %v12646_v28  ;;  %v12650_v28 = vld [vmem:[#allocation155_spill] sm:$0xff] }
 0x68b   : > { %3055 = vmax.xlane.f32.xlu0 %v12649_v18  ;;  %v9688_v3 = vpop.eup %6527  ;;  %v12652_v54 = vmax.f32 %v12650_v28, %v12651_v21  ;;  %v12653_v18 = vld [vmem:[#allocation153_spill] sm:$0xff]  ;;  %v12657_v28 = vld [vmem:[#allocation160_spill] sm:$0xff] }
 0x68c   : > { %v12655_v1 = vmax.f32 %v12653_v18, %v12654_v19  ;;  %v12659_v19 = vld [vmem:[#allocation157_spill] sm:$0xff]  ;;  %v12660_v18 = vld [vmem:[#allocation158_spill] sm:$0xff] }
 0x68d   : > { %v12661_v41 = vmax.f32 %v12659_v19, %v12660_v18  ;;  %v12672_v18 = vld [vmem:[#allocation164_spill] sm:$0xff] }
 0x68e   : > { %2302 = vadd.xlane.f32.xlu1 %v2301_v36  ;;  %v2307_v36 = vadd.f32 %v9686_v40, %v9684_v15 }
 0x68f   : > { %2299 = vadd.xlane.f32.xlu0 %v2298_v6  ;;  %v2304_v6 = vadd.f32 %v9688_v3, %v9682_v24 }
 0x692   : > { %3064 = vmax.xlane.f32.xlu1 %v12652_v54  ;;  %v12656_v54 = vld [vmem:[#allocation159_spill] sm:$0xff] }
 0x693   : > { %3061 = vmax.xlane.f32.xlu0 %v12655_v1  ;;  %v12658_v5 = vmax.f32 %v12656_v54, %v12657_v28  ;;  %v12669_v54 = vld [vmem:[#allocation96_spill] sm:$0xff] }
 0x696   : > { %2308 = vadd.xlane.f32.xlu1 %v2307_v36 }
 0x697   : > { %v2024_v62 = vpop.xlane.xlu0 %2023  ;;  %2305 = vadd.xlane.f32.xlu0 %v2304_v6  ;;  %v12662_v6 = vld [vmem:[#allocation161_spill] sm:$0xff] }
 0x698   : > { %v2090_v2 = vsub.f32 %v12539_v49, %v2024_v62  ;;  %v2091_v60 = vsub.f32 %v12540_v25, %v2024_v62 }
 0x69a   : > { %v2210_v53 = vmul.f32 1.442695, %v2090_v2  ;;  %v2212_v21 = vmul.f32 1.442695, %v2091_v60  ;;  %3070 = vmax.xlane.f32.xlu1 %v12658_v5 }
 0x69b   : > { %v2463_v1 = vpop.permute.xlu0 %2462  ;;  %3067 = vmax.xlane.f32.xlu0 %v12661_v41 }
 0x69c   : > { %6529 = vpow2.f32 %v2210_v53  ;;  %5710 = vmatpush3.bf16.msra.mxu0 %v2463_v1  ;;  %v12663_v1 = vld [vmem:[#allocation162_spill] sm:$0xff] }
 0x69d   : > { %6531 = vpow2.f32 %v2212_v21 }
 0x69e   : > { %6533 = vrcp.f32 %v9396_v39 }
 0x69f   : > { %v2481_v36 = vpop.permute.xlu0 %2480  ;;  %6535 = vrcp.f32 %v9372_v52 }
 0x6a0   : > { %5711 = vmatprep.subr.bf16.mxu0 %v2481_v36  ;;  %6537 = vrcp.f32 %v9580_v0  ;;  %v12664_v36 = vmax.f32 %v12662_v6, %v12663_v1 }
 0x6a2   : > { %v2027_v49 = vpop.xlane.xlu1 %2026 }
 0x6a3   : > { %v2092_v25 = vsub.f32 %v12546_v43, %v2027_v49  ;;  %v2093_v2 = vsub.f32 %v12547_v31, %v2027_v49 }
 0x6a5   : > { %v2214_v5 = vmul.f32 1.442695, %v2092_v25  ;;  %v2216_v60 = vmul.f32 1.442695, %v2093_v2 }
 0x6a6   : > { %v9712_v62 = vpop.eup %6529  ;;  %v2246_v41 = vpop.xlane.xlu1 %2245 }
 0x6a7   : > { %v9715_v53 = vpop.eup %6531  ;;  %6539 = vpow2.f32 %v2214_v5 }
 0x6a8   : > { %6541 = vpow2.f32 %v2216_v60  ;;  %v2310_v39 = vadd.f32 %v9715_v53, %v9712_v62  ;;  %v6534_v52 = vpop.eup %6533 }
 0x6a9   : > { %6543 = vrcp.f32 %v9564_v38  ;;  %v6536_v31 = vpop.eup %6535  ;;  %v2359_v21 = vmul.f32 %v6534_v52, %v9214_v48  ;;  %v12665_v38 = vld [vmem:[#allocation60_spill] sm:$0xff] }
 0x6aa   : > { %2311 = vadd.xlane.f32.xlu0 %v2310_v39  ;;  %v2249_v43 = vpop.xlane.xlu1 %2248  ;;  %v2361_v49 = vmul.f32 %v6536_v31, %v9191_v16  ;;  %v6538_v25 = vpop.eup %6537  ;;  %v12666_v39 = vpack.c.bf16 %v9328_v17, %v12665_v38  ;;  %v12668_v16 = vld [vmem:[#allocation111_spill] sm:$0xff]  ;;  %v2360_v1 = vmul.f32 %v6536_v31, %v12669_v54 }
 0x6ab   : > { %6545 = vrcp.f32 %v2249_v43  ;;  %v2365_v43 = vmul.f32 %v6538_v25, %v12668_v16 }
 0x6ac   : > { %v2421_v5 = vpack.c.bf16 %v2361_v49, %v2359_v21  ;;  %6547 = vrcp.f32 %v2246_v41  ;;  %v12670_v21 = vld [vmem:[#allocation109_spill] sm:$0xff]  ;;  %v12671_v41 = vld [vmem:[#allocation163_spill] sm:$0xff] }
 0x6ad   : > { %v12673_v19 = vmax.f32 %v12671_v41, %v12672_v18 }
 0x6ae   : > { %3073 = vmax.xlane.f32.xlu0 %v12664_v36  ;;  %v2465_v0 = vpop.permute.xlu1 %2464 }
 0x6af   : > { %5712 = vmatpush3.bf16.msra.mxu0 %v2465_v0  ;;  %v12667_v0 = vld [vmem:[#allocation48_spill] sm:$0xff] }
 0x6b0   : > { %v2358_v28 = vmul.f32 %v6534_v52, %v12667_v0  ;;  %v12679_v0 = vld [vmem:[#allocation116_spill] sm:$0xff] }
 0x6b1   : > { %v9725_v2 = vpop.eup %6539 }
 0x6b2   : > { %v9727_v60 = vpop.eup %6541  ;;  %2531 = vmatmul.mubr.bf16.vlgmr.msra.gmra.mrb[96].mxu0 %v12666_v39  ;;  %v2420_v6 = vpack.c.bf16 %v2360_v1, %v2358_v28  ;;  %v12678_v28 = vld [vmem:[#allocation110_spill] sm:$0xff] }
 0x6b3   : > { %2538 = vmatprep.mubr.bf16.mxu0 %v2421_v5  ;;  %v2313_v48 = vadd.f32 %v9727_v60, %v9725_v2  ;;  %v6544_v36 = vpop.eup %6543  ;;  %v2364_v1 = vmul.f32 %v6538_v25, %v12678_v28 }
 0x6b4   : > { %v2363_v49 = vmul.f32 %v6544_v36, %v12670_v21  ;;  %v12681_v21 = vld [vmem:[#allocation185_spill] sm:$0xff] }
 0x6b5   : > { %2314 = vadd.xlane.f32.xlu1 %v2313_v48  ;;  %v6546_v38 = vpop.eup %6545 }
 0x6b6   : > { %v2423_v5 = vpack.c.bf16 %v2365_v43, %v2363_v49  ;;  %v6548_v54 = vpop.eup %6547  ;;  %v2369_v16 = vmul.f32 %v6546_v38, %v12679_v0  ;;  %v12680_v43 = vld [vmem:[#allocation56_spill] sm:$0xff] }
 0x6b7   : > { %v2367_v49 = vmul.f32 %v6548_v54, %v12681_v21 }
 0x6b9   : > { %3076 = vmax.xlane.f32.xlu1 %v12673_v19  ;;  %v9741_v17 = vpop.f32.mrb[248].mxu1  ;;  %v2425_v41 = vpack.c.bf16 %v2369_v16, %v2367_v49 }
 0x6ba   : > { %12674 = vst [vmem:[#allocation86_spill] sm:$0xff] %v9741_v17  ;;  %2539 = vmatmul.mubr.bf16.gmra.mrb[100].mxu0 %v2420_v6  ;;  %v9743_v39 = vpop.f32.mrb[249].mxu1  ;;  %v2362_v6 = vmul.f32 %v6544_v36, %v12680_v43 }
 0x6bb   : > { %12675 = vst [vmem:[#allocation90_spill] sm:$0xff] %v9743_v39  ;;  %2546 = vmatprep.mubr.bf16.mxu0 %v2423_v5  ;;  %v9747_v48 = vpop.f32.mrb[250].mxu1  ;;  %v12682_v5 = vld [vmem:[#allocation115_spill] sm:$0xff]  ;;  %v12683_v39 = vld [vmem:[#allocation114_spill] sm:$0xff] }
 0x6bc   : > { %12676 = vst [vmem:[#allocation107_spill] sm:$0xff] %v9747_v48  ;;  %v9749_v31 = vpop.f32.mrb[251].mxu1  ;;  %v2422_v18 = vpack.c.bf16 %v2364_v1, %v2362_v6  ;;  %v2368_v52 = vmul.f32 %v6546_v38, %v12682_v5  ;;  %v2366_v17 = vmul.f32 %v6548_v54, %v12683_v39  ;;  %v12695_v48 = vld [vmem:[#allocation122_spill] sm:$0xff] }
 0x6bd   : > { %12677 = vst [vmem:[#allocation60_spill] sm:$0xff] %v9749_v31 }
 0x6be   : > { %v2424_v51 = vpack.c.bf16 %v2368_v52, %v2366_v17 }
 0x6c2   : > { %2547 = vmatmul.mubr.bf16.gmra.mrb[104].mxu0 %v2422_v18 }
 0x6c3   : > { %2554 = vmatprep.mubr.bf16.mxu0 %v2425_v41 }
 0x6ca   : > { %2555 = vmatmul.mubr.bf16.gmra.mrb[108].mxu0 %v2424_v51 }
 0x6d0   : > { %v2030_v25 = vpop.xlane.xlu0 %2029 }
 0x6d1   : > { %v2094_v28 = vsub.f32 %v12565_v37, %v2030_v25  ;;  %v2095_v19 = vsub.f32 %v12566_v30, %v2030_v25 }
 0x6d3   : > { %v2218_v0 = vmul.f32 1.442695, %v2094_v28  ;;  %v2220_v31 = vmul.f32 1.442695, %v2095_v19 }
 0x6d4   : > { %v2252_v36 = vpop.xlane.xlu0 %2251 }
 0x6d5   : > { %6549 = vpow2.f32 %v2218_v0 }
 0x6d6   : > { %6551 = vpow2.f32 %v2220_v31 }
 0x6d7   : > { %6553 = vrcp.f32 %v2252_v36 }
 0x6d8   : > { %v2255_v1 = vpop.xlane.xlu0 %2254 }
 0x6d9   : > { %6555 = vrcp.f32 %v2255_v1 }
 0x6dc   : > { %v9761_v18 = vpop.xlane.xlu0 %3013 }
 0x6df   : > { %v9763_v41 = vpop.eup %6549  ;;  %v2033_v38 = vpop.xlane.xlu1 %2032 }
 0x6e0   : > { %v9765_v17 = vpop.eup %6551  ;;  %v2096_v51 = vsub.f32 %v12582_v27, %v2033_v38  ;;  %v2097_v37 = vsub.f32 %v12583_v61, %v2033_v38  ;;  %v9769_v30 = vpop.xlane.xlu0 %3016 }
 0x6e1   : > { %v6554_v39 = vpop.eup %6553  ;;  %v2316_v52 = vadd.f32 %v9765_v17, %v9763_v41 }
 0x6e2   : > { %v2222_v54 = vmul.f32 1.442695, %v2096_v51  ;;  %v2224_v31 = vmul.f32 1.442695, %v2097_v37  ;;  %v2371_v43 = vmul.f32 %v6554_v39, %v9418_v55  ;;  %v2370_v27 = vmul.f32 %v6554_v39, %v9416_v20 }
 0x6e3   : > { %v6556_v19 = vpop.eup %6555  ;;  %2317 = vadd.xlane.f32.xlu0 %v2316_v52  ;;  %v2261_v16 = vpop.xlane.xlu1 %2260 }
 0x6e4   : > { %6557 = vpow2.f32 %v2222_v54  ;;  %v2258_v6 = vpop.xlane.xlu0 %2257  ;;  %v2373_v21 = vmul.f32 %v6556_v19, %v9437_v35  ;;  %v2372_v61 = vmul.f32 %v6556_v19, %v9427_v8  ;;  %v12684_v19 = vld [vmem:[#allocation117_spill] sm:$0xff] }
 0x6e5   : > { %6559 = vpow2.f32 %v2224_v31 }
 0x6e6   : > { %v2427_v49 = vpack.c.bf16 %v2373_v21, %v2371_v43  ;;  %v2426_v5 = vpack.c.bf16 %v2372_v61, %v2370_v27  ;;  %6561 = vrcp.f32 %v2261_v16  ;;  %v12686_v21 = vld [vmem:[#allocation166_spill] sm:$0xff] }
 0x6e7   : > { %v9777_v25 = vpop.xlane.xlu1 %3022  ;;  %6563 = vrcp.f32 %v2258_v6  ;;  %v12685_v6 = vld [vmem:[#allocation165_spill] sm:$0xff] }
 0x6e8   : > { %v9779_v28 = vpop.xlane.xlu0 %3019  ;;  %2562 = vmatprep.mubr.bf16.mxu0 %v2427_v49  ;;  %v12687_v27 = vmax.f32 %v12685_v6, %v12686_v21 }
 0x6e9   : > { %2563 = vmatmul.mubr.bf16.gmra.mrb[112].mxu0 %v2426_v5 }
 0x6eb   : > { %v2267_v55 = vpop.xlane.xlu1 %2266 }
 0x6ec   : > { %v2264_v0 = vpop.xlane.xlu0 %2263  ;;  %6565 = vrcp.f32 %v2267_v55  ;;  %v12690_v55 = vld [vmem:[#allocation168_spill] sm:$0xff] }
 0x6ed   : > { %6567 = vrcp.f32 %v2264_v0 }
 0x6ee   : > { %v9781_v36 = vpop.eup %6557 }
 0x6ef   : > { %v9783_v35 = vpop.eup %6559  ;;  %v9785_v20 = vpop.xlane.xlu1 %3028 }
 0x6f0   : > { %v9787_v8 = vpop.xlane.xlu0 %3025  ;;  %v2319_v1 = vadd.f32 %v9783_v35, %v9781_v36  ;;  %v6562_v38 = vpop.eup %6561 }
 0x6f1   : > { %v6564_v51 = vpop.eup %6563  ;;  %v2377_v39 = vmul.f32 %v6562_v38, %v9468_v12  ;;  %v2376_v52 = vmul.f32 %v6562_v38, %v9462_v13  ;;  %v12688_v13 = vld [vmem:[#allocation11_spill] sm:$0xff] }
 0x6f2   : > { %2320 = vadd.xlane.f32.xlu1 %v2319_v1  ;;  %v2375_v31 = vmul.f32 %v6564_v51, %v9470_v45  ;;  %v2374_v16 = vmul.f32 %v6564_v51, %v12684_v19  ;;  %v12689_v12 = vld [vmem:[#allocation167_spill] sm:$0xff] }
 0x6f3   : > { %v2273_v37 = vpop.xlane.xlu1 %2272  ;;  %v12691_v0 = vmax.f32 %v12689_v12, %v12690_v55 }
 0x6f4   : > { %v2270_v54 = vpop.xlane.xlu0 %2269  ;;  %v2429_v43 = vpack.c.bf16 %v2377_v39, %v2375_v31  ;;  %v2428_v61 = vpack.c.bf16 %v2376_v52, %v2374_v16  ;;  %6569 = vrcp.f32 %v2273_v37  ;;  %v12692_v52 = vld [vmem:[#allocation77_spill] sm:$0xff] }
 0x6f5   : > { %6571 = vrcp.f32 %v2270_v54  ;;  %v12693_v54 = vld [vmem:[#allocation74_spill] sm:$0xff]  ;;  %v12694_v16 = vld [vmem:[#allocation121_spill] sm:$0xff] }
 0x6f6   : > { %3079 = vmax.xlane.f32.xlu1 %v12687_v27  ;;  %2570 = vmatprep.mubr.bf16.mxu0 %v2429_v43  ;;  %v6566_v45 = vpop.eup %6565  ;;  %v3108_v43 = vsub.f32 %v12694_v16, %v9761_v18 }
 0x6f7   : > { %v9798_v49 = vpop.xlane.xlu1 %3034  ;;  %2571 = vmatmul.mubr.bf16.gmra.mrb[116].mxu0 %v2428_v61  ;;  %v6568_v1 = vpop.eup %6567  ;;  %v2381_v51 = vmul.f32 %v6566_v45, %v9492_v9  ;;  %v2380_v37 = vmul.f32 %v6566_v45, %v9488_v50 }
 0x6f8   : > { %v9800_v5 = vpop.xlane.xlu0 %3031  ;;  %v2379_v31 = vmul.f32 %v6568_v1, %v12692_v52  ;;  %v2378_v19 = vmul.f32 %v6568_v1, %v12693_v54  ;;  %v3172_v45 = vmul.f32 1.442695, %v3108_v43 }
 0x6f9   : > { %3540 = vrot.lane.b32.xlu0 %v12688_v13, %s7006_s24  ;;  %v3109_v13 = vsub.f32 %v12695_v48, %v9761_v18  ;;  %v12697_v18 = vld [vmem:[#allocation78_spill] sm:$0xff] }
 0x6fa   : > { %3082 = vmax.xlane.f32.xlu1 %v12691_v0  ;;  %v2431_v27 = vpack.c.bf16 %v2381_v51, %v2379_v31  ;;  %v2430_v61 = vpack.c.bf16 %v2380_v37, %v2378_v19  ;;  %v12696_v31 = vld [vmem:[#allocation119_spill] sm:$0xff] }
 0x6fb   : > { %v2279_v38 = vpop.xlane.xlu1 %2278  ;;  %v3174_v1 = vmul.f32 1.442695, %v3109_v13 }
 0x6fc   : > { %v2276_v39 = vpop.xlane.xlu0 %2275  ;;  %6573 = vrcp.f32 %v2279_v38  ;;  %2578 = vmatprep.mubr.bf16.mxu0 %v2431_v27 }
 0x6fd   : > { %6575 = vrcp.f32 %v2276_v39 }
 0x6fe   : > { %v6570_v50 = vpop.eup %6569  ;;  %6577 = vpow2.f32 %v3172_v45  ;;  %v12700_v45 = vld [vmem:[#allocation3_spill] sm:$0xff] }
 0x6ff   : > { %v9815_v0 = vpop.xlane.xlu1 %3040  ;;  %2579 = vmatmul.mubr.bf16.gmra.mrb[120].mxu0 %v2430_v61  ;;  %v6572_v52 = vpop.eup %6571  ;;  %v2385_v16 = vmul.f32 %v6570_v50, %v9524_v10  ;;  %v2384_v51 = vmul.f32 %v6570_v50, %v9520_v57  ;;  %6579 = vpow2.f32 %v3174_v1 }
 0x700   : > { %v9817_v9 = vpop.xlane.xlu0 %3037  ;;  %v2383_v48 = vmul.f32 %v6572_v52, %v12696_v31  ;;  %v2382_v19 = vmul.f32 %v6572_v52, %v12697_v18 }
 0x702   : > { %v2433_v38 = vpack.c.bf16 %v2385_v16, %v2383_v48  ;;  %v2432_v27 = vpack.c.bf16 %v2384_v51, %v2382_v19  ;;  %v12703_v48 = vld [vmem:[#allocation83_spill] sm:$0xff] }
 0x703   : > { %v2285_v54 = vpop.xlane.xlu1 %2284 }
 0x704   : > { %v2282_v37 = vpop.xlane.xlu0 %2281  ;;  %6581 = vrcp.f32 %v2285_v54  ;;  %2586 = vmatprep.mubr.bf16.mxu0 %v2433_v38 }
 0x705   : > { %6583 = vrcp.f32 %v2282_v37 }
 0x706   : > { %v6574_v57 = vpop.eup %6573 }
 0x707   : > { %v9823_v39 = vpop.xlane.xlu1 %3046  ;;  %2587 = vmatmul.mubr.bf16.gmra.mrb[124].mxu0 %v2432_v27  ;;  %v6576_v61 = vpop.eup %6575  ;;  %v2389_v54 = vmul.f32 %v6574_v57, %v9552_v22  ;;  %v2388_v18 = vmul.f32 %v6574_v57, %v12703_v48 }
 0x708   : > { %v9825_v43 = vpop.xlane.xlu0 %3043  ;;  %v2387_v51 = vmul.f32 %v6576_v61, %v9566_v42  ;;  %v2386_v31 = vmul.f32 %v6576_v61, %v9560_v29 }
 0x709   : > { %v9827_v10 = vpop.f32.mrb[252].mxu1 }
 0x70a   : > { %12698 = vst [vmem:[#allocation48_spill] sm:$0xff] %v9827_v10  ;;  %v9829_v13 = vpop.f32.mrb[253].mxu1  ;;  %v2435_v38 = vpack.c.bf16 %v2389_v54, %v2387_v51  ;;  %v2434_v27 = vpack.c.bf16 %v2388_v18, %v2386_v31 }
 0x70b   : > { %12699 = vst [vmem:[#allocation111_spill] sm:$0xff] %v9829_v13  ;;  %3524 = vrot.lane.b32.xlu1 %v12700_v45, %s7006_s24  ;;  %v9835_v52 = vpop.f32.mrb[254].mxu1  ;;  %v2291_v1 = vpop.xlane.xlu1 %2290 }
 0x70c   : > { %12701 = vst [vmem:[#allocation96_spill] sm:$0xff] %v9835_v52  ;;  %v2288_v16 = vpop.xlane.xlu0 %2287  ;;  %v9839_v37 = vpop.f32.mrb[255].mxu1  ;;  %6585 = vrcp.f32 %v2291_v1  ;;  %2594 = vmatprep.mubr.bf16.mxu0 %v2435_v38  ;;  %v12704_v1 = vld [vmem:[#allocation123_spill] sm:$0xff] }
 0x70d   : > { %12702 = vst [vmem:[#allocation109_spill] sm:$0xff] %v9839_v37  ;;  %v9847_v13 = vpop.eup %6577  ;;  %6587 = vrcp.f32 %v2288_v16  ;;  %v3110_v38 = vsub.f32 %v12704_v1, %v9769_v30 }
 0x70e   : > { %v9851_v42 = vpop.eup %6579 }
 0x70f   : > { %v9845_v50 = vpop.xlane.xlu1 %3052  ;;  %2595 = vmatmul.mubr.bf16.gmra.mrb[128].mxu0 %v2434_v27  ;;  %v6582_v29 = vpop.eup %6581  ;;  %v3300_v16 = vadd.f32 %v9851_v42, %v9847_v13  ;;  %v12705_v27 = vld [vmem:[#allocation124_spill] sm:$0xff] }
 0x710   : > { %v9849_v22 = vpop.xlane.xlu0 %3049  ;;  %v6584_v61 = vpop.eup %6583  ;;  %v2393_v48 = vmul.f32 %v6582_v29, %v9594_v59  ;;  %v2392_v54 = vmul.f32 %v6582_v29, %v9590_v14  ;;  %v3111_v52 = vsub.f32 %v12705_v27, %v9769_v30  ;;  %v3176_v59 = vmul.f32 1.442695, %v3110_v38 }
 0x711   : > { %v2391_v31 = vmul.f32 %v6584_v61, %v9596_v63  ;;  %v2390_v18 = vmul.f32 %v6584_v61, %v9586_v7 }
 0x712   : > { %v3178_v29 = vmul.f32 1.442695, %v3111_v52 }
 0x713   : > { %v2297_v57 = vpop.xlane.xlu1 %2296  ;;  %v2437_v19 = vpack.c.bf16 %v2393_v48, %v2391_v31  ;;  %v2436_v37 = vpack.c.bf16 %v2392_v54, %v2390_v18 }
 0x714   : > { %v2294_v51 = vpop.xlane.xlu0 %2293  ;;  %6589 = vrcp.f32 %v2297_v57 }
 0x715   : > { %2602 = vmatprep.mubr.bf16.mxu0 %v2437_v19  ;;  %6591 = vrcp.f32 %v2294_v51 }
 0x716   : > { %v6586_v7 = vpop.eup %6585  ;;  %6593 = vpow2.f32 %v3176_v59 }
 0x717   : > { %v9863_v10 = vpop.xlane.xlu1 %3058  ;;  %2603 = vmatmul.mubr.bf16.gmra.mrb[132].mxu0 %v2436_v37  ;;  %v6588_v63 = vpop.eup %6587  ;;  %v2397_v48 = vmul.f32 %v6586_v7, %v9620_v32  ;;  %v2396_v54 = vmul.f32 %v6586_v7, %v9616_v11  ;;  %6595 = vpow2.f32 %v3178_v29 }
 0x718   : > { %3301 = vadd.xlane.f32.xlu0 %v3300_v16  ;;  %v9865_v14 = vpop.xlane.xlu0 %3055  ;;  %v2395_v30 = vmul.f32 %v6588_v63, %v9626_v44  ;;  %v2394_v57 = vmul.f32 %v6588_v63, %v9624_v46 }
 0x71a   : > { %v2439_v19 = vpack.c.bf16 %v2397_v48, %v2395_v30  ;;  %v2438_v18 = vpack.c.bf16 %v2396_v54, %v2394_v57 }
 0x71b   : > { %v2303_v61 = vpop.xlane.xlu1 %2302 }
 0x71c   : > { %v2300_v31 = vpop.xlane.xlu0 %2299  ;;  %6597 = vrcp.f32 %v2303_v61  ;;  %2610 = vmatprep.mubr.bf16.mxu0 %v2439_v19 }
 0x71d   : > { %6599 = vrcp.f32 %v2300_v31  ;;  %v12706_v31 = vld [vmem:[#allocation10_spill] sm:$0xff] }
 0x71e   : > { %v6590_v32 = vpop.eup %6589 }
 0x71f   : > { %v9871_v51 = vpop.xlane.xlu1 %3064  ;;  %2611 = vmatmul.mubr.bf16.gmra.mrb[136].mxu0 %v2438_v18  ;;  %v6592_v52 = vpop.eup %6591  ;;  %v2401_v11 = vmul.f32 %v6590_v32, %v9650_v56  ;;  %v2400_v44 = vmul.f32 %v6590_v32, %v9646_v23 }
 0x720   : > { %v9873_v37 = vpop.xlane.xlu0 %3061  ;;  %v2399_v46 = vmul.f32 %v6592_v52, %v9652_v34  ;;  %v2398_v1 = vmul.f32 %v6592_v52, %v9642_v4  ;;  %v9879_v59 = vpop.eup %6593 }
 0x721   : > { %v9881_v63 = vpop.eup %6595 }
 0x722   : > { %v2441_v27 = vpack.c.bf16 %v2401_v11, %v2399_v46  ;;  %v2440_v7 = vpack.c.bf16 %v2400_v44, %v2398_v1  ;;  %v3303_v48 = vadd.f32 %v9881_v63, %v9879_v59  ;;  %v12708_v1 = vld [vmem:[#allocation2_spill] sm:$0xff] }
 0x723   : > { %v2309_v38 = vpop.xlane.xlu1 %2308 }
 0x724   : > { %v2306_v16 = vpop.xlane.xlu0 %2305  ;;  %6601 = vrcp.f32 %v2309_v38  ;;  %2618 = vmatprep.mubr.bf16.mxu0 %v2441_v27 }
 0x725   : > { %6603 = vrcp.f32 %v2306_v16 }
 0x726   : > { %v6598_v29 = vpop.eup %6597 }
 0x727   : > { %2619 = vmatmul.mubr.bf16.gmra.mrb[140].mxu0 %v2440_v7  ;;  %v6600_v56 = vpop.eup %6599  ;;  %v2405_v23 = vmul.f32 %v6598_v29, %v9666_v26  ;;  %v2404_v34 = vmul.f32 %v6598_v29, %v9664_v33  ;;  %v12707_v26 = vld [vmem:[#allocation13_spill] sm:$0xff]  ;;  %v9899_v44 = vpop.xlane.xlu1 %3070 }
 0x728   : > { %v2403_v4 = vmul.f32 %v6600_v56, %v9670_v58  ;;  %v2402_v61 = vmul.f32 %v6600_v56, %v9668_v47  ;;  %v9897_v11 = vpop.xlane.xlu0 %3067  ;;  %v12709_v7 = vld [vmem:[#allocation125_spill] sm:$0xff] }
 0x729   : > { %v3112_v29 = vsub.f32 %v12709_v7, %v9779_v28 }
 0x72a   : > { %v2443_v54 = vpack.c.bf16 %v2405_v23, %v2403_v4  ;;  %v2442_v30 = vpack.c.bf16 %v2404_v34, %v2402_v61  ;;  %v12710_v34 = vld [vmem:[#allocation126_spill] sm:$0xff] }
 0x72b   : > { %v3113_v4 = vsub.f32 %v12710_v34, %v9779_v28  ;;  %v12711_v61 = vld [vmem:[#allocation18_spill] sm:$0xff] }
 0x72c   : > { %2626 = vmatprep.mubr.bf16.mxu0 %v2443_v54 }
 0x72e   : > { %3542 = vrot.lane.b32.xlu0 %v12706_v31, %s7006_s24  ;;  %v6602_v57 = vpop.eup %6601 }
 0x72f   : > { %3304 = vadd.xlane.f32.xlu1 %v3303_v48  ;;  %2627 = vmatmul.mubr.bf16.gmra.mrb[144].mxu0 %v2442_v30  ;;  %v6604_v33 = vpop.eup %6603  ;;  %v2409_v58 = vmul.f32 %v6602_v57, %v9686_v40  ;;  %v2408_v47 = vmul.f32 %v6602_v57, %v9684_v15  ;;  %v12712_v48 = vld [vmem:[#allocation169_spill] sm:$0xff]  ;;  %v3182_v57 = vmul.f32 1.442695, %v3113_v4 }
 0x730   : > { %v2407_v19 = vmul.f32 %v6604_v33, %v9688_v3  ;;  %v2406_v18 = vmul.f32 %v6604_v33, %v9682_v24  ;;  %v12713_v54 = vmax.f32 %v12711_v61, %v12712_v48 }
 0x732   : > { %3544 = vrot.lane.b32.xlu0 %v12707_v26, %s7006_s24  ;;  %v2445_v32 = vpack.c.bf16 %v2409_v58, %v2407_v19  ;;  %v2444_v52 = vpack.c.bf16 %v2408_v47, %v2406_v18  ;;  %v12716_v19 = vld [vmem:[#allocation170_spill] sm:$0xff]  ;;  %v12717_v18 = vld [vmem:[#allocation171_spill] sm:$0xff] }
 0x734   : > { %2634 = vmatprep.mubr.bf16.mxu0 %v2445_v32  ;;  %v12718_v32 = vmax.f32 %v12716_v19, %v12717_v18 }
 0x737   : > { %2635 = vmatmul.mubr.bf16.gmra.mrb[148].mxu0 %v2444_v52  ;;  %v2312_v46 = vpop.xlane.xlu0 %2311 }
 0x738   : > { %6605 = vrcp.f32 %v2312_v46 }
 0x740   : > { %3526 = vrot.lane.b32.xlu1 %v12708_v1, %s7006_s24  ;;  %v12770_v1 = vld [vmem:[#allocation137_spill] sm:$0xff] }
 0x741   : > { %v3124_v26 = vsub.f32 %v12770_v1, %v9817_v9 }
 0x742   : > { %v2315_v40 = vpop.xlane.xlu1 %2314  ;;  %v6606_v15 = vpop.eup %6605 }
 0x743   : > { %6607 = vrcp.f32 %v2315_v40  ;;  %v2411_v3 = vmul.f32 %v6606_v15, %v9715_v53  ;;  %v2410_v16 = vmul.f32 %v6606_v15, %v9712_v62  ;;  %v12714_v53 = vld [vmem:[#allocation127_spill] sm:$0xff]  ;;  %v3180_v62 = vmul.f32 1.442695, %v3112_v29  ;;  %v12719_v40 = vld [vmem:[#allocation5_spill] sm:$0xff]  ;;  %v12722_v29 = vld [vmem:[#allocation12_spill] sm:$0xff] }
 0x745   : > { %6609 = vpow2.f32 %v3180_v62 }
 0x746   : > { %6611 = vpow2.f32 %v3182_v57  ;;  %v9941_v7 = vpop.xlane.xlu1 %3076 }
 0x74d   : > { %v6608_v38 = vpop.eup %6607 }
 0x74e   : > { %v2413_v24 = vmul.f32 %v6608_v38, %v9727_v60  ;;  %v2412_v27 = vmul.f32 %v6608_v38, %v9725_v2  ;;  %v3114_v60 = vsub.f32 %v12714_v53, %v9777_v25  ;;  %v12715_v2 = vld [vmem:[#allocation128_spill] sm:$0xff] }
 0x74f   : > { %v3115_v30 = vsub.f32 %v12715_v2, %v9777_v25  ;;  %v9918_v28 = vpop.eup %6609  ;;  %v12720_v38 = vld [vmem:[#allocation4_spill] sm:$0xff] }
 0x750   : > { %v2447_v56 = vpack.c.bf16 %v2413_v24, %v2411_v3  ;;  %v2446_v23 = vpack.c.bf16 %v2412_v27, %v2410_v16  ;;  %v3184_v33 = vmul.f32 1.442695, %v3114_v60  ;;  %v9920_v47 = vpop.eup %6611  ;;  %v9937_v3 = vpop.xlane.xlu0 %3073  ;;  %v12721_v24 = vld [vmem:[#allocation15_spill] sm:$0xff] }
 0x751   : > { %3085 = vmax.xlane.f32.xlu0 %v12713_v54  ;;  %v3186_v58 = vmul.f32 1.442695, %v3115_v30  ;;  %v3306_v25 = vadd.f32 %v9920_v47, %v9918_v28 }
 0x752   : > { %2642 = vmatprep.mubr.bf16.mxu0 %v2447_v56  ;;  %6613 = vpow2.f32 %v3184_v33 }
 0x753   : > { %2643 = vmatmul.mubr.bf16.gmra.mrb[152].mxu0 %v2446_v23  ;;  %6615 = vpow2.f32 %v3186_v58 }
 0x75c   : > { %v9925_v52 = vpop.eup %6613 }
 0x75d   : > { %v9929_v46 = vpop.eup %6615 }
 0x75e   : > { %v3309_v15 = vadd.f32 %v9929_v46, %v9925_v52 }
 0x764   : > { %3088 = vmax.xlane.f32.xlu1 %v12718_v32 }
 0x767   : > { %3528 = vrot.lane.b32.xlu0 %v12719_v40, %s7006_s24 }
 0x768   : > { %3307 = vadd.xlane.f32.xlu1 %v3306_v25 }
 0x76b   : > { %3530 = vrot.lane.b32.xlu0 %v12720_v38, %s7006_s24 }
 0x76c   : > { %3310 = vadd.xlane.f32.xlu1 %v3309_v15 }
 0x76f   : > { %3548 = vrot.lane.b32.xlu0 %v12721_v24, %s7006_s24 }
 0x770   : > { %v2318_v16 = vpop.xlane.xlu0 %2317 }
 0x771   : > { %6617 = vrcp.f32 %v2318_v16  ;;  %v12725_v16 = vld [vmem:[#allocation129_spill] sm:$0xff] }
 0x774   : > { %v3541_v27 = vpop.permute.xlu0 %3540 }
 0x775   : > { %5857 = vmatprep.subr.bf16.mxu0 %v3541_v27  ;;  %v3116_v27 = vsub.f32 %v12725_v16, %v9787_v8 }
 0x77b   : > { %v6618_v62 = vpop.eup %6617 }
 0x77c   : > { %v2415_v58 = vmul.f32 %v6618_v62, %v9765_v17  ;;  %v2414_v25 = vmul.f32 %v6618_v62, %v9763_v41  ;;  %v12731_v62 = vld [vmem:[#allocation131_spill] sm:$0xff] }
 0x77d   : > { %3546 = vrot.lane.b32.xlu1 %v12722_v29, %s7006_s24 }
 0x77f   : > { %v2321_v56 = vpop.xlane.xlu1 %2320 }
 0x780   : > { %6619 = vrcp.f32 %v2321_v56 }
 0x783   : > { %v9945_v23 = vpop.xlane.xlu1 %3079 }
 0x785   : > { %v5713_v34 = vpop.f32.mrb[96].mxu0 }
 0x786   : > { %v5714_v4 = vpop.f32.mrb[97].mxu0 }
 0x787   : > { %v9947_v54 = vadd.f32 %v5714_v4, %v5713_v34  ;;  %v9949_v53 = vpop.xlane.xlu1 %3082  ;;  %v5716_v60 = vpop.f32.mrb[98].mxu0 }
 0x788   : > { %v5717_v2 = vpop.f32.mrb[99].mxu0 }
 0x789   : > { %12723 = vst [vmem:[#allocation110_spill] sm:$0xff] %v9947_v54  ;;  %v9951_v30 = vadd.f32 %v5717_v2, %v5716_v60  ;;  %v12726_v60 = vld [vmem:[#allocation130_spill] sm:$0xff]  ;;  %v12728_v54 = vld [vmem:[#allocation173_spill] sm:$0xff] }
 0x78a   : > { %v6620_v57 = vpop.eup %6619  ;;  %v3117_v2 = vsub.f32 %v12726_v60, %v9787_v8 }
 0x78b   : > { %12724 = vst [vmem:[#allocation116_spill] sm:$0xff] %v9951_v30  ;;  %v3525_v33 = vpop.permute.xlu1 %3524  ;;  %v2417_v32 = vmul.f32 %v6620_v57, %v9783_v35  ;;  %v2416_v15 = vmul.f32 %v6620_v57, %v9781_v36  ;;  %v12727_v30 = vld [vmem:[#allocation172_spill] sm:$0xff]  ;;  %v3118_v57 = vsub.f32 %v12731_v62, %v9785_v20 }
 0x78c   : > { %5858 = vmatpush3.bf16.msra.mxu0 %v3525_v33  ;;  %v12729_v29 = vmax.f32 %v12727_v30, %v12728_v54  ;;  %v3188_v33 = vmul.f32 1.442695, %v3116_v27 }
 0x78d   : > { %v5719_v56 = vpop.f32.mrb[100].mxu0  ;;  %v2449_v34 = vpack.c.bf16 %v2417_v32, %v2415_v58  ;;  %v2448_v4 = vpack.c.bf16 %v2416_v15, %v2414_v25  ;;  %v12733_v32 = vld [vmem:[#allocation132_spill] sm:$0xff]  ;;  %v3190_v25 = vmul.f32 1.442695, %v3117_v2  ;;  %v3192_v15 = vmul.f32 1.442695, %v3118_v57 }
 0x78e   : > { %3091 = vmax.xlane.f32.xlu0 %v12729_v29  ;;  %v5720_v17 = vpop.f32.mrb[101].mxu0  ;;  %v3119_v8 = vsub.f32 %v12733_v32, %v9785_v20  ;;  %6621 = vpow2.f32 %v3188_v33  ;;  %v12738_v32 = vld [vmem:[#allocation174_spill] sm:$0xff] }
 0x78f   : > { %v9964_v35 = vadd.f32 %v5720_v17, %v5719_v56  ;;  %2650 = vmatprep.mubr.bf16.mxu0 %v2449_v34  ;;  %v5722_v41 = vpop.f32.mrb[102].mxu0  ;;  %6623 = vpow2.f32 %v3190_v25 }
 0x790   : > { %2651 = vmatmul.mubr.bf16.gmra.mrb[156].mxu0 %v2448_v4  ;;  %v5723_v36 = vpop.f32.mrb[103].mxu0  ;;  %v3194_v16 = vmul.f32 1.442695, %v3119_v8  ;;  %6625 = vpow2.f32 %v3192_v15  ;;  %v12739_v8 = vld [vmem:[#allocation175_spill] sm:$0xff] }
 0x791   : > { %12730 = vst [vmem:[#allocation56_spill] sm:$0xff] %v9964_v35  ;;  %v9968_v58 = vadd.f32 %v5723_v36, %v5722_v41  ;;  %v12740_v25 = vmax.f32 %v12738_v32, %v12739_v8 }
 0x792   : > { %6627 = vpow2.f32 %v3194_v16 }
 0x793   : > { %12732 = vst [vmem:[#allocation185_spill] sm:$0xff] %v9968_v58 }
 0x795   : > { %v5725_v29 = vpop.f32.mrb[104].mxu0 }
 0x796   : > { %v5726_v56 = vpop.f32.mrb[105].mxu0 }
 0x797   : > { %v9972_v34 = vadd.f32 %v5726_v56, %v5725_v29  ;;  %v5728_v4 = vpop.f32.mrb[106].mxu0  ;;  %v12741_v56 = vld [vmem:[#allocation7_spill] sm:$0xff] }
 0x798   : > { %v5729_v60 = vpop.f32.mrb[107].mxu0  ;;  %v9976_v36 = vpop.eup %6621 }
 0x799   : > { %12734 = vst [vmem:[#allocation115_spill] sm:$0xff] %v9972_v34  ;;  %v9974_v17 = vadd.f32 %v5729_v60, %v5728_v4  ;;  %v9980_v62 = vpop.eup %6623 }
 0x79a   : > { %v9987_v15 = vpop.eup %6625  ;;  %v3312_v29 = vadd.f32 %v9980_v62, %v9976_v36 }
 0x79b   : > { %12735 = vst [vmem:[#allocation114_spill] sm:$0xff] %v9974_v17 }
 0x79c   : > { %v9991_v16 = vpop.eup %6627 }
 0x79d   : > { %v5731_v27 = vpop.f32.mrb[108].mxu0  ;;  %v3315_v60 = vadd.f32 %v9991_v16, %v9987_v15 }
 0x79e   : > { %v5732_v41 = vpop.f32.mrb[109].mxu0 }
 0x79f   : > { %v9978_v20 = vadd.f32 %v5732_v41, %v5731_v27  ;;  %v5734_v2 = vpop.f32.mrb[110].mxu0  ;;  %v12742_v27 = vld [vmem:[#allocation6_spill] sm:$0xff] }
 0x7a0   : > { %v5735_v57 = vpop.f32.mrb[111].mxu0 }
 0x7a1   : > { %12736 = vst [vmem:[#allocation117_spill] sm:$0xff] %v9978_v20  ;;  %v9982_v33 = vadd.f32 %v5735_v57, %v5734_v2  ;;  %3094 = vmax.xlane.f32.xlu1 %v12740_v25  ;;  %v12743_v2 = vld [vmem:[#allocation17_spill] sm:$0xff]  ;;  %v12744_v57 = vld [vmem:[#allocation14_spill] sm:$0xff] }
 0x7a3   : > { %12737 = vst [vmem:[#allocation165_spill] sm:$0xff] %v9982_v33 }
 0x7a4   : > { %3532 = vrot.lane.b32.xlu0 %v12741_v56, %s7006_s24 }
 0x7a5   : > { %v3302_v4 = vpop.xlane.xlu0 %3301  ;;  %3313 = vadd.xlane.f32.xlu1 %v3312_v29 }
 0x7a6   : > { %6629 = vrcp.f32 %v3302_v4 }
 0x7a8   : > { %3534 = vrot.lane.b32.xlu0 %v12742_v27, %s7006_s24 }
 0x7a9   : > { %v3543_v41 = vpop.permute.xlu0 %3542  ;;  %3316 = vadd.xlane.f32.xlu1 %v3315_v60 }
 0x7aa   : > { %5859 = vmatprep.subr.bf16.mxu0 %v3543_v41 }
 0x7ac   : > { %3552 = vrot.lane.b32.xlu0 %v12743_v2, %s7006_s24 }
 0x7ad   : > { %v3545_v60 = vpop.permute.xlu0 %3544 }
 0x7b0   : > { %v6630_v41 = vpop.eup %6629 }
 0x7b1   : > { %v10008_v27 = vmul.f32 %v6630_v41, %v9847_v13  ;;  %v12750_v13 = vld [vmem:[#allocation20_spill] sm:$0xff] }
 0x7ba   : > { %3550 = vrot.lane.b32.xlu1 %v12744_v57, %s7006_s24 }
 0x7bc   : > { %v3305_v25 = vpop.xlane.xlu1 %3304  ;;  %v5737_v20 = vpop.f32.mrb[112].mxu0 }
 0x7bd   : > { %6631 = vrcp.f32 %v3305_v25  ;;  %v5738_v29 = vpop.f32.mrb[113].mxu0  ;;  %v3429_v25 = vmul.f32 %v6630_v41, %v9851_v42  ;;  %v12752_v42 = vld [vmem:[#allocation135_spill] sm:$0xff] }
 0x7be   : > { %v10003_v34 = vadd.f32 %v5738_v29, %v5737_v20  ;;  %v5740_v35 = vpop.f32.mrb[114].mxu0  ;;  %v12747_v29 = vld [vmem:[#allocation133_spill] sm:$0xff] }
 0x7bf   : > { %v5741_v33 = vpop.f32.mrb[115].mxu0 }
 0x7c0   : > { %12745 = vst [vmem:[#allocation166_spill] sm:$0xff] %v10003_v34  ;;  %v10005_v17 = vadd.f32 %v5741_v33, %v5740_v35  ;;  %v3527_v58 = vpop.permute.xlu1 %3526  ;;  %v3120_v35 = vsub.f32 %v12747_v29, %v9800_v5 }
 0x7c1   : > { %5860 = vmatpush3.bf16.msra.mxu0 %v3527_v58 }
 0x7c2   : > { %12746 = vst [vmem:[#allocation167_spill] sm:$0xff] %v10005_v17  ;;  %5861 = vmatprep.subr.bf16.mxu0 %v3545_v60  ;;  %v12748_v60 = vld [vmem:[#allocation134_spill] sm:$0xff]  ;;  %v12749_v17 = vld [vmem:[#allocation19_spill] sm:$0xff] }
 0x7c3   : > { %v3121_v34 = vsub.f32 %v12748_v60, %v9800_v5  ;;  %v12751_v57 = vmax.f32 %v12749_v17, %v12750_v13 }
 0x7c5   : > { %v3198_v58 = vmul.f32 1.442695, %v3121_v34 }
 0x7c7   : > { %v6632_v2 = vpop.eup %6631 }
 0x7c8   : > { %v10011_v4 = vmul.f32 %v6632_v2, %v9879_v59  ;;  %v3431_v20 = vmul.f32 %v6632_v2, %v9881_v63  ;;  %v3122_v63 = vsub.f32 %v12752_v42, %v9798_v49  ;;  %v3196_v2 = vmul.f32 1.442695, %v3120_v35 }
 0x7ca   : > { %v3493_v33 = vpack.c.bf16 %v3431_v20, %v3429_v25  ;;  %v5743_v59 = vpop.f32.mrb[116].mxu0  ;;  %v12754_v20 = vld [vmem:[#allocation136_spill] sm:$0xff]  ;;  %v3200_v60 = vmul.f32 1.442695, %v3122_v63  ;;  %6633 = vpow2.f32 %v3196_v2 }
 0x7cb   : > { %3097 = vmax.xlane.f32.xlu0 %v12751_v57  ;;  %v5744_v56 = vpop.f32.mrb[117].mxu0  ;;  %v3123_v29 = vsub.f32 %v12754_v20, %v9798_v49  ;;  %6635 = vpow2.f32 %v3198_v58  ;;  %v12761_v20 = vld [vmem:[#allocation22_spill] sm:$0xff] }
 0x7cc   : > { %3604 = vmatprep.mubr.bf16.mxu0 %v3493_v33  ;;  %v10026_v41 = vadd.f32 %v5744_v56, %v5743_v59  ;;  %v5746_v25 = vpop.f32.mrb[118].mxu0  ;;  %6637 = vpow2.f32 %v3200_v60 }
 0x7cd   : > { %v5747_v24 = vpop.f32.mrb[119].mxu0  ;;  %v3202_v57 = vmul.f32 1.442695, %v3123_v29 }
 0x7ce   : > { %12753 = vst [vmem:[#allocation168_spill] sm:$0xff] %v10026_v41  ;;  %v10030_v5 = vadd.f32 %v5747_v24, %v5746_v25  ;;  %v12760_v25 = vld [vmem:[#allocation21_spill] sm:$0xff] }
 0x7cf   : > { %6639 = vpow2.f32 %v3202_v57 }
 0x7d0   : > { %12755 = vst [vmem:[#allocation77_spill] sm:$0xff] %v10030_v5 }
 0x7d2   : > { %v5749_v33 = vpop.f32.mrb[120].mxu0 }
 0x7d3   : > { %v5750_v38 = vpop.f32.mrb[121].mxu0 }
 0x7d4   : > { %v10032_v40 = vadd.f32 %v5750_v38, %v5749_v33  ;;  %v5752_v35 = vpop.f32.mrb[122].mxu0  ;;  %v10036_v42 = vpop.eup %6633  ;;  %v12762_v38 = vmax.f32 %v12760_v25, %v12761_v20 }
 0x7d5   : > { %v5753_v56 = vpop.f32.mrb[123].mxu0  ;;  %12758 = vst [vmem:[#allocation122_spill] sm:$0xff] %v10036_v42  ;;  %v10038_v34 = vpop.eup %6635 }
 0x7d6   : > { %12756 = vst [vmem:[#allocation74_spill] sm:$0xff] %v10032_v40  ;;  %v10034_v59 = vadd.f32 %v5753_v56, %v5752_v35  ;;  %v10047_v60 = vpop.eup %6637  ;;  %v3318_v33 = vadd.f32 %v10038_v34, %v10036_v42  ;;  %v12765_v56 = vld [vmem:[#allocation9_spill] sm:$0xff]  ;;  %v12766_v40 = vld [vmem:[#allocation8_spill] sm:$0xff] }
 0x7d7   : > { %12763 = vst [vmem:[#allocation78_spill] sm:$0xff] %v10047_v60 }
 0x7d8   : > { %12757 = vst [vmem:[#allocation121_spill] sm:$0xff] %v10034_v59 }
 0x7d9   : > { %v10053_v35 = vpop.eup %6639 }
 0x7da   : > { %v5755_v49 = vpop.f32.mrb[124].mxu0 }
 0x7db   : > { %v5756_v24 = vpop.f32.mrb[125].mxu0 }
 0x7dc   : > { %v10040_v63 = vadd.f32 %v5756_v24, %v5755_v49  ;;  %v5758_v2 = vpop.f32.mrb[126].mxu0 }
 0x7dd   : > { %v5759_v29 = vpop.f32.mrb[127].mxu0 }
 0x7de   : > { %12759 = vst [vmem:[#allocation119_spill] sm:$0xff] %v10040_v63  ;;  %v10042_v58 = vpop.xlane.xlu0 %3085  ;;  %3100 = vmax.xlane.f32.xlu1 %v12762_v38  ;;  %v10049_v57 = vadd.f32 %v5759_v29, %v5758_v2  ;;  %v3321_v38 = vadd.f32 %v10053_v35, %v10047_v60 }
 0x7e0   : > { %12764 = vst [vmem:[#allocation83_spill] sm:$0xff] %v10049_v57 }
 0x7e1   : > { %3536 = vrot.lane.b32.xlu0 %v12765_v56, %s7006_s24 }
 0x7e2   : > { %v3529_v49 = vpop.permute.xlu0 %3528  ;;  %3319 = vadd.xlane.f32.xlu1 %v3318_v33  ;;  %v5761_v24 = vpop.f32.mrb[128].mxu0 }
 0x7e3   : > { %5862 = vmatpush3.bf16.msra.mxu0 %v3529_v49  ;;  %v5762_v63 = vpop.f32.mrb[129].mxu0 }
 0x7e4   : > { %v10061_v2 = vadd.f32 %v5762_v63, %v5761_v24  ;;  %v5764_v29 = vpop.f32.mrb[130].mxu0 }
 0x7e5   : > { %3538 = vrot.lane.b32.xlu0 %v12766_v40, %s7006_s24  ;;  %v5765_v41 = vpop.f32.mrb[131].mxu0  ;;  %v12772_v40 = vld [vmem:[#allocation138_spill] sm:$0xff] }
 0x7e6   : > { %12767 = vst [vmem:[#allocation123_spill] sm:$0xff] %v10061_v2  ;;  %3322 = vadd.xlane.f32.xlu1 %v3321_v38  ;;  %v10063_v57 = vadd.f32 %v5765_v41, %v5764_v29  ;;  %v3125_v63 = vsub.f32 %v12772_v40, %v9817_v9  ;;  %v12773_v38 = vld [vmem:[#allocation139_spill] sm:$0xff]  ;;  %v3204_v29 = vmul.f32 1.442695, %v3124_v26  ;;  %v12776_v9 = vld [vmem:[#allocation16_spill] sm:$0xff] }
 0x7e7   : > { %v3126_v41 = vsub.f32 %v12773_v38, %v9815_v0  ;;  %v3531_v38 = vpop.permute.xlu0 %3530 }
 0x7e8   : > { %12768 = vst [vmem:[#allocation124_spill] sm:$0xff] %v10063_v57  ;;  %6641 = vpow2.f32 %v3204_v29 }
 0x7e9   : > { %v3208_v40 = vmul.f32 1.442695, %v3126_v41 }
 0x7ea   : > { %v5767_v59 = vpop.f32.mrb[132].mxu0 }
 0x7eb   : > { %v5768_v5 = vpop.f32.mrb[133].mxu0 }
 0x7ec   : > { %v10065_v56 = vadd.f32 %v5768_v5, %v5767_v59  ;;  %v5770_v33 = vpop.f32.mrb[134].mxu0  ;;  %v12774_v5 = vld [vmem:[#allocation140_spill] sm:$0xff] }
 0x7ed   : > { %v5771_v49 = vpop.f32.mrb[135].mxu0  ;;  %v3127_v59 = vsub.f32 %v12774_v5, %v9815_v0  ;;  %v12778_v0 = vld [vmem:[#allocation141_spill] sm:$0xff] }
 0x7ee   : > { %12769 = vst [vmem:[#allocation125_spill] sm:$0xff] %v10065_v56  ;;  %v10069_v31 = vadd.f32 %v5771_v49, %v5770_v33  ;;  %v3206_v56 = vmul.f32 1.442695, %v3125_v63  ;;  %v3128_v63 = vsub.f32 %v12778_v0, %v9825_v43 }
 0x7ef   : > { %v3210_v26 = vmul.f32 1.442695, %v3127_v59  ;;  %v3549_v59 = vpop.permute.xlu0 %3548 }
 0x7f0   : > { %12771 = vst [vmem:[#allocation126_spill] sm:$0xff] %v10069_v31  ;;  %6643 = vpow2.f32 %v3206_v56 }
 0x7f1   : > { %v10073_v24 = vpop.xlane.xlu1 %3088  ;;  %6645 = vpow2.f32 %v3208_v40 }
 0x7f2   : > { %v5773_v2 = vpop.f32.mrb[136].mxu0  ;;  %6647 = vpow2.f32 %v3210_v26  ;;  %v10097_v0 = vpop.eup %6641 }
 0x7f3   : > { %v5774_v57 = vpop.f32.mrb[137].mxu0  ;;  %12782 = vst [vmem:[#allocation170_spill] sm:$0xff] %v10097_v0 }
 0x7f4   : > { %v10081_v1 = vadd.f32 %v5774_v57, %v5773_v2  ;;  %v5776_v33 = vpop.f32.mrb[138].mxu0  ;;  %v12779_v2 = vld [vmem:[#allocation142_spill] sm:$0xff] }
 0x7f5   : > { %v10079_v45 = vpop.xlane.xlu1 %3307  ;;  %v5777_v49 = vpop.f32.mrb[139].mxu0  ;;  %v3129_v5 = vsub.f32 %v12779_v2, %v9825_v43  ;;  %v12784_v43 = vld [vmem:[#allocation145_spill] sm:$0xff] }
 0x7f6   : > { %12775 = vst [vmem:[#allocation18_spill] sm:$0xff] %v10081_v1  ;;  %v10085_v31 = vadd.f32 %v5777_v49, %v5776_v33  ;;  %v3212_v33 = vmul.f32 1.442695, %v3128_v63  ;;  %v3132_v2 = vsub.f32 %v12784_v43, %v9849_v22 }
 0x7f7   : > { %3554 = vrot.lane.b32.xlu1 %v12776_v9, %s7006_s24  ;;  %v3214_v40 = vmul.f32 1.442695, %v3129_v5 }
 0x7f8   : > { %12777 = vst [vmem:[#allocation169_spill] sm:$0xff] %v10085_v31  ;;  %6649 = vpow2.f32 %v3212_v33  ;;  %v3220_v31 = vmul.f32 1.442695, %v3132_v2  ;;  %v12796_v2 = vld [vmem:[#allocation150_spill] sm:$0xff] }
 0x7f9   : > { %v10087_v42 = vpop.xlane.xlu1 %3310  ;;  %6651 = vpow2.f32 %v3214_v40 }
 0x7fa   : > { %v5779_v57 = vpop.f32.mrb[140].mxu0  ;;  %v10099_v26 = vpop.eup %6643  ;;  %6653 = vpow2.f32 %v3220_v31 }
 0x7fb   : > { %v5780_v1 = vpop.f32.mrb[141].mxu0  ;;  %12783 = vst [vmem:[#allocation171_spill] sm:$0xff] %v10099_v26  ;;  %v3324_v33 = vadd.f32 %v10099_v26, %v10097_v0 }
 0x7fc   : > { %v10093_v41 = vadd.f32 %v5780_v1, %v5779_v57  ;;  %v5782_v29 = vpop.f32.mrb[142].mxu0  ;;  %v12785_v57 = vld [vmem:[#allocation23_spill] sm:$0xff] }
 0x7fd   : > { %v3547_v9 = vpop.permute.xlu1 %3546  ;;  %v5783_v56 = vpop.f32.mrb[143].mxu0 }
 0x7fe   : > { %12780 = vst [vmem:[#allocation127_spill] sm:$0xff] %v10093_v41  ;;  %5863 = vmatprep.subr.bf16.mxu0 %v3547_v9  ;;  %v10095_v49 = vadd.f32 %v5783_v56, %v5782_v29  ;;  %v12786_v41 = vld [vmem:[#allocation24_spill] sm:$0xff] }
 0x7ff   : > { %5864 = vmatpush3.bf16.msra.mxu0 %v3531_v38  ;;  %v12787_v9 = vmax.f32 %v12785_v57, %v12786_v41  ;;  %v12788_v38 = vld [vmem:[#allocation146_spill] sm:$0xff] }
 0x800   : > { %12781 = vst [vmem:[#allocation128_spill] sm:$0xff] %v10095_v49  ;;  %5865 = vmatprep.subr.bf16.mxu0 %v3549_v59  ;;  %v3133_v63 = vsub.f32 %v12788_v38, %v9849_v22  ;;  %v10108_v59 = vpop.eup %6645 }
 0x801   : > { %12789 = vst [vmem:[#allocation129_spill] sm:$0xff] %v10108_v59  ;;  %v10114_v49 = vpop.eup %6647 }
 0x802   : > { %v5785_v1 = vpop.f32.mrb[144].mxu0  ;;  %12791 = vst [vmem:[#allocation172_spill] sm:$0xff] %v10114_v49  ;;  %v3222_v40 = vmul.f32 1.442695, %v3133_v63  ;;  %v3327_v38 = vadd.f32 %v10114_v49, %v10108_v59 }
 0x803   : > { %v5786_v29 = vpop.f32.mrb[145].mxu0 }
 0x804   : > { %3103 = vmax.xlane.f32.xlu0 %v12787_v9  ;;  %v10110_v5 = vadd.f32 %v5786_v29, %v5785_v1  ;;  %v5788_v56 = vpop.f32.mrb[146].mxu0  ;;  %v12793_v9 = vld [vmem:[#allocation143_spill] sm:$0xff]  ;;  %v12794_v1 = vld [vmem:[#allocation144_spill] sm:$0xff]  ;;  %6655 = vpow2.f32 %v3222_v40 }
 0x805   : > { %v5789_v43 = vpop.f32.mrb[147].mxu0  ;;  %v3130_v22 = vsub.f32 %v12793_v9, %v9823_v39  ;;  %v3131_v29 = vsub.f32 %v12794_v1, %v9823_v39 }
 0x806   : > { %12790 = vst [vmem:[#allocation130_spill] sm:$0xff] %v10110_v5  ;;  %v10116_v60 = vadd.f32 %v5789_v43, %v5788_v56  ;;  %v12795_v5 = vld [vmem:[#allocation149_spill] sm:$0xff]  ;;  %v3137_v56 = vsub.f32 %v12796_v2, %v9865_v14 }
 0x807   : > { %v3136_v0 = vsub.f32 %v12795_v5, %v9865_v14  ;;  %v3216_v43 = vmul.f32 1.442695, %v3130_v22  ;;  %v3218_v39 = vmul.f32 1.442695, %v3131_v29  ;;  %v12801_v5 = vld [vmem:[#allocation26_spill] sm:$0xff]  ;;  %v12804_v14 = vld [vmem:[#allocation147_spill] sm:$0xff] }
 0x808   : > { %12792 = vst [vmem:[#allocation173_spill] sm:$0xff] %v10116_v60  ;;  %3325 = vadd.xlane.f32.xlu0 %v3324_v33  ;;  %v10128_v33 = vpop.eup %6649  ;;  %v3230_v41 = vmul.f32 1.442695, %v3137_v56  ;;  %v3134_v2 = vsub.f32 %v12804_v14, %v9845_v50  ;;  %v12805_v22 = vld [vmem:[#allocation148_spill] sm:$0xff] }
 0x809   : > { %12797 = vst [vmem:[#allocation131_spill] sm:$0xff] %v10128_v33  ;;  %v10132_v59 = vpop.eup %6651  ;;  %v3228_v1 = vmul.f32 1.442695, %v3136_v0  ;;  %6657 = vpow2.f32 %v3216_v43  ;;  %v3135_v29 = vsub.f32 %v12805_v22, %v9845_v50 }
 0x80a   : > { %v5791_v26 = vpop.f32.mrb[148].mxu0  ;;  %12799 = vst [vmem:[#allocation174_spill] sm:$0xff] %v10132_v59  ;;  %6659 = vpow2.f32 %v3218_v39  ;;  %v10149_v43 = vpop.eup %6653  ;;  %v12810_v39 = vld [vmem:[#allocation57_spill] sm:$0xff] }
 0x80b   : > { %v5792_v63 = vpop.f32.mrb[149].mxu0  ;;  %6661 = vpow2.f32 %v3228_v1  ;;  %12808 = vst [vmem:[#allocation133_spill] sm:$0xff] %v10149_v43  ;;  %v3226_v14 = vmul.f32 1.442695, %v3135_v29  ;;  %v12813_v1 = vld [vmem:[#allocation151_spill] sm:$0xff]  ;;  %v12815_v29 = vld [vmem:[#allocation93_spill] sm:$0xff] }
 0x80c   : > { %3328 = vadd.xlane.f32.xlu0 %v3327_v38  ;;  %v10130_v9 = vadd.f32 %v5792_v63, %v5791_v26  ;;  %v5794_v60 = vpop.f32.mrb[150].mxu0  ;;  %v12802_v38 = vld [vmem:[#allocation64_spill] sm:$0xff]  ;;  %v3330_v26 = vadd.f32 %v10132_v59, %v10128_v33  ;;  %6663 = vpow2.f32 %v3230_v41  ;;  %v12807_v63 = vld [vmem:[#allocation154_spill] sm:$0xff] }
 0x80d   : > { %v5795_v31 = vpop.f32.mrb[151].mxu0  ;;  %v12803_v40 = vmax.f32 %v12801_v5, %v12802_v38  ;;  %v3141_v56 = vsub.f32 %v12807_v63, %v9873_v37 }
 0x80e   : > { %12798 = vst [vmem:[#allocation132_spill] sm:$0xff] %v10130_v9  ;;  %v10134_v49 = vadd.f32 %v5795_v31, %v5794_v60  ;;  %v12806_v60 = vld [vmem:[#allocation153_spill] sm:$0xff]  ;;  %v3224_v31 = vmul.f32 1.442695, %v3134_v2 }
 0x80f   : > { %v3140_v0 = vsub.f32 %v12806_v60, %v9873_v37  ;;  %v3238_v50 = vmul.f32 1.442695, %v3141_v56  ;;  %v12814_v37 = vld [vmem:[#allocation152_spill] sm:$0xff]  ;;  %v12816_v60 = vld [vmem:[#allocation25_spill] sm:$0xff] }
 0x810   : > { %12800 = vst [vmem:[#allocation175_spill] sm:$0xff] %v10134_v49  ;;  %4087 = vmax.xlane.f32.xlu0 %v12803_v40  ;;  %v10151_v40 = vpop.eup %6655  ;;  %v12811_v49 = vld [vmem:[#allocation27_spill] sm:$0xff]  ;;  %6665 = vpow2.f32 %v3224_v31  ;;  %v3139_v2 = vsub.f32 %v12814_v37, %v9863_v10 }
 0x811   : > { %12809 = vst [vmem:[#allocation134_spill] sm:$0xff] %v10151_v40  ;;  %v3236_v9 = vmul.f32 1.442695, %v3140_v0  ;;  %v12812_v38 = vmax.f32 %v12810_v39, %v12811_v49  ;;  %v3336_v41 = vadd.f32 %v10151_v40, %v10149_v43  ;;  %6667 = vpow2.f32 %v3226_v14  ;;  %v12821_v14 = vld [vmem:[#allocation158_spill] sm:$0xff]  ;;  %v12824_v43 = vld [vmem:[#allocation59_spill] sm:$0xff] }
 0x812   : > { %v12817_v0 = vmax.f32 %v12815_v29, %v12816_v60  ;;  %v3234_v39 = vmul.f32 1.442695, %v3139_v2  ;;  %v12825_v40 = vld [vmem:[#allocation63_spill] sm:$0xff] }
 0x813   : > { %v10167_v63 = vpop.eup %6657  ;;  %6669 = vpow2.f32 %v3236_v9  ;;  %v12826_v9 = vmax.f32 %v12824_v43, %v12825_v40 }
 0x814   : > { %3331 = vadd.xlane.f32.xlu0 %v3330_v26  ;;  %v3138_v26 = vsub.f32 %v12813_v1, %v9863_v10  ;;  %12818 = vst [vmem:[#allocation19_spill] sm:$0xff] %v10167_v63  ;;  %v10171_v31 = vpop.eup %6659  ;;  %6671 = vpow2.f32 %v3238_v50  ;;  %v3145_v1 = vsub.f32 %v12821_v14, %v9897_v11 }
 0x815   : > { %12820 = vst [vmem:[#allocation20_spill] sm:$0xff] %v10171_v31  ;;  %v10175_v10 = vpop.eup %6661 }
 0x816   : > { %12822 = vst [vmem:[#allocation135_spill] sm:$0xff] %v10175_v10  ;;  %v3232_v37 = vmul.f32 1.442695, %v3138_v26  ;;  %v10177_v49 = vpop.eup %6663  ;;  %v3246_v50 = vmul.f32 1.442695, %v3145_v1  ;;  %v12830_v26 = vld [vmem:[#allocation155_spill] sm:$0xff] }
 0x817   : > { %12823 = vst [vmem:[#allocation136_spill] sm:$0xff] %v10177_v49  ;;  %v3142_v14 = vsub.f32 %v12830_v26, %v9871_v51  ;;  %v3342_v2 = vadd.f32 %v10177_v49, %v10175_v10  ;;  %v12838_v49 = vld [vmem:[#allocation36_spill] sm:$0xff] }
 0x818   : > { %4093 = vmax.xlane.f32.xlu0 %v12812_v38  ;;  %v12819_v38 = vld [vmem:[#allocation157_spill] sm:$0xff]  ;;  %6673 = vpow2.f32 %v3232_v37  ;;  %v12833_v37 = vld [vmem:[#allocation162_spill] sm:$0xff] }
 0x819   : > { %v3144_v56 = vsub.f32 %v12819_v38, %v9897_v11  ;;  %v12827_v38 = vld [vmem:[#allocation33_spill] sm:$0xff]  ;;  %v3333_v11 = vadd.f32 %v10171_v31, %v10167_v63  ;;  %6675 = vpow2.f32 %v3234_v39  ;;  %v3149_v26 = vsub.f32 %v12833_v37, %v9937_v3 }
 0x81a   : > { %v10193_v40 = vpop.eup %6665  ;;  %v3240_v39 = vmul.f32 1.442695, %v3142_v14 }
 0x81b   : > { %v10162_v22 = vpop.xlane.xlu0 %3091  ;;  %3106 = vmax.xlane.f32.xlu1 %v12817_v0  ;;  %v3244_v5 = vmul.f32 1.442695, %v3144_v56  ;;  %v3254_v37 = vmul.f32 1.442695, %v3149_v26  ;;  %v3152_v26 = vsub.f32 %v12685_v6, %v9945_v23 }
 0x81c   : > { %3337 = vadd.xlane.f32.xlu0 %v3336_v41  ;;  %v12828_v41 = vld [vmem:[#allocation34_spill] sm:$0xff] }
 0x81d   : > { %v12829_v33 = vmax.f32 %v12827_v38, %v12828_v41  ;;  %6677 = vpow2.f32 %v3244_v5  ;;  %v3260_v6 = vmul.f32 1.442695, %v3152_v26  ;;  %v12851_v26 = vld [vmem:[#allocation164_spill] sm:$0xff] }
 0x81e   : > { %6679 = vpow2.f32 %v3246_v50  ;;  %v12839_v50 = vld [vmem:[#allocation108_spill] sm:$0xff] }
 0x81f   : > { %v3533_v0 = vpop.permute.xlu0 %3532  ;;  %4090 = vmax.xlane.f32.xlu1 %v12826_v9  ;;  %v12831_v9 = vld [vmem:[#allocation156_spill] sm:$0xff]  ;;  %v12840_v63 = vmax.f32 %v12838_v49, %v12839_v50  ;;  %6681 = vpow2.f32 %v3240_v39 }
 0x820   : > { %4099 = vmax.xlane.f32.xlu0 %v12829_v33  ;;  %5866 = vmatpush3.bf16.msra.mxu0 %v3533_v0  ;;  %v3143_v56 = vsub.f32 %v12831_v9, %v9871_v51  ;;  %v12832_v33 = vld [vmem:[#allocation161_spill] sm:$0xff]  ;;  %v10197_v0 = vpop.eup %6667  ;;  %v12835_v9 = vld [vmem:[#allocation100_spill] sm:$0xff] }
 0x821   : > { %v3148_v1 = vsub.f32 %v12832_v33, %v9937_v3  ;;  %v10201_v41 = vpop.eup %6669  ;;  %v3339_v14 = vadd.f32 %v10197_v0, %v10193_v40 }
 0x822   : > { %v10203_v43 = vpop.eup %6671  ;;  %v3242_v51 = vmul.f32 1.442695, %v3143_v56  ;;  %v12841_v56 = vld [vmem:[#allocation159_spill] sm:$0xff] }
 0x823   : > { %3334 = vadd.xlane.f32.xlu1 %v3333_v11  ;;  %v12834_v11 = vld [vmem:[#allocation28_spill] sm:$0xff]  ;;  %v3252_v33 = vmul.f32 1.442695, %v3148_v1  ;;  %v3146_v59 = vsub.f32 %v12841_v56, %v9899_v44  ;;  %v12844_v56 = vld [vmem:[#allocation105_spill] sm:$0xff] }
 0x824   : > { %3343 = vadd.xlane.f32.xlu0 %v3342_v2  ;;  %v12836_v5 = vmax.f32 %v12834_v11, %v12835_v9  ;;  %6683 = vpow2.f32 %v3242_v51 }
 0x825   : > { %6685 = vpow2.f32 %v3252_v33  ;;  %v3248_v51 = vmul.f32 1.442695, %v3146_v59  ;;  %v12845_v33 = vld [vmem:[#allocation35_spill] sm:$0xff] }
 0x826   : > { %v5797_v38 = vpop.f32.mrb[152].mxu0  ;;  %6687 = vpow2.f32 %v3254_v37 }
 0x827   : > { %4096 = vmax.xlane.f32.xlu1 %v12836_v5  ;;  %v5798_v10 = vpop.f32.mrb[153].mxu0  ;;  %6689 = vpow2.f32 %v3248_v51  ;;  %v3157_v51 = vsub.f32 %v12712_v48, %v10042_v58 }
 0x828   : > { %v10208_v2 = vadd.f32 %v5798_v10, %v5797_v38  ;;  %4105 = vmax.xlane.f32.xlu0 %v12840_v63  ;;  %v5800_v3 = vpop.f32.mrb[154].mxu0  ;;  %v3348_v10 = vadd.f32 %v10203_v43, %v10201_v41  ;;  %v12843_v38 = vld [vmem:[#allocation160_spill] sm:$0xff]  ;;  %v10223_v63 = vpop.eup %6673 }
 0x829   : > { %v5801_v31 = vpop.f32.mrb[155].mxu0  ;;  %v3147_v1 = vsub.f32 %v12843_v38, %v9899_v44  ;;  %v10227_v39 = vpop.eup %6675  ;;  %v12846_v38 = vmax.f32 %v12844_v56, %v12845_v33  ;;  %v12856_v56 = vld [vmem:[#allocation46_spill] sm:$0xff]  ;;  %v3270_v11 = vmul.f32 1.442695, %v3157_v51  ;;  %v3160_v51 = vsub.f32 %v12727_v30, %v10162_v22 }
 0x82a   : > { %12837 = vst [vmem:[#allocation21_spill] sm:$0xff] %v10208_v2  ;;  %v10217_v9 = vadd.f32 %v5801_v31, %v5800_v3  ;;  %v3153_v31 = vsub.f32 %v12686_v21, %v9945_v23  ;;  %v10231_v5 = vpop.eup %6677  ;;  %v12848_v2 = vld [vmem:[#allocation39_spill] sm:$0xff]  ;;  %v3345_v21 = vadd.f32 %v10227_v39, %v10223_v63 }
 0x82b   : > { %3340 = vadd.xlane.f32.xlu1 %v3339_v14  ;;  %v10235_v44 = vpop.eup %6679  ;;  %v3250_v14 = vmul.f32 1.442695, %v3147_v1  ;;  %v12850_v23 = vld [vmem:[#allocation163_spill] sm:$0xff]  ;;  %v3276_v30 = vmul.f32 1.442695, %v3160_v51 }
 0x82c   : > { %12842 = vst [vmem:[#allocation22_spill] sm:$0xff] %v10217_v9  ;;  %3349 = vadd.xlane.f32.xlu0 %v3348_v10  ;;  %v12847_v10 = vld [vmem:[#allocation75_spill] sm:$0xff]  ;;  %v3262_v37 = vmul.f32 1.442695, %v3153_v31  ;;  %v3150_v59 = vsub.f32 %v12850_v23, %v9941_v7  ;;  %v3354_v1 = vadd.f32 %v10235_v44, %v10231_v5 }
 0x82d   : > { %v12849_v9 = vmax.f32 %v12847_v10, %v12848_v2  ;;  %6691 = vpow2.f32 %v3250_v14  ;;  %v10253_v2 = vpop.eup %6681  ;;  %v3535_v10 = vpop.permute.xlu0 %3534 }
 0x82e   : > { %v10233_v3 = vpop.xlane.xlu1 %3094  ;;  %6693 = vpow2.f32 %v3260_v6  ;;  %v10257_v31 = vpop.eup %6683  ;;  %v3256_v14 = vmul.f32 1.442695, %v3150_v59  ;;  %v12852_v6 = vld [vmem:[#allocation37_spill] sm:$0xff] }
 0x82f   : > { %4102 = vmax.xlane.f32.xlu1 %v12846_v38  ;;  %v3151_v38 = vsub.f32 %v12851_v26, %v9941_v7  ;;  %6695 = vpow2.f32 %v3262_v37  ;;  %v10261_v23 = vpop.eup %6685  ;;  %v12853_v26 = vld [vmem:[#allocation38_spill] sm:$0xff]  ;;  %v3351_v48 = vadd.f32 %v10257_v31, %v10253_v2 }
 0x830   : > { %4111 = vmax.xlane.f32.xlu0 %v12849_v9  ;;  %v3156_v9 = vsub.f32 %v12711_v61, %v10042_v58  ;;  %v10265_v7 = vpop.eup %6687  ;;  %v12854_v33 = vmax.f32 %v12852_v6, %v12853_v26  ;;  %6697 = vpow2.f32 %v3256_v14  ;;  %v3154_v58 = vsub.f32 %v12689_v12, %v9949_v53 }
 0x831   : > { %v3553_v14 = vpop.permute.xlu0 %3552 }
 0x832   : > { %v10247_v50 = vpop.xlane.xlu1 %3313  ;;  %v3268_v61 = vmul.f32 1.442695, %v3156_v9  ;;  %v10281_v9 = vpop.eup %6689 }
 0x833   : > { %3346 = vadd.xlane.f32.xlu1 %v3345_v21  ;;  %v3258_v21 = vmul.f32 1.442695, %v3151_v38  ;;  %v3360_v38 = vadd.f32 %v10265_v7, %v10261_v23 }
 0x834   : > { %3355 = vadd.xlane.f32.xlu0 %v3354_v1  ;;  %v12855_v1 = vld [vmem:[#allocation45_spill] sm:$0xff] }
 0x835   : > { %v12857_v37 = vmax.f32 %v12855_v1, %v12856_v56  ;;  %6699 = vpow2.f32 %v3258_v21  ;;  %v3161_v21 = vsub.f32 %v12728_v54, %v10162_v22 }
 0x836   : > { %v10263_v49 = vpop.xlane.xlu1 %3316  ;;  %6701 = vpow2.f32 %v3268_v61  ;;  %v12858_v61 = vld [vmem:[#allocation41_spill] sm:$0xff] }
 0x837   : > { %4108 = vmax.xlane.f32.xlu1 %v12854_v33  ;;  %v3155_v33 = vsub.f32 %v12690_v55, %v9949_v53  ;;  %v10285_v12 = vpop.eup %6691  ;;  %6703 = vpow2.f32 %v3270_v11  ;;  %v3264_v55 = vmul.f32 1.442695, %v3154_v58  ;;  %v3278_v11 = vmul.f32 1.442695, %v3161_v21 }
 0x838   : > { %4117 = vmax.xlane.f32.xlu0 %v12857_v37  ;;  %v10289_v37 = vpop.eup %6693  ;;  %v3357_v54 = vadd.f32 %v10285_v12, %v10281_v9  ;;  %v3158_v58 = vsub.f32 %v12716_v19, %v10073_v24 }
 0x839   : > { %v10291_v53 = vpop.eup %6695  ;;  %6705 = vpow2.f32 %v3264_v55  ;;  %v12864_v55 = vld [vmem:[#allocation79_spill] sm:$0xff] }
 0x83a   : > { %v3551_v59 = vpop.permute.xlu1 %3550  ;;  %v3366_v22 = vadd.f32 %v10291_v53, %v10289_v37  ;;  %v3272_v21 = vmul.f32 1.442695, %v3158_v58 }
 0x83b   : > { %3352 = vadd.xlane.f32.xlu1 %v3351_v48  ;;  %5867 = vmatprep.subr.bf16.mxu0 %v3551_v59  ;;  %v3266_v48 = vmul.f32 1.442695, %v3155_v33  ;;  %v12859_v59 = vld [vmem:[#allocation42_spill] sm:$0xff]  ;;  %v10305_v33 = vpop.eup %6697 }
 0x83c   : > { %3361 = vadd.xlane.f32.xlu0 %v3360_v38  ;;  %5868 = vmatpush3.bf16.msra.mxu0 %v3535_v10  ;;  %v12860_v56 = vmax.f32 %v12858_v61, %v12859_v59  ;;  %v12861_v38 = vld [vmem:[#allocation91_spill] sm:$0xff]  ;;  %v12862_v10 = vld [vmem:[#allocation92_spill] sm:$0xff] }
 0x83d   : > { %5869 = vmatprep.subr.bf16.mxu0 %v3553_v14  ;;  %v12863_v1 = vmax.f32 %v12861_v38, %v12862_v10  ;;  %6707 = vpow2.f32 %v3266_v48  ;;  %v12865_v48 = vld [vmem:[#allocation80_spill] sm:$0xff]  ;;  %v12868_v38 = vld [vmem:[#allocation51_spill] sm:$0xff] }
 0x83e   : > { %6709 = vpow2.f32 %v3276_v30  ;;  %v12866_v10 = vmax.f32 %v12864_v55, %v12865_v48  ;;  %v3162_v30 = vsub.f32 %v12738_v32, %v10233_v3  ;;  %v12870_v48 = vld [vmem:[#allocation89_spill] sm:$0xff] }
 0x83f   : > { %4114 = vmax.xlane.f32.xlu1 %v12860_v56  ;;  %v3159_v56 = vsub.f32 %v12717_v18, %v10073_v24  ;;  %6711 = vpow2.f32 %v3278_v11 }
 0x840   : > { %4123 = vmax.xlane.f32.xlu0 %v12863_v1  ;;  %v10309_v1 = vpop.eup %6699  ;;  %6713 = vpow2.f32 %v3272_v21  ;;  %v12871_v21 = vld [vmem:[#allocation94_spill] sm:$0xff] }
 0x841   : > { %v10311_v51 = vpop.eup %6701  ;;  %v3274_v19 = vmul.f32 1.442695, %v3159_v56  ;;  %v3363_v18 = vadd.f32 %v10309_v1, %v10305_v33  ;;  %v3280_v56 = vmul.f32 1.442695, %v3162_v30  ;;  %v12872_v55 = vmax.f32 %v12870_v48, %v12871_v21  ;;  %v12877_v30 = vld [vmem:[#allocation49_spill] sm:$0xff]  ;;  %v12880_v48 = vld [vmem:[#allocation178_spill] sm:$0xff] }
 0x842   : > { %v10313_v14 = vpop.eup %6703 }
 0x843   : > { %3358 = vadd.xlane.f32.xlu1 %v3357_v54  ;;  %v12867_v54 = vld [vmem:[#allocation106_spill] sm:$0xff]  ;;  %v3372_v24 = vadd.f32 %v10313_v14, %v10311_v51  ;;  %v10327_v11 = vpop.eup %6705  ;;  %6715 = vpow2.f32 %v3274_v19 }
 0x844   : > { %3367 = vadd.xlane.f32.xlu0 %v3366_v22  ;;  %v12869_v59 = vmax.f32 %v12867_v54, %v12868_v38  ;;  %v12874_v38 = vld [vmem:[#allocation176_spill] sm:$0xff]  ;;  %6717 = vpow2.f32 %v3280_v56 }
 0x847   : > { %4120 = vmax.xlane.f32.xlu1 %v12866_v10  ;;  %v3163_v10 = vsub.f32 %v12739_v8, %v10233_v3  ;;  %v10331_v22 = vpop.eup %6707 }
 0x848   : > { %4129 = vmax.xlane.f32.xlu0 %v12869_v59  ;;  %v10333_v59 = vpop.eup %6709  ;;  %v3369_v8 = vadd.f32 %v10331_v22, %v10327_v11 }
 0x849   : > { %v10335_v58 = vpop.eup %6711  ;;  %v3282_v32 = vmul.f32 1.442695, %v3163_v10 }
 0x84a   : > { %v3378_v3 = vadd.f32 %v10335_v58, %v10333_v59  ;;  %v10347_v19 = vpop.eup %6713 }
 0x84b   : > { %3364 = vadd.xlane.f32.xlu1 %v3363_v18  ;;  %v12873_v18 = vld [vmem:[#allocation104_spill] sm:$0xff]  ;;  %6719 = vpow2.f32 %v3282_v32 }
 0x84c   : > { %3373 = vadd.xlane.f32.xlu0 %v3372_v24  ;;  %v12875_v54 = vmax.f32 %v12873_v18, %v12874_v38 }
 0x84d   : > { %v10349_v24 = vpop.eup %6715 }
 0x84e   : > { %v3375_v32 = vadd.f32 %v10349_v24, %v10347_v19  ;;  %v10361_v26 = vpop.eup %6717 }
 0x84f   : > { %4126 = vmax.xlane.f32.xlu1 %v12872_v55  ;;  %v12876_v55 = vld [vmem:[#allocation52_spill] sm:$0xff] }
 0x850   : > { %4135 = vmax.xlane.f32.xlu0 %v12875_v54  ;;  %v12878_v10 = vmax.f32 %v12876_v55, %v12877_v30  ;;  %v12879_v54 = vld [vmem:[#allocation112_spill] sm:$0xff]  ;;  %v12882_v30 = vld [vmem:[#allocation177_spill] sm:$0xff] }
 0x851   : > { %v12881_v38 = vmax.f32 %v12879_v54, %v12880_v48 }
 0x853   : > { %3370 = vadd.xlane.f32.xlu1 %v3369_v8 }
 0x854   : > { %3379 = vadd.xlane.f32.xlu0 %v3378_v3 }
 0x857   : > { %4132 = vmax.xlane.f32.xlu1 %v12878_v10  ;;  %v10363_v10 = vpop.eup %6719 }
 0x858   : > { %v3098_v21 = vpop.xlane.xlu0 %3097  ;;  %4141 = vmax.xlane.f32.xlu0 %v12881_v38  ;;  %v12883_v38 = vld [vmem:[#allocation53_spill] sm:$0xff] }
 0x859   : > { %v3164_v18 = vsub.f32 %v12749_v17, %v3098_v21  ;;  %v3165_v56 = vsub.f32 %v12750_v13, %v3098_v21  ;;  %v12884_v55 = vmax.f32 %v12882_v30, %v12883_v38  ;;  %v3381_v17 = vadd.f32 %v10363_v10, %v10361_v26  ;;  %v12913_v30 = vld [vmem:[#allocation131_spill] sm:$0xff] }
 0x85b   : > { %v3284_v8 = vmul.f32 1.442695, %v3164_v18  ;;  %v3286_v3 = vmul.f32 1.442695, %v3165_v56  ;;  %3376 = vadd.xlane.f32.xlu1 %v3375_v32 }
 0x85c   : > { %v3537_v61 = vpop.permute.xlu0 %3536 }
 0x85d   : > { %6721 = vpow2.f32 %v3284_v8  ;;  %5870 = vmatpush3.bf16.msra.mxu0 %v3537_v61  ;;  %v12887_v8 = vld [vmem:[#allocation179_spill] sm:$0xff] }
 0x85e   : > { %6723 = vpow2.f32 %v3286_v3  ;;  %v12888_v3 = vld [vmem:[#allocation180_spill] sm:$0xff] }
 0x85f   : > { %4138 = vmax.xlane.f32.xlu1 %v12884_v55  ;;  %v12889_v54 = vmax.f32 %v12887_v8, %v12888_v3  ;;  %6725 = vrcp.f32 %v10087_v42 }
 0x860   : > { %6727 = vrcp.f32 %v10079_v45 }
 0x863   : > { %v5803_v13 = vpop.f32.mrb[156].mxu0  ;;  %3382 = vadd.xlane.f32.xlu1 %v3381_v17 }
 0x864   : > { %v5804_v21 = vpop.f32.mrb[157].mxu0 }
 0x865   : > { %v10370_v18 = vadd.f32 %v5804_v21, %v5803_v13  ;;  %v5806_v56 = vpop.f32.mrb[158].mxu0 }
 0x866   : > { %v5807_v32 = vpop.f32.mrb[159].mxu0 }
 0x867   : > { %12885 = vst [vmem:[#allocation137_spill] sm:$0xff] %v10370_v18  ;;  %v10372_v48 = vpop.eup %6721  ;;  %v10374_v61 = vadd.f32 %v5807_v32, %v5806_v56  ;;  %4144 = vmax.xlane.f32.xlu1 %v12889_v54  ;;  %v12890_v18 = vld [vmem:[#allocation58_spill] sm:$0xff] }
 0x868   : > { %v10379_v38 = vpop.eup %6723 }
 0x869   : > { %12886 = vst [vmem:[#allocation138_spill] sm:$0xff] %v10374_v61  ;;  %v3384_v55 = vadd.f32 %v10379_v38, %v10372_v48  ;;  %v12891_v61 = vld [vmem:[#allocation183_spill] sm:$0xff] }
 0x86a   : > { %v12892_v54 = vmax.f32 %v12890_v18, %v12891_v61  ;;  %v12915_v61 = vld [vmem:[#allocation26_spill] sm:$0xff] }
 0x86b   : > { %3385 = vadd.xlane.f32.xlu0 %v3384_v55  ;;  %v3101_v17 = vpop.xlane.xlu1 %3100  ;;  %v6726_v55 = vpop.eup %6725 }
 0x86c   : > { %v3166_v13 = vsub.f32 %v12760_v25, %v3101_v17  ;;  %v3167_v21 = vsub.f32 %v12761_v20, %v3101_v17  ;;  %v6728_v45 = vpop.eup %6727  ;;  %v3435_v25 = vmul.f32 %v6726_v55, %v9929_v46  ;;  %v3539_v20 = vpop.permute.xlu0 %3538 }
 0x86d   : > { %v3433_v17 = vmul.f32 %v6728_v45, %v9920_v47  ;;  %v3434_v47 = vmul.f32 %v6726_v55, %v9925_v52 }
 0x86e   : > { %v3288_v56 = vmul.f32 1.442695, %v3166_v13  ;;  %v3290_v32 = vmul.f32 1.442695, %v3167_v21 }
 0x86f   : > { %4147 = vmax.xlane.f32.xlu0 %v12892_v54  ;;  %v3320_v3 = vpop.xlane.xlu1 %3319  ;;  %v3432_v54 = vmul.f32 %v6728_v45, %v9918_v28  ;;  %v12897_v45 = vld [vmem:[#allocation78_spill] sm:$0xff] }
 0x870   : > { %6729 = vpow2.f32 %v3288_v56  ;;  %v3495_v56 = vpack.c.bf16 %v3435_v25, %v3433_v17  ;;  %v12894_v25 = vld [vmem:[#allocation184_spill] sm:$0xff] }
 0x871   : > { %6731 = vpow2.f32 %v3290_v32 }
 0x872   : > { %6733 = vrcp.f32 %v10263_v49 }
 0x873   : > { %v3323_v42 = vpop.xlane.xlu1 %3322  ;;  %6735 = vrcp.f32 %v10247_v50  ;;  %v12893_v50 = vpack.c.bf16 %v10011_v4, %v10008_v27  ;;  %v3494_v27 = vpack.c.bf16 %v3434_v47, %v3432_v54  ;;  %v12898_v47 = vld [vmem:[#allocation122_spill] sm:$0xff] }
 0x874   : > { %6737 = vrcp.f32 %v3323_v42 }
 0x875   : > { %6739 = vrcp.f32 %v3320_v3  ;;  %v12895_v3 = vld [vmem:[#allocation61_spill] sm:$0xff] }
 0x877   : > { %v3555_v8 = vpop.permute.xlu1 %3554 }
 0x878   : > { %5871 = vmatprep.subr.bf16.mxu0 %v3555_v8 }
 0x879   : > { %5872 = vmatpush3.bf16.msra.mxu0 %v3539_v20  ;;  %v12896_v20 = vmax.f32 %v12894_v25, %v12895_v3 }
 0x87a   : > { %v10394_v13 = vpop.eup %6729 }
 0x87b   : > { %v10396_v21 = vpop.eup %6731 }
 0x87c   : > { %v6734_v49 = vpop.eup %6733  ;;  %3605 = vmatmul.mubr.bf16.vlgmr.msra.gmra.mrb[160].mxu0 %v12893_v50  ;;  %v3387_v46 = vadd.f32 %v10396_v21, %v10394_v13 }
 0x87d   : > { %3612 = vmatprep.mubr.bf16.mxu0 %v3495_v56  ;;  %v6736_v8 = vpop.eup %6735  ;;  %v3439_v32 = vmul.f32 %v6734_v49, %v9991_v16  ;;  %v3438_v50 = vmul.f32 %v6734_v49, %v9987_v15 }
 0x87e   : > { %3388 = vadd.xlane.f32.xlu1 %v3387_v46  ;;  %v3437_v42 = vmul.f32 %v6736_v8, %v9980_v62  ;;  %v6738_v17 = vpop.eup %6737  ;;  %v3436_v16 = vmul.f32 %v6736_v8, %v9976_v36 }
 0x87f   : > { %v6740_v56 = vpop.eup %6739  ;;  %v3443_v52 = vmul.f32 %v6738_v17, %v10053_v35  ;;  %v3442_v46 = vmul.f32 %v6738_v17, %v12897_v45 }
 0x880   : > { %v3497_v4 = vpack.c.bf16 %v3439_v32, %v3437_v42  ;;  %v3441_v28 = vmul.f32 %v6740_v56, %v10038_v34  ;;  %v3496_v55 = vpack.c.bf16 %v3438_v50, %v3436_v16  ;;  %v3440_v32 = vmul.f32 %v6740_v56, %v12898_v47 }
 0x882   : > { %4150 = vmax.xlane.f32.xlu1 %v12896_v20  ;;  %v3499_v62 = vpack.c.bf16 %v3443_v52, %v3441_v28  ;;  %v12899_v20 = vld [vmem:[#allocation24_spill] sm:$0xff]  ;;  %v3498_v15 = vpack.c.bf16 %v3442_v46, %v3440_v32  ;;  %v12900_v28 = vld [vmem:[#allocation171_spill] sm:$0xff]  ;;  %v12902_v46 = vld [vmem:[#allocation170_spill] sm:$0xff] }
 0x883   : > { %v12903_v32 = vld [vmem:[#allocation129_spill] sm:$0xff] }
 0x884   : > { %3613 = vmatmul.mubr.bf16.gmra.mrb[164].mxu0 %v3494_v27 }
 0x885   : > { %3620 = vmatprep.mubr.bf16.mxu0 %v3497_v4 }
 0x88c   : > { %3621 = vmatmul.mubr.bf16.gmra.mrb[168].mxu0 %v3496_v55 }
 0x88d   : > { %3628 = vmatprep.mubr.bf16.mxu0 %v3499_v62  ;;  %v12901_v62 = vld [vmem:[#allocation172_spill] sm:$0xff] }
 0x891   : > { %v3104_v54 = vpop.xlane.xlu0 %3103 }
 0x892   : > { %v3168_v42 = vsub.f32 %v12785_v57, %v3104_v54  ;;  %v3169_v27 = vsub.f32 %v12899_v20, %v3104_v54 }
 0x894   : > { %v3292_v49 = vmul.f32 1.442695, %v3168_v42  ;;  %v3294_v35 = vmul.f32 1.442695, %v3169_v27  ;;  %3629 = vmatmul.mubr.bf16.gmra.mrb[172].mxu0 %v3498_v15 }
 0x895   : > { %v3326_v36 = vpop.xlane.xlu0 %3325 }
 0x896   : > { %6741 = vpow2.f32 %v3292_v49 }
 0x897   : > { %6743 = vpow2.f32 %v3294_v35 }
 0x898   : > { %6745 = vrcp.f32 %v3326_v36 }
 0x899   : > { %v3329_v34 = vpop.xlane.xlu0 %3328 }
 0x89a   : > { %6747 = vrcp.f32 %v3329_v34 }
 0x89d   : > { %v10418_v8 = vpop.xlane.xlu0 %4087 }
 0x89e   : > { %v4182_v18 = vsub.f32 %v12915_v61, %v10418_v8 }
 0x8a0   : > { %v10420_v4 = vpop.eup %6741 }
 0x8a1   : > { %v10422_v17 = vpop.eup %6743  ;;  %v3332_v56 = vpop.xlane.xlu0 %3331 }
 0x8a2   : > { %v6746_v57 = vpop.eup %6745  ;;  %v3390_v50 = vadd.f32 %v10422_v17, %v10420_v4 }
 0x8a3   : > { %v3445_v55 = vmul.f32 %v6746_v57, %v12900_v28  ;;  %v3444_v47 = vmul.f32 %v6746_v57, %v12902_v46 }
 0x8a4   : > { %v6748_v52 = vpop.eup %6747  ;;  %3391 = vadd.xlane.f32.xlu0 %v3390_v50 }
 0x8a5   : > { %v10426_v16 = vpop.xlane.xlu0 %4093  ;;  %v3447_v45 = vmul.f32 %v6748_v52, %v12901_v62  ;;  %v3446_v54 = vmul.f32 %v6748_v52, %v12903_v32  ;;  %v12905_v32 = vld [vmem:[#allocation11_spill] sm:$0xff] }
 0x8a7   : > { %v3501_v42 = vpack.c.bf16 %v3447_v45, %v3445_v55  ;;  %v3500_v20 = vpack.c.bf16 %v3446_v54, %v3444_v47 }
 0x8a8   : > { %v3107_v27 = vpop.xlane.xlu1 %3106 }
 0x8a9   : > { %v3170_v15 = vsub.f32 %v12815_v29, %v3107_v27  ;;  %v3171_v49 = vsub.f32 %v12816_v60, %v3107_v27  ;;  %v3338_v35 = vpop.xlane.xlu0 %3337  ;;  %3636 = vmatprep.mubr.bf16.mxu0 %v3501_v42  ;;  %v12908_v27 = vld [vmem:[#allocation186_spill] sm:$0xff] }
 0x8aa   : > { %3637 = vmatmul.mubr.bf16.gmra.mrb[176].mxu0 %v3500_v20 }
 0x8ab   : > { %v3296_v36 = vmul.f32 1.442695, %v3170_v15  ;;  %v3298_v34 = vmul.f32 1.442695, %v3171_v49  ;;  %v12909_v15 = vld [vmem:[#allocation187_spill] sm:$0xff] }
 0x8ac   : > { %v10434_v50 = vpop.xlane.xlu1 %4090  ;;  %v12910_v49 = vmax.f32 %v12908_v27, %v12909_v15  ;;  %v12918_v15 = vld [vmem:[#allocation189_spill] sm:$0xff]  ;;  %v12920_v27 = vld [vmem:[#allocation134_spill] sm:$0xff] }
 0x8ad   : > { %6749 = vpow2.f32 %v3296_v36  ;;  %v10436_v28 = vpop.xlane.xlu0 %4099  ;;  %v12911_v36 = vld [vmem:[#allocation174_spill] sm:$0xff] }
 0x8ae   : > { %6751 = vpow2.f32 %v3298_v34 }
 0x8af   : > { %6753 = vrcp.f32 %v3332_v56 }
 0x8b0   : > { %v3335_v57 = vpop.xlane.xlu1 %3334 }
 0x8b1   : > { %v3344_v52 = vpop.xlane.xlu0 %3343  ;;  %6755 = vrcp.f32 %v3335_v57  ;;  %v12912_v57 = vld [vmem:[#allocation20_spill] sm:$0xff] }
 0x8b2   : > { %6757 = vrcp.f32 %v3338_v35  ;;  %v12914_v35 = vld [vmem:[#allocation19_spill] sm:$0xff] }
 0x8b4   : > { %v10438_v55 = vpop.xlane.xlu1 %4096 }
 0x8b5   : > { %v10440_v29 = vpop.xlane.xlu0 %4105 }
 0x8b6   : > { %12904 = vst [vmem:[#allocation139_spill] sm:$0xff] %v10440_v29 }
 0x8b7   : > { %v10442_v60 = vpop.eup %6749 }
 0x8b8   : > { %v10444_v62 = vpop.eup %6751  ;;  %v3341_v45 = vpop.xlane.xlu1 %3340 }
 0x8b9   : > { %v3350_v46 = vpop.xlane.xlu0 %3349  ;;  %v3393_v47 = vadd.f32 %v10444_v62, %v10442_v60  ;;  %v6754_v54 = vpop.eup %6753  ;;  %6759 = vrcp.f32 %v3341_v45 }
 0x8ba   : > { %4614 = vrot.lane.b32.xlu0 %v12905_v32, %s7007_s25  ;;  %v3449_v34 = vmul.f32 %v6754_v54, %v12911_v36  ;;  %v3448_v32 = vmul.f32 %v6754_v54, %v12913_v30  ;;  %6761 = vrcp.f32 %v3344_v52  ;;  %v4246_v54 = vmul.f32 1.442695, %v4182_v18 }
 0x8bb   : > { %3394 = vadd.xlane.f32.xlu1 %v3393_v47  ;;  %v6756_v20 = vpop.eup %6755 }
 0x8bc   : > { %v10450_v56 = vpop.xlane.xlu1 %4102  ;;  %v3451_v3 = vmul.f32 %v6756_v20, %v12912_v57  ;;  %v3450_v47 = vmul.f32 %v6756_v20, %v12914_v35  ;;  %v6758_v30 = vpop.eup %6757 }
 0x8bd   : > { %12906 = vst [vmem:[#allocation140_spill] sm:$0xff] %v10450_v56  ;;  %v10452_v42 = vpop.xlane.xlu0 %4111 }
 0x8be   : > { %12907 = vst [vmem:[#allocation141_spill] sm:$0xff] %v10452_v42  ;;  %v12916_v42 = vld [vmem:[#allocation64_spill] sm:$0xff]  ;;  %v3503_v29 = vpack.c.bf16 %v3451_v3, %v3449_v34  ;;  %v3502_v56 = vpack.c.bf16 %v3450_v47, %v3448_v32 }
 0x8bf   : > { %4153 = vmax.xlane.f32.xlu1 %v12910_v49  ;;  %v4183_v6 = vsub.f32 %v12916_v42, %v10418_v8  ;;  %v12917_v49 = vld [vmem:[#allocation188_spill] sm:$0xff]  ;;  %v3453_v8 = vmul.f32 %v6758_v30, %v12920_v27  ;;  %v12921_v42 = vld [vmem:[#allocation133_spill] sm:$0xff] }
 0x8c0   : > { %v3347_v25 = vpop.xlane.xlu1 %3346  ;;  %v12919_v36 = vmax.f32 %v12917_v49, %v12918_v15  ;;  %3644 = vmatprep.mubr.bf16.mxu0 %v3503_v29  ;;  %v3452_v34 = vmul.f32 %v6758_v30, %v12921_v42 }
 0x8c1   : > { %v3356_v45 = vpop.xlane.xlu0 %3355  ;;  %6763 = vrcp.f32 %v3347_v25  ;;  %3645 = vmatmul.mubr.bf16.gmra.mrb[180].mxu0 %v3502_v56  ;;  %v4248_v61 = vmul.f32 1.442695, %v4183_v6 }
 0x8c2   : > { %6765 = vpow2.f32 %v4246_v54  ;;  %v12923_v54 = vld [vmem:[#allocation135_spill] sm:$0xff] }
 0x8c3   : > { %4156 = vmax.xlane.f32.xlu1 %v12919_v36  ;;  %v6760_v35 = vpop.eup %6759  ;;  %6767 = vpow2.f32 %v4248_v61 }
 0x8c4   : > { %v10468_v57 = vpop.xlane.xlu1 %4108  ;;  %v3455_v3 = vmul.f32 %v6760_v35, %v10197_v0  ;;  %v3454_v32 = vmul.f32 %v6760_v35, %v10193_v40  ;;  %6769 = vrcp.f32 %v3350_v46  ;;  %v6762_v6 = vpop.eup %6761  ;;  %v12922_v0 = vld [vmem:[#allocation136_spill] sm:$0xff] }
 0x8c5   : > { %v10470_v20 = vpop.xlane.xlu0 %4117  ;;  %v3457_v36 = vmul.f32 %v6762_v6, %v12922_v0  ;;  %v3456_v61 = vmul.f32 %v6762_v6, %v12923_v54 }
 0x8c6   : > { %v3505_v29 = vpack.c.bf16 %v3455_v3, %v3453_v8  ;;  %v3504_v18 = vpack.c.bf16 %v3454_v32, %v3452_v34 }
 0x8c8   : > { %v3353_v52 = vpop.xlane.xlu1 %3352  ;;  %3652 = vmatprep.mubr.bf16.mxu0 %v3505_v29 }
 0x8c9   : > { %v3362_v47 = vpop.xlane.xlu0 %3361  ;;  %6771 = vrcp.f32 %v3353_v52  ;;  %3653 = vmatmul.mubr.bf16.gmra.mrb[184].mxu0 %v3504_v18  ;;  %v12924_v52 = vld [vmem:[#allocation3_spill] sm:$0xff] }
 0x8ca   : > { %6773 = vrcp.f32 %v3356_v45 }
 0x8cb   : > { %v6764_v56 = vpop.eup %6763 }
 0x8cc   : > { %v10476_v25 = vpop.xlane.xlu1 %4114  ;;  %v3459_v30 = vmul.f32 %v6764_v56, %v10227_v39  ;;  %v3458_v35 = vmul.f32 %v6764_v56, %v10223_v63  ;;  %v10484_v3 = vpop.eup %6765 }
 0x8cd   : > { %v10478_v27 = vpop.xlane.xlu0 %4123  ;;  %v10486_v42 = vpop.eup %6767 }
 0x8ce   : > { %v3507_v8 = vpack.c.bf16 %v3459_v30, %v3457_v36  ;;  %v3506_v46 = vpack.c.bf16 %v3458_v35, %v3456_v61  ;;  %v6770_v32 = vpop.eup %6769  ;;  %v4374_v63 = vadd.f32 %v10486_v42, %v10484_v3 }
 0x8cf   : > { %v3461_v18 = vmul.f32 %v6770_v32, %v10203_v43  ;;  %v3460_v56 = vmul.f32 %v6770_v32, %v10201_v41 }
 0x8d0   : > { %v3359_v40 = vpop.xlane.xlu1 %3358  ;;  %3660 = vmatprep.mubr.bf16.mxu0 %v3507_v8 }
 0x8d1   : > { %6775 = vrcp.f32 %v3359_v40  ;;  %3661 = vmatmul.mubr.bf16.gmra.mrb[188].mxu0 %v3506_v46  ;;  %v3368_v39 = vpop.xlane.xlu0 %3367 }
 0x8d2   : > { %6777 = vrcp.f32 %v3362_v47 }
 0x8d3   : > { %v6772_v29 = vpop.eup %6771 }
 0x8d4   : > { %4598 = vrot.lane.b32.xlu1 %v12924_v52, %s7007_s25  ;;  %v10490_v34 = vpop.xlane.xlu1 %4120  ;;  %v3463_v45 = vmul.f32 %v6772_v29, %v10257_v31  ;;  %v3462_v0 = vmul.f32 %v6772_v29, %v10253_v2  ;;  %v6774_v61 = vpop.eup %6773  ;;  %v12925_v31 = vld [vmem:[#allocation59_spill] sm:$0xff] }
 0x8d5   : > { %v10498_v40 = vpop.xlane.xlu0 %4129  ;;  %v4184_v35 = vsub.f32 %v12925_v31, %v10434_v50  ;;  %v3465_v41 = vmul.f32 %v6774_v61, %v10235_v44  ;;  %v3464_v46 = vmul.f32 %v6774_v61, %v10231_v5  ;;  %v12926_v52 = vld [vmem:[#allocation63_spill] sm:$0xff] }
 0x8d6   : > { %v3509_v36 = vpack.c.bf16 %v3463_v45, %v3461_v18  ;;  %v3508_v30 = vpack.c.bf16 %v3462_v0, %v3460_v56  ;;  %v4185_v32 = vsub.f32 %v12926_v52, %v10434_v50 }
 0x8d7   : > { %v4250_v45 = vmul.f32 1.442695, %v4184_v35 }
 0x8d8   : > { %v3365_v6 = vpop.xlane.xlu1 %3364  ;;  %3668 = vmatprep.mubr.bf16.mxu0 %v3509_v36  ;;  %v4252_v44 = vmul.f32 1.442695, %v4185_v32 }
 0x8d9   : > { %4375 = vadd.xlane.f32.xlu0 %v4374_v63  ;;  %6779 = vrcp.f32 %v3365_v6  ;;  %3669 = vmatmul.mubr.bf16.gmra.mrb[192].mxu0 %v3508_v30  ;;  %v3374_v29 = vpop.xlane.xlu0 %3373 }
 0x8da   : > { %6781 = vrcp.f32 %v3368_v39 }
 0x8db   : > { %v6776_v43 = vpop.eup %6775 }
 0x8dc   : > { %v10500_v54 = vpop.xlane.xlu1 %4126  ;;  %v3467_v2 = vmul.f32 %v6776_v43, %v10285_v12  ;;  %v3466_v47 = vmul.f32 %v6776_v43, %v10281_v9  ;;  %v6778_v56 = vpop.eup %6777 }
 0x8dd   : > { %v10512_v5 = vpop.xlane.xlu0 %4135  ;;  %v3469_v9 = vmul.f32 %v6778_v56, %v10265_v7  ;;  %v3468_v36 = vmul.f32 %v6778_v56, %v10261_v23  ;;  %v12927_v7 = vld [vmem:[#allocation10_spill] sm:$0xff] }
 0x8de   : > { %v3511_v63 = vpack.c.bf16 %v3467_v2, %v3465_v41  ;;  %v3510_v18 = vpack.c.bf16 %v3466_v47, %v3464_v46 }
 0x8e0   : > { %v3371_v8 = vpop.xlane.xlu1 %3370  ;;  %3676 = vmatprep.mubr.bf16.mxu0 %v3511_v63 }
 0x8e1   : > { %6783 = vrcp.f32 %v3371_v8  ;;  %3677 = vmatmul.mubr.bf16.gmra.mrb[196].mxu0 %v3510_v18  ;;  %v3380_v35 = vpop.xlane.xlu0 %3379 }
 0x8e2   : > { %6785 = vpow2.f32 %v4250_v45 }
 0x8e3   : > { %v6780_v12 = vpop.eup %6779  ;;  %6787 = vpow2.f32 %v4252_v44 }
 0x8e4   : > { %v10510_v6 = vpop.xlane.xlu1 %4132  ;;  %v3471_v50 = vmul.f32 %v6780_v12, %v10309_v1  ;;  %v3470_v39 = vmul.f32 %v6780_v12, %v10305_v33  ;;  %6789 = vrcp.f32 %v3374_v29  ;;  %v6782_v31 = vpop.eup %6781  ;;  %v12928_v29 = vld [vmem:[#allocation13_spill] sm:$0xff] }
 0x8e5   : > { %v3473_v1 = vmul.f32 %v6782_v31, %v10291_v53  ;;  %v3472_v2 = vmul.f32 %v6782_v31, %v10289_v37  ;;  %v12931_v31 = vld [vmem:[#allocation68_spill] sm:$0xff] }
 0x8e6   : > { %v3513_v30 = vpack.c.bf16 %v3471_v50, %v3469_v9  ;;  %v3512_v61 = vpack.c.bf16 %v3470_v39, %v3468_v36 }
 0x8e8   : > { %v3377_v0 = vpop.xlane.xlu1 %3376  ;;  %3684 = vmatprep.mubr.bf16.mxu0 %v3513_v30 }
 0x8e9   : > { %6791 = vrcp.f32 %v3377_v0  ;;  %3685 = vmatmul.mubr.bf16.gmra.mrb[200].mxu0 %v3512_v61  ;;  %v12929_v61 = vld [vmem:[#allocation2_spill] sm:$0xff] }
 0x8ea   : > { %6793 = vrcp.f32 %v3380_v35 }
 0x8eb   : > { %v6784_v41 = vpop.eup %6783 }
 0x8ec   : > { %v10518_v43 = vpop.xlane.xlu1 %4138  ;;  %v3475_v23 = vmul.f32 %v6784_v41, %v10331_v22  ;;  %v3474_v8 = vmul.f32 %v6784_v41, %v10327_v11  ;;  %v10526_v46 = vpop.eup %6785 }
 0x8ed   : > { %v10528_v32 = vpop.eup %6787 }
 0x8ee   : > { %v3515_v47 = vpack.c.bf16 %v3475_v23, %v3473_v1  ;;  %v3514_v52 = vpack.c.bf16 %v3474_v8, %v3472_v2  ;;  %v6790_v53 = vpop.eup %6789  ;;  %v4377_v22 = vadd.f32 %v10528_v32, %v10526_v46 }
 0x8ef   : > { %4616 = vrot.lane.b32.xlu0 %v12927_v7, %s7007_s25  ;;  %v3477_v11 = vmul.f32 %v6790_v53, %v10313_v14  ;;  %v3476_v18 = vmul.f32 %v6790_v53, %v10311_v51  ;;  %v10542_v51 = vpop.xlane.xlu0 %4141 }
 0x8f0   : > { %v3383_v33 = vpop.xlane.xlu1 %3382  ;;  %3692 = vmatprep.mubr.bf16.mxu0 %v3515_v47 }
 0x8f1   : > { %6795 = vrcp.f32 %v3383_v33  ;;  %3693 = vmatmul.mubr.bf16.gmra.mrb[204].mxu0 %v3514_v52  ;;  %v12933_v33 = vld [vmem:[#allocation57_spill] sm:$0xff]  ;;  %v12934_v52 = vld [vmem:[#allocation27_spill] sm:$0xff] }
 0x8f2   : > { %v4186_v2 = vsub.f32 %v12933_v33, %v10426_v16 }
 0x8f3   : > { %4618 = vrot.lane.b32.xlu0 %v12928_v29, %s7007_s25  ;;  %v6792_v37 = vpop.eup %6791  ;;  %v4187_v29 = vsub.f32 %v12934_v52, %v10426_v16 }
 0x8f4   : > { %v3479_v63 = vmul.f32 %v6792_v37, %v10349_v24  ;;  %v3478_v45 = vmul.f32 %v6792_v37, %v10347_v19  ;;  %v6794_v12 = vpop.eup %6793  ;;  %v10544_v19 = vpop.xlane.xlu1 %4144  ;;  %v4254_v53 = vmul.f32 1.442695, %v4186_v2 }
 0x8f5   : > { %v3481_v50 = vmul.f32 %v6794_v12, %v10335_v58  ;;  %v3480_v14 = vmul.f32 %v6794_v12, %v10333_v59  ;;  %v4256_v37 = vmul.f32 1.442695, %v4187_v29 }
 0x8f6   : > { %v3517_v56 = vpack.c.bf16 %v3479_v63, %v3477_v11  ;;  %v3516_v44 = vpack.c.bf16 %v3478_v45, %v3476_v18  ;;  %v12937_v63 = vld [vmem:[#allocation5_spill] sm:$0xff]  ;;  %v12938_v45 = vld [vmem:[#allocation4_spill] sm:$0xff] }
 0x8f8   : > { %4378 = vadd.xlane.f32.xlu1 %v4377_v22  ;;  %3700 = vmatprep.mubr.bf16.mxu0 %v3517_v56  ;;  %v3386_v30 = vpop.xlane.xlu0 %3385  ;;  %v12935_v22 = vld [vmem:[#allocation28_spill] sm:$0xff] }
 0x8f9   : > { %3701 = vmatmul.mubr.bf16.gmra.mrb[208].mxu0 %v3516_v44  ;;  %6797 = vrcp.f32 %v3386_v30  ;;  %v12939_v44 = vld [vmem:[#allocation69_spill] sm:$0xff] }
 0x8fb   : > { %v6796_v9 = vpop.eup %6795 }
 0x8fc   : > { %v3483_v0 = vmul.f32 %v6796_v9, %v10363_v10  ;;  %v3482_v36 = vmul.f32 %v6796_v9, %v10361_v26  ;;  %v12930_v10 = vld [vmem:[#allocation67_spill] sm:$0xff]  ;;  %v10571_v56 = vpop.xlane.xlu0 %4147 }
 0x8fd   : > { %v12932_v26 = vmax.f32 %v12930_v10, %v12931_v31 }
 0x8fe   : > { %v3519_v39 = vpack.c.bf16 %v3483_v0, %v3481_v50  ;;  %v3518_v24 = vpack.c.bf16 %v3482_v36, %v3480_v14  ;;  %v12942_v36 = vld [vmem:[#allocation15_spill] sm:$0xff] }
 0x900   : > { %3708 = vmatprep.mubr.bf16.mxu0 %v3519_v39 }
 0x901   : > { %3709 = vmatmul.mubr.bf16.gmra.mrb[212].mxu0 %v3518_v24 }
 0x903   : > { %v6798_v59 = vpop.eup %6797 }
 0x904   : > { %v3485_v41 = vmul.f32 %v6798_v59, %v10379_v38  ;;  %v3484_v1 = vmul.f32 %v6798_v59, %v10372_v48  ;;  %v4188_v38 = vsub.f32 %v12935_v22, %v10438_v55  ;;  %v12944_v59 = vld [vmem:[#allocation120_spill] sm:$0xff] }
 0x909   : > { %4600 = vrot.lane.b32.xlu1 %v12929_v61, %s7007_s25  ;;  %v12943_v61 = vld [vmem:[#allocation12_spill] sm:$0xff] }
 0x90b   : > { %v3389_v58 = vpop.xlane.xlu1 %3388 }
 0x90c   : > { %6799 = vrcp.f32 %v3389_v58 }
 0x90d   : > { %6801 = vpow2.f32 %v4254_v53 }
 0x90e   : > { %6803 = vpow2.f32 %v4256_v37 }
 0x90f   : > { %v10586_v30 = vpop.xlane.xlu1 %4150 }
 0x912   : > { %4159 = vmax.xlane.f32.xlu0 %v12932_v26 }
 0x916   : > { %v6800_v35 = vpop.eup %6799 }
 0x917   : > { %v3487_v7 = vmul.f32 %v6800_v35, %v10396_v21  ;;  %v3486_v23 = vmul.f32 %v6800_v35, %v10394_v13  ;;  %v12936_v21 = vld [vmem:[#allocation100_spill] sm:$0xff]  ;;  %v4258_v13 = vmul.f32 1.442695, %v4188_v38  ;;  %v10565_v16 = vpop.eup %6801 }
 0x918   : > { %v4189_v48 = vsub.f32 %v12936_v21, %v10438_v55  ;;  %v10567_v18 = vpop.eup %6803  ;;  %v12940_v55 = vld [vmem:[#allocation70_spill] sm:$0xff]  ;;  %v12945_v35 = vld [vmem:[#allocation84_spill] sm:$0xff] }
 0x919   : > { %v3521_v8 = vpack.c.bf16 %v3487_v7, %v3485_v41  ;;  %v3520_v47 = vpack.c.bf16 %v3486_v23, %v3484_v1  ;;  %6805 = vpow2.f32 %v4258_v13  ;;  %v12941_v12 = vmax.f32 %v12939_v44, %v12940_v55 }
 0x91a   : > { %v4260_v11 = vmul.f32 1.442695, %v4189_v48  ;;  %v4380_v50 = vadd.f32 %v10567_v18, %v10565_v16  ;;  %v12946_v41 = vmax.f32 %v12944_v59, %v12945_v35  ;;  %v12949_v48 = vld [vmem:[#allocation33_spill] sm:$0xff] }
 0x91b   : > { %3716 = vmatprep.mubr.bf16.mxu0 %v3521_v8  ;;  %v4190_v13 = vsub.f32 %v12949_v48, %v10436_v28 }
 0x91c   : > { %3717 = vmatmul.mubr.bf16.gmra.mrb[216].mxu0 %v3520_v47  ;;  %6807 = vpow2.f32 %v4260_v11 }
 0x923   : > { %v10576_v9 = vpop.eup %6805 }
 0x926   : > { %v10580_v0 = vpop.eup %6807 }
 0x927   : > { %v4383_v39 = vadd.f32 %v10580_v0, %v10576_v9 }
 0x928   : > { %4602 = vrot.lane.b32.xlu0 %v12937_v63, %s7007_s25 }
 0x92c   : > { %4604 = vrot.lane.b32.xlu0 %v12938_v45, %s7007_s25  ;;  %v12950_v45 = vld [vmem:[#allocation34_spill] sm:$0xff] }
 0x92d   : > { %4162 = vmax.xlane.f32.xlu1 %v12941_v12  ;;  %v4191_v12 = vsub.f32 %v12950_v45, %v10436_v28 }
 0x930   : > { %4622 = vrot.lane.b32.xlu0 %v12942_v36, %s7007_s25 }
 0x931   : > { %v3392_v14 = vpop.xlane.xlu0 %3391  ;;  %4381 = vadd.xlane.f32.xlu1 %v4380_v50 }
 0x932   : > { %6809 = vrcp.f32 %v3392_v14 }
 0x935   : > { %v4615_v24 = vpop.permute.xlu0 %4614  ;;  %4384 = vadd.xlane.f32.xlu1 %v4383_v39  ;;  %v12953_v39 = vld [vmem:[#allocation105_spill] sm:$0xff] }
 0x936   : > { %6017 = vmatprep.subr.bf16.mxu0 %v4615_v24 }
 0x93c   : > { %v6810_v33 = vpop.eup %6809 }
 0x93d   : > { %v3489_v22 = vmul.f32 %v6810_v33, %v10422_v17  ;;  %v3488_v37 = vmul.f32 %v6810_v33, %v10420_v4  ;;  %v12952_v4 = vld [vmem:[#allocation140_spill] sm:$0xff] }
 0x946   : > { %4620 = vrot.lane.b32.xlu1 %v12943_v61, %s7007_s25  ;;  %v4264_v61 = vmul.f32 1.442695, %v4191_v12 }
 0x948   : > { %v3395_v58 = vpop.xlane.xlu1 %3394 }
 0x949   : > { %6811 = vrcp.f32 %v3395_v58  ;;  %v12954_v58 = vld [vmem:[#allocation35_spill] sm:$0xff] }
 0x94c   : > { %v10590_v26 = vpop.xlane.xlu1 %4153 }
 0x94f   : > { %4165 = vmax.xlane.f32.xlu0 %v12946_v41  ;;  %v5873_v7 = vpop.f32.mrb[160].mxu0  ;;  %v4193_v41 = vsub.f32 %v12954_v58, %v12952_v4  ;;  %v12965_v58 = vld [vmem:[#allocation17_spill] sm:$0xff] }
 0x950   : > { %v10595_v1 = vpop.xlane.xlu1 %4156  ;;  %v5874_v23 = vpop.f32.mrb[161].mxu0 }
 0x951   : > { %v10597_v2 = vadd.f32 %v5874_v23, %v5873_v7  ;;  %v5876_v8 = vpop.f32.mrb[162].mxu0  ;;  %v4268_v23 = vmul.f32 1.442695, %v4193_v41 }
 0x952   : > { %v5877_v47 = vpop.f32.mrb[163].mxu0 }
 0x953   : > { %12947 = vst [vmem:[#allocation142_spill] sm:$0xff] %v10597_v2  ;;  %v6812_v52 = vpop.eup %6811  ;;  %v10599_v29 = vadd.f32 %v5877_v47, %v5876_v8 }
 0x954   : > { %v4599_v53 = vpop.permute.xlu1 %4598  ;;  %v3491_v38 = vmul.f32 %v6812_v52, %v10444_v62  ;;  %v3490_v21 = vmul.f32 %v6812_v52, %v10442_v60  ;;  %v4262_v62 = vmul.f32 1.442695, %v4190_v13  ;;  %v4192_v60 = vsub.f32 %v12953_v39, %v12952_v4 }
 0x955   : > { %12948 = vst [vmem:[#allocation145_spill] sm:$0xff] %v10599_v29  ;;  %6018 = vmatpush3.bf16.msra.mxu0 %v4599_v53 }
 0x956   : > { %v3523_v11 = vpack.c.bf16 %v3491_v38, %v3489_v22  ;;  %v3522_v63 = vpack.c.bf16 %v3490_v21, %v3488_v37  ;;  %6813 = vpow2.f32 %v4262_v62  ;;  %v4266_v28 = vmul.f32 1.442695, %v4192_v60  ;;  %v12958_v38 = vld [vmem:[#allocation7_spill] sm:$0xff] }
 0x957   : > { %v5879_v50 = vpop.f32.mrb[164].mxu0  ;;  %6815 = vpow2.f32 %v4264_v61 }
 0x958   : > { %3724 = vmatprep.mubr.bf16.mxu0 %v3523_v11  ;;  %v5880_v36 = vpop.f32.mrb[165].mxu0  ;;  %6817 = vpow2.f32 %v4266_v28 }
 0x959   : > { %v10609_v14 = vadd.f32 %v5880_v36, %v5879_v50  ;;  %3725 = vmatmul.mubr.bf16.gmra.mrb[220].mxu0 %v3522_v63  ;;  %v5882_v17 = vpop.f32.mrb[166].mxu0  ;;  %6819 = vpow2.f32 %v4268_v23  ;;  %v12959_v63 = vld [vmem:[#allocation6_spill] sm:$0xff]  ;;  %v12961_v36 = vld [vmem:[#allocation81_spill] sm:$0xff] }
 0x95a   : > { %v5883_v24 = vpop.f32.mrb[167].mxu0 }
 0x95b   : > { %12951 = vst [vmem:[#allocation23_spill] sm:$0xff] %v10609_v14  ;;  %v10615_v7 = vadd.f32 %v5883_v24, %v5882_v17  ;;  %v12962_v17 = vld [vmem:[#allocation82_spill] sm:$0xff] }
 0x95c   : > { %v12963_v62 = vmax.f32 %v12961_v36, %v12962_v17 }
 0x95d   : > { %12955 = vst [vmem:[#allocation146_spill] sm:$0xff] %v10615_v7 }
 0x95f   : > { %v5885_v33 = vpop.f32.mrb[168].mxu0 }
 0x960   : > { %v5886_v8 = vpop.f32.mrb[169].mxu0  ;;  %v10623_v48 = vpop.eup %6813 }
 0x961   : > { %v10617_v47 = vadd.f32 %v5886_v8, %v5885_v33  ;;  %v5888_v52 = vpop.f32.mrb[170].mxu0  ;;  %v10625_v11 = vpop.eup %6815 }
 0x962   : > { %v5889_v53 = vpop.f32.mrb[171].mxu0  ;;  %v10636_v60 = vpop.eup %6817  ;;  %v4386_v24 = vadd.f32 %v10625_v11, %v10623_v48 }
 0x963   : > { %12956 = vst [vmem:[#allocation143_spill] sm:$0xff] %v10617_v47  ;;  %v10619_v22 = vadd.f32 %v5889_v53, %v5888_v52  ;;  %v10640_v61 = vpop.eup %6819  ;;  %v12990_v47 = vld [vmem:[#allocation75_spill] sm:$0xff] }
 0x964   : > { %v4389_v41 = vadd.f32 %v10640_v61, %v10636_v60 }
 0x965   : > { %12957 = vst [vmem:[#allocation144_spill] sm:$0xff] %v10619_v22  ;;  %4606 = vrot.lane.b32.xlu0 %v12958_v38, %s7007_s25  ;;  %v12968_v38 = vld [vmem:[#allocation14_spill] sm:$0xff] }
 0x966   : > { %v4376_v37 = vpop.xlane.xlu0 %4375 }
 0x967   : > { %v5891_v21 = vpop.f32.mrb[172].mxu0  ;;  %6821 = vrcp.f32 %v4376_v37 }
 0x968   : > { %v5892_v13 = vpop.f32.mrb[173].mxu0 }
 0x969   : > { %4608 = vrot.lane.b32.xlu0 %v12959_v63, %s7007_s25  ;;  %v10629_v45 = vadd.f32 %v5892_v13, %v5891_v21  ;;  %v5894_v12 = vpop.f32.mrb[174].mxu0 }
 0x96a   : > { %v4617_v50 = vpop.permute.xlu0 %4616  ;;  %4168 = vmax.xlane.f32.xlu1 %v12963_v62  ;;  %v5895_v4 = vpop.f32.mrb[175].mxu0 }
 0x96b   : > { %12960 = vst [vmem:[#allocation149_spill] sm:$0xff] %v10629_v45  ;;  %v10634_v39 = vadd.f32 %v5895_v4, %v5894_v12  ;;  %6019 = vmatprep.subr.bf16.mxu0 %v4617_v50  ;;  %v12969_v12 = vld [vmem:[#allocation86_spill] sm:$0xff] }
 0x96c   : > { %v12970_v50 = vld [vmem:[#allocation90_spill] sm:$0xff] }
 0x96d   : > { %12964 = vst [vmem:[#allocation150_spill] sm:$0xff] %v10634_v39  ;;  %4626 = vrot.lane.b32.xlu0 %v12965_v58, %s7007_s25  ;;  %v12971_v62 = vmax.f32 %v12969_v12, %v12970_v50 }
 0x96e   : > { %4387 = vadd.xlane.f32.xlu1 %v4386_v24  ;;  %v4619_v63 = vpop.permute.xlu0 %4618 }
 0x971   : > { %v6822_v4 = vpop.eup %6821 }
 0x972   : > { %4390 = vadd.xlane.f32.xlu1 %v4389_v41  ;;  %v10656_v58 = vmul.f32 %v6822_v4, %v10484_v3  ;;  %v4503_v37 = vmul.f32 %v6822_v4, %v10486_v42  ;;  %v12976_v42 = vld [vmem:[#allocation38_spill] sm:$0xff] }
 0x973   : > { %v4197_v4 = vsub.f32 %v12976_v42, %v10468_v57 }
 0x97d   : > { %v5897_v28 = vpop.f32.mrb[176].mxu0 }
 0x97e   : > { %v5898_v23 = vpop.f32.mrb[177].mxu0 }
 0x97f   : > { %v10646_v33 = vadd.f32 %v5898_v23, %v5897_v28  ;;  %v5900_v8 = vpop.f32.mrb[178].mxu0  ;;  %v12972_v23 = vld [vmem:[#allocation139_spill] sm:$0xff] }
 0x980   : > { %v5901_v52 = vpop.f32.mrb[179].mxu0 }
 0x981   : > { %12966 = vst [vmem:[#allocation147_spill] sm:$0xff] %v10646_v33  ;;  %v10648_v53 = vadd.f32 %v5901_v52, %v5900_v8  ;;  %v12973_v8 = vld [vmem:[#allocation36_spill] sm:$0xff] }
 0x982   : > { %v4194_v52 = vsub.f32 %v12973_v8, %v12972_v23 }
 0x983   : > { %12967 = vst [vmem:[#allocation148_spill] sm:$0xff] %v10648_v53  ;;  %4624 = vrot.lane.b32.xlu1 %v12968_v38, %s7007_s25 }
 0x984   : > { %v4270_v3 = vmul.f32 1.442695, %v4194_v52 }
 0x985   : > { %v4379_v21 = vpop.xlane.xlu1 %4378 }
 0x986   : > { %6823 = vrcp.f32 %v4379_v21  ;;  %v4276_v21 = vmul.f32 1.442695, %v4197_v4 }
 0x987   : > { %6825 = vpow2.f32 %v4270_v3 }
 0x989   : > { %v4601_v13 = vpop.permute.xlu1 %4600 }
 0x98a   : > { %6020 = vmatpush3.bf16.msra.mxu0 %v4601_v13  ;;  %v12974_v13 = vld [vmem:[#allocation108_spill] sm:$0xff] }
 0x98b   : > { %6021 = vmatprep.subr.bf16.mxu0 %v4619_v63  ;;  %v4195_v63 = vsub.f32 %v12974_v13, %v12972_v23 }
 0x98c   : > { %4171 = vmax.xlane.f32.xlu0 %v12971_v62  ;;  %v12975_v62 = vld [vmem:[#allocation37_spill] sm:$0xff] }
 0x98d   : > { %v4272_v33 = vmul.f32 1.442695, %v4195_v63 }
 0x98f   : > { %6827 = vpow2.f32 %v4272_v33 }
 0x990   : > { %v6824_v24 = vpop.eup %6823 }
 0x991   : > { %v10659_v41 = vmul.f32 %v6824_v24, %v10526_v46  ;;  %v4505_v28 = vmul.f32 %v6824_v24, %v10528_v32  ;;  %v4196_v46 = vsub.f32 %v12975_v62, %v10468_v57  ;;  %v12980_v62 = vld [vmem:[#allocation9_spill] sm:$0xff]  ;;  %v10685_v33 = vpop.eup %6825 }
 0x992   : > { %12982 = vst [vmem:[#allocation93_spill] sm:$0xff] %v10685_v33 }
 0x993   : > { %v4567_v38 = vpack.c.bf16 %v4505_v28, %v4503_v37  ;;  %v4274_v28 = vmul.f32 1.442695, %v4196_v46 }
 0x994   : > { %v5903_v32 = vpop.f32.mrb[180].mxu0 }
 0x995   : > { %4678 = vmatprep.mubr.bf16.mxu0 %v4567_v38  ;;  %v5904_v24 = vpop.f32.mrb[181].mxu0  ;;  %6829 = vpow2.f32 %v4274_v28 }
 0x996   : > { %v10673_v45 = vadd.f32 %v5904_v24, %v5903_v32  ;;  %v5906_v37 = vpop.f32.mrb[182].mxu0  ;;  %6831 = vpow2.f32 %v4276_v21  ;;  %v12983_v32 = vld [vmem:[#allocation8_spill] sm:$0xff]  ;;  %v12984_v21 = vld [vmem:[#allocation107_spill] sm:$0xff] }
 0x997   : > { %v5907_v8 = vpop.f32.mrb[183].mxu0  ;;  %v12985_v24 = vld [vmem:[#allocation60_spill] sm:$0xff] }
 0x998   : > { %12977 = vst [vmem:[#allocation153_spill] sm:$0xff] %v10673_v45  ;;  %v10675_v23 = vadd.f32 %v5907_v8, %v5906_v37  ;;  %v12986_v37 = vmax.f32 %v12984_v21, %v12985_v24  ;;  %v12989_v45 = vld [vmem:[#allocation141_spill] sm:$0xff] }
 0x999   : > { %v10687_v4 = vpop.eup %6827  ;;  %v4198_v14 = vsub.f32 %v12990_v47, %v12989_v45  ;;  %v12996_v47 = vld [vmem:[#allocation45_spill] sm:$0xff] }
 0x99a   : > { %12978 = vst [vmem:[#allocation154_spill] sm:$0xff] %v10675_v23  ;;  %v4202_v7 = vsub.f32 %v12996_v47, %v10470_v20 }
 0x99c   : > { %v5909_v38 = vpop.f32.mrb[184].mxu0 }
 0x99d   : > { %v5910_v13 = vpop.f32.mrb[185].mxu0 }
 0x99e   : > { %v10679_v63 = vadd.f32 %v5910_v13, %v5909_v38  ;;  %v5912_v57 = vpop.f32.mrb[186].mxu0  ;;  %v4392_v13 = vadd.f32 %v10687_v4, %v10685_v33 }
 0x99f   : > { %v10677_v52 = vpop.xlane.xlu0 %4159  ;;  %v5913_v42 = vpop.f32.mrb[187].mxu0 }
 0x9a0   : > { %12979 = vst [vmem:[#allocation151_spill] sm:$0xff] %v10679_v63  ;;  %v10683_v46 = vadd.f32 %v5913_v42, %v5912_v57  ;;  %v10694_v8 = vpop.eup %6829 }
 0x9a1   : > { %v10698_v57 = vpop.eup %6831 }
 0x9a2   : > { %4610 = vrot.lane.b32.xlu0 %v12980_v62, %s7007_s25  ;;  %12981 = vst [vmem:[#allocation152_spill] sm:$0xff] %v10683_v46  ;;  %v12991_v46 = vld [vmem:[#allocation39_spill] sm:$0xff] }
 0x9a3   : > { %v4603_v3 = vpop.permute.xlu0 %4602  ;;  %v4199_v23 = vsub.f32 %v12991_v46, %v12989_v45  ;;  %v12997_v46 = vld [vmem:[#allocation46_spill] sm:$0xff] }
 0x9a4   : > { %6022 = vmatpush3.bf16.msra.mxu0 %v4603_v3  ;;  %v5915_v28 = vpop.f32.mrb[188].mxu0 }
 0x9a5   : > { %v5916_v38 = vpop.f32.mrb[189].mxu0 }
 0x9a6   : > { %4612 = vrot.lane.b32.xlu0 %v12983_v32, %s7007_s25  ;;  %v10700_v62 = vadd.f32 %v5916_v38, %v5915_v28  ;;  %v5918_v42 = vpop.f32.mrb[190].mxu0  ;;  %v4395_v32 = vadd.f32 %v10698_v57, %v10694_v8 }
 0x9a7   : > { %4174 = vmax.xlane.f32.xlu1 %v12986_v37  ;;  %v5919_v3 = vpop.f32.mrb[191].mxu0 }
 0x9a8   : > { %12987 = vst [vmem:[#allocation25_spill] sm:$0xff] %v10700_v62  ;;  %v10702_v63 = vadd.f32 %v5919_v3, %v5918_v42  ;;  %v12994_v42 = vld [vmem:[#allocation41_spill] sm:$0xff] }
 0x9a9   : > { %v4200_v3 = vsub.f32 %v12994_v42, %v10476_v25 }
 0x9aa   : > { %12988 = vst [vmem:[#allocation157_spill] sm:$0xff] %v10702_v63  ;;  %v4280_v63 = vmul.f32 1.442695, %v4199_v23 }
 0x9ab   : > { %4393 = vadd.xlane.f32.xlu1 %v4392_v13  ;;  %v4278_v13 = vmul.f32 1.442695, %v4198_v14  ;;  %v4282_v45 = vmul.f32 1.442695, %v4200_v3 }
 0x9ac   : > { %v5921_v37 = vpop.f32.mrb[192].mxu0 }
 0x9ad   : > { %v5922_v2 = vpop.f32.mrb[193].mxu0  ;;  %6833 = vpow2.f32 %v4278_v13  ;;  %v13000_v13 = vld [vmem:[#allocation91_spill] sm:$0xff] }
 0x9ae   : > { %v10710_v53 = vadd.f32 %v5922_v2, %v5921_v37  ;;  %v5924_v28 = vpop.f32.mrb[194].mxu0  ;;  %6835 = vpow2.f32 %v4280_v63  ;;  %v4203_v37 = vsub.f32 %v12997_v46, %v10470_v20  ;;  %v13001_v63 = vld [vmem:[#allocation92_spill] sm:$0xff]  ;;  %v13003_v46 = vld [vmem:[#allocation106_spill] sm:$0xff] }
 0x9af   : > { %4396 = vadd.xlane.f32.xlu1 %v4395_v32  ;;  %v5925_v38 = vpop.f32.mrb[195].mxu0  ;;  %v12995_v32 = vld [vmem:[#allocation42_spill] sm:$0xff]  ;;  %6837 = vpow2.f32 %v4282_v45  ;;  %v4207_v47 = vsub.f32 %v13001_v63, %v10478_v27  ;;  %v4605_v45 = vpop.permute.xlu0 %4604 }
 0x9b0   : > { %12992 = vst [vmem:[#allocation158_spill] sm:$0xff] %v10710_v53  ;;  %v10712_v62 = vadd.f32 %v5925_v38, %v5924_v28  ;;  %v4201_v39 = vsub.f32 %v12995_v32, %v10476_v25  ;;  %v4286_v25 = vmul.f32 1.442695, %v4202_v7  ;;  %v4206_v32 = vsub.f32 %v13000_v13, %v10478_v27 }
 0x9b1   : > { %v4288_v3 = vmul.f32 1.442695, %v4203_v37  ;;  %v4210_v7 = vsub.f32 %v13003_v46, %v10498_v40  ;;  %v13004_v37 = vld [vmem:[#allocation51_spill] sm:$0xff] }
 0x9b2   : > { %12993 = vst [vmem:[#allocation155_spill] sm:$0xff] %v10712_v62  ;;  %v4284_v28 = vmul.f32 1.442695, %v4201_v39  ;;  %v13002_v39 = vld [vmem:[#allocation16_spill] sm:$0xff]  ;;  %v13011_v62 = vld [vmem:[#allocation111_spill] sm:$0xff] }
 0x9b3   : > { %v4302_v46 = vmul.f32 1.442695, %v4210_v7 }
 0x9b4   : > { %v5927_v22 = vpop.f32.mrb[196].mxu0  ;;  %6839 = vpow2.f32 %v4284_v28  ;;  %v4211_v28 = vsub.f32 %v13004_v37, %v10498_v40 }
 0x9b5   : > { %v5928_v2 = vpop.f32.mrb[197].mxu0  ;;  %6841 = vpow2.f32 %v4286_v25 }
 0x9b6   : > { %v10722_v14 = vadd.f32 %v5928_v2, %v5927_v22  ;;  %v5930_v38 = vpop.f32.mrb[198].mxu0  ;;  %v4294_v2 = vmul.f32 1.442695, %v4206_v32  ;;  %6843 = vpow2.f32 %v4288_v3  ;;  %v13009_v3 = vld [vmem:[#allocation104_spill] sm:$0xff] }
 0x9b7   : > { %v5931_v23 = vpop.f32.mrb[199].mxu0 }
 0x9b8   : > { %12998 = vst [vmem:[#allocation156_spill] sm:$0xff] %v10722_v14  ;;  %v10726_v53 = vadd.f32 %v5931_v23, %v5930_v38  ;;  %v4296_v23 = vmul.f32 1.442695, %v4207_v47  ;;  %v10744_v14 = vpop.eup %6833  ;;  %6845 = vpow2.f32 %v4294_v2  ;;  %v4214_v47 = vsub.f32 %v13009_v3, %v10512_v5 }
 0x9b9   : > { %13006 = vst [vmem:[#allocation159_spill] sm:$0xff] %v10744_v14  ;;  %v10746_v25 = vpop.eup %6835 }
 0x9ba   : > { %v10724_v42 = vpop.xlane.xlu1 %4162  ;;  %12999 = vst [vmem:[#allocation161_spill] sm:$0xff] %v10726_v53  ;;  %13007 = vst [vmem:[#allocation160_spill] sm:$0xff] %v10746_v25  ;;  %v13010_v53 = vld [vmem:[#allocation48_spill] sm:$0xff]  ;;  %6847 = vpow2.f32 %v4296_v23  ;;  %v10757_v29 = vpop.eup %6837  ;;  %v4398_v2 = vadd.f32 %v10746_v25, %v10744_v14  ;;  %v4310_v3 = vmul.f32 1.442695, %v4214_v47 }
 0x9bb   : > { %v13012_v40 = vmax.f32 %v13010_v53, %v13011_v62  ;;  %13014 = vst [vmem:[#allocation164_spill] sm:$0xff] %v10757_v29  ;;  %6849 = vpow2.f32 %v4302_v46  ;;  %v13015_v23 = vld [vmem:[#allocation112_spill] sm:$0xff] }
 0x9bc   : > { %v5933_v22 = vpop.f32.mrb[200].mxu0 }
 0x9bd   : > { %v5934_v38 = vpop.f32.mrb[201].mxu0 }
 0x9be   : > { %v10732_v20 = vpop.xlane.xlu1 %4381  ;;  %v10740_v13 = vadd.f32 %v5934_v38, %v5933_v22  ;;  %v5936_v27 = vpop.f32.mrb[202].mxu0  ;;  %v4304_v22 = vmul.f32 1.442695, %v4211_v28  ;;  %v13013_v38 = vld [vmem:[#allocation176_spill] sm:$0xff]  ;;  %v4218_v28 = vsub.f32 %v13015_v23, %v10542_v51 }
 0x9bf   : > { %v4215_v37 = vsub.f32 %v13013_v38, %v10512_v5  ;;  %v10761_v7 = vpop.eup %6839 }
 0x9c0   : > { %4628 = vrot.lane.b32.xlu1 %v13002_v39, %s7007_s25  ;;  %13005 = vst [vmem:[#allocation162_spill] sm:$0xff] %v10740_v13  ;;  %v5937_v39 = vpop.f32.mrb[203].mxu0  ;;  %6851 = vpow2.f32 %v4304_v22  ;;  %v10769_v25 = vpop.eup %6841  ;;  %v13021_v22 = vld [vmem:[#allocation58_spill] sm:$0xff] }
 0x9c1   : > { %v10748_v32 = vadd.f32 %v5937_v39, %v5936_v27  ;;  %v4623_v27 = vpop.permute.xlu0 %4622  ;;  %v4312_v5 = vmul.f32 1.442695, %v4215_v37  ;;  %13018 = vst [vmem:[#allocation122_spill] sm:$0xff] %v10769_v25  ;;  %v10773_v46 = vpop.eup %6843  ;;  %6853 = vpow2.f32 %v4310_v3  ;;  %v4222_v37 = vsub.f32 %v13021_v22, %v10571_v56  ;;  %v13024_v3 = vld [vmem:[#allocation80_spill] sm:$0xff] }
 0x9c2   : > { %v10742_v63 = vpop.xlane.xlu1 %4384  ;;  %13019 = vst [vmem:[#allocation24_spill] sm:$0xff] %v10773_v46  ;;  %v10781_v23 = vpop.eup %6845 }
 0x9c3   : > { %13008 = vst [vmem:[#allocation163_spill] sm:$0xff] %v10748_v32  ;;  %6855 = vpow2.f32 %v4312_v5  ;;  %v4326_v5 = vmul.f32 1.442695, %v4222_v37 }
 0x9c4   : > { %v5939_v39 = vpop.f32.mrb[204].mxu0 }
 0x9c5   : > { %4177 = vmax.xlane.f32.xlu0 %v13012_v40  ;;  %v5940_v40 = vpop.f32.mrb[205].mxu0 }
 0x9c6   : > { %v4621_v13 = vpop.permute.xlu1 %4620  ;;  %v10767_v32 = vadd.f32 %v5940_v40, %v5939_v39  ;;  %v5942_v14 = vpop.f32.mrb[206].mxu0  ;;  %v13023_v40 = vld [vmem:[#allocation79_spill] sm:$0xff] }
 0x9c7   : > { %6023 = vmatprep.subr.bf16.mxu0 %v4621_v13  ;;  %v13016_v13 = vld [vmem:[#allocation178_spill] sm:$0xff]  ;;  %v5943_v33 = vpop.f32.mrb[207].mxu0 }
 0x9c8   : > { %6024 = vmatpush3.bf16.msra.mxu0 %v4605_v45  ;;  %v4219_v38 = vsub.f32 %v13016_v13, %v10542_v51  ;;  %13017 = vst [vmem:[#allocation78_spill] sm:$0xff] %v10767_v32  ;;  %v4401_v45 = vadd.f32 %v10761_v7, %v10757_v29  ;;  %v10775_v47 = vadd.f32 %v5943_v33, %v5942_v14  ;;  %v10787_v14 = vpop.eup %6847 }
 0x9c9   : > { %4399 = vadd.xlane.f32.xlu0 %v4398_v2  ;;  %6025 = vmatprep.subr.bf16.mxu0 %v4623_v27  ;;  %v4318_v2 = vmul.f32 1.442695, %v4218_v28  ;;  %v13022_v27 = vld [vmem:[#allocation183_spill] sm:$0xff]  ;;  %v4204_v13 = vsub.f32 %v13023_v40, %v10490_v34  ;;  %v4404_v33 = vadd.f32 %v10773_v46, %v10769_v25  ;;  %v4205_v28 = vsub.f32 %v13024_v3, %v10490_v34  ;;  %v10797_v46 = vpop.eup %6849  ;;  %v13028_v34 = vld [vmem:[#allocation89_spill] sm:$0xff] }
 0x9ca   : > { %13020 = vst [vmem:[#allocation171_spill] sm:$0xff] %v10775_v47  ;;  %v4320_v51 = vmul.f32 1.442695, %v4219_v38  ;;  %v4223_v39 = vsub.f32 %v13022_v27, %v10571_v56  ;;  %v13025_v38 = vld [vmem:[#allocation186_spill] sm:$0xff]  ;;  %v13026_v40 = vld [vmem:[#allocation187_spill] sm:$0xff]  ;;  %v4410_v3 = vadd.f32 %v10787_v14, %v10781_v23 }
 0x9cb   : > { %6857 = vpow2.f32 %v4318_v2  ;;  %v4227_v32 = vsub.f32 %v13026_v40, %v10590_v26  ;;  %v4290_v29 = vmul.f32 1.442695, %v4204_v13  ;;  %v4208_v2 = vsub.f32 %v13028_v34, %v10500_v54 }
 0x9cc   : > { %v5945_v22 = vpop.f32.mrb[208].mxu0  ;;  %6859 = vpow2.f32 %v4320_v51  ;;  %v4328_v27 = vmul.f32 1.442695, %v4223_v39  ;;  %v4292_v51 = vmul.f32 1.442695, %v4205_v28  ;;  %v13029_v39 = vld [vmem:[#allocation94_spill] sm:$0xff]  ;;  %v4230_v13 = vsub.f32 %v12930_v10, %v10677_v52 }
 0x9cd   : > { %4402 = vadd.xlane.f32.xlu0 %v4401_v45  ;;  %v4226_v45 = vsub.f32 %v13025_v38, %v10590_v26  ;;  %v5946_v56 = vpop.f32.mrb[209].mxu0  ;;  %v10803_v38 = vpop.eup %6851  ;;  %6861 = vpow2.f32 %v4326_v5  ;;  %v4231_v40 = vsub.f32 %v12931_v31, %v10677_v52  ;;  %v4298_v28 = vmul.f32 1.442695, %v4208_v2 }
 0x9ce   : > { %v10795_v47 = vadd.f32 %v5946_v56, %v5945_v22  ;;  %v5948_v25 = vpop.f32.mrb[210].mxu0  ;;  %6863 = vpow2.f32 %v4328_v27  ;;  %v4336_v56 = vmul.f32 1.442695, %v4227_v32  ;;  %v10813_v34 = vpop.eup %6853  ;;  %v4342_v31 = vmul.f32 1.442695, %v4230_v13 }
 0x9cf   : > { %v5949_v37 = vpop.f32.mrb[211].mxu0  ;;  %v4334_v22 = vmul.f32 1.442695, %v4226_v45  ;;  %6865 = vpow2.f32 %v4290_v29  ;;  %v10819_v5 = vpop.eup %6855  ;;  %v13032_v45 = vld [vmem:[#allocation49_spill] sm:$0xff]  ;;  %v4344_v29 = vmul.f32 1.442695, %v4231_v40 }
 0x9d0   : > { %13027 = vst [vmem:[#allocation172_spill] sm:$0xff] %v10795_v47  ;;  %v10807_v26 = vadd.f32 %v5949_v37, %v5948_v25  ;;  %v13031_v47 = vld [vmem:[#allocation52_spill] sm:$0xff]  ;;  %v4416_v25 = vadd.f32 %v10803_v38, %v10797_v46  ;;  %6867 = vpow2.f32 %v4292_v51  ;;  %v4213_v32 = vsub.f32 %v13032_v45, %v10510_v6 }
 0x9d1   : > { %4405 = vadd.xlane.f32.xlu0 %v4404_v33  ;;  %v4209_v33 = vsub.f32 %v13029_v39, %v10500_v54  ;;  %v4212_v54 = vsub.f32 %v13031_v47, %v10510_v6  ;;  %6869 = vpow2.f32 %v4334_v22  ;;  %v4422_v51 = vadd.f32 %v10819_v5, %v10813_v34  ;;  %v13034_v22 = vld [vmem:[#allocation177_spill] sm:$0xff] }
 0x9d2   : > { %13030 = vst [vmem:[#allocation170_spill] sm:$0xff] %v10807_v26  ;;  %6871 = vpow2.f32 %v4336_v56  ;;  %v4308_v6 = vmul.f32 1.442695, %v4213_v32  ;;  %v4216_v13 = vsub.f32 %v13034_v22, %v10518_v43 }
 0x9d3   : > { %v4300_v10 = vmul.f32 1.442695, %v4209_v33  ;;  %6873 = vpow2.f32 %v4298_v28 }
 0x9d4   : > { %v5951_v27 = vpop.f32.mrb[212].mxu0 }
 0x9d5   : > { %4411 = vadd.xlane.f32.xlu0 %v4410_v3  ;;  %v5952_v52 = vpop.f32.mrb[213].mxu0  ;;  %v10825_v37 = vpop.eup %6857  ;;  %v4306_v3 = vmul.f32 1.442695, %v4212_v54  ;;  %6875 = vpow2.f32 %v4300_v10 }
 0x9d6   : > { %v10823_v2 = vadd.f32 %v5952_v52, %v5951_v27  ;;  %v5954_v47 = vpop.f32.mrb[214].mxu0  ;;  %v10829_v33 = vpop.eup %6859  ;;  %6877 = vpow2.f32 %v4342_v31 }
 0x9d7   : > { %v5955_v39 = vpop.f32.mrb[215].mxu0  ;;  %6879 = vpow2.f32 %v4344_v29  ;;  %v10839_v27 = vpop.eup %6861  ;;  %v4428_v52 = vadd.f32 %v10829_v33, %v10825_v37  ;;  %v13038_v29 = vld [vmem:[#allocation180_spill] sm:$0xff] }
 0x9d8   : > { %13033 = vst [vmem:[#allocation129_spill] sm:$0xff] %v10823_v2  ;;  %v10833_v56 = vadd.f32 %v5955_v39, %v5954_v47  ;;  %6881 = vpow2.f32 %v4306_v3  ;;  %v10843_v47 = vpop.eup %6863  ;;  %v4314_v39 = vmul.f32 1.442695, %v4216_v13 }
 0x9d9   : > { %4417 = vadd.xlane.f32.xlu0 %v4416_v25  ;;  %v13036_v25 = vld [vmem:[#allocation53_spill] sm:$0xff]  ;;  %6883 = vpow2.f32 %v4308_v6  ;;  %v10847_v22 = vpop.eup %6865  ;;  %v4434_v6 = vadd.f32 %v10843_v47, %v10839_v27 }
 0x9da   : > { %13035 = vst [vmem:[#allocation11_spill] sm:$0xff] %v10833_v56  ;;  %v4217_v45 = vsub.f32 %v13036_v25, %v10518_v43  ;;  %v13037_v43 = vld [vmem:[#allocation179_spill] sm:$0xff]  ;;  %v10851_v3 = vpop.eup %6867 }
 0x9db   : > { %v4220_v31 = vsub.f32 %v13037_v43, %v10544_v19  ;;  %v13044_v43 = vld [vmem:[#allocation61_spill] sm:$0xff] }
 0x9dc   : > { %v4166_v40 = vpop.xlane.xlu0 %4165 }
 0x9dd   : > { %v4234_v28 = vsub.f32 %v12944_v59, %v4166_v40  ;;  %v4235_v54 = vsub.f32 %v12945_v35, %v4166_v40  ;;  %4423 = vadd.xlane.f32.xlu0 %v4422_v51  ;;  %v4316_v35 = vmul.f32 1.442695, %v4217_v45  ;;  %v4221_v51 = vsub.f32 %v13038_v29, %v10544_v19  ;;  %v10853_v40 = vpop.eup %6869  ;;  %v13040_v45 = vld [vmem:[#allocation184_spill] sm:$0xff]  ;;  %v13042_v19 = vld [vmem:[#allocation109_spill] sm:$0xff] }
 0x9de   : > { %13039 = vst [vmem:[#allocation174_spill] sm:$0xff] %v10853_v40  ;;  %v10857_v13 = vpop.eup %6871  ;;  %v4322_v25 = vmul.f32 1.442695, %v4220_v31 }
 0x9df   : > { %v4350_v10 = vmul.f32 1.442695, %v4234_v28  ;;  %v4352_v32 = vmul.f32 1.442695, %v4235_v54  ;;  %v4224_v28 = vsub.f32 %v13040_v45, %v10586_v30  ;;  %v13041_v54 = vld [vmem:[#allocation96_spill] sm:$0xff]  ;;  %v4440_v45 = vadd.f32 %v10857_v13, %v10853_v40 }
 0x9e0   : > { %v4607_v59 = vpop.permute.xlu0 %4606 }
 0x9e1   : > { %6885 = vpow2.f32 %v4350_v10  ;;  %4429 = vadd.xlane.f32.xlu0 %v4428_v52  ;;  %6026 = vmatpush3.bf16.msra.mxu0 %v4607_v59  ;;  %v13043_v10 = vmax.f32 %v13041_v54, %v13042_v19  ;;  %v10864_v52 = vpop.eup %6873  ;;  %v4225_v59 = vsub.f32 %v13044_v43, %v10586_v30 }
 0x9e2   : > { %6887 = vpow2.f32 %v4352_v32  ;;  %v4324_v32 = vmul.f32 1.442695, %v4221_v51  ;;  %v10868_v29 = vpop.eup %6875 }
 0x9e3   : > { %6889 = vpow2.f32 %v4314_v39  ;;  %v4407_v39 = vadd.f32 %v10851_v3, %v10847_v22  ;;  %v10872_v31 = vpop.eup %6877  ;;  %v4332_v51 = vmul.f32 1.442695, %v4225_v59  ;;  %v4413_v56 = vadd.f32 %v10868_v29, %v10864_v52 }
 0x9e4   : > { %4180 = vmax.xlane.f32.xlu1 %v13043_v10  ;;  %6891 = vpow2.f32 %v4316_v35  ;;  %13045 = vst [vmem:[#allocation20_spill] sm:$0xff] %v10872_v31  ;;  %v10876_v2 = vpop.eup %6879  ;;  %v4330_v10 = vmul.f32 1.442695, %v4224_v28  ;;  %v4228_v35 = vsub.f32 %v12917_v49, %v10595_v1 }
 0x9e5   : > { %4435 = vadd.xlane.f32.xlu0 %v4434_v6  ;;  %13046 = vst [vmem:[#allocation131_spill] sm:$0xff] %v10876_v2  ;;  %6893 = vpow2.f32 %v4322_v25  ;;  %v10880_v30 = vpop.eup %6881  ;;  %v4229_v6 = vsub.f32 %v12918_v15, %v10595_v1  ;;  %v4446_v25 = vadd.f32 %v10876_v2, %v10872_v31  ;;  %v4233_v1 = vsub.f32 %v12940_v55, %v10724_v42 }
 0x9e6   : > { %6895 = vpow2.f32 %v4324_v32  ;;  %v10884_v43 = vpop.eup %6883  ;;  %v4338_v28 = vmul.f32 1.442695, %v4228_v35  ;;  %v4232_v32 = vsub.f32 %v12939_v44, %v10724_v42 }
 0x9e7   : > { %6897 = vpow2.f32 %v4330_v10  ;;  %v4340_v15 = vmul.f32 1.442695, %v4229_v6  ;;  %v4348_v35 = vmul.f32 1.442695, %v4233_v1 }
 0x9e8   : > { %4408 = vadd.xlane.f32.xlu1 %v4407_v39  ;;  %6899 = vpow2.f32 %v4332_v51  ;;  %v4419_v39 = vadd.f32 %v10884_v43, %v10880_v30  ;;  %v4346_v44 = vmul.f32 1.442695, %v4232_v32 }
 0x9e9   : > { %4441 = vadd.xlane.f32.xlu0 %v4440_v45  ;;  %6901 = vpow2.f32 %v4338_v28 }
 0x9ea   : > { %6903 = vpow2.f32 %v4340_v15 }
 0x9eb   : > { %v10888_v26 = vpop.eup %6885  ;;  %6905 = vpow2.f32 %v4346_v44 }
 0x9ec   : > { %13047 = vst [vmem:[#allocation19_spill] sm:$0xff] %v10888_v26  ;;  %v10892_v49 = vpop.eup %6887  ;;  %4414 = vadd.xlane.f32.xlu1 %v4413_v56  ;;  %6907 = vpow2.f32 %v4348_v35 }
 0x9ed   : > { %13048 = vst [vmem:[#allocation26_spill] sm:$0xff] %v10892_v49  ;;  %4447 = vadd.xlane.f32.xlu0 %v4446_v25  ;;  %v10898_v59 = vpop.eup %6889  ;;  %v4452_v10 = vadd.f32 %v10892_v49, %v10888_v26 }
 0x9ee   : > { %v10902_v45 = vpop.eup %6891 }
 0x9ef   : > { %v5957_v31 = vpop.f32.mrb[216].mxu0  ;;  %v10908_v42 = vpop.eup %6893  ;;  %v4425_v25 = vadd.f32 %v10902_v45, %v10898_v59 }
 0x9f0   : > { %4420 = vadd.xlane.f32.xlu1 %v4419_v39  ;;  %v5958_v56 = vpop.f32.mrb[217].mxu0  ;;  %v10912_v2 = vpop.eup %6895 }
 0x9f1   : > { %v10906_v51 = vadd.f32 %v5958_v56, %v5957_v31  ;;  %v5960_v55 = vpop.f32.mrb[218].mxu0  ;;  %4453 = vadd.xlane.f32.xlu0 %v4452_v10  ;;  %v10916_v28 = vpop.eup %6897  ;;  %v4431_v31 = vadd.f32 %v10912_v2, %v10908_v42 }
 0x9f2   : > { %v5961_v6 = vpop.f32.mrb[219].mxu0  ;;  %v10920_v32 = vpop.eup %6899 }
 0x9f3   : > { %13049 = vst [vmem:[#allocation64_spill] sm:$0xff] %v10906_v51  ;;  %v10914_v40 = vadd.f32 %v5961_v6, %v5960_v55  ;;  %v10924_v10 = vpop.eup %6901  ;;  %v4437_v44 = vadd.f32 %v10920_v32, %v10916_v28 }
 0x9f4   : > { %4426 = vadd.xlane.f32.xlu1 %v4425_v25  ;;  %v10928_v35 = vpop.eup %6903 }
 0x9f5   : > { %13050 = vst [vmem:[#allocation188_spill] sm:$0xff] %v10914_v40  ;;  %v10930_v25 = vpop.eup %6905 }
 0x9f6   : > { %13051 = vst [vmem:[#allocation189_spill] sm:$0xff] %v10930_v25 }
 0x9f7   : > { %v4169_v15 = vpop.xlane.xlu1 %4168 }
 0x9f8   : > { %v4236_v1 = vsub.f32 %v12961_v36, %v4169_v15  ;;  %v4237_v39 = vsub.f32 %v12962_v17, %v4169_v15  ;;  %4432 = vadd.xlane.f32.xlu1 %v4431_v31  ;;  %v4443_v36 = vadd.f32 %v10928_v35, %v10924_v10  ;;  %v10934_v17 = vpop.eup %6907  ;;  %v4609_v31 = vpop.permute.xlu0 %4608 }
 0x9fa   : > { %v4354_v56 = vmul.f32 1.442695, %v4236_v1  ;;  %v4356_v55 = vmul.f32 1.442695, %v4237_v39  ;;  %v4449_v1 = vadd.f32 %v10934_v17, %v10930_v25 }
 0x9fb   : > { %v4388_v6 = vpop.xlane.xlu1 %4387 }
 0x9fc   : > { %6909 = vpow2.f32 %v4354_v56  ;;  %4438 = vadd.xlane.f32.xlu1 %v4437_v44  ;;  %v4627_v51 = vpop.permute.xlu0 %4626 }
 0x9fd   : > { %6911 = vpow2.f32 %v4356_v55 }
 0x9ff   : > { %v4391_v15 = vpop.xlane.xlu1 %4390 }
 0xa00   : > { %4444 = vadd.xlane.f32.xlu1 %v4443_v36 }
 0xa03   : > { %v4625_v39 = vpop.permute.xlu1 %4624 }
 0xa04   : > { %4450 = vadd.xlane.f32.xlu1 %v4449_v1  ;;  %6027 = vmatprep.subr.bf16.mxu0 %v4625_v39 }
 0xa05   : > { %6028 = vmatpush3.bf16.msra.mxu0 %v4609_v31 }
 0xa06   : > { %v10938_v56 = vpop.eup %6909  ;;  %6029 = vmatprep.subr.bf16.mxu0 %v4627_v51 }
 0xa07   : > { %13052 = vst [vmem:[#allocation134_spill] sm:$0xff] %v10938_v56  ;;  %v10940_v55 = vpop.eup %6911 }
 0xa08   : > { %13053 = vst [vmem:[#allocation133_spill] sm:$0xff] %v10940_v55  ;;  %v4455_v44 = vadd.f32 %v10940_v55, %v10938_v56 }
 0xa0a   : > { %4456 = vadd.xlane.f32.xlu1 %v4455_v44 }
 0xa19   : > { %v4172_v40 = vpop.xlane.xlu0 %4171 }
 0xa1a   : > { %v4238_v36 = vsub.f32 %v12969_v12, %v4172_v40  ;;  %v4239_v26 = vsub.f32 %v12970_v50, %v4172_v40 }
 0xa1c   : > { %v4358_v49 = vmul.f32 1.442695, %v4238_v36  ;;  %v4360_v25 = vmul.f32 1.442695, %v4239_v26 }
 0xa1d   : > { %v4611_v1 = vpop.permute.xlu0 %4610 }
 0xa1e   : > { %6913 = vpow2.f32 %v4358_v49  ;;  %6030 = vmatpush3.bf16.msra.mxu0 %v4611_v1 }
 0xa1f   : > { %6915 = vpow2.f32 %v4360_v25 }
 0xa20   : > { %6917 = vrcp.f32 %v10742_v63 }
 0xa21   : > { %6919 = vrcp.f32 %v10732_v20 }
 0xa28   : > { %v10946_v31 = vpop.eup %6913 }
 0xa29   : > { %v10948_v51 = vpop.eup %6915 }
 0xa2a   : > { %v4458_v39 = vadd.f32 %v10948_v51, %v10946_v31 }
 0xa2c   : > { %4459 = vadd.xlane.f32.xlu0 %v4458_v39  ;;  %v5963_v44 = vpop.f32.mrb[220].mxu0 }
 0xa2d   : > { %v5964_v56 = vpop.f32.mrb[221].mxu0 }
 0xa2e   : > { %v10952_v55 = vadd.f32 %v5964_v56, %v5963_v44  ;;  %v5966_v12 = vpop.f32.mrb[222].mxu0  ;;  %v6918_v44 = vpop.eup %6917 }
 0xa2f   : > { %v5967_v50 = vpop.f32.mrb[223].mxu0  ;;  %v4509_v63 = vmul.f32 %v6918_v44, %v10580_v0 }
 0xa30   : > { %13054 = vst [vmem:[#allocation136_spill] sm:$0xff] %v10952_v55  ;;  %v10954_v40 = vadd.f32 %v5967_v50, %v5966_v12  ;;  %v6920_v12 = vpop.eup %6919  ;;  %v4613_v55 = vpop.permute.xlu0 %4612 }
 0xa34   : > { %v4175_v26 = vpop.xlane.xlu1 %4174 }
 0xa35   : > { %v4240_v49 = vsub.f32 %v12984_v21, %v4175_v26  ;;  %v4241_v25 = vsub.f32 %v12985_v24, %v4175_v26  ;;  %v4507_v21 = vmul.f32 %v6920_v12, %v10567_v18  ;;  %v4508_v18 = vmul.f32 %v6918_v44, %v10576_v9 }
 0xa37   : > { %v4362_v36 = vmul.f32 1.442695, %v4240_v49  ;;  %v4364_v1 = vmul.f32 1.442695, %v4241_v25  ;;  %v4569_v26 = vpack.c.bf16 %v4509_v63, %v4507_v21  ;;  %v4506_v25 = vmul.f32 %v6920_v12, %v10565_v16 }
 0xa38   : > { %v4394_v39 = vpop.xlane.xlu1 %4393 }
 0xa39   : > { %6921 = vpow2.f32 %v4362_v36 }
 0xa3a   : > { %6923 = vpow2.f32 %v4364_v1  ;;  %v4568_v1 = vpack.c.bf16 %v4508_v18, %v4506_v25 }
 0xa3b   : > { %6925 = vrcp.f32 %v4391_v15 }
 0xa3c   : > { %v4397_v56 = vpop.xlane.xlu1 %4396  ;;  %6927 = vrcp.f32 %v4388_v6  ;;  %v13055_v6 = vpack.c.bf16 %v10659_v41, %v10656_v58 }
 0xa3d   : > { %6929 = vrcp.f32 %v4397_v56 }
 0xa3e   : > { %6931 = vrcp.f32 %v4394_v39 }
 0xa40   : > { %v4629_v50 = vpop.permute.xlu1 %4628 }
 0xa41   : > { %6031 = vmatprep.subr.bf16.mxu0 %v4629_v50 }
 0xa42   : > { %6032 = vmatpush3.bf16.msra.mxu0 %v4613_v55 }
 0xa43   : > { %v10962_v20 = vpop.eup %6921 }
 0xa44   : > { %v10964_v24 = vpop.eup %6923 }
 0xa45   : > { %v6926_v49 = vpop.eup %6925  ;;  %4679 = vmatmul.mubr.bf16.vlgmr.msra.gmra.mrb[224].mxu0 %v13055_v6  ;;  %v4461_v0 = vadd.f32 %v10964_v24, %v10962_v20 }
 0xa46   : > { %4686 = vmatprep.mubr.bf16.mxu0 %v4569_v26  ;;  %v6928_v15 = vpop.eup %6927  ;;  %v4513_v55 = vmul.f32 %v6926_v49, %v10640_v61  ;;  %v4512_v41 = vmul.f32 %v6926_v49, %v10636_v60 }
 0xa47   : > { %4462 = vadd.xlane.f32.xlu1 %v4461_v0  ;;  %v4511_v36 = vmul.f32 %v6928_v15, %v10625_v11  ;;  %v6930_v56 = vpop.eup %6929  ;;  %v4510_v63 = vmul.f32 %v6928_v15, %v10623_v48  ;;  %v13056_v48 = vld [vmem:[#allocation93_spill] sm:$0xff] }
 0xa48   : > { %v6932_v58 = vpop.eup %6931  ;;  %v4517_v50 = vmul.f32 %v6930_v56, %v10698_v57  ;;  %v4516_v60 = vmul.f32 %v6930_v56, %v10694_v8 }
 0xa49   : > { %v4571_v39 = vpack.c.bf16 %v4513_v55, %v4511_v36  ;;  %v4515_v9 = vmul.f32 %v6932_v58, %v10687_v4  ;;  %v4570_v11 = vpack.c.bf16 %v4512_v41, %v4510_v63  ;;  %v4514_v57 = vmul.f32 %v6932_v58, %v13056_v48  ;;  %v13057_v55 = vld [vmem:[#allocation160_spill] sm:$0xff]  ;;  %v13058_v36 = vld [vmem:[#allocation159_spill] sm:$0xff] }
 0xa4b   : > { %v4573_v44 = vpack.c.bf16 %v4517_v50, %v4515_v9  ;;  %v4572_v4 = vpack.c.bf16 %v4516_v60, %v4514_v57 }
 0xa4d   : > { %4687 = vmatmul.mubr.bf16.gmra.mrb[228].mxu0 %v4568_v1 }
 0xa4e   : > { %4694 = vmatprep.mubr.bf16.mxu0 %v4571_v39  ;;  %v13059_v39 = vld [vmem:[#allocation164_spill] sm:$0xff] }
 0xa52   : > { %v4178_v21 = vpop.xlane.xlu0 %4177 }
 0xa53   : > { %v4242_v61 = vsub.f32 %v13010_v53, %v4178_v21  ;;  %v4243_v16 = vsub.f32 %v13011_v62, %v4178_v21 }
 0xa55   : > { %v4366_v12 = vmul.f32 1.442695, %v4242_v61  ;;  %v4368_v26 = vmul.f32 1.442695, %v4243_v16  ;;  %4695 = vmatmul.mubr.bf16.gmra.mrb[232].mxu0 %v4570_v11 }
 0xa56   : > { %v4400_v6 = vpop.xlane.xlu0 %4399  ;;  %4702 = vmatprep.mubr.bf16.mxu0 %v4573_v44 }
 0xa57   : > { %6933 = vpow2.f32 %v4366_v12  ;;  %v13060_v12 = vld [vmem:[#allocation110_spill] sm:$0xff] }
 0xa58   : > { %6935 = vpow2.f32 %v4368_v26 }
 0xa59   : > { %6937 = vrcp.f32 %v4400_v6 }
 0xa5a   : > { %v4403_v49 = vpop.xlane.xlu0 %4402 }
 0xa5b   : > { %6939 = vrcp.f32 %v4403_v49 }
 0xa5d   : > { %4703 = vmatmul.mubr.bf16.gmra.mrb[236].mxu0 %v4572_v4 }
 0xa5e   : > { %v4406_v50 = vpop.xlane.xlu0 %4405 }
 0xa5f   : > { %6941 = vrcp.f32 %v4406_v50 }
 0xa61   : > { %v10983_v53 = vpop.eup %6933 }
 0xa62   : > { %v10985_v62 = vpop.eup %6935  ;;  %v4412_v21 = vpop.xlane.xlu0 %4411 }
 0xa63   : > { %v6938_v0 = vpop.eup %6937  ;;  %v4464_v15 = vadd.f32 %v10985_v62, %v10983_v53  ;;  %6943 = vrcp.f32 %v4412_v21  ;;  %v13065_v21 = vld [vmem:[#allocation165_spill] sm:$0xff] }
 0xa64   : > { %v4519_v8 = vmul.f32 %v6938_v0, %v13057_v55  ;;  %v4518_v1 = vmul.f32 %v6938_v0, %v13058_v36 }
 0xa65   : > { %v6940_v18 = vpop.eup %6939  ;;  %4465 = vadd.xlane.f32.xlu0 %v4464_v15  ;;  %v13062_v15 = vld [vmem:[#allocation114_spill] sm:$0xff] }
 0xa66   : > { %v4521_v25 = vmul.f32 %v6940_v18, %v10761_v7  ;;  %v4520_v56 = vmul.f32 %v6940_v18, %v13059_v39  ;;  %v4418_v26 = vpop.xlane.xlu0 %4417  ;;  %v13063_v18 = vld [vmem:[#allocation24_spill] sm:$0xff] }
 0xa68   : > { %v4575_v58 = vpack.c.bf16 %v4521_v25, %v4519_v8  ;;  %v4574_v41 = vpack.c.bf16 %v4520_v56, %v4518_v1  ;;  %v13064_v25 = vld [vmem:[#allocation122_spill] sm:$0xff] }
 0xa69   : > { %v6942_v60 = vpop.eup %6941 }
 0xa6a   : > { %4710 = vmatprep.mubr.bf16.mxu0 %v4575_v58  ;;  %v4523_v55 = vmul.f32 %v6942_v60, %v13063_v18  ;;  %v4522_v36 = vmul.f32 %v6942_v60, %v13064_v25  ;;  %v4424_v56 = vpop.xlane.xlu0 %4423  ;;  %v13070_v18 = vld [vmem:[#allocation83_spill] sm:$0xff] }
 0xa6b   : > { %4711 = vmatmul.mubr.bf16.gmra.mrb[240].mxu0 %v4574_v41 }
 0xa71   : > { %v4181_v63 = vpop.xlane.xlu1 %4180 }
 0xa72   : > { %v4244_v9 = vsub.f32 %v13041_v54, %v4181_v63  ;;  %v4245_v61 = vsub.f32 %v13042_v19, %v4181_v63  ;;  %v6944_v54 = vpop.eup %6943  ;;  %v13061_v19 = vld [vmem:[#allocation185_spill] sm:$0xff] }
 0xa73   : > { %v4527_v50 = vmul.f32 %v6944_v54, %v10787_v14 }
 0xa74   : > { %v4370_v16 = vmul.f32 1.442695, %v4244_v9  ;;  %v4372_v11 = vmul.f32 1.442695, %v4245_v61 }
 0xa75   : > { %v4409_v7 = vpop.xlane.xlu1 %4408 }
 0xa76   : > { %6945 = vpow2.f32 %v4370_v16 }
 0xa77   : > { %6947 = vpow2.f32 %v4372_v11  ;;  %v13066_v11 = vld [vmem:[#allocation167_spill] sm:$0xff] }
 0xa78   : > { %6949 = vrcp.f32 %v4409_v7  ;;  %v4430_v7 = vpop.xlane.xlu0 %4429 }
 0xa79   : > { %v4415_v44 = vpop.xlane.xlu1 %4414 }
 0xa7a   : > { %6951 = vrcp.f32 %v4415_v44 }
 0xa7b   : > { %4839 = vrot.lane.b32.xlu0 %v13060_v12, %s7008_s26 }
 0xa7d   : > { %v4421_v6 = vpop.xlane.xlu1 %4420 }
 0xa7e   : > { %6953 = vrcp.f32 %v4421_v6 }
 0xa7f   : > { %4845 = vrot.lane.b32.xlu0 %v13061_v19, %s7008_s26  ;;  %6955 = vrcp.f32 %v4418_v26  ;;  %v13067_v26 = vld [vmem:[#allocation77_spill] sm:$0xff] }
 0xa80   : > { %v10999_v48 = vpop.eup %6945 }
 0xa81   : > { %v11001_v57 = vpop.eup %6947  ;;  %v4427_v0 = vpop.xlane.xlu1 %4426 }
 0xa82   : > { %v6950_v49 = vpop.eup %6949  ;;  %v4467_v4 = vadd.f32 %v11001_v57, %v10999_v48  ;;  %6957 = vrcp.f32 %v4427_v0 }
 0xa83   : > { %4849 = vrot.lane.b32.xlu0 %v13062_v15, %s7008_s26  ;;  %v4525_v8 = vmul.f32 %v6950_v49, %v10851_v3  ;;  %v4524_v1 = vmul.f32 %v6950_v49, %v10847_v22  ;;  %6959 = vrcp.f32 %v4424_v56  ;;  %v13073_v56 = vld [vmem:[#allocation115_spill] sm:$0xff] }
 0xa84   : > { %v6952_v39 = vpop.eup %6951  ;;  %4468 = vadd.xlane.f32.xlu1 %v4467_v4  ;;  %v13069_v4 = vld [vmem:[#allocation116_spill] sm:$0xff] }
 0xa85   : > { %v4577_v58 = vpack.c.bf16 %v4525_v8, %v4523_v55  ;;  %v4576_v41 = vpack.c.bf16 %v4524_v1, %v4522_v36  ;;  %v4529_v63 = vmul.f32 %v6952_v39, %v10868_v29  ;;  %v4528_v61 = vmul.f32 %v6952_v39, %v10864_v52  ;;  %v4433_v16 = vpop.xlane.xlu1 %4432  ;;  %v13072_v36 = vld [vmem:[#allocation124_spill] sm:$0xff] }
 0xa86   : > { %v4526_v29 = vmul.f32 %v6944_v54, %v10781_v23  ;;  %6961 = vrcp.f32 %v4433_v16  ;;  %v4436_v54 = vpop.xlane.xlu0 %4435  ;;  %v13077_v16 = vld [vmem:[#allocation166_spill] sm:$0xff] }
 0xa87   : > { %4718 = vmatprep.mubr.bf16.mxu0 %v4577_v58  ;;  %4853 = vrot.lane.b32.xlu0 %v13065_v21, %s7008_s26  ;;  %v4579_v9 = vpack.c.bf16 %v4529_v63, %v4527_v50  ;;  %6963 = vrcp.f32 %v4430_v7  ;;  %v13074_v50 = vld [vmem:[#allocation126_spill] sm:$0xff] }
 0xa88   : > { %v6954_v3 = vpop.eup %6953  ;;  %4719 = vmatmul.mubr.bf16.gmra.mrb[244].mxu0 %v4576_v41  ;;  %v4578_v12 = vpack.c.bf16 %v4528_v61, %v4526_v29  ;;  %v13078_v29 = vld [vmem:[#allocation128_spill] sm:$0xff] }
 0xa89   : > { %4726 = vmatprep.mubr.bf16.mxu0 %v4579_v9  ;;  %v6956_v22 = vpop.eup %6955  ;;  %v4533_v14 = vmul.f32 %v6954_v3, %v10884_v43  ;;  %v4532_v19 = vmul.f32 %v6954_v3, %v10880_v30  ;;  %v4439_v49 = vpop.xlane.xlu1 %4438  ;;  %v13068_v43 = vld [vmem:[#allocation121_spill] sm:$0xff] }
 0xa8a   : > { %v4531_v44 = vmul.f32 %v6956_v22, %v10803_v38  ;;  %v4530_v38 = vmul.f32 %v6956_v22, %v10797_v46  ;;  %6965 = vrcp.f32 %v4439_v49  ;;  %v4442_v39 = vpop.xlane.xlu0 %4441  ;;  %v13076_v3 = vld [vmem:[#allocation169_spill] sm:$0xff] }
 0xa8b   : > { %4857 = vrot.lane.b32.xlu0 %v13066_v11, %s7008_s26  ;;  %6967 = vrcp.f32 %v4436_v54  ;;  %v13084_v54 = vld [vmem:[#allocation22_spill] sm:$0xff] }
 0xa8c   : > { %v4581_v6 = vpack.c.bf16 %v4533_v14, %v4531_v44  ;;  %v6958_v60 = vpop.eup %6957  ;;  %v4580_v15 = vpack.c.bf16 %v4532_v19, %v4530_v38 }
 0xa8d   : > { %v6960_v52 = vpop.eup %6959  ;;  %v4537_v23 = vmul.f32 %v6958_v60, %v10902_v45  ;;  %v13071_v45 = vld [vmem:[#allocation56_spill] sm:$0xff]  ;;  %v4536_v8 = vmul.f32 %v6958_v60, %v10898_v59  ;;  %v4445_v25 = vpop.xlane.xlu1 %4444 }
 0xa8e   : > { %v4535_v0 = vmul.f32 %v6960_v52, %v10819_v5  ;;  %v4534_v1 = vmul.f32 %v6960_v52, %v10813_v34  ;;  %6969 = vrcp.f32 %v4445_v25  ;;  %v4448_v61 = vpop.xlane.xlu0 %4447  ;;  %v13081_v52 = vld [vmem:[#allocation74_spill] sm:$0xff] }
 0xa8f   : > { %4861 = vrot.lane.b32.xlu0 %v13067_v26, %s7008_s26  ;;  %6971 = vrcp.f32 %v4442_v39  ;;  %v13080_v26 = vld [vmem:[#allocation173_spill] sm:$0xff] }
 0xa90   : > { %4727 = vmatmul.mubr.bf16.gmra.mrb[248].mxu0 %v4578_v12  ;;  %v4583_v30 = vpack.c.bf16 %v4537_v23, %v4535_v0  ;;  %v6962_v55 = vpop.eup %6961  ;;  %v4582_v41 = vpack.c.bf16 %v4536_v8, %v4534_v1  ;;  %v13092_v1 = vld [vmem:[#allocation133_spill] sm:$0xff] }
 0xa91   : > { %4734 = vmatprep.mubr.bf16.mxu0 %v4581_v6  ;;  %v6964_v46 = vpop.eup %6963  ;;  %v4541_v5 = vmul.f32 %v6962_v55, %v10912_v2  ;;  %v13075_v2 = vld [vmem:[#allocation117_spill] sm:$0xff]  ;;  %v4540_v21 = vmul.f32 %v6962_v55, %v10908_v42  ;;  %v4451_v9 = vpop.xlane.xlu1 %4450 }
 0xa92   : > { %v4539_v58 = vmul.f32 %v6964_v46, %v10829_v33  ;;  %v4538_v22 = vmul.f32 %v6964_v46, %v10825_v37  ;;  %6973 = vrcp.f32 %v4451_v9  ;;  %v4454_v60 = vpop.xlane.xlu0 %4453  ;;  %v13098_v9 = vld [vmem:[#allocation134_spill] sm:$0xff] }
 0xa93   : > { %4865 = vrot.lane.b32.xlu0 %v13068_v43, %s7008_s26  ;;  %6975 = vrcp.f32 %v4448_v61  ;;  %v13082_v43 = vld [vmem:[#allocation175_spill] sm:$0xff] }
 0xa94   : > { %v4585_v59 = vpack.c.bf16 %v4541_v5, %v4539_v58  ;;  %v6966_v63 = vpop.eup %6965  ;;  %v4584_v14 = vpack.c.bf16 %v4540_v21, %v4538_v22  ;;  %v13091_v5 = vld [vmem:[#allocation145_spill] sm:$0xff]  ;;  %v13097_v21 = vld [vmem:[#allocation127_spill] sm:$0xff] }
 0xa95   : > { %4841 = vrot.lane.b32.xlu1 %v13069_v4, %s7008_s26  ;;  %v6968_v34 = vpop.eup %6967  ;;  %v4545_v33 = vmul.f32 %v6966_v63, %v10920_v32  ;;  %v13079_v32 = vld [vmem:[#allocation168_spill] sm:$0xff]  ;;  %v4544_v44 = vmul.f32 %v6966_v63, %v10916_v28  ;;  %v13085_v4 = vld [vmem:[#allocation174_spill] sm:$0xff]  ;;  %v13100_v22 = vld [vmem:[#allocation19_spill] sm:$0xff] }
 0xa96   : > { %v4543_v11 = vmul.f32 %v6968_v34, %v10843_v47  ;;  %v4542_v6 = vmul.f32 %v6968_v34, %v10839_v27 }
 0xa97   : > { %4869 = vrot.lane.b32.xlu0 %v13070_v18, %s7008_s26  ;;  %v4457_v12 = vpop.xlane.xlu1 %4456  ;;  %v13087_v18 = vld [vmem:[#allocation131_spill] sm:$0xff] }
 0xa98   : > { %4735 = vmatmul.mubr.bf16.gmra.mrb[252].mxu0 %v4580_v15  ;;  %v4587_v42 = vpack.c.bf16 %v4545_v33, %v4543_v11  ;;  %v6970_v7 = vpop.eup %6969  ;;  %v4586_v49 = vpack.c.bf16 %v4544_v44, %v4542_v6  ;;  %6977 = vrcp.f32 %v4457_v12  ;;  %v13086_v15 = vld [vmem:[#allocation123_spill] sm:$0xff]  ;;  %v13099_v33 = vld [vmem:[#allocation144_spill] sm:$0xff]  ;;  %v13107_v44 = vld [vmem:[#allocation137_spill] sm:$0xff] }
 0xa99   : > { %4742 = vmatprep.mubr.bf16.mxu0 %v4583_v30  ;;  %4843 = vrot.lane.b32.xlu1 %v13071_v45, %s7008_s26  ;;  %v6972_v37 = vpop.eup %6971  ;;  %v4549_v47 = vmul.f32 %v6970_v7, %v10928_v35  ;;  %6979 = vrcp.f32 %v4454_v60  ;;  %v13083_v35 = vld [vmem:[#allocation119_spill] sm:$0xff]  ;;  %v4548_v38 = vmul.f32 %v6970_v7, %v10924_v10  ;;  %v13088_v45 = vld [vmem:[#allocation138_spill] sm:$0xff]  ;;  %v13089_v10 = vld [vmem:[#allocation125_spill] sm:$0xff] }
 0xa9a   : > { %v4547_v19 = vmul.f32 %v6972_v37, %v10857_v13  ;;  %v4546_v0 = vmul.f32 %v6972_v37, %v13085_v4  ;;  %v13105_v7 = vld [vmem:[#allocation21_spill] sm:$0xff]  ;;  %v13108_v12 = vld [vmem:[#allocation152_spill] sm:$0xff]  ;;  %v13111_v60 = vld [vmem:[#allocation23_spill] sm:$0xff] }
 0xa9b   : > { %4873 = vrot.lane.b32.xlu0 %v13072_v36, %s7008_s26  ;;  %v13110_v6 = vld [vmem:[#allocation157_spill] sm:$0xff] }
 0xa9c   : > { %v4589_v28 = vpack.c.bf16 %v4549_v47, %v4547_v19  ;;  %v6974_v23 = vpop.eup %6973  ;;  %v4588_v55 = vpack.c.bf16 %v4548_v38, %v4546_v0  ;;  %v13109_v47 = vld [vmem:[#allocation142_spill] sm:$0xff]  ;;  %v13116_v0 = vld [vmem:[#allocation163_spill] sm:$0xff] }
 0xa9d   : > { %4847 = vrot.lane.b32.xlu1 %v13073_v56, %s7008_s26  ;;  %v6976_v27 = vpop.eup %6975  ;;  %v4553_v13 = vmul.f32 %v6974_v23, %v10934_v17  ;;  %v13090_v17 = vld [vmem:[#allocation189_spill] sm:$0xff]  ;;  %v13093_v56 = vld [vmem:[#allocation20_spill] sm:$0xff] }
 0xa9e   : > { %v4551_v30 = vmul.f32 %v6976_v27, %v13087_v18  ;;  %v4552_v36 = vmul.f32 %v6974_v23, %v13090_v17  ;;  %v4550_v58 = vmul.f32 %v6976_v27, %v13093_v56  ;;  %v13122_v18 = vld [vmem:[#allocation11_spill] sm:$0xff]  ;;  %v13127_v17 = vld [vmem:[#allocation156_spill] sm:$0xff] }
 0xa9f   : > { %4877 = vrot.lane.b32.xlu0 %v13074_v50, %s7008_s26  ;;  %v13095_v50 = vld [vmem:[#allocation26_spill] sm:$0xff] }
 0xaa0   : > { %4743 = vmatmul.mubr.bf16.gmra.mrb[0].mxu0 %v4582_v41  ;;  %v4591_v46 = vpack.c.bf16 %v4553_v13, %v4551_v30  ;;  %v13094_v41 = vld [vmem:[#allocation18_spill] sm:$0xff]  ;;  %v4590_v63 = vpack.c.bf16 %v4552_v36, %v4550_v58  ;;  %v13123_v30 = vld [vmem:[#allocation25_spill] sm:$0xff]  ;;  %v13130_v58 = vld [vmem:[#allocation31_spill] sm:$0xff] }
 0xaa1   : > { %4750 = vmatprep.mubr.bf16.mxu0 %v4585_v59  ;;  %4851 = vrot.lane.b32.xlu1 %v13075_v2, %s7008_s26  ;;  %v13096_v2 = vld [vmem:[#allocation146_spill] sm:$0xff] }
 0xaa2   : > { %v6978_v8 = vpop.eup %6977 }
 0xaa3   : > { %4881 = vrot.lane.b32.xlu0 %v13076_v3, %s7008_s26  ;;  %v6980_v25 = vpop.eup %6979  ;;  %v4557_v39 = vmul.f32 %v6978_v8, %v13092_v1  ;;  %v4556_v3 = vmul.f32 %v6978_v8, %v13098_v9 }
 0xaa4   : > { %v4555_v59 = vmul.f32 %v6980_v25, %v13095_v50  ;;  %v4554_v61 = vmul.f32 %v6980_v25, %v13100_v22  ;;  %v13131_v50 = vld [vmem:[#allocation78_spill] sm:$0xff]  ;;  %v13136_v22 = vld [vmem:[#allocation40_spill] sm:$0xff] }
 0xaa5   : > { %4855 = vrot.lane.b32.xlu1 %v13077_v16, %s7008_s26  ;;  %v13101_v16 = vld [vmem:[#allocation130_spill] sm:$0xff] }
 0xaa6   : > { %v4593_v34 = vpack.c.bf16 %v4557_v39, %v4555_v59  ;;  %v4592_v11 = vpack.c.bf16 %v4556_v3, %v4554_v61  ;;  %v13129_v39 = vld [vmem:[#allocation162_spill] sm:$0xff]  ;;  %v13135_v3 = vld [vmem:[#allocation129_spill] sm:$0xff] }
 0xaa7   : > { %4885 = vrot.lane.b32.xlu0 %v13078_v29, %s7008_s26  ;;  %v13103_v29 = vld [vmem:[#allocation132_spill] sm:$0xff]  ;;  %v13132_v59 = vld [vmem:[#allocation102_spill] sm:$0xff] }
 0xaa8   : > { %4751 = vmatmul.mubr.bf16.gmra.mrb[4].mxu0 %v4584_v14  ;;  %v13102_v14 = vld [vmem:[#allocation150_spill] sm:$0xff] }
 0xaa9   : > { %4758 = vmatprep.mubr.bf16.mxu0 %v4587_v42  ;;  %4859 = vrot.lane.b32.xlu1 %v13079_v32, %s7008_s26  ;;  %v13104_v42 = vld [vmem:[#allocation148_spill] sm:$0xff]  ;;  %v13106_v32 = vld [vmem:[#allocation154_spill] sm:$0xff] }
 0xaab   : > { %4889 = vrot.lane.b32.xlu0 %v13080_v26, %s7008_s26 }
 0xaad   : > { %4863 = vrot.lane.b32.xlu1 %v13081_v52, %s7008_s26  ;;  %v13112_v52 = vld [vmem:[#allocation155_spill] sm:$0xff] }
 0xaaf   : > { %4893 = vrot.lane.b32.xlu0 %v13082_v43, %s7008_s26 }
 0xab0   : > { %4759 = vmatmul.mubr.bf16.gmra.mrb[8].mxu0 %v4586_v49  ;;  %v13113_v49 = vld [vmem:[#allocation143_spill] sm:$0xff] }
 0xab1   : > { %4766 = vmatprep.mubr.bf16.mxu0 %v4589_v28  ;;  %4867 = vrot.lane.b32.xlu1 %v13083_v35, %s7008_s26  ;;  %v13114_v28 = vld [vmem:[#allocation161_spill] sm:$0xff] }
 0xab3   : > { %4897 = vrot.lane.b32.xlu0 %v13084_v54, %s7008_s26  ;;  %v13115_v54 = vld [vmem:[#allocation149_spill] sm:$0xff] }
 0xab5   : > { %4871 = vrot.lane.b32.xlu1 %v13086_v15, %s7008_s26  ;;  %v13117_v15 = vld [vmem:[#allocation147_spill] sm:$0xff] }
 0xab7   : > { %4901 = vrot.lane.b32.xlu0 %v13088_v45, %s7008_s26  ;;  %v13124_v45 = vld [vmem:[#allocation188_spill] sm:$0xff] }
 0xab8   : > { %4767 = vmatmul.mubr.bf16.gmra.mrb[12].mxu0 %v4588_v55 }
 0xab9   : > { %4774 = vmatprep.mubr.bf16.mxu0 %v4591_v46  ;;  %4875 = vrot.lane.b32.xlu1 %v13089_v10, %s7008_s26  ;;  %v4460_v37 = vpop.xlane.xlu0 %4459  ;;  %v13125_v46 = vld [vmem:[#allocation158_spill] sm:$0xff]  ;;  %v13126_v10 = vld [vmem:[#allocation95_spill] sm:$0xff] }
 0xaba   : > { %6981 = vrcp.f32 %v4460_v37  ;;  %v13140_v37 = vld [vmem:[#allocation85_spill] sm:$0xff] }
 0xabb   : > { %4969 = vrot.lane.b32.xlu0 %v13091_v5, %s7009_s28  ;;  %v13128_v5 = vld [vmem:[#allocation30_spill] sm:$0xff] }
 0xabd   : > { %4879 = vrot.lane.b32.xlu1 %v13094_v41, %s7008_s26 }
 0xabf   : > { %4973 = vrot.lane.b32.xlu0 %v13096_v2, %s7009_s28  ;;  %v13133_v2 = vld [vmem:[#allocation172_spill] sm:$0xff] }
 0xac0   : > { %4775 = vmatmul.mubr.bf16.gmra.mrb[16].mxu0 %v4590_v63 }
 0xac1   : > { %4782 = vmatprep.mubr.bf16.mxu0 %v4593_v34  ;;  %4883 = vrot.lane.b32.xlu1 %v13097_v21, %s7008_s26  ;;  %v13134_v21 = vld [vmem:[#allocation72_spill] sm:$0xff] }
 0xac3   : > { %4977 = vrot.lane.b32.xlu0 %v13099_v33, %s7009_s28 }
 0xac4   : > { %v6982_v19 = vpop.eup %6981 }
 0xac5   : > { %4887 = vrot.lane.b32.xlu1 %v13101_v16, %s7008_s26  ;;  %v4558_v23 = vmul.f32 %v6982_v19, %v10946_v31  ;;  %v4559_v27 = vmul.f32 %v6982_v19, %v10948_v51  ;;  %v13118_v31 = vld [vmem:[#allocation171_spill] sm:$0xff]  ;;  %v13119_v51 = vld [vmem:[#allocation153_spill] sm:$0xff]  ;;  %v13137_v16 = vld [vmem:[#allocation64_spill] sm:$0xff] }
 0xac7   : > { %4981 = vrot.lane.b32.xlu0 %v13102_v14, %s7009_s28  ;;  %v13138_v14 = vld [vmem:[#allocation44_spill] sm:$0xff] }
 0xac8   : > { %4783 = vmatmul.mubr.bf16.gmra.mrb[20].mxu0 %v4592_v11 }
 0xac9   : > { %4891 = vrot.lane.b32.xlu1 %v13103_v29, %s7008_s26 }
 0xacb   : > { %4985 = vrot.lane.b32.xlu0 %v13104_v42, %s7009_s28  ;;  %v13139_v42 = vld [vmem:[#allocation136_spill] sm:$0xff] }
 0xacd   : > { %4895 = vrot.lane.b32.xlu1 %v13105_v7, %s7008_s26 }
 0xacf   : > { %4989 = vrot.lane.b32.xlu0 %v13106_v32, %s7009_s28 }
 0xad1   : > { %4899 = vrot.lane.b32.xlu1 %v13107_v44, %s7008_s26 }
 0xad3   : > { %4993 = vrot.lane.b32.xlu0 %v13108_v12, %s7009_s28 }
 0xad4   : > { %v4463_v26 = vpop.xlane.xlu1 %4462 }
 0xad5   : > { %6983 = vrcp.f32 %v4463_v26  ;;  %4967 = vrot.lane.b32.xlu1 %v13109_v47, %s7009_s28  ;;  %v13141_v26 = vld [vmem:[#allocation97_spill] sm:$0xff] }
 0xad7   : > { %4997 = vrot.lane.b32.xlu0 %v13110_v6, %s7009_s28 }
 0xad9   : > { %4971 = vrot.lane.b32.xlu1 %v13111_v60, %s7009_s28  ;;  %v13142_v60 = vld [vmem:[#allocation99_spill] sm:$0xff] }
 0xadb   : > { %5001 = vrot.lane.b32.xlu0 %v13112_v52, %s7009_s28 }
 0xadd   : > { %4975 = vrot.lane.b32.xlu1 %v13113_v49, %s7009_s28 }
 0xadf   : > { %v6984_v43 = vpop.eup %6983  ;;  %5005 = vrot.lane.b32.xlu0 %v13114_v28, %s7009_s28 }
 0xae0   : > { %v4560_v35 = vmul.f32 %v6984_v43, %v10962_v20  ;;  %v4561_v38 = vmul.f32 %v6984_v43, %v10964_v24  ;;  %v13120_v20 = vld [vmem:[#allocation170_spill] sm:$0xff]  ;;  %v13121_v24 = vld [vmem:[#allocation151_spill] sm:$0xff] }
 0xae1   : > { %4979 = vrot.lane.b32.xlu1 %v13115_v54, %s7009_s28 }
 0xae2   : > { %v4594_v13 = vpack.c.bf16 %v4560_v35, %v4558_v23  ;;  %v4595_v4 = vpack.c.bf16 %v4561_v38, %v4559_v27  ;;  %v13143_v23 = vld [vmem:[#allocation29_spill] sm:$0xff] }
 0xae3   : > { %5009 = vrot.lane.b32.xlu0 %v13116_v0, %s7009_s28 }
 0xae4   : > { %4790 = vmatprep.mubr.bf16.mxu0 %v4595_v4 }
 0xae5   : > { %4983 = vrot.lane.b32.xlu1 %v13117_v15, %s7009_s28  ;;  %4791 = vmatmul.mubr.bf16.gmra.mrb[24].mxu0 %v4594_v13  ;;  %v13144_v13 = vld [vmem:[#allocation103_spill] sm:$0xff] }
 0xae7   : > { %5013 = vrot.lane.b32.xlu0 %v13118_v31, %s7009_s28 }
 0xae9   : > { %4987 = vrot.lane.b32.xlu1 %v13119_v51, %s7009_s28 }
 0xaeb   : > { %5017 = vrot.lane.b32.xlu0 %v13120_v20, %s7009_s28 }
 0xaed   : > { %4991 = vrot.lane.b32.xlu1 %v13121_v24, %s7009_s28 }
 0xaef   : > { %5021 = vrot.lane.b32.xlu0 %v13122_v18, %s7009_s28 }
 0xaf1   : > { %4995 = vrot.lane.b32.xlu1 %v13123_v30, %s7009_s28 }
 0xaf2   : > { %v4466_v55 = vpop.xlane.xlu0 %4465 }
 0xaf3   : > { %5025 = vrot.lane.b32.xlu0 %v13124_v45, %s7009_s28  ;;  %6985 = vrcp.f32 %v4466_v55  ;;  %v13145_v55 = vld [vmem:[#allocation101_spill] sm:$0xff] }
 0xaf5   : > { %4999 = vrot.lane.b32.xlu1 %v13125_v46, %s7009_s28 }
 0xaf6   : > { %v4840_v8 = vpop.permute.xlu0 %4839 }
 0xaf7   : > { %v11155_v25 = vsel %vm574_vm1, %v13126_v10, %v4840_v8  ;;  %5029 = vrot.lane.b32.xlu0 %v10954_v40, %s7009_s28  ;;  %v13146_v10 = vld [vmem:[#allocation55_spill] sm:$0xff] }
 0xaf9   : > { %5003 = vrot.lane.b32.xlu1 %v13127_v17, %s7009_s28 }
 0xafa   : > { %v4846_v36 = vpop.permute.xlu0 %4845 }
 0xafb   : > { %v11163_v1 = vsel %vm574_vm1, %v13128_v5, %v4846_v36 }
 0xafd   : > { %5007 = vrot.lane.b32.xlu1 %v13129_v39, %s7009_s28  ;;  %v6986_v28 = vpop.eup %6985 }
 0xafe   : > { %v4850_v56 = vpop.permute.xlu0 %4849  ;;  %v4562_v51 = vmul.f32 %v6986_v28, %v10983_v53  ;;  %v4563_v18 = vmul.f32 %v6986_v28, %v10985_v62  ;;  %v13147_v62 = vld [vmem:[#allocation32_spill] sm:$0xff]  ;;  %v13153_v28 = vld [vmem:[#allocation43_spill] sm:$0xff] }
 0xaff   : > { %v11169_v41 = vsel %vm574_vm1, %v13130_v58, %v4850_v56 }
 0xb01   : > { %5011 = vrot.lane.b32.xlu1 %v13131_v50, %s7009_s28  ;;  %v13148_v50 = vld [vmem:[#allocation182_spill] sm:$0xff] }
 0xb02   : > { %v4854_v40 = vpop.permute.xlu0 %4853 }
 0xb03   : > { %v11175_v63 = vsel %vm574_vm1, %v13132_v59, %v4854_v40 }
 0xb05   : > { %5015 = vrot.lane.b32.xlu1 %v13133_v2, %s7009_s28 }
 0xb06   : > { %v4858_v34 = vpop.permute.xlu0 %4857 }
 0xb07   : > { %v11181_v9 = vsel %vm574_vm1, %v13134_v21, %v4858_v34  ;;  %v13149_v21 = vld [vmem:[#allocation71_spill] sm:$0xff] }
 0xb09   : > { %5019 = vrot.lane.b32.xlu1 %v13135_v3, %s7009_s28 }
 0xb0a   : > { %v4862_v33 = vpop.permute.xlu0 %4861 }
 0xb0b   : > { %v11187_v61 = vsel %vm574_vm1, %v13136_v22, %v4862_v33  ;;  %v13150_v22 = vld [vmem:[#allocation113_spill] sm:$0xff] }
 0xb0d   : > { %5023 = vrot.lane.b32.xlu1 %v13137_v16, %s7009_s28 }
 0xb0e   : > { %v4866_v11 = vpop.permute.xlu0 %4865 }
 0xb0f   : > { %v11193_v29 = vsel %vm574_vm1, %v13138_v14, %v4866_v11 }
 0xb11   : > { %5027 = vrot.lane.b32.xlu1 %v13139_v42, %s7009_s28  ;;  %v4469_v7 = vpop.xlane.xlu1 %4468 }
 0xb12   : > { %6987 = vrcp.f32 %v4469_v7  ;;  %v4870_v32 = vpop.permute.xlu0 %4869  ;;  %v13151_v7 = vld [vmem:[#allocation76_spill] sm:$0xff] }
 0xb13   : > { %v11199_v44 = vsel %vm574_vm1, %v13140_v37, %v4870_v32 }
 0xb15   : > { %v4842_v12 = vpop.permute.xlu1 %4841 }
 0xb16   : > { %v11203_v47 = vsel %vm574_vm1, %v13141_v26, %v4842_v12  ;;  %v4874_v6 = vpop.permute.xlu0 %4873 }
 0xb17   : > { %v11207_v52 = vsel %vm574_vm1, %v13142_v60, %v4874_v6  ;;  %v13152_v6 = vld [vmem:[#allocation66_spill] sm:$0xff] }
 0xb18   : > { %v6033_v19 = vpop.f32.mrb[224].mxu0 }
 0xb19   : > { %v4844_v49 = vpop.permute.xlu1 %4843  ;;  %v6034_v43 = vpop.f32.mrb[225].mxu0 }
 0xb1a   : > { %v11211_v35 = vsel %vm574_vm1, %v13143_v23, %v4844_v49  ;;  %v4878_v27 = vpop.permute.xlu0 %4877  ;;  %v6035_v38 = vadd.f32 %v6034_v43, %v6033_v19  ;;  %v6036_v54 = vpop.f32.mrb[226].mxu0 }
 0xb1b   : > { %v11215_v4 = vsel %vm574_vm1, %v13144_v13, %v4878_v27  ;;  %v6037_v0 = vpop.f32.mrb[227].mxu0 }
 0xb1c   : > { %v6988_v15 = vpop.eup %6987  ;;  %v6038_v31 = vadd.f32 %v6037_v0, %v6036_v54  ;;  %5095 = vrot.lane.b32.xlu1 %v6035_v38, %s7010_s29  ;;  %v13154_v38 = vld [vmem:[#allocation73_spill] sm:$0xff] }
 0xb1d   : > { %v4564_v20 = vmul.f32 %v6988_v15, %v10999_v48  ;;  %v4848_v24 = vpop.permute.xlu1 %4847  ;;  %v4565_v30 = vmul.f32 %v6988_v15, %v11001_v57 }
 0xb1e   : > { %v11224_v45 = vsel %vm574_vm1, %v13145_v55, %v4848_v24  ;;  %v4882_v46 = vpop.permute.xlu0 %4881  ;;  %5097 = vrot.lane.b32.xlu0 %v6038_v31, %s7010_s29  ;;  %v13155_v31 = vld [vmem:[#allocation47_spill] sm:$0xff] }
 0xb1f   : > { %v4596_v8 = vpack.c.bf16 %v4564_v20, %v4562_v51  ;;  %v11229_v17 = vsel %vm574_vm1, %v13146_v10, %v4882_v46  ;;  %v4597_v53 = vpack.c.bf16 %v4565_v30, %v4563_v18  ;;  %v13156_v30 = vld [vmem:[#allocation88_spill] sm:$0xff] }
 0xb20   : > { %v6039_v36 = vpop.f32.mrb[228].mxu0 }
 0xb21   : > { %4798 = vmatprep.mubr.bf16.mxu0 %v4597_v53  ;;  %v4852_v48 = vpop.permute.xlu1 %4851  ;;  %v6040_v5 = vpop.f32.mrb[229].mxu0  ;;  %v13157_v53 = vld [vmem:[#allocation98_spill] sm:$0xff] }
 0xb22   : > { %v11233_v57 = vsel %vm574_vm1, %v13147_v62, %v4852_v48  ;;  %v4886_v39 = vpop.permute.xlu0 %4885  ;;  %v6041_v56 = vadd.f32 %v6040_v5, %v6039_v36  ;;  %4799 = vmatmul.mubr.bf16.gmra.mrb[28].mxu0 %v4596_v8  ;;  %v6042_v58 = vpop.f32.mrb[230].mxu0  ;;  %v13158_v62 = vld [vmem:[#allocation50_spill] sm:$0xff] }
 0xb23   : > { %v11237_v40 = vsel %vm574_vm1, %v13148_v50, %v4886_v39  ;;  %v6043_v59 = vpop.f32.mrb[231].mxu0 }
 0xb24   : > { %v6044_v2 = vadd.f32 %v6043_v59, %v6042_v58  ;;  %5099 = vrot.lane.b32.xlu1 %v6041_v56, %s7010_s29  ;;  %v13159_v59 = vld [vmem:[#allocation54_spill] sm:$0xff] }
 0xb25   : > { %v4856_v34 = vpop.permute.xlu1 %4855 }
 0xb26   : > { %v11242_v3 = vsel %vm574_vm1, %v13149_v21, %v4856_v34  ;;  %v4890_v33 = vpop.permute.xlu0 %4889  ;;  %5101 = vrot.lane.b32.xlu0 %v6044_v2, %s7010_s29 }
 0xb27   : > { %v11247_v16 = vsel %vm574_vm1, %v13150_v22, %v4890_v33 }
 0xb28   : > { %v6045_v11 = vpop.f32.mrb[232].mxu0 }
 0xb29   : > { %v4860_v14 = vpop.permute.xlu1 %4859  ;;  %v6046_v42 = vpop.f32.mrb[233].mxu0 }
 0xb2a   : > { %v11251_v32 = vsel %vm574_vm1, %v13151_v7, %v4860_v14  ;;  %v4894_v37 = vpop.permute.xlu0 %4893  ;;  %v6047_v12 = vadd.f32 %v6046_v42, %v6045_v11  ;;  %v6048_v26 = vpop.f32.mrb[234].mxu0 }
 0xb2b   : > { %v11255_v60 = vsel %vm574_vm1, %v13152_v6, %v4894_v37  ;;  %v6049_v19 = vpop.f32.mrb[235].mxu0  ;;  %v13160_v37 = vld [vmem:[#allocation181_spill] sm:$0xff] }
 0xb2c   : > { %v6050_v49 = vadd.f32 %v6049_v19, %v6048_v26  ;;  %5103 = vrot.lane.b32.xlu1 %v6047_v12, %s7010_s29  ;;  %v13161_v19 = vld [vmem:[#allocation62_spill] sm:$0xff] }
 0xb2d   : > { %v4864_v43 = vpop.permute.xlu1 %4863 }
 0xb2e   : > { %v11260_v23 = vsel %vm574_vm1, %v13153_v28, %v4864_v43  ;;  %v4898_v27 = vpop.permute.xlu0 %4897  ;;  %5105 = vrot.lane.b32.xlu0 %v6050_v49, %s7010_s29 }
 0xb2f   : > { %v11265_v54 = vsel %vm574_vm1, %v13154_v38, %v4898_v27  ;;  %v13162_v38 = vld [vmem:[#allocation65_spill] sm:$0xff] }
 0xb30   : > { %v6051_v13 = vpop.f32.mrb[236].mxu0 }
 0xb31   : > { %v4868_v0 = vpop.permute.xlu1 %4867  ;;  %v6052_v15 = vpop.f32.mrb[237].mxu0 }
 0xb32   : > { %v11269_v51 = vsel %vm574_vm1, %v13155_v31, %v4868_v0  ;;  %v4902_v20 = vpop.permute.xlu0 %4901  ;;  %v6053_v24 = vadd.f32 %v6052_v15, %v6051_v13  ;;  %v6054_v18 = vpop.f32.mrb[238].mxu0  ;;  %v13163_v31 = vld [vmem:[#allocation118_spill] sm:$0xff] }
 0xb33   : > { %v11273_v55 = vsel %vm574_vm1, %v13156_v30, %v4902_v20  ;;  %v6055_v46 = vpop.f32.mrb[239].mxu0  ;;  %v13164_v30 = vld [vmem:[#allocation87_spill] sm:$0xff] }
 0xb34   : > { %v6056_v8 = vadd.f32 %v6055_v46, %v6054_v18  ;;  %5107 = vrot.lane.b32.xlu1 %v6053_v24, %s7010_s29 }
 0xb35   : > { %v4872_v10 = vpop.permute.xlu1 %4871 }
 0xb36   : > { %v11278_v36 = vsel %vm574_vm1, %v13157_v53, %v4872_v10  ;;  %v11280_v48 = vpop.permute.xlu0 %4969  ;;  %5109 = vrot.lane.b32.xlu0 %v6056_v8, %s7010_s29 }
 0xb39   : > { %v4876_v5 = vpop.permute.xlu1 %4875 }
 0xb3a   : > { %v11285_v39 = vsel %vm574_vm1, %v13158_v62, %v4876_v5  ;;  %v4974_v56 = vpop.permute.xlu0 %4973 }
 0xb3b   : > { %v11289_v58 = vsel %vm5223_vm2, %v11163_v1, %v4974_v56 }
 0xb3d   : > { %v4880_v50 = vpop.permute.xlu1 %4879 }
 0xb3e   : > { %v11293_v2 = vsel %vm574_vm1, %v13159_v59, %v4880_v50  ;;  %v4978_v34 = vpop.permute.xlu0 %4977  ;;  %v6057_v21 = vpop.f32.mrb[240].mxu0 }
 0xb3f   : > { %v11297_v33 = vsel %vm5223_vm2, %v11169_v41, %v4978_v34  ;;  %v6058_v22 = vpop.f32.mrb[241].mxu0 }
 0xb40   : > { %v6059_v11 = vadd.f32 %v6058_v22, %v6057_v21  ;;  %v6060_v14 = vpop.f32.mrb[242].mxu0 }
 0xb41   : > { %v4884_v42 = vpop.permute.xlu1 %4883  ;;  %v6061_v7 = vpop.f32.mrb[243].mxu0 }
 0xb42   : > { %v11301_v1 = vsel %vm574_vm1, %v13160_v37, %v4884_v42  ;;  %v4982_v12 = vpop.permute.xlu0 %4981  ;;  %v6062_v26 = vadd.f32 %v6061_v7, %v6060_v14  ;;  %5111 = vrot.lane.b32.xlu1 %v6059_v11, %s7010_s29 }
 0xb43   : > { %v11306_v6 = vsel %vm5223_vm2, %v11175_v63, %v4982_v12 }
 0xb44   : > { %5113 = vrot.lane.b32.xlu0 %v6062_v26, %s7010_s29 }
 0xb45   : > { %v4888_v41 = vpop.permute.xlu1 %4887 }
 0xb46   : > { %v11311_v49 = vsel %vm574_vm1, %v13161_v19, %v4888_v41  ;;  %v4986_v43 = vpop.permute.xlu0 %4985 }
 0xb47   : > { %v11315_v28 = vsel %vm5223_vm2, %v11181_v9, %v4986_v43 }
 0xb49   : > { %v4892_v27 = vpop.permute.xlu1 %4891 }
 0xb4a   : > { %v11319_v13 = vsel %vm574_vm1, %v13162_v38, %v4892_v27  ;;  %v4990_v0 = vpop.permute.xlu0 %4989 }
 0xb4b   : > { %v11323_v63 = vsel %vm5223_vm2, %v11187_v61, %v4990_v0 }
 0xb4d   : > { %v4896_v15 = vpop.permute.xlu1 %4895 }
 0xb4e   : > { %v11327_v20 = vsel %vm574_vm1, %v13163_v31, %v4896_v15  ;;  %v4994_v24 = vpop.permute.xlu0 %4993 }
 0xb4f   : > { %v11331_v9 = vsel %vm5223_vm2, %v11193_v29, %v4994_v24 }
 0xb51   : > { %v4900_v18 = vpop.permute.xlu1 %4899 }
 0xb52   : > { %v11335_v46 = vsel %vm574_vm1, %v13164_v30, %v4900_v18  ;;  %v4998_v8 = vpop.permute.xlu0 %4997 }
 0xb53   : > { %v11339_v61 = vsel %vm5223_vm2, %v11199_v44, %v4998_v8 }
 0xb55   : > { %v11341_v10 = vpop.permute.xlu1 %4967 }
 0xb56   : > { %v5002_v53 = vpop.permute.xlu0 %5001 }
 0xb57   : > { %v11345_v5 = vsel %vm5223_vm2, %v11207_v52, %v5002_v53 }
 0xb59   : > { %v11347_v62 = vpop.permute.xlu1 %4971 }
 0xb5a   : > { %v5006_v29 = vpop.permute.xlu0 %5005 }
 0xb5b   : > { %v11351_v56 = vsel %vm5223_vm2, %v11215_v4, %v5006_v29  ;;  %v6063_v50 = vpop.f32.mrb[244].mxu0 }
 0xb5c   : > { %v6064_v59 = vpop.f32.mrb[245].mxu0 }
 0xb5d   : > { %v6065_v34 = vadd.f32 %v6064_v59, %v6063_v50  ;;  %v6066_v21 = vpop.f32.mrb[246].mxu0  ;;  %v4976_v44 = vpop.permute.xlu1 %4975 }
 0xb5e   : > { %v6067_v22 = vpop.f32.mrb[247].mxu0  ;;  %v11355_v11 = vsel %vm5223_vm2, %v11224_v45, %v4976_v44  ;;  %v5010_v14 = vpop.permute.xlu0 %5009 }
 0xb5f   : > { %v6068_v52 = vadd.f32 %v6067_v22, %v6066_v21  ;;  %v11359_v42 = vsel %vm5223_vm2, %v11229_v17, %v5010_v14  ;;  %5115 = vrot.lane.b32.xlu1 %v6065_v34, %s7010_s29 }
 0xb61   : > { %5117 = vrot.lane.b32.xlu0 %v6068_v52, %s7010_s29  ;;  %v4980_v4 = vpop.permute.xlu1 %4979 }
 0xb62   : > { %v11365_v7 = vsel %vm5223_vm2, %v11233_v57, %v4980_v4  ;;  %v5014_v37 = vpop.permute.xlu0 %5013 }
 0xb63   : > { %v11369_v45 = vsel %vm5223_vm2, %v11237_v40, %v5014_v37  ;;  %v6069_v12 = vpop.f32.mrb[248].mxu0 }
 0xb64   : > { %v6070_v26 = vpop.f32.mrb[249].mxu0 }
 0xb65   : > { %v6071_v41 = vadd.f32 %v6070_v26, %v6069_v12  ;;  %v6072_v19 = vpop.f32.mrb[250].mxu0  ;;  %v4984_v17 = vpop.permute.xlu1 %4983 }
 0xb66   : > { %v6073_v43 = vpop.f32.mrb[251].mxu0  ;;  %v11373_v27 = vsel %vm5223_vm2, %v11242_v3, %v4984_v17  ;;  %v5018_v38 = vpop.permute.xlu0 %5017 }
 0xb67   : > { %v6074_v0 = vadd.f32 %v6073_v43, %v6072_v19  ;;  %v11377_v57 = vsel %vm5223_vm2, %v11247_v16, %v5018_v38  ;;  %5119 = vrot.lane.b32.xlu1 %v6071_v41, %s7010_s29 }
 0xb69   : > { %5121 = vrot.lane.b32.xlu0 %v6074_v0, %s7010_s29  ;;  %v4988_v40 = vpop.permute.xlu1 %4987 }
 0xb6a   : > { %v11383_v15 = vsel %vm5223_vm2, %v11251_v32, %v4988_v40  ;;  %v5022_v31 = vpop.permute.xlu0 %5021 }
 0xb6b   : > { %v11387_v3 = vsel %vm5223_vm2, %v11255_v60, %v5022_v31  ;;  %v6075_v24 = vpop.f32.mrb[252].mxu0 }
 0xb6c   : > { %v6076_v18 = vpop.f32.mrb[253].mxu0 }
 0xb6d   : > { %v6077_v30 = vadd.f32 %v6076_v18, %v6075_v24  ;;  %v6078_v8 = vpop.f32.mrb[254].mxu0  ;;  %v4992_v16 = vpop.permute.xlu1 %4991 }
 0xb6e   : > { %v6079_v53 = vpop.f32.mrb[255].mxu0  ;;  %v11391_v29 = vsel %vm5223_vm2, %v11260_v23, %v4992_v16  ;;  %v5026_v50 = vpop.permute.xlu0 %5025 }
 0xb6f   : > { %v6080_v59 = vadd.f32 %v6079_v53, %v6078_v8  ;;  %v11395_v32 = vsel %vm5223_vm2, %v11265_v54, %v5026_v50  ;;  %5123 = vrot.lane.b32.xlu1 %v6077_v30, %s7010_s29 }
 0xb71   : > { %5125 = vrot.lane.b32.xlu0 %v6080_v59, %s7010_s29  ;;  %v4996_v60 = vpop.permute.xlu1 %4995 }
 0xb72   : > { %v11401_v34 = vsel %vm5223_vm2, %v11269_v51, %v4996_v60  ;;  %v5030_v21 = vpop.permute.xlu0 %5029 }
 0xb73   : > { %v11405_v23 = vsel %vm5223_vm2, %v11273_v55, %v5030_v21  ;;  %v6081_v44 = vpop.f32.mrb[0].mxu0 }
 0xb74   : > { %v6082_v22 = vpop.f32.mrb[1].mxu0 }
 0xb75   : > { %v6083_v14 = vadd.f32 %v6082_v22, %v6081_v44  ;;  %v6084_v52 = vpop.f32.mrb[2].mxu0  ;;  %v5000_v54 = vpop.permute.xlu1 %4999 }
 0xb76   : > { %v6085_v4 = vpop.f32.mrb[3].mxu0  ;;  %v11409_v37 = vsel %vm5223_vm2, %v11278_v36, %v5000_v54 }
 0xb77   : > { %v6086_v12 = vadd.f32 %v6085_v4, %v6084_v52  ;;  %5127 = vrot.lane.b32.xlu1 %v6083_v14, %s7010_s29 }
 0xb79   : > { %5129 = vrot.lane.b32.xlu0 %v6086_v12, %s7010_s29  ;;  %v5004_v51 = vpop.permute.xlu1 %5003 }
 0xb7a   : > { %v11415_v55 = vsel %vm5223_vm2, %v11285_v39, %v5004_v51 }
 0xb7b   : > { %v6087_v26 = vpop.f32.mrb[4].mxu0 }
 0xb7c   : > { %v6088_v41 = vpop.f32.mrb[5].mxu0 }
 0xb7d   : > { %v6089_v19 = vadd.f32 %v6088_v41, %v6087_v26  ;;  %v6090_v17 = vpop.f32.mrb[6].mxu0  ;;  %v5008_v43 = vpop.permute.xlu1 %5007 }
 0xb7e   : > { %v6091_v38 = vpop.f32.mrb[7].mxu0  ;;  %v11419_v36 = vsel %vm5223_vm2, %v11293_v2, %v5008_v43 }
 0xb7f   : > { %v6092_v0 = vadd.f32 %v6091_v38, %v6090_v17  ;;  %5131 = vrot.lane.b32.xlu1 %v6089_v19, %s7010_s29 }
 0xb81   : > { %5133 = vrot.lane.b32.xlu0 %v6092_v0, %s7010_s29  ;;  %v5012_v40 = vpop.permute.xlu1 %5011  ;;  %v5226_v0 = vsel %vm5223_vm2, %v11211_v35, %v11347_v62 }
 0xb82   : > { %v11425_v39 = vsel %vm5223_vm2, %v11301_v1, %v5012_v40 }
 0xb83   : > { %v6093_v31 = vpop.f32.mrb[8].mxu0 }
 0xb84   : > { %v6094_v24 = vpop.f32.mrb[9].mxu0 }
 0xb85   : > { %v6095_v18 = vadd.f32 %v6094_v24, %v6093_v31  ;;  %v6096_v30 = vpop.f32.mrb[10].mxu0  ;;  %v5016_v8 = vpop.permute.xlu1 %5015 }
 0xb86   : > { %v6097_v16 = vpop.f32.mrb[11].mxu0  ;;  %v11429_v2 = vsel %vm5223_vm2, %v11311_v49, %v5016_v8 }
 0xb87   : > { %v6098_v53 = vadd.f32 %v6097_v16, %v6096_v30  ;;  %5135 = vrot.lane.b32.xlu1 %v6095_v18, %s7010_s29 }
 0xb89   : > { %5137 = vrot.lane.b32.xlu0 %v6098_v53, %s7010_s29  ;;  %v5020_v50 = vpop.permute.xlu1 %5019 }
 0xb8a   : > { %v11435_v1 = vsel %vm5223_vm2, %v11319_v13, %v5020_v50  ;;  %v5225_v13 = vsel %vm5223_vm2, %v11203_v47, %v11280_v48  ;;  %v5224_v47 = vsel %vm5223_vm2, %v11155_v25, %v11341_v10 }
 0xb8b   : > { %v6099_v59 = vpop.f32.mrb[12].mxu0 }
 0xb8c   : > { %v6100_v60 = vpop.f32.mrb[13].mxu0 }
 0xb8d   : > { %v6101_v21 = vadd.f32 %v6100_v60, %v6099_v59  ;;  %v6102_v44 = vpop.f32.mrb[14].mxu0  ;;  %v5024_v22 = vpop.permute.xlu1 %5023 }
 0xb8e   : > { %v6103_v14 = vpop.f32.mrb[15].mxu0  ;;  %v11439_v49 = vsel %vm5223_vm2, %v11327_v20, %v5024_v22 }
 0xb8f   : > { %v6104_v52 = vadd.f32 %v6103_v14, %v6102_v44  ;;  %5139 = vrot.lane.b32.xlu1 %v6101_v21, %s7010_s29 }
 0xb90   : > { %v5098_v54 = vpop.permute.xlu0 %5097 }
 0xb91   : > { %5141 = vrot.lane.b32.xlu0 %v6104_v52, %s7010_s29  ;;  %v5258_v20 = vsel %vm5256_vm3, %v5225_v13, %v5098_v54  ;;  %v5028_v4 = vpop.permute.xlu1 %5027 }
 0xb92   : > { %5290 = vst.msk [vmem:[%s11447_s5 + $0x8] sm:$0xff] %vm300_vm0, %v5258_v20  ;;  %v11458_v12 = vsel %vm5223_vm2, %v11335_v46, %v5028_v4 }
 0xb93   : > { %v6105_v51 = vpop.f32.mrb[16].mxu0 }
 0xb94   : > { %v6106_v26 = vpop.f32.mrb[17].mxu0 }
 0xb95   : > { %v6107_v48 = vadd.f32 %v6106_v26, %v6105_v51  ;;  %v6108_v41 = vpop.f32.mrb[18].mxu0  ;;  %v5096_v19 = vpop.permute.xlu1 %5095 }
 0xb96   : > { %v6109_v17 = vpop.f32.mrb[19].mxu0  ;;  %v5257_v43 = vsel %vm5256_vm3, %v5224_v47, %v5096_v19 }
 0xb97   : > { %v6110_v38 = vadd.f32 %v6109_v17, %v6108_v41  ;;  %5289 = vst.msk [vmem:[%s11447_s5] sm:$0xff] %vm300_vm0, %v5257_v43  ;;  %5143 = vrot.lane.b32.xlu1 %v6107_v48, %s7010_s29 }
 0xb98   : > { %v5102_v46 = vpop.permute.xlu0 %5101 }
 0xb99   : > { %5145 = vrot.lane.b32.xlu0 %v6110_v38, %s7010_s29  ;;  %v5260_v25 = vsel %vm5256_vm3, %v11289_v58, %v5102_v46  ;;  %v5100_v10 = vpop.permute.xlu1 %5099 }
 0xb9a   : > { %5292 = vst.msk [vmem:[%s11447_s5 + $0x18] sm:$0xff] %vm300_vm0, %v5260_v25  ;;  %v5259_v40 = vsel %vm5256_vm3, %v5226_v0, %v5100_v10 }
 0xb9b   : > { %5291 = vst.msk [vmem:[%s11447_s5 + $0x10] sm:$0xff] %vm300_vm0, %v5259_v40  ;;  %v6111_v31 = vpop.f32.mrb[20].mxu0 }
 0xb9c   : > { %v6112_v24 = vpop.f32.mrb[21].mxu0 }
 0xb9d   : > { %v6113_v18 = vadd.f32 %v6112_v24, %v6111_v31  ;;  %v6114_v30 = vpop.f32.mrb[22].mxu0 }
 0xb9e   : > { %v6115_v35 = vpop.f32.mrb[23].mxu0  ;;  %v5104_v62 = vpop.permute.xlu1 %5103 }
 0xb9f   : > { %v6116_v8 = vadd.f32 %v6115_v35, %v6114_v30  ;;  %5147 = vrot.lane.b32.xlu1 %v6113_v18, %s7010_s29  ;;  %v5261_v58 = vsel %vm5256_vm3, %v11355_v11, %v5104_v62 }
 0xba0   : > { %5293 = vst.msk [vmem:[%s11447_s5 + $0x20] sm:$0xff] %vm300_vm0, %v5261_v58  ;;  %v5106_v16 = vpop.permute.xlu0 %5105 }
 0xba1   : > { %5149 = vrot.lane.b32.xlu0 %v6116_v8, %s7010_s29  ;;  %v5262_v53 = vsel %vm5256_vm3, %v11297_v33, %v5106_v16 }
 0xba2   : > { %5294 = vst.msk [vmem:[%s11447_s5 + $0x28] sm:$0xff] %vm300_vm0, %v5262_v53 }
 0xba6   : > { %v5108_v50 = vpop.permute.xlu1 %5107 }
 0xba7   : > { %v5263_v59 = vsel %vm5256_vm3, %v11365_v7, %v5108_v50 }
 0xba8   : > { %5295 = vst.msk [vmem:[%s11447_s5 + $0x30] sm:$0xff] %vm300_vm0, %v5263_v59  ;;  %v5110_v60 = vpop.permute.xlu0 %5109 }
 0xba9   : > { %v5264_v11 = vsel %vm5256_vm3, %v11306_v6, %v5110_v60 }
 0xbaa   : > { %5296 = vst.msk [vmem:[%s11447_s5 + $0x38] sm:$0xff] %vm300_vm0, %v5264_v11 }
 0xbb4   : > { %v5112_v21 = vpop.permute.xlu1 %5111 }
 0xbb5   : > { %v5265_v44 = vsel %vm5256_vm3, %v11373_v27, %v5112_v21 }
 0xbb6   : > { %5297 = vst.msk [vmem:[%s11447_s5 + $0x40] sm:$0xff] %vm300_vm0, %v5265_v44  ;;  %v5114_v33 = vpop.permute.xlu0 %5113 }
 0xbb7   : > { %v5266_v7 = vsel %vm5256_vm3, %v11315_v28, %v5114_v33 }
 0xbb8   : > { %5298 = vst.msk [vmem:[%s11447_s5 + $0x48] sm:$0xff] %vm300_vm0, %v5266_v7  ;;  %v6117_v22 = vpop.f32.mrb[24].mxu0 }
 0xbb9   : > { %v6118_v14 = vpop.f32.mrb[25].mxu0 }
 0xbba   : > { %v6119_v6 = vadd.f32 %v6118_v14, %v6117_v22  ;;  %v6120_v52 = vpop.f32.mrb[26].mxu0 }
 0xbbb   : > { %v6121_v13 = vpop.f32.mrb[27].mxu0 }
 0xbbc   : > { %v6122_v54 = vadd.f32 %v6121_v13, %v6120_v52  ;;  %5151 = vrot.lane.b32.xlu1 %v6119_v6, %s7010_s29 }
 0xbbe   : > { %5153 = vrot.lane.b32.xlu0 %v6122_v54, %s7010_s29 }
 0xbd1   : > { %v5116_v27 = vpop.permute.xlu1 %5115 }
 0xbd2   : > { %v5267_v20 = vsel %vm5256_vm3, %v11383_v15, %v5116_v27 }
 0xbd3   : > { %5299 = vst.msk [vmem:[%s11447_s5 + $0x50] sm:$0xff] %vm300_vm0, %v5267_v20  ;;  %v5118_v28 = vpop.permute.xlu0 %5117 }
 0xbd4   : > { %v5268_v4 = vsel %vm5256_vm3, %v11323_v63, %v5118_v28 }
 0xbd5   : > { %5300 = vst.msk [vmem:[%s11447_s5 + $0x58] sm:$0xff] %vm300_vm0, %v5268_v4 }
 0xbd9   : > { %v5120_v51 = vpop.permute.xlu1 %5119 }
 0xbda   : > { %v5269_v26 = vsel %vm5256_vm3, %v11391_v29, %v5120_v51 }
 0xbdb   : > { %5301 = vst.msk [vmem:[%s11447_s5 + $0x60] sm:$0xff] %vm300_vm0, %v5269_v26  ;;  %v5122_v47 = vpop.permute.xlu0 %5121 }
 0xbdc   : > { %v5270_v15 = vsel %vm5256_vm3, %v11331_v9, %v5122_v47 }
 0xbdd   : > { %5302 = vst.msk [vmem:[%s11447_s5 + $0x68] sm:$0xff] %vm300_vm0, %v5270_v15 }
 0xbe1   : > { %v5124_v48 = vpop.permute.xlu1 %5123 }
 0xbe2   : > { %v5271_v63 = vsel %vm5256_vm3, %v11401_v34, %v5124_v48 }
 0xbe3   : > { %5303 = vst.msk [vmem:[%s11447_s5 + $0x70] sm:$0xff] %vm300_vm0, %v5271_v63  ;;  %v5126_v41 = vpop.permute.xlu0 %5125 }
 0xbe4   : > { %v5272_v29 = vsel %vm5256_vm3, %v11339_v61, %v5126_v41 }
 0xbe5   : > { %5304 = vst.msk [vmem:[%s11447_s5 + $0x78] sm:$0xff] %vm300_vm0, %v5272_v29 }
 0xbe9   : > { %v5128_v19 = vpop.permute.xlu1 %5127 }
 0xbea   : > { %v5273_v9 = vsel %vm5256_vm3, %v11409_v37, %v5128_v19 }
 0xbeb   : > { %5305 = vst.msk [vmem:[%s11447_s5 + $0x80] sm:$0xff] %vm300_vm0, %v5273_v9  ;;  %v5130_v17 = vpop.permute.xlu0 %5129 }
 0xbec   : > { %v5274_v43 = vsel %vm5256_vm3, %v11345_v5, %v5130_v17 }
 0xbed   : > { %5306 = vst.msk [vmem:[%s11447_s5 + $0x88] sm:$0xff] %vm300_vm0, %v5274_v43 }
 0xbf1   : > { %v5132_v34 = vpop.permute.xlu1 %5131 }
 0xbf2   : > { %v5275_v38 = vsel %vm5256_vm3, %v11415_v55, %v5132_v34 }
 0xbf3   : > { %5307 = vst.msk [vmem:[%s11447_s5 + $0x90] sm:$0xff] %vm300_vm0, %v5275_v38  ;;  %v5134_v61 = vpop.permute.xlu0 %5133 }
 0xbf4   : > { %v5276_v37 = vsel %vm5256_vm3, %v11351_v56, %v5134_v61 }
 0xbf5   : > { %5308 = vst.msk [vmem:[%s11447_s5 + $0x98] sm:$0xff] %vm300_vm0, %v5276_v37  ;;  %v6123_v46 = vpop.f32.mrb[28].mxu0 }
 0xbf6   : > { %v6124_v0 = vpop.f32.mrb[29].mxu0 }
 0xbf7   : > { %v6125_v5 = vadd.f32 %v6124_v0, %v6123_v46  ;;  %v6126_v25 = vpop.f32.mrb[30].mxu0 }
 0xbf8   : > { %v6127_v10 = vpop.f32.mrb[31].mxu0 }
 0xbf9   : > { %v6128_v40 = vadd.f32 %v6127_v10, %v6126_v25  ;;  %v5136_v31 = vpop.permute.xlu1 %5135  ;;  %5155 = vrot.lane.b32.xlu1 %v6125_v5, %s7010_s29 }
 0xbfa   : > { %v5277_v55 = vsel %vm5256_vm3, %v11419_v36, %v5136_v31 }
 0xbfb   : > { %5309 = vst.msk [vmem:[%s11447_s5 + $0xa0] sm:$0xff] %vm300_vm0, %v5277_v55  ;;  %v5138_v56 = vpop.permute.xlu0 %5137  ;;  %5157 = vrot.lane.b32.xlu0 %v6128_v40, %s7010_s29 }
 0xbfc   : > { %v5278_v24 = vsel %vm5256_vm3, %v11359_v42, %v5138_v56 }
 0xbfd   : > { %5310 = vst.msk [vmem:[%s11447_s5 + $0xa8] sm:$0xff] %vm300_vm0, %v5278_v24 }
 0xc01   : > { %v5140_v18 = vpop.permute.xlu1 %5139 }
 0xc02   : > { %v5279_v30 = vsel %vm5256_vm3, %v11425_v39, %v5140_v18 }
 0xc03   : > { %5311 = vst.msk [vmem:[%s11447_s5 + $0xb0] sm:$0xff] %vm300_vm0, %v5279_v30  ;;  %v5142_v36 = vpop.permute.xlu0 %5141 }
 0xc04   : > { %v5280_v35 = vsel %vm5256_vm3, %v11369_v45, %v5142_v36 }
 0xc05   : > { %5312 = vst.msk [vmem:[%s11447_s5 + $0xb8] sm:$0xff] %vm300_vm0, %v5280_v35 }
 0xc09   : > { %v5144_v62 = vpop.permute.xlu1 %5143 }
 0xc0a   : > { %v5281_v42 = vsel %vm5256_vm3, %v11429_v2, %v5144_v62 }
 0xc0b   : > { %5313 = vst.msk [vmem:[%s11447_s5 + $0xc0] sm:$0xff] %vm300_vm0, %v5281_v42  ;;  %v5146_v8 = vpop.permute.xlu0 %5145 }
 0xc0c   : > { %v5282_v39 = vsel %vm5256_vm3, %v11377_v57, %v5146_v8 }
 0xc0d   : > { %5314 = vst.msk [vmem:[%s11447_s5 + $0xc8] sm:$0xff] %vm300_vm0, %v5282_v39 }
 0xc11   : > { %v5148_v58 = vpop.permute.xlu1 %5147 }
 0xc12   : > { %v5283_v45 = vsel %vm5256_vm3, %v11435_v1, %v5148_v58 }
 0xc13   : > { %5315 = vst.msk [vmem:[%s11447_s5 + $0xd0] sm:$0xff] %vm300_vm0, %v5283_v45  ;;  %v5150_v16 = vpop.permute.xlu0 %5149 }
 0xc14   : > { %v5284_v2 = vsel %vm5256_vm3, %v11387_v3, %v5150_v16 }
 0xc15   : > { %5316 = vst.msk [vmem:[%s11447_s5 + $0xd8] sm:$0xff] %vm300_vm0, %v5284_v2 }
 0xc2e   : > { %v5152_v53 = vpop.permute.xlu1 %5151 }
 0xc2f   : > { %v5285_v57 = vsel %vm5256_vm3, %v11439_v49, %v5152_v53 }
 0xc30   : > { %5317 = vst.msk [vmem:[%s11447_s5 + $0xe0] sm:$0xff] %vm300_vm0, %v5285_v57  ;;  %v5154_v50 = vpop.permute.xlu0 %5153 }
 0xc31   : > { %v5286_v59 = vsel %vm5256_vm3, %v11395_v32, %v5154_v50 }
 0xc32   : > { %5318 = vst.msk [vmem:[%s11447_s5 + $0xe8] sm:$0xff] %vm300_vm0, %v5286_v59 }
 0xc6b   : > { %v5156_v1 = vpop.permute.xlu1 %5155 }
 0xc6c   : > { %v5287_v60 = vsel %vm5256_vm3, %v11458_v12, %v5156_v1 }
 0xc6d   : > { %5319 = vst.msk [vmem:[%s11447_s5 + $0xf0] sm:$0xff] %vm300_vm0, %v5287_v60  ;;  %v5158_v3 = vpop.permute.xlu0 %5157 }
 0xc6e   : > { %v5288_v11 = vsel %vm5256_vm3, %v11405_v23, %v5158_v3 }
 0xc6f   : > { %5320 = vst.msk [vmem:[%s11447_s5 + $0xf8] sm:$0xff] %vm300_vm0, %v5288_v11 }
 0xc70 PF: > { %s13_s12 = sadd.s32 1, %s6995_s12  }
 0xc71   : > { %p10_p4 = scmp.ge.s32.totalorder %s13_s12, 4  }
 0xc73   :  { %12 = sbr.rel (!%p10_p4) target bundleno = 1 (0x1), region = 62 }

</bundles_post_ra>
